<compile_context>
chip_gen: v5e
topology: v5e:2x2
jax: 0.10.0
libtpu: 0.0.40
codegen_flags: <defaults>
</compile_context>

<pallas_src>
import jax
import jax.numpy as jnp
from jax import lax
from jax.experimental import pallas as pl
from jax.experimental.pallas import tpu as pltpu


# ---------------------------------------------------------------------------
# helpers
# ---------------------------------------------------------------------------
def _round_up(x, m):
    return (x + m - 1) // m * m


def _vmem_capacity_bytes():
    try:
        return int(pltpu.get_tpu_info().vmem_capacity_bytes)
    except Exception:
        return 64 * 2 ** 20          # conservative: v7x per-TensorCore VMEM


def _choose_tile_rows(H, W, c2in, ncp, budget_bytes):
    """Largest TH dividing H with (TH*W) % 8 == 0 whose working set fits budget."""
    per_pixel = ncp * 12 + c2in * 4          # f32 acc + 2x bf16 out + 2x bf16 input
    max_pixels = max(8, budget_bytes // per_pixel)
    th_max = max(1, max_pixels // max(W, 1))
    cands = [th for th in range(1, H + 1) if H % th == 0 and (th * W) % 8 == 0]
    if not cands:
        return H
    fit = [th for th in cands if th <= th_max]
    return max(fit) if fit else min(cands)


def _build_weight_matrix(wr, wi, cin_pad, cop):
    """(9, 2*cin_pad, 2*cop) bf16 real 2x2-block embedding of the complex weights.

    Row layout [real-in | imag-in], column layout [real-out | imag-out] so that
    x @ W = [conv_r(xr)-conv_i(xi) | conv_r(xi)+conv_i(xr)].
    """
    co, ci = wr.shape[0], wr.shape[1]
    wr_t = jnp.transpose(wr, (2, 3, 1, 0)).reshape(9, ci, co).astype(jnp.float32)
    wi_t = jnp.transpose(wi, (2, 3, 1, 0)).reshape(9, ci, co).astype(jnp.float32)

    def pad(w):
        return jnp.pad(w, ((0, 0), (0, cin_pad - ci), (0, cop - co)))

    top = jnp.concatenate([pad(wr_t), pad(wi_t)], axis=2)     # real-input rows
    bot = jnp.concatenate([pad(-wi_t), pad(wr_t)], axis=2)    # imag-input rows
    return jnp.concatenate([top, bot], axis=1).astype(jnp.bfloat16)


# ---------------------------------------------------------------------------
# kernel 1: in-kernel 9-tap complex conv + bias + per-tile BN partial stats
# ---------------------------------------------------------------------------
def _make_conv_stats_kernel(TH, W, c2in, cop, ncp):
    TM = TH * W

    def kernel(xt_ref, w_ref, bias_ref, out_ref, stats_ref, acc_ref):
        # xt_ref   : (TH+2, W+2, c2in) bf16 halo tile (resident, reused 9x)
        # w_ref    : (9, c2in, ncp)    bf16 weights   (resident across grid)
        # bias_ref : (1, ncp)          f32 fused conv bias [br-bi | br+bi]
        # out_ref  : (TM, ncp)         bf16 conv output tile
        # stats_ref: (8, ncp)          f32 per-tile partial BN stats
        # acc_ref  : (TM, ncp)         f32 VMEM scratch accumulator
        for t in range(9):
            ky, kx = divmod(t, 3)
            a = xt_ref[ky:ky + TH, kx:kx + W, :].reshape(TM, c2in)
            p = jnp.dot(a, w_ref[t], preferred_element_type=jnp.float32)
            if t == 0:
                acc_ref[...] = p                     # no zero-init pass
            else:
                acc_ref[...] += p

        acc = acc_ref[...] + bias_ref[...]           # (TM, ncp) f32
        out_ref[...] = acc.astype(out_ref.dtype)

        # single-pass partial stats, full-lane-width ops via a half-width roll
        sw = pltpu.roll(acc, shift=cop, axis=1)      # [imag | real]
        s1 = jnp.sum(acc, axis=0, keepdims=True)         # [sum r   | sum i  ]
        s2 = jnp.sum(acc * acc, axis=0, keepdims=True)   # [sum r^2 | sum i^2]
        s3 = jnp.sum(acc * sw, axis=0, keepdims=True)    # [sum r*i | sum i*r]
        zrows = jnp.zeros((5, ncp), jnp.float32)
        stats_ref[...] = jnp.concatenate([s1, s2, s3, zrows], axis=0)

    return kernel


# ---------------------------------------------------------------------------
# kernel 2: whitening + affine + complex_relu (single elementwise pass)
# ---------------------------------------------------------------------------
def _make_bn_relu_kernel(cop):
    def kernel(y_ref, coef_ref, o_ref):
        y = y_ref[...].astype(jnp.float32)
        ysw = pltpu.roll(y, shift=cop, axis=1)       # [imag | real]
        v = coef_ref[0:1, :] * y + coef_ref[1:2, :] * ysw + coef_ref[2:3, :]
        o_ref[...] = jnp.maximum(v, 0.0).astype(o_ref.dtype)
    return kernel


# ---------------------------------------------------------------------------
# fold BN (whitening * affine, mean-centering) into 3 per-channel coefficient rows
# ---------------------------------------------------------------------------
def _bn_fold_coefficients(stats_sum, bn_weight, bn_bias, n_elems, co, cop, eps):
    inv_n = 1.0 / float(n_elems)
    mu = stats_sum[0] * inv_n                         # [mu_r | mu_i]
    ex2 = stats_sum[1] * inv_n                        # [E r^2 | E i^2]
    exy = stats_sum[2, :cop] * inv_n                  # E[r*i]
    mu_r, mu_i = mu[:cop], mu[cop:]
    crr = ex2[:cop] - mu_r * mu_r + eps
    cii = ex2[cop:] - mu_i * mu_i + eps
    cri = exy - mu_r * mu_i

    s = jnp.sqrt(jnp.maximum(crr * cii - cri * cri, 1e-30))
    t = jnp.sqrt(crr + cii + 2.0 * s)
    ist = 1.0 / (s * t)
    rrr = (cii + s) * ist
    rii = (crr + s) * ist
    rri = -cri * ist

    def padc(v):
        return jnp.pad(v.astype(jnp.float32), (0, cop - co))

    g_rr, g_ii, g_ri = padc(bn_weight[:, 0]), padc(bn_weight[:, 1]), padc(bn_weight[:, 2])
    b_r, b_i = padc(bn_bias[:, 0]), padc(bn_bias[:, 1])

    a_rr = g_rr * rrr + g_ri * rri
    a_ri = g_rr * rri + g_ri * rii
    a_ir = g_ri * rrr + g_ii * rri
    a_ii = g_ri * rri + g_ii * rii
    c_r = b_r - a_rr * mu_r - a_ri * mu_i
    c_i = b_i - a_ir * mu_r - a_ii * mu_i

    p1 = jnp.concatenate([a_rr, a_ii])[None, :]       # multiplies same part
    p2 = jnp.concatenate([a_ri, a_ir])[None, :]       # multiplies swapped part
    cc = jnp.concatenate([c_r, c_i])[None, :]
    return jnp.concatenate([p1, p2, cc, jnp.zeros((5, 2 * cop), jnp.float32)], axis=0)


# ---------------------------------------------------------------------------
# one layer: ComplexConv2d(3x3, pad=1) + ComplexBatchNorm2d(train) + complex_relu
# ---------------------------------------------------------------------------
def complex_conv3x3_bn_relu(x_nhwc, wr, br, wi, bi, bn_weight, bn_bias,
                            *, eps=1e-5, out_dtype=jnp.bfloat16):
    """x_nhwc: (N, H, W, 2*cin_pad) [real | imag]; first wr.shape[1] channels of each
    half are live (the rest are zero padding).  Returns (N, H, W, 2*cop) out_dtype."""
    N, H, W, c2in = x_nhwc.shape
    cin_pad = c2in // 2
    co, ci = wr.shape[0], wr.shape[1]
    assert cin_pad >= ci
    cop = _round_up(co, 64)
    ncp = 2 * cop                                     # multiple of 128 -> lane-dense
    M = N * H * W

    cap = _vmem_capacity_bytes()
    tile_budget = min(12 * 2 ** 20, cap // 5)
    TH = _choose_tile_rows(H, W, c2in, ncp, tile_budget)
    R = H // TH
    NR = N * R
    TM = TH * W
    assert TM % 8 == 0 or NR == 1, "H*W must be a multiple of 8"

    # ---- halo row-tiles (input read ~(TH+2)/TH x, instead of 9x via im2col) ----
    xp = jnp.pad(x_nhwc.astype(jnp.bfloat16), ((0, 0), (1, 1), (1, 1), (0, 0)))
    if R == 1:
        xt = xp                                       # (N, H+2, W+2, c2in)
    else:
        rows = jnp.arange(R)[:, None] * TH + jnp.arange(TH + 2)[None, :]
        xt = xp[:, rows].reshape(NR, TH + 2, W + 2, c2in)

    wb = _build_weight_matrix(wr, wi, cin_pad, cop)   # (9, c2in, ncp) bf16
    bias = jnp.concatenate([
        jnp.pad((br - bi).astype(jnp.float32), (0, cop - co)),
        jnp.pad((br + bi).astype(jnp.float32), (0, cop - co))])[None, :]   # (1, ncp)

    # VMEM accounting: double-buffered halo/output blocks + f32 accumulator + weights.
    xt_bytes = (TH + 2) * (W + 2) * c2in * 2
    out_bytes = TM * ncp * 2
    need = (2 * xt_bytes + 2 * out_bytes + TM * ncp * 4
            + 9 * c2in * ncp * 2 + 2 * 8 * ncp * 4 + ncp * 4)
    vmem_limit = int(min(max(3 * cap // 4, need + (2 << 20)),
                         max(16 * 2 ** 20, 2 * need)))

    y_raw, stats = pl.pallas_call(
        _make_conv_stats_kernel(TH, W, c2in, cop, ncp),
        out_shape=(jax.ShapeDtypeStruct((M, ncp), jnp.bfloat16),
                   jax.ShapeDtypeStruct((NR, 8, ncp), jnp.float32)),
        grid_spec=pltpu.PrefetchScalarGridSpec(
            num_scalar_prefetch=0,
            grid=(NR,),
            in_specs=[
                pl.BlockSpec((None, TH + 2, W + 2, c2in), lambda i: (i, 0, 0, 0)),
                pl.BlockSpec((9, c2in, ncp), lambda i: (0, 0, 0)),
                pl.BlockSpec((1, ncp), lambda i: (0, 0)),
            ],
            out_specs=(
                pl.BlockSpec((TM, ncp), lambda i: (i, 0)),
                pl.BlockSpec((None, 8, ncp), lambda i: (i, 0, 0)),
            ),
            scratch_shapes=[pltpu.VMEM((TM, ncp), jnp.float32)],
        ),
        compiler_params=pltpu.CompilerParams(
            dimension_semantics=("parallel",),
            vmem_limit_bytes=vmem_limit),
    )(xt, wb, bias)

    # ---- BN whitening/affine folded into per-channel coefficients (O(Co)) ----
    coef = _bn_fold_coefficients(jnp.sum(stats, axis=0), bn_weight, bn_bias,
                                 M, co, cop, eps)

    # ---- second pass: whiten + affine + complex_relu (parallel, larger tiles) ----
    ga = 1
    for d in range(1, NR + 1):
        if NR % d == 0 and d * TM <= 8192:
            ga = d
    TA, GA = ga * TM, NR // ga
    need_a = 2 * TA * ncp * 2 + 2 * TA * ncp * jnp.dtype(out_dtype).itemsize + 8 * ncp * 4
    vmem_limit_a = int(min(max(3 * cap // 4, need_a + (2 << 20)),
                           max(16 * 2 ** 20, 2 * need_a)))

    y = pl.pallas_call(
        _make_bn_relu_kernel(cop),
        out_shape=jax.ShapeDtypeStruct((M, ncp), out_dtype),
        grid_spec=pltpu.PrefetchScalarGridSpec(
            num_scalar_prefetch=0,
            grid=(GA,),
            in_specs=[pl.BlockSpec((TA, ncp), lambda i: (i, 0)),
                      pl.BlockSpec((8, ncp), lambda i: (0, 0))],
            out_specs=pl.BlockSpec((TA, ncp), lambda i: (i, 0)),
        ),
        compiler_params=pltpu.CompilerParams(
            dimension_semantics=("parallel",),
            vmem_limit_bytes=vmem_limit_a),
    )(y_raw, coef)

    return y.reshape(N, H, W, ncp)


# ---------------------------------------------------------------------------
# ComplexDoubleConv forward (two fused layers; channel padding kept in between)
# ---------------------------------------------------------------------------
def complex_double_conv_forward(params, x_real, x_imag):
    """x_real/x_imag: (N, in_ch, H, W) NCHW.  Returns complex64 (N, out_ch, H, W)."""
    z = jnp.concatenate([jnp.transpose(x_real, (0, 2, 3, 1)),
                         jnp.transpose(x_imag, (0, 2, 3, 1))], axis=-1)
    p1, p2 = params["layer1"], params["layer2"]

    z = complex_conv3x3_bn_relu(z, p1["wr"], p1["br"], p1["wi"], p1["bi"],
                                p1["bn_w"], p1["bn_b"], out_dtype=jnp.bfloat16)
    z = complex_conv3x3_bn_relu(z, p2["wr"], p2["br"], p2["wi"], p2["bi"],
                                p2["bn_w"], p2["bn_b"], out_dtype=jnp.float32)

    co = p2["wr"].shape[0]
    cop = z.shape[-1] // 2
    yr = jnp.transpose(z[..., :co], (0, 3, 1, 2))
    yi = jnp.transpose(z[..., cop:cop + co], (0, 3, 1, 2))
    return lax.complex(yr, yi)


# ---------------------------------------------------------------------------
# Deterministic parameter init (same shapes as the PyTorch __init__)
# ---------------------------------------------------------------------------
def init_complex_conv(key, co, ci, k=3):
    k1, k2, k3, k4 = jax.random.split(key, 4)
    scale = 1.0 / (ci * k * k) ** 0.5
    return {"wr": scale * jax.random.normal(k1, (co, ci, k, k), jnp.float32),
            "br": 0.1 * jax.random.normal(k2, (co,), jnp.float32),
            "wi": scale * jax.random.normal(k3, (co, ci, k, k), jnp.float32),
            "bi": 0.1 * jax.random.normal(k4, (co,), jnp.float32)}


def init_complex_bn(key, c):
    k1, k2, k3, k4, k5 = jax.random.split(key, 5)
    w = jnp.stack([2.0 ** -0.5 + 0.05 * jax.random.normal(k1, (c,)),
                   2.0 ** -0.5 + 0.05 * jax.random.normal(k2, (c,)),
                   0.05 * jax.random.normal(k3, (c,))], axis=1).astype(jnp.float32)
    b = jnp.stack([0.05 * jax.random.normal(k4, (c,)),
                   0.05 * jax.random.normal(k5, (c,))], axis=1).astype(jnp.float32)
    return w, b


def init_complex_double_conv(key, in_ch, out_ch, mid_ch=None):
    mid_ch = out_ch if mid_ch is None else mid_ch
    k1, k2, k3, k4 = jax.random.split(key, 4)
    l1 = init_complex_conv(k1, mid_ch, in_ch)
    l1["bn_w"], l1["bn_b"] = init_complex_bn(k2, mid_ch)
    l2 = init_complex_conv(k3, out_ch, mid_ch)
    l2["bn_w"], l2["bn_b"] = init_complex_bn(k4, out_ch)
    return {"layer1": l1, "layer2": l2}


# ---------------------------------------------------------------------------
# Pure-JAX (XLA) reference with the same bf16-input / f32-accumulate policy
# ---------------------------------------------------------------------------
def _conv3x3_ref(x_nhwc, w_oihw):
    w_hwio = jnp.transpose(w_oihw, (2, 3, 1, 0)).astype(jnp.bfloat16)
    return lax.conv_general_dilated(
        x_nhwc.astype(jnp.bfloat16), w_hwio, window_strides=(1, 1),
        padding="SAME", dimension_numbers=("NHWC", "HWIO", "NHWC"),
        preferred_element_type=jnp.float32)


def _complex_layer_ref(z, p, eps=1e-5):
    Ci = z.shape[-1] // 2
    xr, xi = z[..., :Ci], z[..., Ci:]
    cr = _conv3x3_ref(xr, p["wr"]) - _conv3x3_ref(xi, p["wi"]) + (p["br"] - p["bi"])
    cim = _conv3x3_ref(xi, p["wr"]) + _conv3x3_ref(xr, p["wi"]) + (p["br"] + p["bi"])
    mr, mi = cr.mean(axis=(0, 1, 2)), cim.mean(axis=(0, 1, 2))
    r, im = cr - mr, cim - mi
    crr = (r * r).mean(axis=(0, 1, 2)) + eps
    cii = (im * im).mean(axis=(0, 1, 2)) + eps
    cri = (r * im).mean(axis=(0, 1, 2))
    s = jnp.sqrt(crr * cii - cri * cri)
    t = jnp.sqrt(crr + cii + 2.0 * s)
    ist = 1.0 / (s * t)
    rrr, rii, rri = (cii + s) * ist, (crr + s) * ist, -cri * ist
    xhr = rrr * r + rri * im
    xhi = rii * im + rri * r
    w, b = p["bn_w"], p["bn_b"]
    yr = w[:, 0] * xhr + w[:, 2] * xhi + b[:, 0]
    yi = w[:, 2] * xhr + w[:, 1] * xhi + b[:, 1]
    return jnp.concatenate([jnp.maximum(yr, 0.0), jnp.maximum(yi, 0.0)], axis=-1)


if __name__ == "__main__":
    key = jax.random.PRNGKey(0)
    kp, kr, ki = jax.random.split(key, 3)
    in_ch, out_ch = 4, 64          # mid_ch defaults to out_ch, as in the module
    N, H, W = 2, 16, 16

    params = init_complex_double_conv(kp, in_ch, out_ch)
    x_real = jax.random.normal(kr, (N, in_ch, H, W), jnp.float32)
    x_imag = jax.random.normal(ki, (N, in_ch, H, W), jnp.float32)

    fwd = jax.jit(complex_double_conv_forward)
    y = fwd(params, x_real, x_imag)
    jax.block_until_ready(y)

    assert y.shape == (N, out_ch, H, W) and y.dtype == jnp.complex64
    # complex_relu => both parts non-negative
    assert float(jnp.min(y.real)) >= 0.0 and float(jnp.min(y.imag)) >= 0.0

    # correctness check against the XLA reference
    z = jnp.concatenate([jnp.transpose(x_real, (0, 2, 3, 1)),
                         jnp.transpose(x_imag, (0, 2, 3, 1))], axis=-1)
    z = _complex_layer_ref(z, params["layer1"])
    z = _complex_layer_ref(z, params["layer2"])
    yr_ref = jnp.transpose(z[..., :out_ch], (0, 3, 1, 2))
    yi_ref = jnp.transpose(z[..., out_ch:], (0, 3, 1, 2))
    err = max(float(jnp.max(jnp.abs(y.real - yr_ref))),
              float(jnp.max(jnp.abs(y.imag - yi_ref))))
    assert err < 5e-2, f"kernel/reference mismatch: max abs err {err}"

    print("KERNEL_OK")
</pallas_src>

<mosaic_0001>
module attributes {stable_mosaic.version = 11 : i64} {
  func.func @kernel(%arg0: i32, %arg1: memref<1x18x18x8xbf16, #tpu.memory_space<vmem>>, %arg2: memref<9x8x128xbf16, #tpu.memory_space<vmem>>, %arg3: memref<1x128xf32, #tpu.memory_space<vmem>>, %arg4: memref<256x128xbf16, #tpu.memory_space<vmem>>, %arg5: memref<1x8x128xf32, #tpu.memory_space<vmem>>, %arg6: memref<256x128xf32, #tpu.memory_space<vmem>>) attributes {dimension_semantics = [#tpu.dimension_semantics<parallel>], iteration_bounds = array<i64: 2>, scalar_prefetch = 0 : i64, scratch_operands = 1 : i64, tpu.core_type = #tpu.core_type<tc>, window_params = [{transform_indices = @transform_0, window_bounds = array<i64: 1, 18, 18, 8>}, {pipeline_mode = #tpu.pipeline_mode<synchronous>, transform_indices = @transform_1, window_bounds = array<i64: 9, 8, 128>}, {pipeline_mode = #tpu.pipeline_mode<synchronous>, transform_indices = @transform_2, window_bounds = array<i64: 1, 128>}, {transform_indices = @transform_3, window_bounds = array<i64: 256, 128>}, {transform_indices = @transform_4, window_bounds = array<i64: 1, 8, 128>}]} {
    %c0 = arith.constant 0 : index
    %c0_0 = arith.constant 0 : index
    %c0_1 = arith.constant 0 : index
    %c0_2 = arith.constant 0 : index
    %0 = vector.load %arg1[%c0, %c0_0, %c0_1, %c0_2] : memref<1x18x18x8xbf16, #tpu.memory_space<vmem>>, vector<1x16x16x8xbf16>
    %1 = vector.shape_cast %0 : vector<1x16x16x8xbf16> to vector<16x16x8xbf16>
    %2 = vector.shape_cast %1 : vector<16x16x8xbf16> to vector<256x8xbf16>
    %c0_3 = arith.constant 0 : index
    %c0_4 = arith.constant 0 : index
    %c0_5 = arith.constant 0 : index
    %3 = vector.load %arg2[%c0_3, %c0_4, %c0_5] : memref<9x8x128xbf16, #tpu.memory_space<vmem>>, vector<1x8x128xbf16>
    %4 = vector.shape_cast %3 : vector<1x8x128xbf16> to vector<8x128xbf16>
    %cst = arith.constant dense<0.000000e+00> : vector<256x128xf32>
    %5 = tpu.matmul %2, %4, %cst {dimension_numbers = #tpu.dot_dimension_numbers<[1], [0], [0], [1], [0, 0, 1, 1], [], []>} : vector<256x8xbf16>, vector<8x128xbf16>, vector<256x128xf32> -> vector<256x128xf32>
    %c0_6 = arith.constant 0 : index
    %c0_7 = arith.constant 0 : index
    %6 = vector.load %arg6[%c0_6, %c0_7] : memref<256x128xf32, #tpu.memory_space<vmem>>, vector<256x128xf32>
    tpu.vector_store %arg6[%c0_6, %c0_7], %5 {strides = array<i32>} : memref<256x128xf32, #tpu.memory_space<vmem>>, vector<256x128xf32>,
    %c0_8 = arith.constant 0 : index
    %c0_9 = arith.constant 0 : index
    %c1 = arith.constant 1 : index
    %c0_10 = arith.constant 0 : index
    %7 = vector.load %arg1[%c0_8, %c0_9, %c1, %c0_10] : memref<1x18x18x8xbf16, #tpu.memory_space<vmem>>, vector<1x16x16x8xbf16>
    %8 = vector.shape_cast %7 : vector<1x16x16x8xbf16> to vector<16x16x8xbf16>
    %9 = vector.shape_cast %8 : vector<16x16x8xbf16> to vector<256x8xbf16>
    %c1_11 = arith.constant 1 : index
    %c0_12 = arith.constant 0 : index
    %c0_13 = arith.constant 0 : index
    %10 = vector.load %arg2[%c1_11, %c0_12, %c0_13] : memref<9x8x128xbf16, #tpu.memory_space<vmem>>, vector<1x8x128xbf16>
    %11 = vector.shape_cast %10 : vector<1x8x128xbf16> to vector<8x128xbf16>
    %cst_14 = arith.constant dense<0.000000e+00> : vector<256x128xf32>
    %12 = tpu.matmul %9, %11, %cst_14 {dimension_numbers = #tpu.dot_dimension_numbers<[1], [0], [0], [1], [0, 0, 1, 1], [], []>} : vector<256x8xbf16>, vector<8x128xbf16>, vector<256x128xf32> -> vector<256x128xf32>
    %c0_15 = arith.constant 0 : index
    %c0_16 = arith.constant 0 : index
    %13 = vector.load %arg6[%c0_15, %c0_16] : memref<256x128xf32, #tpu.memory_space<vmem>>, vector<256x128xf32>
    %14 = arith.addf %13, %12 : vector<256x128xf32>
    %c0_17 = arith.constant 0 : index
    %c0_18 = arith.constant 0 : index
    %15 = vector.load %arg6[%c0_17, %c0_18] : memref<256x128xf32, #tpu.memory_space<vmem>>, vector<256x128xf32>
    tpu.vector_store %arg6[%c0_17, %c0_18], %14 {strides = array<i32>} : memref<256x128xf32, #tpu.memory_space<vmem>>, vector<256x128xf32>,
    %c0_19 = arith.constant 0 : index
    %c0_20 = arith.constant 0 : index
    %c2 = arith.constant 2 : index
    %c0_21 = arith.constant 0 : index
    %16 = vector.load %arg1[%c0_19, %c0_20, %c2, %c0_21] : memref<1x18x18x8xbf16, #tpu.memory_space<vmem>>, vector<1x16x16x8xbf16>
    %17 = vector.shape_cast %16 : vector<1x16x16x8xbf16> to vector<16x16x8xbf16>
    %18 = vector.shape_cast %17 : vector<16x16x8xbf16> to vector<256x8xbf16>
    %c2_22 = arith.constant 2 : index
    %c0_23 = arith.constant 0 : index
    %c0_24 = arith.constant 0 : index
    %19 = vector.load %arg2[%c2_22, %c0_23, %c0_24] : memref<9x8x128xbf16, #tpu.memory_space<vmem>>, vector<1x8x128xbf16>
    %20 = vector.shape_cast %19 : vector<1x8x128xbf16> to vector<8x128xbf16>
    %cst_25 = arith.constant dense<0.000000e+00> : vector<256x128xf32>
    %21 = tpu.matmul %18, %20, %cst_25 {dimension_numbers = #tpu.dot_dimension_numbers<[1], [0], [0], [1], [0, 0, 1, 1], [], []>} : vector<256x8xbf16>, vector<8x128xbf16>, vector<256x128xf32> -> vector<256x128xf32>
    %c0_26 = arith.constant 0 : index
    %c0_27 = arith.constant 0 : index
    %22 = vector.load %arg6[%c0_26, %c0_27] : memref<256x128xf32, #tpu.memory_space<vmem>>, vector<256x128xf32>
    %23 = arith.addf %22, %21 : vector<256x128xf32>
    %c0_28 = arith.constant 0 : index
    %c0_29 = arith.constant 0 : index
    %24 = vector.load %arg6[%c0_28, %c0_29] : memref<256x128xf32, #tpu.memory_space<vmem>>, vector<256x128xf32>
    tpu.vector_store %arg6[%c0_28, %c0_29], %23 {strides = array<i32>} : memref<256x128xf32, #tpu.memory_space<vmem>>, vector<256x128xf32>,
    %c0_30 = arith.constant 0 : index
    %c1_31 = arith.constant 1 : index
    %c0_32 = arith.constant 0 : index
    %c0_33 = arith.constant 0 : index
    %25 = vector.load %arg1[%c0_30, %c1_31, %c0_32, %c0_33] : memref<1x18x18x8xbf16, #tpu.memory_space<vmem>>, vector<1x16x16x8xbf16>
    %26 = vector.shape_cast %25 : vector<1x16x16x8xbf16> to vector<16x16x8xbf16>
    %27 = vector.shape_cast %26 : vector<16x16x8xbf16> to vector<256x8xbf16>
    %c3 = arith.constant 3 : index
    %c0_34 = arith.constant 0 : index
    %c0_35 = arith.constant 0 : index
    %28 = vector.load %arg2[%c3, %c0_34, %c0_35] : memref<9x8x128xbf16, #tpu.memory_space<vmem>>, vector<1x8x128xbf16>
    %29 = vector.shape_cast %28 : vector<1x8x128xbf16> to vector<8x128xbf16>
    %cst_36 = arith.constant dense<0.000000e+00> : vector<256x128xf32>
    %30 = tpu.matmul %27, %29, %cst_36 {dimension_numbers = #tpu.dot_dimension_numbers<[1], [0], [0], [1], [0, 0, 1, 1], [], []>} : vector<256x8xbf16>, vector<8x128xbf16>, vector<256x128xf32> -> vector<256x128xf32>
    %c0_37 = arith.constant 0 : index
    %c0_38 = arith.constant 0 : index
    %31 = vector.load %arg6[%c0_37, %c0_38] : memref<256x128xf32, #tpu.memory_space<vmem>>, vector<256x128xf32>
    %32 = arith.addf %31, %30 : vector<256x128xf32>
    %c0_39 = arith.constant 0 : index
    %c0_40 = arith.constant 0 : index
    %33 = vector.load %arg6[%c0_39, %c0_40] : memref<256x128xf32, #tpu.memory_space<vmem>>, vector<256x128xf32>
    tpu.vector_store %arg6[%c0_39, %c0_40], %32 {strides = array<i32>} : memref<256x128xf32, #tpu.memory_space<vmem>>, vector<256x128xf32>,
    %c0_41 = arith.constant 0 : index
    %c1_42 = arith.constant 1 : index
    %c1_43 = arith.constant 1 : index
    %c0_44 = arith.constant 0 : index
    %34 = vector.load %arg1[%c0_41, %c1_42, %c1_43, %c0_44] : memref<1x18x18x8xbf16, #tpu.memory_space<vmem>>, vector<1x16x16x8xbf16>
    %35 = vector.shape_cast %34 : vector<1x16x16x8xbf16> to vector<16x16x8xbf16>
    %36 = vector.shape_cast %35 : vector<16x16x8xbf16> to vector<256x8xbf16>
    %c4 = arith.constant 4 : index
    %c0_45 = arith.constant 0 : index
    %c0_46 = arith.constant 0 : index
    %37 = vector.load %arg2[%c4, %c0_45, %c0_46] : memref<9x8x128xbf16, #tpu.memory_space<vmem>>, vector<1x8x128xbf16>
    %38 = vector.shape_cast %37 : vector<1x8x128xbf16> to vector<8x128xbf16>
    %cst_47 = arith.constant dense<0.000000e+00> : vector<256x128xf32>
    %39 = tpu.matmul %36, %38, %cst_47 {dimension_numbers = #tpu.dot_dimension_numbers<[1], [0], [0], [1], [0, 0, 1, 1], [], []>} : vector<256x8xbf16>, vector<8x128xbf16>, vector<256x128xf32> -> vector<256x128xf32>
    %c0_48 = arith.constant 0 : index
    %c0_49 = arith.constant 0 : index
    %40 = vector.load %arg6[%c0_48, %c0_49] : memref<256x128xf32, #tpu.memory_space<vmem>>, vector<256x128xf32>
    %41 = arith.addf %40, %39 : vector<256x128xf32>
    %c0_50 = arith.constant 0 : index
    %c0_51 = arith.constant 0 : index
    %42 = vector.load %arg6[%c0_50, %c0_51] : memref<256x128xf32, #tpu.memory_space<vmem>>, vector<256x128xf32>
    tpu.vector_store %arg6[%c0_50, %c0_51], %41 {strides = array<i32>} : memref<256x128xf32, #tpu.memory_space<vmem>>, vector<256x128xf32>,
    %c0_52 = arith.constant 0 : index
    %c1_53 = arith.constant 1 : index
    %c2_54 = arith.constant 2 : index
    %c0_55 = arith.constant 0 : index
    %43 = vector.load %arg1[%c0_52, %c1_53, %c2_54, %c0_55] : memref<1x18x18x8xbf16, #tpu.memory_space<vmem>>, vector<1x16x16x8xbf16>
    %44 = vector.shape_cast %43 : vector<1x16x16x8xbf16> to vector<16x16x8xbf16>
    %45 = vector.shape_cast %44 : vector<16x16x8xbf16> to vector<256x8xbf16>
    %c5 = arith.constant 5 : index
    %c0_56 = arith.constant 0 : index
    %c0_57 = arith.constant 0 : index
    %46 = vector.load %arg2[%c5, %c0_56, %c0_57] : memref<9x8x128xbf16, #tpu.memory_space<vmem>>, vector<1x8x128xbf16>
    %47 = vector.shape_cast %46 : vector<1x8x128xbf16> to vector<8x128xbf16>
    %cst_58 = arith.constant dense<0.000000e+00> : vector<256x128xf32>
    %48 = tpu.matmul %45, %47, %cst_58 {dimension_numbers = #tpu.dot_dimension_numbers<[1], [0], [0], [1], [0, 0, 1, 1], [], []>} : vector<256x8xbf16>, vector<8x128xbf16>, vector<256x128xf32> -> vector<256x128xf32>
    %c0_59 = arith.constant 0 : index
    %c0_60 = arith.constant 0 : index
    %49 = vector.load %arg6[%c0_59, %c0_60] : memref<256x128xf32, #tpu.memory_space<vmem>>, vector<256x128xf32>
    %50 = arith.addf %49, %48 : vector<256x128xf32>
    %c0_61 = arith.constant 0 : index
    %c0_62 = arith.constant 0 : index
    %51 = vector.load %arg6[%c0_61, %c0_62] : memref<256x128xf32, #tpu.memory_space<vmem>>, vector<256x128xf32>
    tpu.vector_store %arg6[%c0_61, %c0_62], %50 {strides = array<i32>} : memref<256x128xf32, #tpu.memory_space<vmem>>, vector<256x128xf32>,
    %c0_63 = arith.constant 0 : index
    %c2_64 = arith.constant 2 : index
    %c0_65 = arith.constant 0 : index
    %c0_66 = arith.constant 0 : index
    %52 = vector.load %arg1[%c0_63, %c2_64, %c0_65, %c0_66] : memref<1x18x18x8xbf16, #tpu.memory_space<vmem>>, vector<1x16x16x8xbf16>
    %53 = vector.shape_cast %52 : vector<1x16x16x8xbf16> to vector<16x16x8xbf16>
    %54 = vector.shape_cast %53 : vector<16x16x8xbf16> to vector<256x8xbf16>
    %c6 = arith.constant 6 : index
    %c0_67 = arith.constant 0 : index
    %c0_68 = arith.constant 0 : index
    %55 = vector.load %arg2[%c6, %c0_67, %c0_68] : memref<9x8x128xbf16, #tpu.memory_space<vmem>>, vector<1x8x128xbf16>
    %56 = vector.shape_cast %55 : vector<1x8x128xbf16> to vector<8x128xbf16>
    %cst_69 = arith.constant dense<0.000000e+00> : vector<256x128xf32>
    %57 = tpu.matmul %54, %56, %cst_69 {dimension_numbers = #tpu.dot_dimension_numbers<[1], [0], [0], [1], [0, 0, 1, 1], [], []>} : vector<256x8xbf16>, vector<8x128xbf16>, vector<256x128xf32> -> vector<256x128xf32>
    %c0_70 = arith.constant 0 : index
    %c0_71 = arith.constant 0 : index
    %58 = vector.load %arg6[%c0_70, %c0_71] : memref<256x128xf32, #tpu.memory_space<vmem>>, vector<256x128xf32>
    %59 = arith.addf %58, %57 : vector<256x128xf32>
    %c0_72 = arith.constant 0 : index
    %c0_73 = arith.constant 0 : index
    %60 = vector.load %arg6[%c0_72, %c0_73] : memref<256x128xf32, #tpu.memory_space<vmem>>, vector<256x128xf32>
    tpu.vector_store %arg6[%c0_72, %c0_73], %59 {strides = array<i32>} : memref<256x128xf32, #tpu.memory_space<vmem>>, vector<256x128xf32>,
    %c0_74 = arith.constant 0 : index
    %c2_75 = arith.constant 2 : index
    %c1_76 = arith.constant 1 : index
    %c0_77 = arith.constant 0 : index
    %61 = vector.load %arg1[%c0_74, %c2_75, %c1_76, %c0_77] : memref<1x18x18x8xbf16, #tpu.memory_space<vmem>>, vector<1x16x16x8xbf16>
    %62 = vector.shape_cast %61 : vector<1x16x16x8xbf16> to vector<16x16x8xbf16>
    %63 = vector.shape_cast %62 : vector<16x16x8xbf16> to vector<256x8xbf16>
    %c7 = arith.constant 7 : index
    %c0_78 = arith.constant 0 : index
    %c0_79 = arith.constant 0 : index
    %64 = vector.load %arg2[%c7, %c0_78, %c0_79] : memref<9x8x128xbf16, #tpu.memory_space<vmem>>, vector<1x8x128xbf16>
    %65 = vector.shape_cast %64 : vector<1x8x128xbf16> to vector<8x128xbf16>
    %cst_80 = arith.constant dense<0.000000e+00> : vector<256x128xf32>
    %66 = tpu.matmul %63, %65, %cst_80 {dimension_numbers = #tpu.dot_dimension_numbers<[1], [0], [0], [1], [0, 0, 1, 1], [], []>} : vector<256x8xbf16>, vector<8x128xbf16>, vector<256x128xf32> -> vector<256x128xf32>
    %c0_81 = arith.constant 0 : index
    %c0_82 = arith.constant 0 : index
    %67 = vector.load %arg6[%c0_81, %c0_82] : memref<256x128xf32, #tpu.memory_space<vmem>>, vector<256x128xf32>
    %68 = arith.addf %67, %66 : vector<256x128xf32>
    %c0_83 = arith.constant 0 : index
    %c0_84 = arith.constant 0 : index
    %69 = vector.load %arg6[%c0_83, %c0_84] : memref<256x128xf32, #tpu.memory_space<vmem>>, vector<256x128xf32>
    tpu.vector_store %arg6[%c0_83, %c0_84], %68 {strides = array<i32>} : memref<256x128xf32, #tpu.memory_space<vmem>>, vector<256x128xf32>,
    %c0_85 = arith.constant 0 : index
    %c2_86 = arith.constant 2 : index
    %c2_87 = arith.constant 2 : index
    %c0_88 = arith.constant 0 : index
    %70 = vector.load %arg1[%c0_85, %c2_86, %c2_87, %c0_88] : memref<1x18x18x8xbf16, #tpu.memory_space<vmem>>, vector<1x16x16x8xbf16>
    %71 = vector.shape_cast %70 : vector<1x16x16x8xbf16> to vector<16x16x8xbf16>
    %72 = vector.shape_cast %71 : vector<16x16x8xbf16> to vector<256x8xbf16>
    %c8 = arith.constant 8 : index
    %c0_89 = arith.constant 0 : index
    %c0_90 = arith.constant 0 : index
    %73 = vector.load %arg2[%c8, %c0_89, %c0_90] : memref<9x8x128xbf16, #tpu.memory_space<vmem>>, vector<1x8x128xbf16>
    %74 = vector.shape_cast %73 : vector<1x8x128xbf16> to vector<8x128xbf16>
    %cst_91 = arith.constant dense<0.000000e+00> : vector<256x128xf32>
    %75 = tpu.matmul %72, %74, %cst_91 {dimension_numbers = #tpu.dot_dimension_numbers<[1], [0], [0], [1], [0, 0, 1, 1], [], []>} : vector<256x8xbf16>, vector<8x128xbf16>, vector<256x128xf32> -> vector<256x128xf32>
    %c0_92 = arith.constant 0 : index
    %c0_93 = arith.constant 0 : index
    %76 = vector.load %arg6[%c0_92, %c0_93] : memref<256x128xf32, #tpu.memory_space<vmem>>, vector<256x128xf32>
    %77 = arith.addf %76, %75 : vector<256x128xf32>
    %c0_94 = arith.constant 0 : index
    %c0_95 = arith.constant 0 : index
    %78 = vector.load %arg6[%c0_94, %c0_95] : memref<256x128xf32, #tpu.memory_space<vmem>>, vector<256x128xf32>
    tpu.vector_store %arg6[%c0_94, %c0_95], %77 {strides = array<i32>} : memref<256x128xf32, #tpu.memory_space<vmem>>, vector<256x128xf32>,
    %c0_96 = arith.constant 0 : index
    %c0_97 = arith.constant 0 : index
    %79 = vector.load %arg6[%c0_96, %c0_97] : memref<256x128xf32, #tpu.memory_space<vmem>>, vector<256x128xf32>
    %c0_98 = arith.constant 0 : index
    %c0_99 = arith.constant 0 : index
    %80 = vector.load %arg3[%c0_98, %c0_99] : memref<1x128xf32, #tpu.memory_space<vmem>>, vector<1x128xf32>
    %81 = vector.broadcast %80 : vector<1x128xf32> to vector<256x128xf32>
    %82 = arith.addf %79, %81 : vector<256x128xf32>
    %83 = arith.truncf %82 : vector<256x128xf32> to vector<256x128xbf16>
    %c0_100 = arith.constant 0 : index
    %c0_101 = arith.constant 0 : index
    %84 = vector.load %arg4[%c0_100, %c0_101] : memref<256x128xbf16, #tpu.memory_space<vmem>>, vector<256x128xbf16>
    tpu.vector_store %arg4[%c0_100, %c0_101], %83 {strides = array<i32>} : memref<256x128xbf16, #tpu.memory_space<vmem>>, vector<256x128xbf16>,
    %c64_i32 = arith.constant 64 : i32
    %85 = tpu.dynamic_rotate %82 by %c64_i32 dim 1 : vector<256x128xf32>, i32 -> vector<256x128xf32>
    %cst_102 = arith.constant dense<0.000000e+00> : vector<128xf32>
    %86 = vector.multi_reduction <add>, %82, %cst_102 [0] : vector<256x128xf32> to vector<128xf32>
    %87 = vector.shape_cast %86 : vector<128xf32> to vector<1x128xf32>
    %88 = arith.mulf %82, %82 : vector<256x128xf32>
    %cst_103 = arith.constant dense<0.000000e+00> : vector<128xf32>
    %89 = vector.multi_reduction <add>, %88, %cst_103 [0] : vector<256x128xf32> to vector<128xf32>
    %90 = vector.shape_cast %89 : vector<128xf32> to vector<1x128xf32>
    %91 = arith.mulf %82, %85 : vector<256x128xf32>
    %cst_104 = arith.constant dense<0.000000e+00> : vector<128xf32>
    %92 = vector.multi_reduction <add>, %91, %cst_104 [0] : vector<256x128xf32> to vector<128xf32>
    %93 = vector.shape_cast %92 : vector<128xf32> to vector<1x128xf32>
    %cst_105 = arith.constant 0.000000e+00 : f32
    %94 = vector.broadcast %cst_105 : f32 to vector<5x128xf32>
    %95 = tpu.concatenate %87, %90, %93, %94 in 0 : vector<1x128xf32>, vector<1x128xf32>, vector<1x128xf32>, vector<5x128xf32> -> vector<8x128xf32>
    %c0_106 = arith.constant 0 : index
    %c0_107 = arith.constant 0 : index
    %c0_108 = arith.constant 0 : index
    %96 = vector.load %arg5[%c0_106, %c0_107, %c0_108] : memref<1x8x128xf32, #tpu.memory_space<vmem>>, vector<1x8x128xf32>
    %97 = vector.shape_cast %96 : vector<1x8x128xf32> to vector<8x128xf32>
    %98 = vector.shape_cast %95 : vector<8x128xf32> to vector<1x8x128xf32>
    tpu.vector_store %arg5[%c0_106, %c0_107, %c0_108], %98 {strides = array<i32>} : memref<1x8x128xf32, #tpu.memory_space<vmem>>, vector<1x8x128xf32>,
    return
  }
  func.func @transform_0(%arg0: i32) -> (i32, i32, i32, i32) {
    %c0_i32 = arith.constant 0 : i32
    %c0_i32_0 = arith.constant 0 : i32
    %c0_i32_1 = arith.constant 0 : i32
    %c0_i32_2 = arith.constant 0 : i32
    return %arg0, %c0_i32, %c0_i32_0, %c0_i32_1 : i32, i32, i32, i32
  }
  func.func @transform_1(%arg0: i32) -> (i32, i32, i32) {
    %c0_i32 = arith.constant 0 : i32
    %c0_i32_0 = arith.constant 0 : i32
    %c0_i32_1 = arith.constant 0 : i32
    %c0_i32_2 = arith.constant 0 : i32
    return %c0_i32, %c0_i32_0, %c0_i32_1 : i32, i32, i32
  }
  func.func @transform_2(%arg0: i32) -> (i32, i32) {
    %c0_i32 = arith.constant 0 : i32
    %c0_i32_0 = arith.constant 0 : i32
    %c0_i32_1 = arith.constant 0 : i32
    return %c0_i32, %c0_i32_0 : i32, i32
  }
  func.func @transform_3(%arg0: i32) -> (i32, i32) {
    %c0_i32 = arith.constant 0 : i32
    %c0_i32_0 = arith.constant 0 : i32
    return %arg0, %c0_i32 : i32, i32
  }
  func.func @transform_4(%arg0: i32) -> (i32, i32, i32) {
    %c0_i32 = arith.constant 0 : i32
    %c0_i32_0 = arith.constant 0 : i32
    %c0_i32_1 = arith.constant 0 : i32
    return %arg0, %c0_i32, %c0_i32_0 : i32, i32, i32
  }
}

module attributes {stable_mosaic.version = 11 : i64} {
  func.func @kernel(%arg0: i32, %arg1: memref<512x128xbf16, #tpu.memory_space<vmem>>, %arg2: memref<8x128xf32, #tpu.memory_space<vmem>>, %arg3: memref<512x128xbf16, #tpu.memory_space<vmem>>) attributes {dimension_semantics = [#tpu.dimension_semantics<parallel>], iteration_bounds = array<i64: 1>, scalar_prefetch = 0 : i64, scratch_operands = 0 : i64, tpu.core_type = #tpu.core_type<tc>, window_params = [{transform_indices = @transform_0, window_bounds = array<i64: 512, 128>}, {pipeline_mode = #tpu.pipeline_mode<synchronous>, transform_indices = @transform_1, window_bounds = array<i64: 8, 128>}, {transform_indices = @transform_2, window_bounds = array<i64: 512, 128>}]} {
    %c0 = arith.constant 0 : index
    %c0_0 = arith.constant 0 : index
    %0 = vector.load %arg1[%c0, %c0_0] : memref<512x128xbf16, #tpu.memory_space<vmem>>, vector<512x128xbf16>
    %1 = arith.extf %0 : vector<512x128xbf16> to vector<512x128xf32>
    %c64_i32 = arith.constant 64 : i32
    %2 = tpu.dynamic_rotate %1 by %c64_i32 dim 1 : vector<512x128xf32>, i32 -> vector<512x128xf32>
    %c0_1 = arith.constant 0 : index
    %c0_2 = arith.constant 0 : index
    %3 = vector.load %arg2[%c0_1, %c0_2] : memref<8x128xf32, #tpu.memory_space<vmem>>, vector<1x128xf32>
    %4 = vector.broadcast %3 : vector<1x128xf32> to vector<512x128xf32>
    %5 = arith.mulf %4, %1 : vector<512x128xf32>
    %c1 = arith.constant 1 : index
    %c0_3 = arith.constant 0 : index
    %6 = vector.load %arg2[%c1, %c0_3] : memref<8x128xf32, #tpu.memory_space<vmem>>, vector<1x128xf32>
    %7 = vector.broadcast %6 : vector<1x128xf32> to vector<512x128xf32>
    %8 = arith.mulf %7, %2 : vector<512x128xf32>
    %9 = arith.addf %5, %8 : vector<512x128xf32>
    %c2 = arith.constant 2 : index
    %c0_4 = arith.constant 0 : index
    %10 = vector.load %arg2[%c2, %c0_4] : memref<8x128xf32, #tpu.memory_space<vmem>>, vector<1x128xf32>
    %11 = vector.broadcast %10 : vector<1x128xf32> to vector<512x128xf32>
    %12 = arith.addf %9, %11 : vector<512x128xf32>
    %cst = arith.constant 0.000000e+00 : f32
    %13 = vector.broadcast %cst : f32 to vector<512x128xf32>
    %14 = arith.maximumf %12, %13 : vector<512x128xf32>
    %15 = arith.truncf %14 : vector<512x128xf32> to vector<512x128xbf16>
    %c0_5 = arith.constant 0 : index
    %c0_6 = arith.constant 0 : index
    %16 = vector.load %arg3[%c0_5, %c0_6] : memref<512x128xbf16, #tpu.memory_space<vmem>>, vector<512x128xbf16>
    tpu.vector_store %arg3[%c0_5, %c0_6], %15 {strides = array<i32>} : memref<512x128xbf16, #tpu.memory_space<vmem>>, vector<512x128xbf16>,
    return
  }
  func.func @transform_0(%arg0: i32) -> (i32, i32) {
    %c0_i32 = arith.constant 0 : i32
    %c0_i32_0 = arith.constant 0 : i32
    return %arg0, %c0_i32 : i32, i32
  }
  func.func @transform_1(%arg0: i32) -> (i32, i32) {
    %c0_i32 = arith.constant 0 : i32
    %c0_i32_0 = arith.constant 0 : i32
    %c0_i32_1 = arith.constant 0 : i32
    return %c0_i32, %c0_i32_0 : i32, i32
  }
  func.func @transform_2(%arg0: i32) -> (i32, i32) {
    %c0_i32 = arith.constant 0 : i32
    %c0_i32_0 = arith.constant 0 : i32
    return %arg0, %c0_i32 : i32, i32
  }
}

module attributes {stable_mosaic.version = 11 : i64} {
  func.func @kernel(%arg0: i32, %arg1: memref<512x128xbf16, #tpu.memory_space<vmem>>, %arg2: memref<8x128xf32, #tpu.memory_space<vmem>>, %arg3: memref<512x128xf32, #tpu.memory_space<vmem>>) attributes {dimension_semantics = [#tpu.dimension_semantics<parallel>], iteration_bounds = array<i64: 1>, scalar_prefetch = 0 : i64, scratch_operands = 0 : i64, tpu.core_type = #tpu.core_type<tc>, window_params = [{transform_indices = @transform_0, window_bounds = array<i64: 512, 128>}, {pipeline_mode = #tpu.pipeline_mode<synchronous>, transform_indices = @transform_1, window_bounds = array<i64: 8, 128>}, {transform_indices = @transform_2, window_bounds = array<i64: 512, 128>}]} {
    %c0 = arith.constant 0 : index
    %c0_0 = arith.constant 0 : index
    %0 = vector.load %arg1[%c0, %c0_0] : memref<512x128xbf16, #tpu.memory_space<vmem>>, vector<512x128xbf16>
    %1 = arith.extf %0 : vector<512x128xbf16> to vector<512x128xf32>
    %c64_i32 = arith.constant 64 : i32
    %2 = tpu.dynamic_rotate %1 by %c64_i32 dim 1 : vector<512x128xf32>, i32 -> vector<512x128xf32>
    %c0_1 = arith.constant 0 : index
    %c0_2 = arith.constant 0 : index
    %3 = vector.load %arg2[%c0_1, %c0_2] : memref<8x128xf32, #tpu.memory_space<vmem>>, vector<1x128xf32>
    %4 = vector.broadcast %3 : vector<1x128xf32> to vector<512x128xf32>
    %5 = arith.mulf %4, %1 : vector<512x128xf32>
    %c1 = arith.constant 1 : index
    %c0_3 = arith.constant 0 : index
    %6 = vector.load %arg2[%c1, %c0_3] : memref<8x128xf32, #tpu.memory_space<vmem>>, vector<1x128xf32>
    %7 = vector.broadcast %6 : vector<1x128xf32> to vector<512x128xf32>
    %8 = arith.mulf %7, %2 : vector<512x128xf32>
    %9 = arith.addf %5, %8 : vector<512x128xf32>
    %c2 = arith.constant 2 : index
    %c0_4 = arith.constant 0 : index
    %10 = vector.load %arg2[%c2, %c0_4] : memref<8x128xf32, #tpu.memory_space<vmem>>, vector<1x128xf32>
    %11 = vector.broadcast %10 : vector<1x128xf32> to vector<512x128xf32>
    %12 = arith.addf %9, %11 : vector<512x128xf32>
    %cst = arith.constant 0.000000e+00 : f32
    %13 = vector.broadcast %cst : f32 to vector<512x128xf32>
    %14 = arith.maximumf %12, %13 : vector<512x128xf32>
    %c0_5 = arith.constant 0 : index
    %c0_6 = arith.constant 0 : index
    %15 = vector.load %arg3[%c0_5, %c0_6] : memref<512x128xf32, #tpu.memory_space<vmem>>, vector<512x128xf32>
    tpu.vector_store %arg3[%c0_5, %c0_6], %14 {strides = array<i32>} : memref<512x128xf32, #tpu.memory_space<vmem>>, vector<512x128xf32>,
    return
  }
  func.func @transform_0(%arg0: i32) -> (i32, i32) {
    %c0_i32 = arith.constant 0 : i32
    %c0_i32_0 = arith.constant 0 : i32
    return %arg0, %c0_i32 : i32, i32
  }
  func.func @transform_1(%arg0: i32) -> (i32, i32) {
    %c0_i32 = arith.constant 0 : i32
    %c0_i32_0 = arith.constant 0 : i32
    %c0_i32_1 = arith.constant 0 : i32
    return %c0_i32, %c0_i32_0 : i32, i32
  }
  func.func @transform_2(%arg0: i32) -> (i32, i32) {
    %c0_i32 = arith.constant 0 : i32
    %c0_i32_0 = arith.constant 0 : i32
    return %arg0, %c0_i32 : i32, i32
  }
}

module attributes {stable_mosaic.version = 11 : i64} {
  func.func @kernel(%arg0: i32, %arg1: memref<1x18x18x128xbf16, #tpu.memory_space<vmem>>, %arg2: memref<9x128x128xbf16, #tpu.memory_space<vmem>>, %arg3: memref<1x128xf32, #tpu.memory_space<vmem>>, %arg4: memref<256x128xbf16, #tpu.memory_space<vmem>>, %arg5: memref<1x8x128xf32, #tpu.memory_space<vmem>>, %arg6: memref<256x128xf32, #tpu.memory_space<vmem>>) attributes {dimension_semantics = [#tpu.dimension_semantics<parallel>], iteration_bounds = array<i64: 2>, scalar_prefetch = 0 : i64, scratch_operands = 1 : i64, tpu.core_type = #tpu.core_type<tc>, window_params = [{transform_indices = @transform_0, window_bounds = array<i64: 1, 18, 18, 128>}, {pipeline_mode = #tpu.pipeline_mode<synchronous>, transform_indices = @transform_1, window_bounds = array<i64: 9, 128, 128>}, {pipeline_mode = #tpu.pipeline_mode<synchronous>, transform_indices = @transform_2, window_bounds = array<i64: 1, 128>}, {transform_indices = @transform_3, window_bounds = array<i64: 256, 128>}, {transform_indices = @transform_4, window_bounds = array<i64: 1, 8, 128>}]} {
    %c0 = arith.constant 0 : index
    %c0_0 = arith.constant 0 : index
    %c0_1 = arith.constant 0 : index
    %c0_2 = arith.constant 0 : index
    %0 = vector.load %arg1[%c0, %c0_0, %c0_1, %c0_2] : memref<1x18x18x128xbf16, #tpu.memory_space<vmem>>, vector<1x16x16x128xbf16>
    %1 = vector.shape_cast %0 : vector<1x16x16x128xbf16> to vector<16x16x128xbf16>
    %2 = vector.shape_cast %1 : vector<16x16x128xbf16> to vector<256x128xbf16>
    %c0_3 = arith.constant 0 : index
    %c0_4 = arith.constant 0 : index
    %c0_5 = arith.constant 0 : index
    %3 = vector.load %arg2[%c0_3, %c0_4, %c0_5] : memref<9x128x128xbf16, #tpu.memory_space<vmem>>, vector<1x128x128xbf16>
    %4 = vector.shape_cast %3 : vector<1x128x128xbf16> to vector<128x128xbf16>
    %cst = arith.constant dense<0.000000e+00> : vector<256x128xf32>
    %5 = tpu.matmul %2, %4, %cst {dimension_numbers = #tpu.dot_dimension_numbers<[1], [0], [0], [1], [0, 0, 1, 1], [], []>} : vector<256x128xbf16>, vector<128x128xbf16>, vector<256x128xf32> -> vector<256x128xf32>
    %c0_6 = arith.constant 0 : index
    %c0_7 = arith.constant 0 : index
    %6 = vector.load %arg6[%c0_6, %c0_7] : memref<256x128xf32, #tpu.memory_space<vmem>>, vector<256x128xf32>
    tpu.vector_store %arg6[%c0_6, %c0_7], %5 {strides = array<i32>} : memref<256x128xf32, #tpu.memory_space<vmem>>, vector<256x128xf32>,
    %c0_8 = arith.constant 0 : index
    %c0_9 = arith.constant 0 : index
    %c1 = arith.constant 1 : index
    %c0_10 = arith.constant 0 : index
    %7 = vector.load %arg1[%c0_8, %c0_9, %c1, %c0_10] : memref<1x18x18x128xbf16, #tpu.memory_space<vmem>>, vector<1x16x16x128xbf16>
    %8 = vector.shape_cast %7 : vector<1x16x16x128xbf16> to vector<16x16x128xbf16>
    %9 = vector.shape_cast %8 : vector<16x16x128xbf16> to vector<256x128xbf16>
    %c1_11 = arith.constant 1 : index
    %c0_12 = arith.constant 0 : index
    %c0_13 = arith.constant 0 : index
    %10 = vector.load %arg2[%c1_11, %c0_12, %c0_13] : memref<9x128x128xbf16, #tpu.memory_space<vmem>>, vector<1x128x128xbf16>
    %11 = vector.shape_cast %10 : vector<1x128x128xbf16> to vector<128x128xbf16>
    %cst_14 = arith.constant dense<0.000000e+00> : vector<256x128xf32>
    %12 = tpu.matmul %9, %11, %cst_14 {dimension_numbers = #tpu.dot_dimension_numbers<[1], [0], [0], [1], [0, 0, 1, 1], [], []>} : vector<256x128xbf16>, vector<128x128xbf16>, vector<256x128xf32> -> vector<256x128xf32>
    %c0_15 = arith.constant 0 : index
    %c0_16 = arith.constant 0 : index
    %13 = vector.load %arg6[%c0_15, %c0_16] : memref<256x128xf32, #tpu.memory_space<vmem>>, vector<256x128xf32>
    %14 = arith.addf %13, %12 : vector<256x128xf32>
    %c0_17 = arith.constant 0 : index
    %c0_18 = arith.constant 0 : index
    %15 = vector.load %arg6[%c0_17, %c0_18] : memref<256x128xf32, #tpu.memory_space<vmem>>, vector<256x128xf32>
    tpu.vector_store %arg6[%c0_17, %c0_18], %14 {strides = array<i32>} : memref<256x128xf32, #tpu.memory_space<vmem>>, vector<256x128xf32>,
    %c0_19 = arith.constant 0 : index
    %c0_20 = arith.constant 0 : index
    %c2 = arith.constant 2 : index
    %c0_21 = arith.constant 0 : index
    %16 = vector.load %arg1[%c0_19, %c0_20, %c2, %c0_21] : memref<1x18x18x128xbf16, #tpu.memory_space<vmem>>, vector<1x16x16x128xbf16>
    %17 = vector.shape_cast %16 : vector<1x16x16x128xbf16> to vector<16x16x128xbf16>
    %18 = vector.shape_cast %17 : vector<16x16x128xbf16> to vector<256x128xbf16>
    %c2_22 = arith.constant 2 : index
    %c0_23 = arith.constant 0 : index
    %c0_24 = arith.constant 0 : index
    %19 = vector.load %arg2[%c2_22, %c0_23, %c0_24] : memref<9x128x128xbf16, #tpu.memory_space<vmem>>, vector<1x128x128xbf16>
    %20 = vector.shape_cast %19 : vector<1x128x128xbf16> to vector<128x128xbf16>
    %cst_25 = arith.constant dense<0.000000e+00> : vector<256x128xf32>
    %21 = tpu.matmul %18, %20, %cst_25 {dimension_numbers = #tpu.dot_dimension_numbers<[1], [0], [0], [1], [0, 0, 1, 1], [], []>} : vector<256x128xbf16>, vector<128x128xbf16>, vector<256x128xf32> -> vector<256x128xf32>
    %c0_26 = arith.constant 0 : index
    %c0_27 = arith.constant 0 : index
    %22 = vector.load %arg6[%c0_26, %c0_27] : memref<256x128xf32, #tpu.memory_space<vmem>>, vector<256x128xf32>
    %23 = arith.addf %22, %21 : vector<256x128xf32>
    %c0_28 = arith.constant 0 : index
    %c0_29 = arith.constant 0 : index
    %24 = vector.load %arg6[%c0_28, %c0_29] : memref<256x128xf32, #tpu.memory_space<vmem>>, vector<256x128xf32>
    tpu.vector_store %arg6[%c0_28, %c0_29], %23 {strides = array<i32>} : memref<256x128xf32, #tpu.memory_space<vmem>>, vector<256x128xf32>,
    %c0_30 = arith.constant 0 : index
    %c1_31 = arith.constant 1 : index
    %c0_32 = arith.constant 0 : index
    %c0_33 = arith.constant 0 : index
    %25 = vector.load %arg1[%c0_30, %c1_31, %c0_32, %c0_33] : memref<1x18x18x128xbf16, #tpu.memory_space<vmem>>, vector<1x16x16x128xbf16>
    %26 = vector.shape_cast %25 : vector<1x16x16x128xbf16> to vector<16x16x128xbf16>
    %27 = vector.shape_cast %26 : vector<16x16x128xbf16> to vector<256x128xbf16>
    %c3 = arith.constant 3 : index
    %c0_34 = arith.constant 0 : index
    %c0_35 = arith.constant 0 : index
    %28 = vector.load %arg2[%c3, %c0_34, %c0_35] : memref<9x128x128xbf16, #tpu.memory_space<vmem>>, vector<1x128x128xbf16>
    %29 = vector.shape_cast %28 : vector<1x128x128xbf16> to vector<128x128xbf16>
    %cst_36 = arith.constant dense<0.000000e+00> : vector<256x128xf32>
    %30 = tpu.matmul %27, %29, %cst_36 {dimension_numbers = #tpu.dot_dimension_numbers<[1], [0], [0], [1], [0, 0, 1, 1], [], []>} : vector<256x128xbf16>, vector<128x128xbf16>, vector<256x128xf32> -> vector<256x128xf32>
    %c0_37 = arith.constant 0 : index
    %c0_38 = arith.constant 0 : index
    %31 = vector.load %arg6[%c0_37, %c0_38] : memref<256x128xf32, #tpu.memory_space<vmem>>, vector<256x128xf32>
    %32 = arith.addf %31, %30 : vector<256x128xf32>
    %c0_39 = arith.constant 0 : index
    %c0_40 = arith.constant 0 : index
    %33 = vector.load %arg6[%c0_39, %c0_40] : memref<256x128xf32, #tpu.memory_space<vmem>>, vector<256x128xf32>
    tpu.vector_store %arg6[%c0_39, %c0_40], %32 {strides = array<i32>} : memref<256x128xf32, #tpu.memory_space<vmem>>, vector<256x128xf32>,
    %c0_41 = arith.constant 0 : index
    %c1_42 = arith.constant 1 : index
    %c1_43 = arith.constant 1 : index
    %c0_44 = arith.constant 0 : index
    %34 = vector.load %arg1[%c0_41, %c1_42, %c1_43, %c0_44] : memref<1x18x18x128xbf16, #tpu.memory_space<vmem>>, vector<1x16x16x128xbf16>
    %35 = vector.shape_cast %34 : vector<1x16x16x128xbf16> to vector<16x16x128xbf16>
    %36 = vector.shape_cast %35 : vector<16x16x128xbf16> to vector<256x128xbf16>
    %c4 = arith.constant 4 : index
    %c0_45 = arith.constant 0 : index
    %c0_46 = arith.constant 0 : index
    %37 = vector.load %arg2[%c4, %c0_45, %c0_46] : memref<9x128x128xbf16, #tpu.memory_space<vmem>>, vector<1x128x128xbf16>
    %38 = vector.shape_cast %37 : vector<1x128x128xbf16> to vector<128x128xbf16>
    %cst_47 = arith.constant dense<0.000000e+00> : vector<256x128xf32>
    %39 = tpu.matmul %36, %38, %cst_47 {dimension_numbers = #tpu.dot_dimension_numbers<[1], [0], [0], [1], [0, 0, 1, 1], [], []>} : vector<256x128xbf16>, vector<128x128xbf16>, vector<256x128xf32> -> vector<256x128xf32>
    %c0_48 = arith.constant 0 : index
    %c0_49 = arith.constant 0 : index
    %40 = vector.load %arg6[%c0_48, %c0_49] : memref<256x128xf32, #tpu.memory_space<vmem>>, vector<256x128xf32>
    %41 = arith.addf %40, %39 : vector<256x128xf32>
    %c0_50 = arith.constant 0 : index
    %c0_51 = arith.constant 0 : index
    %42 = vector.load %arg6[%c0_50, %c0_51] : memref<256x128xf32, #tpu.memory_space<vmem>>, vector<256x128xf32>
    tpu.vector_store %arg6[%c0_50, %c0_51], %41 {strides = array<i32>} : memref<256x128xf32, #tpu.memory_space<vmem>>, vector<256x128xf32>,
    %c0_52 = arith.constant 0 : index
    %c1_53 = arith.constant 1 : index
    %c2_54 = arith.constant 2 : index
    %c0_55 = arith.constant 0 : index
    %43 = vector.load %arg1[%c0_52, %c1_53, %c2_54, %c0_55] : memref<1x18x18x128xbf16, #tpu.memory_space<vmem>>, vector<1x16x16x128xbf16>
    %44 = vector.shape_cast %43 : vector<1x16x16x128xbf16> to vector<16x16x128xbf16>
    %45 = vector.shape_cast %44 : vector<16x16x128xbf16> to vector<256x128xbf16>
    %c5 = arith.constant 5 : index
    %c0_56 = arith.constant 0 : index
    %c0_57 = arith.constant 0 : index
    %46 = vector.load %arg2[%c5, %c0_56, %c0_57] : memref<9x128x128xbf16, #tpu.memory_space<vmem>>, vector<1x128x128xbf16>
    %47 = vector.shape_cast %46 : vector<1x128x128xbf16> to vector<128x128xbf16>
    %cst_58 = arith.constant dense<0.000000e+00> : vector<256x128xf32>
    %48 = tpu.matmul %45, %47, %cst_58 {dimension_numbers = #tpu.dot_dimension_numbers<[1], [0], [0], [1], [0, 0, 1, 1], [], []>} : vector<256x128xbf16>, vector<128x128xbf16>, vector<256x128xf32> -> vector<256x128xf32>
    %c0_59 = arith.constant 0 : index
    %c0_60 = arith.constant 0 : index
    %49 = vector.load %arg6[%c0_59, %c0_60] : memref<256x128xf32, #tpu.memory_space<vmem>>, vector<256x128xf32>
    %50 = arith.addf %49, %48 : vector<256x128xf32>
    %c0_61 = arith.constant 0 : index
    %c0_62 = arith.constant 0 : index
    %51 = vector.load %arg6[%c0_61, %c0_62] : memref<256x128xf32, #tpu.memory_space<vmem>>, vector<256x128xf32>
    tpu.vector_store %arg6[%c0_61, %c0_62], %50 {strides = array<i32>} : memref<256x128xf32, #tpu.memory_space<vmem>>, vector<256x128xf32>,
    %c0_63 = arith.constant 0 : index
    %c2_64 = arith.constant 2 : index
    %c0_65 = arith.constant 0 : index
    %c0_66 = arith.constant 0 : index
    %52 = vector.load %arg1[%c0_63, %c2_64, %c0_65, %c0_66] : memref<1x18x18x128xbf16, #tpu.memory_space<vmem>>, vector<1x16x16x128xbf16>
    %53 = vector.shape_cast %52 : vector<1x16x16x128xbf16> to vector<16x16x128xbf16>
    %54 = vector.shape_cast %53 : vector<16x16x128xbf16> to vector<256x128xbf16>
    %c6 = arith.constant 6 : index
    %c0_67 = arith.constant 0 : index
    %c0_68 = arith.constant 0 : index
    %55 = vector.load %arg2[%c6, %c0_67, %c0_68] : memref<9x128x128xbf16, #tpu.memory_space<vmem>>, vector<1x128x128xbf16>
    %56 = vector.shape_cast %55 : vector<1x128x128xbf16> to vector<128x128xbf16>
    %cst_69 = arith.constant dense<0.000000e+00> : vector<256x128xf32>
    %57 = tpu.matmul %54, %56, %cst_69 {dimension_numbers = #tpu.dot_dimension_numbers<[1], [0], [0], [1], [0, 0, 1, 1], [], []>} : vector<256x128xbf16>, vector<128x128xbf16>, vector<256x128xf32> -> vector<256x128xf32>
    %c0_70 = arith.constant 0 : index
    %c0_71 = arith.constant 0 : index
    %58 = vector.load %arg6[%c0_70, %c0_71] : memref<256x128xf32, #tpu.memory_space<vmem>>, vector<256x128xf32>
    %59 = arith.addf %58, %57 : vector<256x128xf32>
    %c0_72 = arith.constant 0 : index
    %c0_73 = arith.constant 0 : index
    %60 = vector.load %arg6[%c0_72, %c0_73] : memref<256x128xf32, #tpu.memory_space<vmem>>, vector<256x128xf32>
    tpu.vector_store %arg6[%c0_72, %c0_73], %59 {strides = array<i32>} : memref<256x128xf32, #tpu.memory_space<vmem>>, vector<256x128xf32>,
    %c0_74 = arith.constant 0 : index
    %c2_75 = arith.constant 2 : index
    %c1_76 = arith.constant 1 : index
    %c0_77 = arith.constant 0 : index
    %61 = vector.load %arg1[%c0_74, %c2_75, %c1_76, %c0_77] : memref<1x18x18x128xbf16, #tpu.memory_space<vmem>>, vector<1x16x16x128xbf16>
    %62 = vector.shape_cast %61 : vector<1x16x16x128xbf16> to vector<16x16x128xbf16>
    %63 = vector.shape_cast %62 : vector<16x16x128xbf16> to vector<256x128xbf16>
    %c7 = arith.constant 7 : index
    %c0_78 = arith.constant 0 : index
    %c0_79 = arith.constant 0 : index
    %64 = vector.load %arg2[%c7, %c0_78, %c0_79] : memref<9x128x128xbf16, #tpu.memory_space<vmem>>, vector<1x128x128xbf16>
    %65 = vector.shape_cast %64 : vector<1x128x128xbf16> to vector<128x128xbf16>
    %cst_80 = arith.constant dense<0.000000e+00> : vector<256x128xf32>
    %66 = tpu.matmul %63, %65, %cst_80 {dimension_numbers = #tpu.dot_dimension_numbers<[1], [0], [0], [1], [0, 0, 1, 1], [], []>} : vector<256x128xbf16>, vector<128x128xbf16>, vector<256x128xf32> -> vector<256x128xf32>
    %c0_81 = arith.constant 0 : index
    %c0_82 = arith.constant 0 : index
    %67 = vector.load %arg6[%c0_81, %c0_82] : memref<256x128xf32, #tpu.memory_space<vmem>>, vector<256x128xf32>
    %68 = arith.addf %67, %66 : vector<256x128xf32>
    %c0_83 = arith.constant 0 : index
    %c0_84 = arith.constant 0 : index
    %69 = vector.load %arg6[%c0_83, %c0_84] : memref<256x128xf32, #tpu.memory_space<vmem>>, vector<256x128xf32>
    tpu.vector_store %arg6[%c0_83, %c0_84], %68 {strides = array<i32>} : memref<256x128xf32, #tpu.memory_space<vmem>>, vector<256x128xf32>,
    %c0_85 = arith.constant 0 : index
    %c2_86 = arith.constant 2 : index
    %c2_87 = arith.constant 2 : index
    %c0_88 = arith.constant 0 : index
    %70 = vector.load %arg1[%c0_85, %c2_86, %c2_87, %c0_88] : memref<1x18x18x128xbf16, #tpu.memory_space<vmem>>, vector<1x16x16x128xbf16>
    %71 = vector.shape_cast %70 : vector<1x16x16x128xbf16> to vector<16x16x128xbf16>
    %72 = vector.shape_cast %71 : vector<16x16x128xbf16> to vector<256x128xbf16>
    %c8 = arith.constant 8 : index
    %c0_89 = arith.constant 0 : index
    %c0_90 = arith.constant 0 : index
    %73 = vector.load %arg2[%c8, %c0_89, %c0_90] : memref<9x128x128xbf16, #tpu.memory_space<vmem>>, vector<1x128x128xbf16>
    %74 = vector.shape_cast %73 : vector<1x128x128xbf16> to vector<128x128xbf16>
    %cst_91 = arith.constant dense<0.000000e+00> : vector<256x128xf32>
    %75 = tpu.matmul %72, %74, %cst_91 {dimension_numbers = #tpu.dot_dimension_numbers<[1], [0], [0], [1], [0, 0, 1, 1], [], []>} : vector<256x128xbf16>, vector<128x128xbf16>, vector<256x128xf32> -> vector<256x128xf32>
    %c0_92 = arith.constant 0 : index
    %c0_93 = arith.constant 0 : index
    %76 = vector.load %arg6[%c0_92, %c0_93] : memref<256x128xf32, #tpu.memory_space<vmem>>, vector<256x128xf32>
    %77 = arith.addf %76, %75 : vector<256x128xf32>
    %c0_94 = arith.constant 0 : index
    %c0_95 = arith.constant 0 : index
    %78 = vector.load %arg6[%c0_94, %c0_95] : memref<256x128xf32, #tpu.memory_space<vmem>>, vector<256x128xf32>
    tpu.vector_store %arg6[%c0_94, %c0_95], %77 {strides = array<i32>} : memref<256x128xf32, #tpu.memory_space<vmem>>, vector<256x128xf32>,
    %c0_96 = arith.constant 0 : index
    %c0_97 = arith.constant 0 : index
    %79 = vector.load %arg6[%c0_96, %c0_97] : memref<256x128xf32, #tpu.memory_space<vmem>>, vector<256x128xf32>
    %c0_98 = arith.constant 0 : index
    %c0_99 = arith.constant 0 : index
    %80 = vector.load %arg3[%c0_98, %c0_99] : memref<1x128xf32, #tpu.memory_space<vmem>>, vector<1x128xf32>
    %81 = vector.broadcast %80 : vector<1x128xf32> to vector<256x128xf32>
    %82 = arith.addf %79, %81 : vector<256x128xf32>
    %83 = arith.truncf %82 : vector<256x128xf32> to vector<256x128xbf16>
    %c0_100 = arith.constant 0 : index
    %c0_101 = arith.constant 0 : index
    %84 = vector.load %arg4[%c0_100, %c0_101] : memref<256x128xbf16, #tpu.memory_space<vmem>>, vector<256x128xbf16>
    tpu.vector_store %arg4[%c0_100, %c0_101], %83 {strides = array<i32>} : memref<256x128xbf16, #tpu.memory_space<vmem>>, vector<256x128xbf16>,
    %c64_i32 = arith.constant 64 : i32
    %85 = tpu.dynamic_rotate %82 by %c64_i32 dim 1 : vector<256x128xf32>, i32 -> vector<256x128xf32>
    %cst_102 = arith.constant dense<0.000000e+00> : vector<128xf32>
    %86 = vector.multi_reduction <add>, %82, %cst_102 [0] : vector<256x128xf32> to vector<128xf32>
    %87 = vector.shape_cast %86 : vector<128xf32> to vector<1x128xf32>
    %88 = arith.mulf %82, %82 : vector<256x128xf32>
    %cst_103 = arith.constant dense<0.000000e+00> : vector<128xf32>
    %89 = vector.multi_reduction <add>, %88, %cst_103 [0] : vector<256x128xf32> to vector<128xf32>
    %90 = vector.shape_cast %89 : vector<128xf32> to vector<1x128xf32>
    %91 = arith.mulf %82, %85 : vector<256x128xf32>
    %cst_104 = arith.constant dense<0.000000e+00> : vector<128xf32>
    %92 = vector.multi_reduction <add>, %91, %cst_104 [0] : vector<256x128xf32> to vector<128xf32>
    %93 = vector.shape_cast %92 : vector<128xf32> to vector<1x128xf32>
    %cst_105 = arith.constant 0.000000e+00 : f32
    %94 = vector.broadcast %cst_105 : f32 to vector<5x128xf32>
    %95 = tpu.concatenate %87, %90, %93, %94 in 0 : vector<1x128xf32>, vector<1x128xf32>, vector<1x128xf32>, vector<5x128xf32> -> vector<8x128xf32>
    %c0_106 = arith.constant 0 : index
    %c0_107 = arith.constant 0 : index
    %c0_108 = arith.constant 0 : index
    %96 = vector.load %arg5[%c0_106, %c0_107, %c0_108] : memref<1x8x128xf32, #tpu.memory_space<vmem>>, vector<1x8x128xf32>
    %97 = vector.shape_cast %96 : vector<1x8x128xf32> to vector<8x128xf32>
    %98 = vector.shape_cast %95 : vector<8x128xf32> to vector<1x8x128xf32>
    tpu.vector_store %arg5[%c0_106, %c0_107, %c0_108], %98 {strides = array<i32>} : memref<1x8x128xf32, #tpu.memory_space<vmem>>, vector<1x8x128xf32>,
    return
  }
  func.func @transform_0(%arg0: i32) -> (i32, i32, i32, i32) {
    %c0_i32 = arith.constant 0 : i32
    %c0_i32_0 = arith.constant 0 : i32
    %c0_i32_1 = arith.constant 0 : i32
    %c0_i32_2 = arith.constant 0 : i32
    return %arg0, %c0_i32, %c0_i32_0, %c0_i32_1 : i32, i32, i32, i32
  }
  func.func @transform_1(%arg0: i32) -> (i32, i32, i32) {
    %c0_i32 = arith.constant 0 : i32
    %c0_i32_0 = arith.constant 0 : i32
    %c0_i32_1 = arith.constant 0 : i32
    %c0_i32_2 = arith.constant 0 : i32
    return %c0_i32, %c0_i32_0, %c0_i32_1 : i32, i32, i32
  }
  func.func @transform_2(%arg0: i32) -> (i32, i32) {
    %c0_i32 = arith.constant 0 : i32
    %c0_i32_0 = arith.constant 0 : i32
    %c0_i32_1 = arith.constant 0 : i32
    return %c0_i32, %c0_i32_0 : i32, i32
  }
  func.func @transform_3(%arg0: i32) -> (i32, i32) {
    %c0_i32 = arith.constant 0 : i32
    %c0_i32_0 = arith.constant 0 : i32
    return %arg0, %c0_i32 : i32, i32
  }
  func.func @transform_4(%arg0: i32) -> (i32, i32, i32) {
    %c0_i32 = arith.constant 0 : i32
    %c0_i32_0 = arith.constant 0 : i32
    %c0_i32_1 = arith.constant 0 : i32
    return %arg0, %c0_i32, %c0_i32_0 : i32, i32, i32
  }
}

</mosaic_0001>

<bundles_post_ra>
// kernel: complex_double_conv_forward.5
= control target key start
LH: loop header
LB: loop body
LE: loop exit
PB: predicated region body
PF: predicated region fallthrough
CT: control target
= control target key end

     0   :  { %s1239_s19 = smov 64   ;;  %s2139_s0 = inlined_call_operand.vmem [shape: bf16[512,128], index: 0, kind: input, shape index: {}]   ;;  %s2140_s1 = inlined_call_operand.vmem [shape: f32[8,128], index: 1, kind: input, shape index: {}]   ;;  %s2141_s2 = inlined_call_operand.vmem [shape: bf16[512,128], index: 2, kind: output, shape index: {}]  }
   0x1   :  { %v1258_v0 = vld [vmem:[%s2139_s0 + $0x10] sm:$0xff]   ;;  %v1265_v3 = vld [vmem:[%s2139_s0] sm:$0xff]   ;;  %v1272_v6 = vld [vmem:[%s2139_s0 + $0x18] sm:$0xff]  }
   0x2   :  { %v735_v1 = vunpack.c.l.bf16 %v1258_v0  ;;  %v736_v2 = vunpack.c.h.bf16 %v1258_v0  ;;  %v727_v4 = vunpack.c.l.bf16 %v1265_v3  ;;  %v728_v5 = vunpack.c.h.bf16 %v1265_v3  ;;  %v1281_v8 = vld [vmem:[%s2139_s0 + $0x8] sm:$0xff]   ;;  %v1290_v10 = vld [vmem:[%s2139_s0 + $0x20] sm:$0xff]   ;;  %v1316_v20 = vld [vmem:[%s2139_s0 + $0x38] sm:$0xff]  }
   0x3   :  { %v739_v11 = vunpack.c.l.bf16 %v1272_v6  ;;  %v740_v12 = vunpack.c.h.bf16 %v1272_v6  ;;  %v731_v13 = vunpack.c.l.bf16 %v1281_v8  ;;  %v732_v14 = vunpack.c.h.bf16 %v1281_v8  ;;  %v1307_v18 = vld [vmem:[%s2139_s0 + $0x28] sm:$0xff]   ;;  %v1325_v22 = vld [vmem:[%s2139_s0 + $0x30] sm:$0xff]   ;;  %v1347_v31 = vld [vmem:[%s2139_s0 + $0x40] sm:$0xff]  }
   0x4   :  { %v1086_v7 = vpack.i.bf16 %v736_v2, %v735_v1  ;;  %v1076_v9 = vpack.i.bf16 %v728_v5, %v727_v4  ;;  %v743_v15 = vunpack.c.l.bf16 %v1290_v10  ;;  %v744_v16 = vunpack.c.h.bf16 %v1290_v10  ;;  %v1356_v33 = vld [vmem:[%s2139_s0 + $0x50] sm:$0xff]   ;;  %v1361_v34 = vld [vmem:[%s2139_s0 + $0x48] sm:$0xff]   ;;  %v1383_v43 = vld [vmem:[%s2139_s0 + $0x58] sm:$0xff]  }
   0x5   :  { %v1091_v17 = vpack.i.bf16 %v740_v12, %v739_v11  ;;  %v1081_v19 = vpack.i.bf16 %v732_v14, %v731_v13  ;;  %v747_v23 = vunpack.c.l.bf16 %v1307_v18  ;;  %v748_v24 = vunpack.c.h.bf16 %v1307_v18  ;;  %v1392_v45 = vld [vmem:[%s2139_s0 + $0x68] sm:$0xff]   ;;  %v1397_v46 = vld [vmem:[%s2139_s0 + $0x60] sm:$0xff]   ;;  %v1419_v55 = vld [vmem:[%s2139_s0 + $0x70] sm:$0xff]  }
   0x6   :  { %1087 = vrot.lane.b32.xlu1 %v1086_v7, %s1239_s19  ;;  %1077 = vrot.lane.b32.xlu0 %v1076_v9, %s1239_s19  ;;  %v1096_v21 = vpack.i.bf16 %v744_v16, %v743_v15  ;;  %v755_v25 = vunpack.c.l.bf16 %v1316_v20  ;;  %v756_v26 = vunpack.c.h.bf16 %v1316_v20  ;;  %v751_v27 = vunpack.c.l.bf16 %v1325_v22  ;;  %v1428_v57 = vld [vmem:[%s2139_s0 + $0x80] sm:$0xff]   ;;  %v1433_v58 = vld [vmem:[%s2139_s0 + $0x78] sm:$0xff]  }
   0x7   :  { %v752_v28 = vunpack.c.h.bf16 %v1325_v22  ;;  %v1101_v29 = vpack.i.bf16 %v748_v24, %v747_v23  ;;  %v2189_v35 = vunpack.c.l.bf16 %v1347_v31  ;;  %v2188_v36 = vunpack.c.h.bf16 %v1347_v31 }
   0x8   :  { %1097 = vrot.lane.b32.xlu2 %v1096_v21, %s1239_s19  ;;  %v1111_v30 = vpack.i.bf16 %v756_v26, %v755_v25  ;;  %v2187_v37 = vunpack.c.l.bf16 %v1356_v33  ;;  %v2186_v38 = vunpack.c.h.bf16 %v1356_v33  ;;  %v2185_v39 = vunpack.c.l.bf16 %v1361_v34 }
   0x9   :  { %v1106_v32 = vpack.i.bf16 %v752_v28, %v751_v27  ;;  %v2184_v40 = vunpack.c.h.bf16 %v1361_v34  ;;  %v1116_v41 = vpack.i.bf16 %v2188_v36, %v2189_v35  ;;  %v2177_v47 = vunpack.c.l.bf16 %v1383_v43 }
   0xa   :  { %v1126_v42 = vpack.i.bf16 %v2186_v38, %v2187_v37  ;;  %v2176_v48 = vunpack.c.h.bf16 %v1383_v43  ;;  %v2169_v49 = vunpack.c.l.bf16 %v1392_v45  ;;  %v2168_v50 = vunpack.c.h.bf16 %v1392_v45 }
   0xb   :  { %v1121_v44 = vpack.i.bf16 %v2184_v40, %v2185_v39  ;;  %v2167_v51 = vunpack.c.l.bf16 %v1397_v46  ;;  %v2160_v52 = vunpack.c.h.bf16 %v1397_v46  ;;  %v2159_v59 = vunpack.c.l.bf16 %v1419_v55 }
   0xc   :  { %v1131_v53 = vpack.i.bf16 %v2176_v48, %v2177_v47  ;;  %v1141_v54 = vpack.i.bf16 %v2168_v50, %v2169_v49  ;;  %v2158_v60 = vunpack.c.h.bf16 %v1419_v55  ;;  %v2151_v61 = vunpack.c.l.bf16 %v1428_v57  ;;  %v1599_v50 = vld [vmem:[%s2139_s0 + $0xe8] sm:$0xff]   ;;  %v1608_v49 = vld [vmem:[%s2139_s0 + $0xf8] sm:$0xff]  }
   0xd   :  { %v1136_v56 = vpack.i.bf16 %v2160_v52, %v2167_v51  ;;  %v2150_v62 = vunpack.c.h.bf16 %v1428_v57  ;;  %v2149_v63 = vunpack.c.l.bf16 %v1433_v58  ;;  %v2142_v7 = vunpack.c.h.bf16 %v1433_v58  ;;  %v1572_v52 = vld [vmem:[%s2139_s0 + $0xe0] sm:$0xff]  }
   0xe   :  { %1092 = vrot.lane.b32.xlu1 %v1091_v17, %s1239_s19  ;;  %1082 = vrot.lane.b32.xlu0 %v1081_v19, %s1239_s19  ;;  %v1146_v9 = vpack.i.bf16 %v2158_v60, %v2159_v59  ;;  %v1455_v19 = vld [vmem:[%s2139_s0 + $0x88] sm:$0xff]   ;;  %v1563_v59 = vld [vmem:[%s2139_s0 + $0xd0] sm:$0xff]  }
   0xf   :  { %v1156_v17 = vpack.i.bf16 %v2150_v62, %v2151_v61  ;;  %v1151_v21 = vpack.i.bf16 %v2142_v7, %v2149_v63  ;;  %v1500_v7 = vld [vmem:[%s2139_s0 + $0xb0] sm:$0xff]   ;;  %v1527_v62 = vld [vmem:[%s2139_s0 + $0xb8] sm:$0xff]   ;;  %v1536_v61 = vld [vmem:[%s2139_s0 + $0xc8] sm:$0xff]  }
  0x10   :  { %1102 = vrot.lane.b32.xlu2 %v1101_v29, %s1239_s19  ;;  %v1464_v29 = vld [vmem:[%s2139_s0 + $0x98] sm:$0xff]  }
  0x16   :  { %1112 = vrot.lane.b32.xlu1 %v1111_v30, %s1239_s19  ;;  %1107 = vrot.lane.b32.xlu0 %v1106_v32, %s1239_s19  ;;  %v1469_v30 = vld [vmem:[%s2139_s0 + $0x90] sm:$0xff]   ;;  %v2148_v32 = vunpack.c.l.bf16 %v1455_v19 }
  0x18   :  { %1117 = vrot.lane.b32.xlu2 %v1116_v41, %s1239_s19  ;;  %v2143_v41 = vunpack.c.h.bf16 %v1455_v19 }
  0x1e   :  { %1127 = vrot.lane.b32.xlu1 %v1126_v42, %s1239_s19  ;;  %1122 = vrot.lane.b32.xlu0 %v1121_v44, %s1239_s19  ;;  %v2145_v42 = vunpack.c.l.bf16 %v1464_v29  ;;  %v2144_v44 = vunpack.c.h.bf16 %v1464_v29 }
  0x20   :  { %1132 = vrot.lane.b32.xlu2 %v1131_v53, %s1239_s19  ;;  %v2147_v53 = vunpack.c.l.bf16 %v1469_v30 }
  0x26   :  { %1142 = vrot.lane.b32.xlu1 %v1141_v54, %s1239_s19  ;;  %1137 = vrot.lane.b32.xlu0 %v1136_v56, %s1239_s19  ;;  %v2146_v54 = vunpack.c.h.bf16 %v1469_v30  ;;  %v1161_v56 = vpack.i.bf16 %v2143_v41, %v2148_v32  ;;  %v1505_v41 = vld [vmem:[%s2139_s0 + $0xa8] sm:$0xff]  }
  0x27   :  { %v2156_v32 = vunpack.c.l.bf16 %v1505_v41  ;;  %v2155_v63 = vunpack.c.h.bf16 %v1505_v41 }
  0x28   :  { %1147 = vrot.lane.b32.xlu2 %v1146_v9, %s1239_s19  ;;  %v1171_v9 = vpack.i.bf16 %v2144_v44, %v2145_v42 }
  0x2e   :  { %1157 = vrot.lane.b32.xlu1 %v1156_v17, %s1239_s19  ;;  %1152 = vrot.lane.b32.xlu0 %v1151_v21, %s1239_s19  ;;  %v1491_v17 = vld [vmem:[%s2139_s0 + $0xa0] sm:$0xff]   ;;  %v1166_v21 = vpack.i.bf16 %v2146_v54, %v2147_v53  ;;  %v2154_v54 = vunpack.c.l.bf16 %v1500_v7  ;;  %v2153_v53 = vunpack.c.h.bf16 %v1500_v7 }
  0x2f   :  { %v2157_v44 = vunpack.c.l.bf16 %v1491_v17  ;;  %v2152_v42 = vunpack.c.h.bf16 %v1491_v17 }
  0x30   :  { %1162 = vrot.lane.b32.xlu2 %v1161_v56, %s1239_s19 }
  0x31   :  { %v1176_v56 = vpack.i.bf16 %v2152_v42, %v2157_v44  ;;  %v1541_v42 = vld [vmem:[%s2139_s0 + $0xc0] sm:$0xff]  }
  0x32   :  { %v2165_v44 = vunpack.c.l.bf16 %v1541_v42  ;;  %v2164_v60 = vunpack.c.h.bf16 %v1541_v42 }
  0x36   :  { %1172 = vrot.lane.b32.xlu1 %v1171_v9, %s1239_s19  ;;  %1167 = vrot.lane.b32.xlu0 %v1166_v21, %s1239_s19  ;;  %v1186_v9 = vpack.i.bf16 %v2153_v53, %v2154_v54  ;;  %v1181_v21 = vpack.i.bf16 %v2155_v63, %v2156_v32  ;;  %v2166_v53 = vunpack.c.l.bf16 %v1527_v62  ;;  %v2161_v54 = vunpack.c.h.bf16 %v1527_v62 }
  0x37   :  { %v2163_v63 = vunpack.c.l.bf16 %v1536_v61  ;;  %v2162_v32 = vunpack.c.h.bf16 %v1536_v61 }
  0x38   :  { %1177 = vrot.lane.b32.xlu2 %v1176_v56, %s1239_s19  ;;  %v1191_v56 = vpack.i.bf16 %v2161_v54, %v2166_v53  ;;  %v1577_v54 = vld [vmem:[%s2139_s0 + $0xd8] sm:$0xff]  }
  0x39   :  { %v2174_v53 = vunpack.c.l.bf16 %v1577_v54  ;;  %v2173_v51 = vunpack.c.h.bf16 %v1577_v54 }
  0x3e   :  { %1187 = vrot.lane.b32.xlu1 %v1186_v9, %s1239_s19  ;;  %1182 = vrot.lane.b32.xlu0 %v1181_v21, %s1239_s19  ;;  %v1201_v9 = vpack.i.bf16 %v2162_v32, %v2163_v63  ;;  %v1196_v21 = vpack.i.bf16 %v2164_v60, %v2165_v44  ;;  %v2175_v32 = vunpack.c.l.bf16 %v1563_v59  ;;  %v2170_v63 = vunpack.c.h.bf16 %v1563_v59 }
  0x3f   :  { %v2172_v60 = vunpack.c.l.bf16 %v1572_v52  ;;  %v2171_v44 = vunpack.c.h.bf16 %v1572_v52 }
  0x40   :  { %1192 = vrot.lane.b32.xlu2 %v1191_v56, %s1239_s19  ;;  %v1206_v56 = vpack.i.bf16 %v2170_v63, %v2175_v32  ;;  %v1613_v63 = vld [vmem:[%s2139_s0 + $0xf0] sm:$0xff]  }
  0x41   :  { %v2181_v32 = vunpack.c.l.bf16 %v1613_v63  ;;  %v2180_v48 = vunpack.c.h.bf16 %v1613_v63 }
  0x43   :  { %v1226_v47 = vpack.i.bf16 %v2180_v48, %v2181_v32 }
  0x46   :  { %1202 = vrot.lane.b32.xlu1 %v1201_v9, %s1239_s19  ;;  %1197 = vrot.lane.b32.xlu0 %v1196_v21, %s1239_s19  ;;  %v1216_v9 = vpack.i.bf16 %v2171_v44, %v2172_v60  ;;  %v1211_v21 = vpack.i.bf16 %v2173_v51, %v2174_v53  ;;  %v2183_v44 = vunpack.c.l.bf16 %v1599_v50  ;;  %v2178_v60 = vunpack.c.h.bf16 %v1599_v50 }
  0x47   :  { %v2182_v51 = vunpack.c.l.bf16 %v1608_v49  ;;  %v2179_v53 = vunpack.c.h.bf16 %v1608_v49 }
  0x48   :  { %1207 = vrot.lane.b32.xlu2 %v1206_v56, %s1239_s19  ;;  %v1221_v56 = vpack.i.bf16 %v2178_v60, %v2183_v44  ;;  %v1660_v44 = vld [vmem:[%s2140_s1 + $0x2] ss:$0 sm:$0xff] }
  0x4e   :  { %1217 = vrot.lane.b32.xlu1 %v1216_v9, %s1239_s19  ;;  %1212 = vrot.lane.b32.xlu0 %v1211_v21, %s1239_s19  ;;  %v1231_v9 = vpack.i.bf16 %v2179_v53, %v2182_v51  ;;  %v1642_v21 = vld [vmem:[%s2140_s1] ss:$0 sm:$0xff] }
  0x4f   :  { %v278_v53 = vmul.f32 %v1642_v21, %v744_v16  ;;  %v277_v48 = vmul.f32 %v1642_v21, %v743_v15  ;;  %v279_v39 = vmul.f32 %v1642_v21, %v747_v23  ;;  %v273_v18 = vmul.f32 %v1642_v21, %v735_v1 }
  0x50   :  { %1222 = vrot.lane.b32.xlu2 %v1221_v56, %s1239_s19  ;;  %v1653_v56 = vld [vmem:[%s2140_s1 + $0x1] ss:$0 sm:$0xff]  ;;  %v270_v23 = vmul.f32 %v1642_v21, %v728_v5  ;;  %v1695_v1 = vmul.f32 %v1642_v21, %v740_v12  ;;  %v1700_v3 = vmul.f32 %v1642_v21, %v731_v13  ;;  %v1710_v5 = vmul.f32 %v1642_v21, %v755_v25 }
  0x51   :  { %v1717_v12 = vmul.f32 %v1642_v21, %v756_v26  ;;  %v1722_v8 = vmul.f32 %v1642_v21, %v751_v27  ;;  %v1727_v13 = vmul.f32 %v1642_v21, %v752_v28 }
  0x56   :  { %1232 = vrot.lane.b32.xlu1 %v1231_v9, %s1239_s19  ;;  %1227 = vrot.lane.b32.xlu0 %v1226_v47, %s1239_s19 }
  0x62   :  { %v1098_v60 = vpop.permute.xlu2 %1097 }
  0x63   :  { %v1100_v47 = vunpack.i.h.bf16 %v1098_v60  ;;  %v1099_v9 = vunpack.i.l.bf16 %v1098_v60  ;;  %v280_v60 = vmul.f32 %v1642_v21, %v748_v24  ;;  %v269_v24 = vmul.f32 %v1642_v21, %v727_v4 }
  0x64   :  { %v1705_v4 = vmul.f32 %v1642_v21, %v732_v14  ;;  %v2190_v14 = vunpack.c.l.bf16 %v1347_v31 }
  0x65   :  { %v344_v32 = vmul.f32 %v1653_v56, %v1100_v47  ;;  %v343_v51 = vmul.f32 %v1653_v56, %v1099_v9 }
  0x66   :  { %v285_v25 = vmul.f32 %v1642_v21, %v2190_v14 }
  0x67   :  { %v408_v16 = vadd.f32 %v344_v32, %v278_v53  ;;  %v407_v10 = vadd.f32 %v343_v51, %v277_v48  ;;  %v274_v32 = vmul.f32 %v1642_v21, %v736_v2  ;;  %v1690_v2 = vmul.f32 %v1642_v21, %v739_v11 }
  0x69   :  { %v474_v15 = vadd.f32 %v1660_v44, %v408_v16  ;;  %v473_v40 = vadd.f32 %v1660_v44, %v407_v10 }
  0x6a   :  { %v1103_v47 = vpop.permute.xlu2 %1102 }
  0x6b   :  { %v538_v9 = vmax.f32 %v474_v15, 0.0  ;;  %v537_v38 = vmax.f32 %v473_v40, 0.0  ;;  %v1105_v37 = vunpack.i.h.bf16 %v1103_v47  ;;  %v1104_v36 = vunpack.i.l.bf16 %v1103_v47 }
  0x6c   :  { %v2193_v15 = vunpack.c.h.bf16 %v1356_v33 }
  0x6d   :  { %v876_v35 = vpack.c.bf16 %v538_v9, %v537_v38  ;;  %v346_v48 = vmul.f32 %v1653_v56, %v1105_v37  ;;  %v345_v51 = vmul.f32 %v1653_v56, %v1104_v36  ;;  %v2192_v37 = vunpack.c.l.bf16 %v1356_v33 }
  0x6e   :  { %v2195_v33 = vunpack.c.h.bf16 %v1361_v34 }
  0x6f   :  { %1047 = vst [vmem:[%s2141_s2 + $0x20] sm:$0xff] %v876_v35   ;;  %v410_v0 = vadd.f32 %v346_v48, %v280_v60  ;;  %v409_v36 = vadd.f32 %v345_v51, %v279_v39  ;;  %v2191_v35 = vunpack.c.h.bf16 %v1347_v31  ;;  %v1738_v38 = vmul.f32 %v1642_v21, %v2192_v37 }
  0x70   :  { %v1743_v31 = vmul.f32 %v1642_v21, %v2193_v15  ;;  %v2194_v60 = vunpack.c.l.bf16 %v1361_v34  ;;  %v1757_v14 = vmul.f32 %v1642_v21, %v2195_v33 }
  0x71   :  { %v476_v6 = vadd.f32 %v1660_v44, %v410_v0  ;;  %v475_v11 = vadd.f32 %v1660_v44, %v409_v36  ;;  %v286_v20 = vmul.f32 %v1642_v21, %v2191_v35 }
  0x72   :  { %v1118_v26 = vpop.permute.xlu2 %1117  ;;  %v1748_v47 = vmul.f32 %v1642_v21, %v2194_v60  ;;  %v2198_v60 = vunpack.c.l.bf16 %v1392_v45 }
  0x73   :  { %v540_v39 = vmax.f32 %v476_v6, 0.0  ;;  %v539_v22 = vmax.f32 %v475_v11, 0.0  ;;  %v1120_v40 = vunpack.i.h.bf16 %v1118_v26  ;;  %v1119_v28 = vunpack.i.l.bf16 %v1118_v26 }
  0x75   :  { %v881_v51 = vpack.c.bf16 %v540_v39, %v539_v22  ;;  %v352_v0 = vmul.f32 %v1653_v56, %v1120_v40  ;;  %v351_v11 = vmul.f32 %v1653_v56, %v1119_v28  ;;  %v2197_v28 = vunpack.c.h.bf16 %v1383_v43 }
  0x77   :  { %1048 = vst [vmem:[%s2141_s2 + $0x28] sm:$0xff] %v881_v51   ;;  %v416_v37 = vadd.f32 %v352_v0, %v286_v20  ;;  %v415_v34 = vadd.f32 %v351_v11, %v285_v25  ;;  %v1776_v20 = vmul.f32 %v1642_v21, %v2198_v60 }
  0x78   :  { %v1088_v27 = vpop.permute.xlu1 %1087  ;;  %v1078_v10 = vpop.permute.xlu0 %1077 }
  0x79   :  { %v1090_v53 = vunpack.i.h.bf16 %v1088_v27  ;;  %v1089_v16 = vunpack.i.l.bf16 %v1088_v27  ;;  %v1080_v9 = vunpack.i.h.bf16 %v1078_v10  ;;  %v1079_v48 = vunpack.i.l.bf16 %v1078_v10 }
  0x7a   :  { %v2196_v27 = vunpack.c.l.bf16 %v1383_v43  ;;  %v482_v15 = vadd.f32 %v1660_v44, %v416_v37  ;;  %v2199_v43 = vunpack.c.h.bf16 %v1392_v45 }
  0x7b   :  { %v340_v36 = vmul.f32 %v1653_v56, %v1090_v53  ;;  %v339_v6 = vmul.f32 %v1653_v56, %v1089_v16  ;;  %v336_v35 = vmul.f32 %v1653_v56, %v1080_v9  ;;  %v335_v26 = vmul.f32 %v1653_v56, %v1079_v48 }
  0x7c   :  { %v1767_v39 = vmul.f32 %v1642_v21, %v2196_v27  ;;  %v292_v53 = vmul.f32 %v1642_v21, %v2197_v28  ;;  %v1784_v25 = vmul.f32 %v1642_v21, %v2199_v43  ;;  %v546_v0 = vmax.f32 %v482_v15, 0.0 }
  0x7d   :  { %v404_v22 = vadd.f32 %v340_v36, %v274_v32  ;;  %v403_v40 = vadd.f32 %v339_v6, %v273_v18  ;;  %v400_v16 = vadd.f32 %v336_v35, %v270_v23  ;;  %v399_v10 = vadd.f32 %v335_v26, %v269_v24  ;;  %v1133_v18 = vpop.permute.xlu2 %1132 }
  0x7e   :  { %v481_v32 = vadd.f32 %v1660_v44, %v415_v34  ;;  %v1135_v36 = vunpack.i.h.bf16 %v1133_v18 }
  0x7f   :  { %v470_v9 = vadd.f32 %v1660_v44, %v404_v22  ;;  %v469_v48 = vadd.f32 %v1660_v44, %v403_v40  ;;  %v466_v23 = vadd.f32 %v1660_v44, %v400_v16  ;;  %v465_v24 = vadd.f32 %v1660_v44, %v399_v10 }
  0x80   :  { %v1093_v51 = vpop.permute.xlu1 %1092  ;;  %v1083_v26 = vpop.permute.xlu0 %1082  ;;  %v545_v16 = vmax.f32 %v481_v32, 0.0 }
  0x81   :  { %v534_v6 = vmax.f32 %v470_v9, 0.0  ;;  %v533_v11 = vmax.f32 %v469_v48, 0.0  ;;  %v1095_v33 = vunpack.i.h.bf16 %v1093_v51  ;;  %v1094_v35 = vunpack.i.l.bf16 %v1093_v51 }
  0x82   :  { %v530_v37 = vmax.f32 %v466_v23, 0.0  ;;  %v529_v27 = vmax.f32 %v465_v24, 0.0  ;;  %v1085_v22 = vunpack.i.h.bf16 %v1083_v26  ;;  %v1084_v40 = vunpack.i.l.bf16 %v1083_v26 }
  0x83   :  { %v866_v45 = vpack.c.bf16 %v534_v6, %v533_v11  ;;  %v342_v34 = vmul.f32 %v1653_v56, %v1095_v33  ;;  %v341_v28 = vmul.f32 %v1653_v56, %v1094_v35  ;;  %v358_v9 = vmul.f32 %v1653_v56, %v1135_v36 }
  0x84   :  { %v856_v60 = vpack.c.bf16 %v530_v37, %v529_v27  ;;  %v338_v10 = vmul.f32 %v1653_v56, %v1085_v22  ;;  %v337_v15 = vmul.f32 %v1653_v56, %v1084_v40  ;;  %v896_v23 = vpack.c.bf16 %v546_v0, %v545_v16 }
  0x85   :  { %1045 = vst [vmem:[%s2141_s2 + $0x10] sm:$0xff] %v866_v45   ;;  %v406_v48 = vadd.f32 %v342_v34, %v1695_v1  ;;  %v405_v43 = vadd.f32 %v341_v28, %v1690_v2  ;;  %v1134_v24 = vunpack.i.l.bf16 %v1133_v18  ;;  %v422_v6 = vadd.f32 %v358_v9, %v292_v53 }
  0x86   :  { %857 = vst [vmem:[%s2141_s2] sm:$0xff] %v856_v60   ;;  %v402_v32 = vadd.f32 %v338_v10, %v1705_v4  ;;  %v401_v51 = vadd.f32 %v337_v15, %v1700_v3  ;;  %v2200_v36 = vunpack.c.l.bf16 %v1397_v46  ;;  %v2201_v4 = vunpack.c.h.bf16 %v1397_v46  ;;  %v1148_v10 = vpop.permute.xlu2 %1147 }
  0x87   :  { %v472_v1 = vadd.f32 %v1660_v44, %v406_v48  ;;  %v471_v2 = vadd.f32 %v1660_v44, %v405_v43  ;;  %1051 = vst [vmem:[%s2141_s2 + $0x40] sm:$0xff] %v896_v23   ;;  %v357_v18 = vmul.f32 %v1653_v56, %v1134_v24  ;;  %v488_v35 = vadd.f32 %v1660_v44, %v422_v6 }
  0x88   :  { %v1806_v11 = vmul.f32 %v1642_v21, %v2200_v36  ;;  %v1817_v3 = vmul.f32 %v1642_v21, %v2201_v4  ;;  %v468_v53 = vadd.f32 %v1660_v44, %v402_v32  ;;  %v467_v0 = vadd.f32 %v1660_v44, %v401_v51  ;;  %v1113_v33 = vpop.permute.xlu1 %1112  ;;  %v1108_v34 = vpop.permute.xlu0 %1107 }
  0x89   :  { %v2202_v26 = vunpack.c.l.bf16 %v1419_v55  ;;  %v536_v27 = vmax.f32 %v472_v1, 0.0  ;;  %v535_v22 = vmax.f32 %v471_v2, 0.0  ;;  %v1115_v40 = vunpack.i.h.bf16 %v1113_v33 }
  0x8a   :  { %v1114_v45 = vunpack.i.l.bf16 %v1113_v33  ;;  %v532_v46 = vmax.f32 %v468_v53, 0.0  ;;  %v531_v28 = vmax.f32 %v467_v0, 0.0  ;;  %v1110_v16 = vunpack.i.h.bf16 %v1108_v34 }
  0x8b   :  { %v297_v37 = vmul.f32 %v1642_v21, %v2202_v26  ;;  %v1109_v60 = vunpack.i.l.bf16 %v1108_v34  ;;  %v871_v15 = vpack.c.bf16 %v536_v27, %v535_v22  ;;  %v350_v9 = vmul.f32 %v1653_v56, %v1115_v40 }
  0x8c   :  { %v349_v48 = vmul.f32 %v1653_v56, %v1114_v45  ;;  %v552_v43 = vmax.f32 %v488_v35, 0.0  ;;  %v861_v23 = vpack.c.bf16 %v532_v46, %v531_v28  ;;  %v348_v24 = vmul.f32 %v1653_v56, %v1110_v16 }
  0x8d   :  { %v347_v32 = vmul.f32 %v1653_v56, %v1109_v60  ;;  %v421_v51 = vadd.f32 %v357_v18, %v1767_v39  ;;  %1046 = vst [vmem:[%s2141_s2 + $0x18] sm:$0xff] %v871_v15   ;;  %v414_v6 = vadd.f32 %v350_v9, %v1717_v12  ;;  %v2203_v1 = vunpack.c.h.bf16 %v1419_v55 }
  0x8e   :  { %v413_v36 = vadd.f32 %v349_v48, %v1710_v5  ;;  %v1150_v4 = vunpack.i.h.bf16 %v1148_v10  ;;  %1044 = vst [vmem:[%s2141_s2 + $0x8] sm:$0xff] %v861_v23   ;;  %v412_v53 = vadd.f32 %v348_v24, %v1727_v13  ;;  %v1149_v0 = vunpack.i.l.bf16 %v1148_v10 }
  0x8f   :  { %v298_v2 = vmul.f32 %v1642_v21, %v2203_v1  ;;  %v411_v39 = vadd.f32 %v347_v32, %v1722_v8  ;;  %v487_v18 = vadd.f32 %v1660_v44, %v421_v51  ;;  %v480_v12 = vadd.f32 %v1660_v44, %v414_v6 }
  0x90   :  { %v479_v5 = vadd.f32 %v1660_v44, %v413_v36  ;;  %v364_v55 = vmul.f32 %v1653_v56, %v1150_v4  ;;  %v2204_v33 = vunpack.c.l.bf16 %v1428_v57  ;;  %v478_v26 = vadd.f32 %v1660_v44, %v412_v53  ;;  %v1128_v27 = vpop.permute.xlu1 %1127  ;;  %v1123_v28 = vpop.permute.xlu0 %1122 }
  0x91   :  { %v477_v13 = vadd.f32 %v1660_v44, %v411_v39  ;;  %v551_v8 = vmax.f32 %v487_v18, 0.0  ;;  %v363_v22 = vmul.f32 %v1653_v56, %v1149_v0  ;;  %v544_v40 = vmax.f32 %v480_v12, 0.0 }
  0x92   :  { %v1850_v35 = vmul.f32 %v1642_v21, %v2204_v33  ;;  %v543_v45 = vmax.f32 %v479_v5, 0.0  ;;  %v1130_v34 = vunpack.i.h.bf16 %v1128_v27  ;;  %v1129_v46 = vunpack.i.l.bf16 %v1128_v27 }
  0x93   :  { %v542_v16 = vmax.f32 %v478_v26, 0.0  ;;  %v541_v60 = vmax.f32 %v477_v13, 0.0  ;;  %v1125_v10 = vunpack.i.h.bf16 %v1123_v28  ;;  %v1124_v15 = vunpack.i.l.bf16 %v1123_v28 }
  0x94   :  { %v891_v9 = vpack.c.bf16 %v544_v40, %v543_v45  ;;  %v356_v48 = vmul.f32 %v1653_v56, %v1130_v34  ;;  %v355_v23 = vmul.f32 %v1653_v56, %v1129_v46  ;;  %v911_v24 = vpack.c.bf16 %v552_v43, %v551_v8 }
  0x95   :  { %v886_v32 = vpack.c.bf16 %v542_v16, %v541_v60  ;;  %v354_v51 = vmul.f32 %v1653_v56, %v1125_v10  ;;  %v353_v6 = vmul.f32 %v1653_v56, %v1124_v15  ;;  %v428_v36 = vadd.f32 %v364_v55, %v298_v2  ;;  %v1163_v60 = vpop.permute.xlu2 %1162 }
  0x96   :  { %1050 = vst [vmem:[%s2141_s2 + $0x38] sm:$0xff] %v891_v9   ;;  %v420_v1 = vadd.f32 %v356_v48, %v1743_v31  ;;  %v419_v4 = vadd.f32 %v355_v23, %v1738_v38  ;;  %v427_v53 = vadd.f32 %v363_v22, %v297_v37  ;;  %v2205_v39 = vunpack.c.h.bf16 %v1428_v57 }
  0x97   :  { %1049 = vst [vmem:[%s2141_s2 + $0x30] sm:$0xff] %v886_v32   ;;  %v418_v43 = vadd.f32 %v354_v51, %v1757_v14  ;;  %v417_v2 = vadd.f32 %v353_v6, %v1748_v47  ;;  %v494_v0 = vadd.f32 %v1660_v44, %v428_v36  ;;  %v2206_v31 = vunpack.c.l.bf16 %v1433_v58 }
  0x98   :  { %v1867_v18 = vmul.f32 %v1642_v21, %v2205_v39  ;;  %v486_v57 = vadd.f32 %v1660_v44, %v420_v1  ;;  %v485_v37 = vadd.f32 %v1660_v44, %v419_v4  ;;  %1054 = vst [vmem:[%s2141_s2 + $0x58] sm:$0xff] %v911_v24   ;;  %v493_v12 = vadd.f32 %v1660_v44, %v427_v53  ;;  %v1143_v33 = vpop.permute.xlu1 %1142  ;;  %v1138_v34 = vpop.permute.xlu0 %1137 }
  0x99   :  { %v1878_v38 = vmul.f32 %v1642_v21, %v2206_v31  ;;  %v2207_v14 = vunpack.c.h.bf16 %v1433_v58  ;;  %v484_v5 = vadd.f32 %v1660_v44, %v418_v43  ;;  %v483_v55 = vadd.f32 %v1660_v44, %v417_v2 }
  0x9a   :  { %v558_v26 = vmax.f32 %v494_v0, 0.0  ;;  %v2208_v13 = vunpack.c.l.bf16 %v1455_v19  ;;  %v550_v8 = vmax.f32 %v486_v57, 0.0  ;;  %v549_v22 = vmax.f32 %v485_v37, 0.0 }
  0x9b   :  { %v1889_v47 = vmul.f32 %v1642_v21, %v2207_v14  ;;  %v1145_v40 = vunpack.i.h.bf16 %v1143_v33  ;;  %v1144_v45 = vunpack.i.l.bf16 %v1143_v33  ;;  %v548_v46 = vmax.f32 %v484_v5, 0.0 }
  0x9c   :  { %v303_v27 = vmul.f32 %v1642_v21, %v2208_v13  ;;  %v547_v58 = vmax.f32 %v483_v55, 0.0  ;;  %v1140_v28 = vunpack.i.h.bf16 %v1138_v34  ;;  %v1139_v16 = vunpack.i.l.bf16 %v1138_v34 }
  0x9d   :  { %v906_v10 = vpack.c.bf16 %v550_v8, %v549_v22  ;;  %v362_v15 = vmul.f32 %v1653_v56, %v1145_v40  ;;  %v361_v9 = vmul.f32 %v1653_v56, %v1144_v45  ;;  %v557_v48 = vmax.f32 %v493_v12, 0.0 }
  0x9e   :  { %v901_v23 = vpack.c.bf16 %v548_v46, %v547_v58  ;;  %v360_v24 = vmul.f32 %v1653_v56, %v1140_v28  ;;  %v359_v32 = vmul.f32 %v1653_v56, %v1139_v16  ;;  %v2209_v51 = vunpack.c.h.bf16 %v1455_v19 }
  0x9f   :  { %1053 = vst [vmem:[%s2141_s2 + $0x50] sm:$0xff] %v906_v10   ;;  %v426_v36 = vadd.f32 %v362_v15, %v1784_v25  ;;  %v425_v1 = vadd.f32 %v361_v9, %v1776_v20  ;;  %v926_v4 = vpack.c.bf16 %v558_v26, %v557_v48  ;;  %v1165_v53 = vunpack.i.h.bf16 %v1163_v60 }
  0xa0   :  { %v304_v6 = vmul.f32 %v1642_v21, %v2209_v51  ;;  %1052 = vst [vmem:[%s2141_s2 + $0x48] sm:$0xff] %v901_v23   ;;  %v424_v39 = vadd.f32 %v360_v24, %v1817_v3  ;;  %v423_v19 = vadd.f32 %v359_v32, %v1806_v11  ;;  %v1164_v43 = vunpack.i.l.bf16 %v1163_v60  ;;  %v1158_v12 = vpop.permute.xlu1 %1157  ;;  %v1153_v22 = vpop.permute.xlu0 %1152 }
  0xa1   :  { %v2210_v2 = vunpack.c.l.bf16 %v1464_v29  ;;  %v492_v25 = vadd.f32 %v1660_v44, %v426_v36  ;;  %v491_v20 = vadd.f32 %v1660_v44, %v425_v1  ;;  %1057 = vst [vmem:[%s2141_s2 + $0x70] sm:$0xff] %v926_v4   ;;  %v370_v31 = vmul.f32 %v1653_v56, %v1165_v53 }
  0xa2   :  { %v2211_v3 = vunpack.c.h.bf16 %v1464_v29  ;;  %v490_v57 = vadd.f32 %v1660_v44, %v424_v39  ;;  %v489_v37 = vadd.f32 %v1660_v44, %v423_v19  ;;  %v369_v14 = vmul.f32 %v1653_v56, %v1164_v43 }
  0xa3   :  { %v1916_v0 = vmul.f32 %v1642_v21, %v2210_v2  ;;  %v2212_v5 = vunpack.c.l.bf16 %v1469_v30  ;;  %v556_v33 = vmax.f32 %v492_v25, 0.0  ;;  %v555_v26 = vmax.f32 %v491_v20, 0.0 }
  0xa4   :  { %v308_v11 = vmul.f32 %v1642_v21, %v2211_v3  ;;  %v1160_v13 = vunpack.i.h.bf16 %v1158_v12  ;;  %v1159_v8 = vunpack.i.l.bf16 %v1158_v12  ;;  %v554_v29 = vmax.f32 %v490_v57, 0.0 }
  0xa5   :  { %v1933_v55 = vmul.f32 %v1642_v21, %v2212_v5  ;;  %v553_v40 = vmax.f32 %v489_v37, 0.0  ;;  %v1155_v45 = vunpack.i.h.bf16 %v1153_v22  ;;  %v1154_v34 = vunpack.i.l.bf16 %v1153_v22 }
  0xa6   :  { %v921_v46 = vpack.c.bf16 %v556_v33, %v555_v26  ;;  %v368_v58 = vmul.f32 %v1653_v56, %v1160_v13  ;;  %v367_v28 = vmul.f32 %v1653_v56, %v1159_v8  ;;  %v434_v16 = vadd.f32 %v370_v31, %v304_v6  ;;  %v1178_v6 = vpop.permute.xlu2 %1177 }
  0xa7   :  { %v916_v60 = vpack.c.bf16 %v554_v29, %v553_v40  ;;  %v366_v10 = vmul.f32 %v1653_v56, %v1155_v45  ;;  %v365_v15 = vmul.f32 %v1653_v56, %v1154_v34  ;;  %v433_v9 = vadd.f32 %v369_v14, %v303_v27 }
  0xa8   :  { %1056 = vst [vmem:[%s2141_s2 + $0x68] sm:$0xff] %v921_v46   ;;  %v432_v48 = vadd.f32 %v368_v58, %v1867_v18  ;;  %v431_v23 = vadd.f32 %v367_v28, %v1850_v35  ;;  %v500_v24 = vadd.f32 %v1660_v44, %v434_v16  ;;  %v2213_v32 = vunpack.c.h.bf16 %v1469_v30  ;;  %v1173_v2 = vpop.permute.xlu1 %1172  ;;  %v1168_v37 = vpop.permute.xlu0 %1167 }
  0xa9   :  { %1055 = vst [vmem:[%s2141_s2 + $0x60] sm:$0xff] %v916_v60   ;;  %v430_v27 = vadd.f32 %v366_v10, %v1889_v47  ;;  %v429_v36 = vadd.f32 %v365_v15, %v1878_v38  ;;  %v499_v1 = vadd.f32 %v1660_v44, %v433_v9  ;;  %v2214_v18 = vunpack.c.l.bf16 %v1491_v17 }
  0xaa   :  { %v306_v51 = vmul.f32 %v1642_v21, %v2213_v32  ;;  %v498_v4 = vadd.f32 %v1660_v44, %v432_v48  ;;  %v497_v30 = vadd.f32 %v1660_v44, %v431_v23  ;;  %v564_v53 = vmax.f32 %v500_v24, 0.0 }
  0xab   :  { %v309_v35 = vmul.f32 %v1642_v21, %v2214_v18  ;;  %v2215_v39 = vunpack.c.h.bf16 %v1491_v17  ;;  %v496_v43 = vadd.f32 %v1660_v44, %v430_v27  ;;  %v495_v47 = vadd.f32 %v1660_v44, %v429_v36 }
  0xac   :  { %v563_v38 = vmax.f32 %v499_v1, 0.0  ;;  %v1180_v25 = vunpack.i.h.bf16 %v1178_v6  ;;  %v562_v20 = vmax.f32 %v498_v4, 0.0  ;;  %v561_v31 = vmax.f32 %v497_v30, 0.0 }
  0xad   :  { %v310_v19 = vmul.f32 %v1642_v21, %v2215_v39  ;;  %v1175_v3 = vunpack.i.h.bf16 %v1173_v2  ;;  %v1174_v57 = vunpack.i.l.bf16 %v1173_v2  ;;  %v560_v12 = vmax.f32 %v496_v43, 0.0 }
  0xae   :  { %v559_v14 = vmax.f32 %v495_v47, 0.0  ;;  %v941_v5 = vpack.c.bf16 %v564_v53, %v563_v38  ;;  %v1170_v33 = vunpack.i.h.bf16 %v1168_v37  ;;  %v936_v26 = vpack.c.bf16 %v562_v20, %v561_v31  ;;  %v1193_v20 = vpop.permute.xlu2 %1192 }
  0xaf   :  { %v374_v17 = vmul.f32 %v1653_v56, %v1175_v3  ;;  %v373_v13 = vmul.f32 %v1653_v56, %v1174_v57  ;;  %v1169_v8 = vunpack.i.l.bf16 %v1168_v37  ;;  %v376_v40 = vmul.f32 %v1653_v56, %v1180_v25 }
  0xb0   :  { %v931_v22 = vpack.c.bf16 %v560_v12, %v559_v14  ;;  %1060 = vst [vmem:[%s2141_s2 + $0x88] sm:$0xff] %v941_v5   ;;  %v372_v29 = vmul.f32 %v1653_v56, %v1170_v33  ;;  %v1179_v45 = vunpack.i.l.bf16 %v1178_v6  ;;  %v2216_v28 = vunpack.c.l.bf16 %v1500_v7  ;;  %v1188_v36 = vpop.permute.xlu1 %1187 }
  0xb1   :  { %1059 = vst [vmem:[%s2141_s2 + $0x80] sm:$0xff] %v936_v26   ;;  %v438_v34 = vadd.f32 %v374_v17, %v308_v11  ;;  %v437_v46 = vadd.f32 %v373_v13, %v1916_v0  ;;  %v371_v58 = vmul.f32 %v1653_v56, %v1169_v8  ;;  %v440_v10 = vadd.f32 %v376_v40, %v310_v19 }
  0xb2   :  { %v313_v16 = vmul.f32 %v1642_v21, %v2216_v28  ;;  %1058 = vst [vmem:[%s2141_s2 + $0x78] sm:$0xff] %v931_v22   ;;  %v436_v60 = vadd.f32 %v372_v29, %v306_v51  ;;  %v375_v15 = vmul.f32 %v1653_v56, %v1179_v45  ;;  %v2217_v9 = vunpack.c.h.bf16 %v1500_v7 }
  0xb3   :  { %v504_v0 = vadd.f32 %v1660_v44, %v438_v34  ;;  %v503_v48 = vadd.f32 %v1660_v44, %v437_v46  ;;  %v435_v23 = vadd.f32 %v371_v58, %v1933_v55  ;;  %v2218_v24 = vunpack.c.l.bf16 %v1505_v41  ;;  %v1183_v55 = vpop.permute.xlu0 %1182 }
  0xb4   :  { %v314_v11 = vmul.f32 %v1642_v21, %v2217_v9  ;;  %v502_v6 = vadd.f32 %v1660_v44, %v436_v60  ;;  %v506_v51 = vadd.f32 %v1660_v44, %v440_v10  ;;  %v439_v27 = vadd.f32 %v375_v15, %v309_v35 }
  0xb5   :  { %v311_v32 = vmul.f32 %v1642_v21, %v2218_v24  ;;  %v2219_v7 = vunpack.c.h.bf16 %v1505_v41  ;;  %v568_v18 = vmax.f32 %v504_v0, 0.0  ;;  %v567_v4 = vmax.f32 %v503_v48, 0.0 }
  0xb6   :  { %v501_v30 = vadd.f32 %v1660_v44, %v435_v23  ;;  %v1190_v53 = vunpack.i.h.bf16 %v1188_v36  ;;  %v566_v39 = vmax.f32 %v502_v6, 0.0  ;;  %v570_v19 = vmax.f32 %v506_v51, 0.0 }
  0xb7   :  { %v312_v1 = vmul.f32 %v1642_v21, %v2219_v7  ;;  %v505_v43 = vadd.f32 %v1660_v44, %v439_v27  ;;  %v1189_v47 = vunpack.i.l.bf16 %v1188_v36  ;;  %v951_v38 = vpack.c.bf16 %v568_v18, %v567_v4 }
  0xb8   :  { %v565_v2 = vmax.f32 %v501_v30, 0.0  ;;  %v380_v35 = vmul.f32 %v1653_v56, %v1190_v53  ;;  %v1185_v25 = vunpack.i.h.bf16 %v1183_v55  ;;  %v1184_v3 = vunpack.i.l.bf16 %v1183_v55  ;;  %v1203_v10 = vpop.permute.xlu1 %1202 }
  0xb9   :  { %v569_v41 = vmax.f32 %v505_v43, 0.0  ;;  %v379_v31 = vmul.f32 %v1653_v56, %v1189_v47  ;;  %v2220_v57 = vunpack.c.l.bf16 %v1527_v62  ;;  %1062 = vst [vmem:[%s2141_s2 + $0x98] sm:$0xff] %v951_v38   ;;  %v2221_v33 = vunpack.c.h.bf16 %v1527_v62  ;;  %v1208_v47 = vpop.permute.xlu2 %1207 }
  0xba   :  { %v946_v12 = vpack.c.bf16 %v566_v39, %v565_v2  ;;  %v444_v14 = vadd.f32 %v380_v35, %v314_v11  ;;  %v378_v5 = vmul.f32 %v1653_v56, %v1185_v25  ;;  %v377_v8 = vmul.f32 %v1653_v56, %v1184_v3 }
  0xbb   :  { %v315_v37 = vmul.f32 %v1642_v21, %v2220_v57  ;;  %v316_v26 = vmul.f32 %v1642_v21, %v2221_v33  ;;  %v956_v17 = vpack.c.bf16 %v570_v19, %v569_v41  ;;  %v443_v13 = vadd.f32 %v379_v31, %v313_v16  ;;  %v1198_v51 = vpop.permute.xlu0 %1197 }
  0xbc   :  { %v1195_v22 = vunpack.i.h.bf16 %v1193_v20  ;;  %1061 = vst [vmem:[%s2141_s2 + $0x90] sm:$0xff] %v946_v12   ;;  %v510_v29 = vadd.f32 %v1660_v44, %v444_v14  ;;  %v442_v40 = vadd.f32 %v378_v5, %v312_v1  ;;  %v1194_v45 = vunpack.i.l.bf16 %v1193_v20 }
  0xbd   :  { %v2222_v34 = vunpack.c.l.bf16 %v1536_v61  ;;  %1063 = vst [vmem:[%s2141_s2 + $0xa0] sm:$0xff] %v956_v17   ;;  %v509_v62 = vadd.f32 %v1660_v44, %v443_v13  ;;  %v441_v58 = vadd.f32 %v377_v8, %v311_v32  ;;  %v2223_v16 = vunpack.c.h.bf16 %v1536_v61 }
  0xbe   :  { %v382_v28 = vmul.f32 %v1653_v56, %v1195_v22  ;;  %v574_v15 = vmax.f32 %v510_v29, 0.0  ;;  %v508_v9 = vadd.f32 %v1660_v44, %v442_v40  ;;  %v381_v11 = vmul.f32 %v1653_v56, %v1194_v45 }
  0xbf   :  { %v319_v46 = vmul.f32 %v1642_v21, %v2222_v34  ;;  %v320_v60 = vmul.f32 %v1642_v21, %v2223_v16  ;;  %v1205_v0 = vunpack.i.h.bf16 %v1203_v10  ;;  %v573_v48 = vmax.f32 %v509_v62, 0.0 }
  0xc0   :  { %v507_v23 = vadd.f32 %v1660_v44, %v441_v58  ;;  %v446_v24 = vadd.f32 %v382_v28, %v316_v26  ;;  %v1204_v6 = vunpack.i.l.bf16 %v1203_v10  ;;  %v572_v32 = vmax.f32 %v508_v9, 0.0  ;;  %v1218_v33 = vpop.permute.xlu1 %1217 }
  0xc1   :  { %v445_v27 = vadd.f32 %v381_v11, %v315_v37  ;;  %v386_v36 = vmul.f32 %v1653_v56, %v1205_v0  ;;  %v2224_v61 = vunpack.c.l.bf16 %v1541_v42  ;;  %v966_v1 = vpack.c.bf16 %v574_v15, %v573_v48 }
  0xc2   :  { %v571_v18 = vmax.f32 %v507_v23, 0.0  ;;  %v512_v4 = vadd.f32 %v1660_v44, %v446_v24  ;;  %v385_v30 = vmul.f32 %v1653_v56, %v1204_v6  ;;  %v2225_v39 = vunpack.c.h.bf16 %v1541_v42 }
  0xc3   :  { %v317_v7 = vmul.f32 %v1642_v21, %v2224_v61  ;;  %v511_v53 = vadd.f32 %v1660_v44, %v445_v27  ;;  %v450_v55 = vadd.f32 %v386_v36, %v320_v60  ;;  %v1200_v43 = vunpack.i.h.bf16 %v1198_v51  ;;  %1065 = vst [vmem:[%s2141_s2 + $0xb0] sm:$0xff] %v966_v1   ;;  %v1213_v9 = vpop.permute.xlu0 %1212 }
  0xc4   :  { %v318_v19 = vmul.f32 %v1642_v21, %v2225_v39  ;;  %v961_v38 = vpack.c.bf16 %v572_v32, %v571_v18  ;;  %v576_v2 = vmax.f32 %v512_v4, 0.0  ;;  %v449_v35 = vadd.f32 %v385_v30, %v319_v46  ;;  %v1223_v18 = vpop.permute.xlu2 %1222 }
  0xc5   :  { %v1199_v25 = vunpack.i.l.bf16 %v1198_v51  ;;  %v575_v20 = vmax.f32 %v511_v53, 0.0  ;;  %v516_v41 = vadd.f32 %v1660_v44, %v450_v55  ;;  %v384_v31 = vmul.f32 %v1653_v56, %v1200_v43 }
  0xc6   :  { %v2226_v3 = vunpack.c.l.bf16 %v1563_v59  ;;  %1064 = vst [vmem:[%s2141_s2 + $0xa8] sm:$0xff] %v961_v38   ;;  %v515_v57 = vadd.f32 %v1660_v44, %v449_v35  ;;  %v2227_v12 = vunpack.c.h.bf16 %v1563_v59  ;;  %v1210_v5 = vunpack.i.h.bf16 %v1208_v47 }
  0xc7   :  { %v383_v37 = vmul.f32 %v1653_v56, %v1199_v25  ;;  %v971_v26 = vpack.c.bf16 %v576_v2, %v575_v20  ;;  %v580_v17 = vmax.f32 %v516_v41, 0.0  ;;  %v448_v13 = vadd.f32 %v384_v31, %v318_v19 }
  0xc8   :  { %v321_v42 = vmul.f32 %v1642_v21, %v2226_v3  ;;  %v322_v14 = vmul.f32 %v1642_v21, %v2227_v12  ;;  %v1209_v8 = vunpack.i.l.bf16 %v1208_v47  ;;  %v579_v22 = vmax.f32 %v515_v57, 0.0  ;;  %v1233_v41 = vpop.permute.xlu1 %1232 }
  0xc9   :  { %v447_v29 = vadd.f32 %v383_v37, %v317_v7  ;;  %v388_v40 = vmul.f32 %v1653_v56, %v1210_v5  ;;  %v2228_v45 = vunpack.c.l.bf16 %v1572_v52  ;;  %1066 = vst [vmem:[%s2141_s2 + $0xb8] sm:$0xff] %v971_v26   ;;  %v514_v59 = vadd.f32 %v1660_v44, %v448_v13 }
  0xca   :  { %v387_v46 = vmul.f32 %v1653_v56, %v1209_v8  ;;  %v2229_v62 = vunpack.c.h.bf16 %v1572_v52  ;;  %v1220_v28 = vunpack.i.h.bf16 %v1218_v33  ;;  %v981_v16 = vpack.c.bf16 %v580_v17, %v579_v22 }
  0xcb   :  { %v325_v34 = vmul.f32 %v1642_v21, %v2228_v45  ;;  %v513_v60 = vadd.f32 %v1660_v44, %v447_v29  ;;  %v452_v10 = vadd.f32 %v388_v40, %v322_v14  ;;  %v1219_v15 = vunpack.i.l.bf16 %v1218_v33 }
  0xcc   :  { %v326_v58 = vmul.f32 %v1642_v21, %v2229_v62  ;;  %v578_v11 = vmax.f32 %v514_v59, 0.0  ;;  %v451_v0 = vadd.f32 %v387_v46, %v321_v42  ;;  %v392_v48 = vmul.f32 %v1653_v56, %v1220_v28  ;;  %1068 = vst [vmem:[%s2141_s2 + $0xc8] sm:$0xff] %v981_v16  }
  0xcd   :  { %v2230_v23 = vunpack.c.l.bf16 %v1577_v54  ;;  %v577_v52 = vmax.f32 %v513_v60, 0.0  ;;  %v518_v6 = vadd.f32 %v1660_v44, %v452_v10  ;;  %v391_v51 = vmul.f32 %v1653_v56, %v1219_v15 }
  0xce   :  { %v2231_v32 = vunpack.c.h.bf16 %v1577_v54  ;;  %v517_v36 = vadd.f32 %v1660_v44, %v451_v0  ;;  %v456_v61 = vadd.f32 %v392_v48, %v326_v58  ;;  %v1215_v7 = vunpack.i.h.bf16 %v1213_v9 }
  0xcf   :  { %v323_v24 = vmul.f32 %v1642_v21, %v2230_v23  ;;  %v1214_v1 = vunpack.i.l.bf16 %v1213_v9  ;;  %v976_v4 = vpack.c.bf16 %v578_v11, %v577_v52  ;;  %v582_v30 = vmax.f32 %v518_v6, 0.0 }
  0xd0   :  { %v324_v27 = vmul.f32 %v1642_v21, %v2231_v32  ;;  %v455_v53 = vadd.f32 %v391_v51, %v325_v34  ;;  %v2232_v55 = vunpack.c.l.bf16 %v1599_v50  ;;  %v581_v19 = vmax.f32 %v517_v36, 0.0  ;;  %v1228_v34 = vpop.permute.xlu0 %1227 }
  0xd1   :  { %v522_v43 = vadd.f32 %v1660_v44, %v456_v61  ;;  %v390_v54 = vmul.f32 %v1653_v56, %v1215_v7  ;;  %v389_v47 = vmul.f32 %v1653_v56, %v1214_v1  ;;  %1067 = vst [vmem:[%s2141_s2 + $0xc0] sm:$0xff] %v976_v4   ;;  %v2233_v2 = vunpack.c.h.bf16 %v1599_v50 }
  0xd2   :  { %v327_v39 = vmul.f32 %v1642_v21, %v2232_v55  ;;  %v521_v38 = vadd.f32 %v1660_v44, %v455_v53  ;;  %v1225_v25 = vunpack.i.h.bf16 %v1223_v18  ;;  %v1224_v20 = vunpack.i.l.bf16 %v1223_v18 }
  0xd3   :  { %v328_v35 = vmul.f32 %v1642_v21, %v2233_v2  ;;  %v986_v31 = vpack.c.bf16 %v582_v30, %v581_v19  ;;  %v586_v3 = vmax.f32 %v522_v43, 0.0  ;;  %v454_v42 = vadd.f32 %v390_v54, %v324_v27 }
  0xd4   :  { %v453_v57 = vadd.f32 %v389_v47, %v323_v24  ;;  %v585_v37 = vmax.f32 %v521_v38, 0.0  ;;  %v394_v12 = vmul.f32 %v1653_v56, %v1225_v25  ;;  %v393_v14 = vmul.f32 %v1653_v56, %v1224_v20 }
  0xd5   :  { %v2234_v5 = vunpack.c.l.bf16 %v1608_v49  ;;  %1069 = vst [vmem:[%s2141_s2 + $0xd0] sm:$0xff] %v986_v31   ;;  %v520_v50 = vadd.f32 %v1660_v44, %v454_v42  ;;  %v2235_v17 = vunpack.c.h.bf16 %v1608_v49  ;;  %v1235_v8 = vunpack.i.h.bf16 %v1233_v41 }
  0xd6   :  { %v519_v26 = vadd.f32 %v1660_v44, %v453_v57  ;;  %v996_v22 = vpack.c.bf16 %v586_v3, %v585_v37  ;;  %v458_v29 = vadd.f32 %v394_v12, %v328_v35  ;;  %v457_v40 = vadd.f32 %v393_v14, %v327_v39 }
  0xd7   :  { %v331_v33 = vmul.f32 %v1642_v21, %v2234_v5  ;;  %v332_v13 = vmul.f32 %v1642_v21, %v2235_v17  ;;  %v1234_v45 = vunpack.i.l.bf16 %v1233_v41  ;;  %v584_v59 = vmax.f32 %v520_v50, 0.0 }
  0xd8   :  { %v583_v46 = vmax.f32 %v519_v26, 0.0  ;;  %v398_v62 = vmul.f32 %v1653_v56, %v1235_v8  ;;  %v2236_v58 = vunpack.c.l.bf16 %v1613_v63  ;;  %1071 = vst [vmem:[%s2141_s2 + $0xe0] sm:$0xff] %v996_v22   ;;  %v524_v49 = vadd.f32 %v1660_v44, %v458_v29 }
  0xd9   :  { %v523_v16 = vadd.f32 %v1660_v44, %v457_v40  ;;  %v397_v60 = vmul.f32 %v1653_v56, %v1234_v45  ;;  %v2237_v10 = vunpack.c.h.bf16 %v1613_v63  ;;  %v1230_v0 = vunpack.i.h.bf16 %v1228_v34 }
  0xda   :  { %v329_v28 = vmul.f32 %v1642_v21, %v2236_v58  ;;  %v991_v9 = vpack.c.bf16 %v584_v59, %v583_v46  ;;  %v462_v11 = vadd.f32 %v398_v62, %v332_v13  ;;  %v1229_v48 = vunpack.i.l.bf16 %v1228_v34 }
  0xdb   :  { %v330_v15 = vmul.f32 %v1642_v21, %v2237_v10  ;;  %v588_v23 = vmax.f32 %v524_v49, 0.0  ;;  %v587_v24 = vmax.f32 %v523_v16, 0.0  ;;  %v461_v52 = vadd.f32 %v397_v60, %v331_v33 }
  0xdc   :  { %1070 = vst [vmem:[%s2141_s2 + $0xd8] sm:$0xff] %v991_v9   ;;  %v528_v6 = vadd.f32 %v1660_v44, %v462_v11  ;;  %v396_v51 = vmul.f32 %v1653_v56, %v1230_v0  ;;  %v395_v32 = vmul.f32 %v1653_v56, %v1229_v48 }
  0xdd   :  { %v1001_v63 = vpack.c.bf16 %v588_v23, %v587_v24  ;;  %v527_v21 = vadd.f32 %v1660_v44, %v461_v52 }
  0xde   :  { %v592_v27 = vmax.f32 %v528_v6, 0.0  ;;  %v460_v36 = vadd.f32 %v396_v51, %v330_v15  ;;  %v459_v61 = vadd.f32 %v395_v32, %v329_v28 }
  0xdf   :  { %1072 = vst [vmem:[%s2141_s2 + $0xe8] sm:$0xff] %v1001_v63   ;;  %v591_v7 = vmax.f32 %v527_v21, 0.0 }
  0xe0   :  { %v526_v1 = vadd.f32 %v1660_v44, %v460_v36  ;;  %v525_v18 = vadd.f32 %v1660_v44, %v459_v61 }
  0xe1   :  { %v1011_v4 = vpack.c.bf16 %v592_v27, %v591_v7 }
  0xe2   :  { %v590_v30 = vmax.f32 %v526_v1, 0.0  ;;  %v589_v53 = vmax.f32 %v525_v18, 0.0 }
  0xe3   :  { %1074 = vst [vmem:[%s2141_s2 + $0xf8] sm:$0xff] %v1011_v4  }
  0xe4   :  { %v1006_v56 = vpack.c.bf16 %v590_v30, %v589_v53 }
  0xe6   :  { %1073 = vst [vmem:[%s2141_s2 + $0xf0] sm:$0xff] %v1006_v56  }

// kernel: complex_double_conv_forward.7
= control target key start
LH: loop header
LB: loop body
LE: loop exit
PB: predicated region body
PF: predicated region fallthrough
CT: control target
= control target key end

     0   :  { %s984_s19 = smov 64   ;;  %s2007_s0 = inlined_call_operand.vmem [shape: bf16[512,128], index: 0, kind: input, shape index: {}]   ;;  %s2008_s1 = inlined_call_operand.vmem [shape: f32[8,128], index: 1, kind: input, shape index: {}]   ;;  %s2009_s2 = inlined_call_operand.vmem [shape: f32[512,128], index: 2, kind: output, shape index: {}]  }
   0x1   :  { %v1003_v0 = vld [vmem:[%s2007_s0 + $0x10] sm:$0xff]   ;;  %v1010_v3 = vld [vmem:[%s2007_s0] sm:$0xff]   ;;  %v1017_v6 = vld [vmem:[%s2007_s0 + $0x18] sm:$0xff]  }
   0x2   :  { %v671_v1 = vunpack.c.l.bf16 %v1003_v0  ;;  %v672_v2 = vunpack.c.h.bf16 %v1003_v0  ;;  %v663_v4 = vunpack.c.l.bf16 %v1010_v3  ;;  %v664_v5 = vunpack.c.h.bf16 %v1010_v3  ;;  %v1026_v8 = vld [vmem:[%s2007_s0 + $0x8] sm:$0xff]   ;;  %v1035_v10 = vld [vmem:[%s2007_s0 + $0x20] sm:$0xff]   ;;  %v1061_v20 = vld [vmem:[%s2007_s0 + $0x38] sm:$0xff]  }
   0x3   :  { %v675_v11 = vunpack.c.l.bf16 %v1017_v6  ;;  %v676_v12 = vunpack.c.h.bf16 %v1017_v6  ;;  %v667_v13 = vunpack.c.l.bf16 %v1026_v8  ;;  %v668_v14 = vunpack.c.h.bf16 %v1026_v8  ;;  %v1052_v18 = vld [vmem:[%s2007_s0 + $0x28] sm:$0xff]   ;;  %v1070_v22 = vld [vmem:[%s2007_s0 + $0x30] sm:$0xff]   ;;  %v1092_v31 = vld [vmem:[%s2007_s0 + $0x40] sm:$0xff]  }
   0x4   :  { %v831_v7 = vpack.i.bf16 %v672_v2, %v671_v1  ;;  %v821_v9 = vpack.i.bf16 %v664_v5, %v663_v4  ;;  %v679_v15 = vunpack.c.l.bf16 %v1035_v10  ;;  %v680_v16 = vunpack.c.h.bf16 %v1035_v10  ;;  %v1101_v33 = vld [vmem:[%s2007_s0 + $0x50] sm:$0xff]   ;;  %v1106_v34 = vld [vmem:[%s2007_s0 + $0x48] sm:$0xff]   ;;  %v1128_v43 = vld [vmem:[%s2007_s0 + $0x58] sm:$0xff]  }
   0x5   :  { %v836_v17 = vpack.i.bf16 %v676_v12, %v675_v11  ;;  %v826_v19 = vpack.i.bf16 %v668_v14, %v667_v13  ;;  %v683_v23 = vunpack.c.l.bf16 %v1052_v18  ;;  %v684_v24 = vunpack.c.h.bf16 %v1052_v18  ;;  %v1137_v45 = vld [vmem:[%s2007_s0 + $0x68] sm:$0xff]   ;;  %v1142_v46 = vld [vmem:[%s2007_s0 + $0x60] sm:$0xff]   ;;  %v1164_v55 = vld [vmem:[%s2007_s0 + $0x70] sm:$0xff]  }
   0x6   :  { %832 = vrot.lane.b32.xlu1 %v831_v7, %s984_s19  ;;  %822 = vrot.lane.b32.xlu0 %v821_v9, %s984_s19  ;;  %v841_v21 = vpack.i.bf16 %v680_v16, %v679_v15  ;;  %v691_v25 = vunpack.c.l.bf16 %v1061_v20  ;;  %v692_v26 = vunpack.c.h.bf16 %v1061_v20  ;;  %v687_v27 = vunpack.c.l.bf16 %v1070_v22  ;;  %v1173_v57 = vld [vmem:[%s2007_s0 + $0x80] sm:$0xff]   ;;  %v1178_v58 = vld [vmem:[%s2007_s0 + $0x78] sm:$0xff]  }
   0x7   :  { %v2056_v28 = vunpack.c.h.bf16 %v1070_v22  ;;  %v846_v29 = vpack.i.bf16 %v684_v24, %v683_v23  ;;  %v695_v35 = vunpack.c.l.bf16 %v1092_v31  ;;  %v696_v36 = vunpack.c.h.bf16 %v1092_v31 }
   0x8   :  { %842 = vrot.lane.b32.xlu2 %v841_v21, %s984_s19  ;;  %v856_v30 = vpack.i.bf16 %v692_v26, %v691_v25  ;;  %v2055_v37 = vunpack.c.l.bf16 %v1101_v33  ;;  %v2054_v38 = vunpack.c.h.bf16 %v1101_v33  ;;  %v2053_v39 = vunpack.c.l.bf16 %v1106_v34 }
   0x9   :  { %v851_v32 = vpack.i.bf16 %v2056_v28, %v687_v27  ;;  %v2052_v40 = vunpack.c.h.bf16 %v1106_v34  ;;  %v861_v41 = vpack.i.bf16 %v696_v36, %v695_v35  ;;  %v2045_v47 = vunpack.c.l.bf16 %v1128_v43 }
   0xa   :  { %v871_v42 = vpack.i.bf16 %v2054_v38, %v2055_v37  ;;  %v2044_v48 = vunpack.c.h.bf16 %v1128_v43  ;;  %v2037_v49 = vunpack.c.l.bf16 %v1137_v45  ;;  %v2036_v50 = vunpack.c.h.bf16 %v1137_v45 }
   0xb   :  { %v866_v44 = vpack.i.bf16 %v2052_v40, %v2053_v39  ;;  %v2035_v51 = vunpack.c.l.bf16 %v1142_v46  ;;  %v2028_v52 = vunpack.c.h.bf16 %v1142_v46  ;;  %v2027_v59 = vunpack.c.l.bf16 %v1164_v55 }
   0xc   :  { %v876_v53 = vpack.i.bf16 %v2044_v48, %v2045_v47  ;;  %v886_v54 = vpack.i.bf16 %v2036_v50, %v2037_v49  ;;  %v2026_v60 = vunpack.c.h.bf16 %v1164_v55  ;;  %v2019_v61 = vunpack.c.l.bf16 %v1173_v57  ;;  %v1344_v50 = vld [vmem:[%s2007_s0 + $0xe8] sm:$0xff]   ;;  %v1353_v49 = vld [vmem:[%s2007_s0 + $0xf8] sm:$0xff]  }
   0xd   :  { %v881_v56 = vpack.i.bf16 %v2028_v52, %v2035_v51  ;;  %v2018_v62 = vunpack.c.h.bf16 %v1173_v57  ;;  %v2017_v63 = vunpack.c.l.bf16 %v1178_v58  ;;  %v2010_v7 = vunpack.c.h.bf16 %v1178_v58  ;;  %v1317_v52 = vld [vmem:[%s2007_s0 + $0xe0] sm:$0xff]  }
   0xe   :  { %837 = vrot.lane.b32.xlu1 %v836_v17, %s984_s19  ;;  %827 = vrot.lane.b32.xlu0 %v826_v19, %s984_s19  ;;  %v891_v9 = vpack.i.bf16 %v2026_v60, %v2027_v59  ;;  %v1200_v19 = vld [vmem:[%s2007_s0 + $0x88] sm:$0xff]   ;;  %v1308_v59 = vld [vmem:[%s2007_s0 + $0xd0] sm:$0xff]  }
   0xf   :  { %v901_v17 = vpack.i.bf16 %v2018_v62, %v2019_v61  ;;  %v896_v21 = vpack.i.bf16 %v2010_v7, %v2017_v63  ;;  %v1245_v7 = vld [vmem:[%s2007_s0 + $0xb0] sm:$0xff]   ;;  %v1272_v62 = vld [vmem:[%s2007_s0 + $0xb8] sm:$0xff]   ;;  %v1281_v61 = vld [vmem:[%s2007_s0 + $0xc8] sm:$0xff]  }
  0x10   :  { %847 = vrot.lane.b32.xlu2 %v846_v29, %s984_s19  ;;  %v1209_v29 = vld [vmem:[%s2007_s0 + $0x98] sm:$0xff]  }
  0x16   :  { %857 = vrot.lane.b32.xlu1 %v856_v30, %s984_s19  ;;  %852 = vrot.lane.b32.xlu0 %v851_v32, %s984_s19  ;;  %v1214_v30 = vld [vmem:[%s2007_s0 + $0x90] sm:$0xff]   ;;  %v2016_v32 = vunpack.c.l.bf16 %v1200_v19 }
  0x18   :  { %862 = vrot.lane.b32.xlu2 %v861_v41, %s984_s19  ;;  %v2011_v41 = vunpack.c.h.bf16 %v1200_v19 }
  0x1e   :  { %872 = vrot.lane.b32.xlu1 %v871_v42, %s984_s19  ;;  %867 = vrot.lane.b32.xlu0 %v866_v44, %s984_s19  ;;  %v2013_v42 = vunpack.c.l.bf16 %v1209_v29  ;;  %v2012_v44 = vunpack.c.h.bf16 %v1209_v29 }
  0x20   :  { %877 = vrot.lane.b32.xlu2 %v876_v53, %s984_s19  ;;  %v2015_v53 = vunpack.c.l.bf16 %v1214_v30 }
  0x26   :  { %887 = vrot.lane.b32.xlu1 %v886_v54, %s984_s19  ;;  %882 = vrot.lane.b32.xlu0 %v881_v56, %s984_s19  ;;  %v2014_v54 = vunpack.c.h.bf16 %v1214_v30  ;;  %v906_v56 = vpack.i.bf16 %v2011_v41, %v2016_v32  ;;  %v1250_v41 = vld [vmem:[%s2007_s0 + $0xa8] sm:$0xff]  }
  0x27   :  { %v2024_v32 = vunpack.c.l.bf16 %v1250_v41  ;;  %v2023_v63 = vunpack.c.h.bf16 %v1250_v41 }
  0x28   :  { %892 = vrot.lane.b32.xlu2 %v891_v9, %s984_s19  ;;  %v916_v9 = vpack.i.bf16 %v2012_v44, %v2013_v42 }
  0x2e   :  { %902 = vrot.lane.b32.xlu1 %v901_v17, %s984_s19  ;;  %897 = vrot.lane.b32.xlu0 %v896_v21, %s984_s19  ;;  %v1236_v17 = vld [vmem:[%s2007_s0 + $0xa0] sm:$0xff]   ;;  %v911_v21 = vpack.i.bf16 %v2014_v54, %v2015_v53  ;;  %v2022_v54 = vunpack.c.l.bf16 %v1245_v7  ;;  %v2021_v53 = vunpack.c.h.bf16 %v1245_v7 }
  0x2f   :  { %v2025_v44 = vunpack.c.l.bf16 %v1236_v17  ;;  %v2020_v42 = vunpack.c.h.bf16 %v1236_v17 }
  0x30   :  { %907 = vrot.lane.b32.xlu2 %v906_v56, %s984_s19 }
  0x31   :  { %v921_v56 = vpack.i.bf16 %v2020_v42, %v2025_v44  ;;  %v1286_v42 = vld [vmem:[%s2007_s0 + $0xc0] sm:$0xff]  }
  0x32   :  { %v2033_v44 = vunpack.c.l.bf16 %v1286_v42  ;;  %v2032_v60 = vunpack.c.h.bf16 %v1286_v42 }
  0x36   :  { %917 = vrot.lane.b32.xlu1 %v916_v9, %s984_s19  ;;  %912 = vrot.lane.b32.xlu0 %v911_v21, %s984_s19  ;;  %v931_v9 = vpack.i.bf16 %v2021_v53, %v2022_v54  ;;  %v926_v21 = vpack.i.bf16 %v2023_v63, %v2024_v32  ;;  %v2034_v53 = vunpack.c.l.bf16 %v1272_v62  ;;  %v2029_v54 = vunpack.c.h.bf16 %v1272_v62 }
  0x37   :  { %v2031_v63 = vunpack.c.l.bf16 %v1281_v61  ;;  %v2030_v32 = vunpack.c.h.bf16 %v1281_v61 }
  0x38   :  { %922 = vrot.lane.b32.xlu2 %v921_v56, %s984_s19  ;;  %v936_v56 = vpack.i.bf16 %v2029_v54, %v2034_v53  ;;  %v1322_v54 = vld [vmem:[%s2007_s0 + $0xd8] sm:$0xff]  }
  0x39   :  { %v2042_v53 = vunpack.c.l.bf16 %v1322_v54  ;;  %v2041_v51 = vunpack.c.h.bf16 %v1322_v54 }
  0x3e   :  { %932 = vrot.lane.b32.xlu1 %v931_v9, %s984_s19  ;;  %927 = vrot.lane.b32.xlu0 %v926_v21, %s984_s19  ;;  %v946_v9 = vpack.i.bf16 %v2030_v32, %v2031_v63  ;;  %v941_v21 = vpack.i.bf16 %v2032_v60, %v2033_v44  ;;  %v2043_v32 = vunpack.c.l.bf16 %v1308_v59  ;;  %v2038_v63 = vunpack.c.h.bf16 %v1308_v59 }
  0x3f   :  { %v2040_v60 = vunpack.c.l.bf16 %v1317_v52  ;;  %v2039_v44 = vunpack.c.h.bf16 %v1317_v52 }
  0x40   :  { %937 = vrot.lane.b32.xlu2 %v936_v56, %s984_s19  ;;  %v951_v56 = vpack.i.bf16 %v2038_v63, %v2043_v32  ;;  %v1358_v63 = vld [vmem:[%s2007_s0 + $0xf0] sm:$0xff]  }
  0x41   :  { %v2049_v32 = vunpack.c.l.bf16 %v1358_v63  ;;  %v2048_v48 = vunpack.c.h.bf16 %v1358_v63 }
  0x43   :  { %v971_v47 = vpack.i.bf16 %v2048_v48, %v2049_v32 }
  0x46   :  { %947 = vrot.lane.b32.xlu1 %v946_v9, %s984_s19  ;;  %942 = vrot.lane.b32.xlu0 %v941_v21, %s984_s19  ;;  %v961_v9 = vpack.i.bf16 %v2039_v44, %v2040_v60  ;;  %v956_v21 = vpack.i.bf16 %v2041_v51, %v2042_v53  ;;  %v2051_v44 = vunpack.c.l.bf16 %v1344_v50  ;;  %v2046_v60 = vunpack.c.h.bf16 %v1344_v50 }
  0x47   :  { %v2050_v51 = vunpack.c.l.bf16 %v1353_v49  ;;  %v2047_v53 = vunpack.c.h.bf16 %v1353_v49 }
  0x48   :  { %952 = vrot.lane.b32.xlu2 %v951_v56, %s984_s19  ;;  %v966_v56 = vpack.i.bf16 %v2046_v60, %v2051_v44  ;;  %v1405_v44 = vld [vmem:[%s2008_s1 + $0x2] ss:$0 sm:$0xff] }
  0x4e   :  { %962 = vrot.lane.b32.xlu1 %v961_v9, %s984_s19  ;;  %957 = vrot.lane.b32.xlu0 %v956_v21, %s984_s19  ;;  %v976_v9 = vpack.i.bf16 %v2047_v53, %v2050_v51  ;;  %v1387_v21 = vld [vmem:[%s2008_s1] ss:$0 sm:$0xff] }
  0x4f   :  { %v278_v53 = vmul.f32 %v1387_v21, %v680_v16  ;;  %v277_v48 = vmul.f32 %v1387_v21, %v679_v15  ;;  %v279_v39 = vmul.f32 %v1387_v21, %v683_v23  ;;  %v274_v18 = vmul.f32 %v1387_v21, %v672_v2 }
  0x50   :  { %967 = vrot.lane.b32.xlu2 %v966_v56, %s984_s19  ;;  %v1398_v56 = vld [vmem:[%s2008_s1 + $0x1] ss:$0 sm:$0xff]  ;;  %v273_v23 = vmul.f32 %v1387_v21, %v671_v1  ;;  %v1443_v0 = vmul.f32 %v1387_v21, %v676_v12  ;;  %v1448_v1 = vmul.f32 %v1387_v21, %v667_v13  ;;  %v1453_v2 = vmul.f32 %v1387_v21, %v668_v14 }
  0x51   :  { %v1465_v6 = vmul.f32 %v1387_v21, %v692_v26  ;;  %v285_v8 = vmul.f32 %v1387_v21, %v695_v35  ;;  %v1476_v26 = vmul.f32 %v1387_v21, %v687_v27  ;;  %v2057_v35 = vunpack.c.h.bf16 %v1070_v22 }
  0x52   :  { %v2058_v22 = vunpack.c.l.bf16 %v1101_v33 }
  0x53   :  { %v1481_v31 = vmul.f32 %v1387_v21, %v2057_v35  ;;  %v2063_v35 = vunpack.c.h.bf16 %v1128_v43 }
  0x56   :  { %977 = vrot.lane.b32.xlu1 %v976_v9, %s984_s19  ;;  %972 = vrot.lane.b32.xlu0 %v971_v47, %s984_s19 }
  0x62   :  { %v843_v60 = vpop.permute.xlu2 %842 }
  0x63   :  { %v845_v47 = vunpack.i.h.bf16 %v843_v60  ;;  %v844_v9 = vunpack.i.l.bf16 %v843_v60  ;;  %v280_v60 = vmul.f32 %v1387_v21, %v684_v24 }
  0x65   :  { %v344_v32 = vmul.f32 %v1398_v56, %v845_v47  ;;  %v343_v51 = vmul.f32 %v1398_v56, %v844_v9 }
  0x67   :  { %v408_v16 = vadd.f32 %v344_v32, %v278_v53  ;;  %v407_v10 = vadd.f32 %v343_v51, %v277_v48 }
  0x69   :  { %v474_v15 = vadd.f32 %v1405_v44, %v408_v16  ;;  %v473_v40 = vadd.f32 %v1405_v44, %v407_v10 }
  0x6a   :  { %v848_v47 = vpop.permute.xlu2 %847 }
  0x6b   :  { %v538_v9 = vmax.f32 %v474_v15, 0.0  ;;  %v537_v38 = vmax.f32 %v473_v40, 0.0  ;;  %v850_v37 = vunpack.i.h.bf16 %v848_v47  ;;  %v849_v28 = vunpack.i.l.bf16 %v848_v47 }
  0x6d   :  { %602 = vst [vmem:[%s2009_s2 + $0x48] sm:$0xff] %v538_v9  ;;  %v346_v48 = vmul.f32 %v1398_v56, %v850_v37  ;;  %v345_v51 = vmul.f32 %v1398_v56, %v849_v28  ;;  %v270_v37 = vmul.f32 %v1387_v21, %v664_v5  ;;  %v269_v28 = vmul.f32 %v1387_v21, %v663_v4 }
  0x6e   :  { %601 = vst [vmem:[%s2009_s2 + $0x40] sm:$0xff] %v537_v38  ;;  %v1438_v38 = vmul.f32 %v1387_v21, %v675_v11  ;;  %v1460_v5 = vmul.f32 %v1387_v21, %v691_v25  ;;  %v286_v11 = vmul.f32 %v1387_v21, %v696_v36  ;;  %v1496_v9 = vmul.f32 %v1387_v21, %v2058_v22 }
  0x6f   :  { %v410_v24 = vadd.f32 %v346_v48, %v280_v60  ;;  %v409_v40 = vadd.f32 %v345_v51, %v279_v39  ;;  %v2059_v48 = vunpack.c.h.bf16 %v1101_v33 }
  0x71   :  { %v476_v3 = vadd.f32 %v1405_v44, %v410_v24  ;;  %v475_v4 = vadd.f32 %v1405_v44, %v409_v40  ;;  %v1501_v51 = vmul.f32 %v1387_v21, %v2059_v48 }
  0x72   :  { %v863_v12 = vpop.permute.xlu2 %862 }
  0x73   :  { %v540_v14 = vmax.f32 %v476_v3, 0.0  ;;  %v539_v39 = vmax.f32 %v475_v4, 0.0  ;;  %v865_v32 = vunpack.i.h.bf16 %v863_v12  ;;  %v864_v25 = vunpack.i.l.bf16 %v863_v12 }
  0x75   :  { %604 = vst [vmem:[%s2009_s2 + $0x58] sm:$0xff] %v540_v14  ;;  %v352_v15 = vmul.f32 %v1398_v56, %v865_v32  ;;  %v351_v60 = vmul.f32 %v1398_v56, %v864_v25  ;;  %v2060_v14 = vunpack.c.l.bf16 %v1106_v34  ;;  %v2061_v32 = vunpack.c.h.bf16 %v1106_v34 }
  0x76   :  { %603 = vst [vmem:[%s2009_s2 + $0x50] sm:$0xff] %v539_v39  ;;  %v292_v34 = vmul.f32 %v1387_v21, %v2063_v35 }
  0x77   :  { %v416_v3 = vadd.f32 %v352_v15, %v286_v11  ;;  %v415_v4 = vadd.f32 %v351_v60, %v285_v8  ;;  %v1508_v39 = vmul.f32 %v1387_v21, %v2060_v14  ;;  %v1513_v33 = vmul.f32 %v1387_v21, %v2061_v32 }
  0x78   :  { %v833_v13 = vpop.permute.xlu1 %832  ;;  %v823_v20 = vpop.permute.xlu0 %822 }
  0x79   :  { %v835_v53 = vunpack.i.h.bf16 %v833_v13  ;;  %v834_v16 = vunpack.i.l.bf16 %v833_v13  ;;  %v825_v36 = vunpack.i.h.bf16 %v823_v20  ;;  %v824_v10 = vunpack.i.l.bf16 %v823_v20 }
  0x7a   :  { %v481_v20 = vadd.f32 %v1405_v44, %v415_v4 }
  0x7b   :  { %v340_v47 = vmul.f32 %v1398_v56, %v835_v53  ;;  %v339_v27 = vmul.f32 %v1398_v56, %v834_v16  ;;  %v336_v24 = vmul.f32 %v1398_v56, %v825_v36  ;;  %v335_v40 = vmul.f32 %v1398_v56, %v824_v10  ;;  %v878_v36 = vpop.permute.xlu2 %877 }
  0x7c   :  { %v482_v16 = vadd.f32 %v1405_v44, %v416_v3  ;;  %v545_v60 = vmax.f32 %v481_v20, 0.0  ;;  %v880_v14 = vunpack.i.h.bf16 %v878_v36  ;;  %v879_v32 = vunpack.i.l.bf16 %v878_v36 }
  0x7d   :  { %v404_v12 = vadd.f32 %v340_v47, %v274_v18  ;;  %v403_v13 = vadd.f32 %v339_v27, %v273_v23  ;;  %v400_v25 = vadd.f32 %v336_v24, %v270_v37  ;;  %v399_v53 = vadd.f32 %v335_v40, %v269_v28 }
  0x7e   :  { %v2062_v23 = vunpack.c.l.bf16 %v1128_v43  ;;  %v546_v15 = vmax.f32 %v482_v16, 0.0  ;;  %v2064_v16 = vunpack.c.l.bf16 %v1137_v45  ;;  %v358_v36 = vmul.f32 %v1398_v56, %v880_v14  ;;  %609 = vst [vmem:[%s2009_s2 + $0x80] sm:$0xff] %v545_v60 }
  0x7f   :  { %v470_v8 = vadd.f32 %v1405_v44, %v404_v12  ;;  %v469_v18 = vadd.f32 %v1405_v44, %v403_v13  ;;  %v466_v37 = vadd.f32 %v1405_v44, %v400_v25  ;;  %v465_v28 = vadd.f32 %v1405_v44, %v399_v53 }
  0x80   :  { %v291_v11 = vmul.f32 %v1387_v21, %v2062_v23  ;;  %v838_v10 = vpop.permute.xlu1 %837  ;;  %v828_v24 = vpop.permute.xlu0 %827  ;;  %610 = vst [vmem:[%s2009_s2 + $0x88] sm:$0xff] %v546_v15  ;;  %v1543_v20 = vmul.f32 %v1387_v21, %v2064_v16 }
  0x81   :  { %v534_v47 = vmax.f32 %v470_v8, 0.0  ;;  %v533_v27 = vmax.f32 %v469_v18, 0.0  ;;  %v840_v22 = vunpack.i.h.bf16 %v838_v10  ;;  %v839_v48 = vunpack.i.l.bf16 %v838_v10 }
  0x82   :  { %v530_v40 = vmax.f32 %v466_v37, 0.0  ;;  %v529_v3 = vmax.f32 %v465_v28, 0.0  ;;  %v830_v4 = vunpack.i.h.bf16 %v828_v24  ;;  %v829_v12 = vunpack.i.l.bf16 %v828_v24 }
  0x83   :  { %598 = vst [vmem:[%s2009_s2 + $0x28] sm:$0xff] %v534_v47  ;;  %v342_v43 = vmul.f32 %v1398_v56, %v840_v22  ;;  %v341_v13 = vmul.f32 %v1398_v56, %v839_v48  ;;  %v2065_v8 = vunpack.c.h.bf16 %v1137_v45  ;;  %v357_v37 = vmul.f32 %v1398_v56, %v879_v32 }
  0x84   :  { %597 = vst [vmem:[%s2009_s2 + $0x20] sm:$0xff] %v533_v27  ;;  %v338_v25 = vmul.f32 %v1398_v56, %v830_v4  ;;  %v337_v53 = vmul.f32 %v1398_v56, %v829_v12  ;;  %v2066_v10 = vunpack.c.l.bf16 %v1142_v46 }
  0x85   :  { %v1548_v18 = vmul.f32 %v1387_v21, %v2065_v8  ;;  %594 = vst [vmem:[%s2009_s2 + $0x8] sm:$0xff] %v530_v40  ;;  %v406_v23 = vadd.f32 %v342_v43, %v1443_v0  ;;  %v405_v35 = vadd.f32 %v341_v13, %v1438_v38  ;;  %v2067_v0 = vunpack.c.h.bf16 %v1142_v46 }
  0x86   :  { %593 = vst [vmem:[%s2009_s2] sm:$0xff] %v529_v3  ;;  %v402_v45 = vadd.f32 %v338_v25, %v1453_v2  ;;  %v401_v28 = vadd.f32 %v337_v53, %v1448_v1  ;;  %v1565_v15 = vmul.f32 %v1387_v21, %v2066_v10  ;;  %v422_v2 = vadd.f32 %v358_v36, %v292_v34  ;;  %v893_v34 = vpop.permute.xlu2 %892 }
  0x87   :  { %v1570_v38 = vmul.f32 %v1387_v21, %v2067_v0  ;;  %v472_v47 = vadd.f32 %v1405_v44, %v406_v23  ;;  %v471_v27 = vadd.f32 %v1405_v44, %v405_v35  ;;  %v421_v1 = vadd.f32 %v357_v37, %v291_v11 }
  0x88   :  { %v468_v22 = vadd.f32 %v1405_v44, %v402_v45  ;;  %v467_v48 = vadd.f32 %v1405_v44, %v401_v28  ;;  %v858_v24 = vpop.permute.xlu1 %857  ;;  %v2068_v46 = vunpack.c.l.bf16 %v1164_v55  ;;  %v2069_v3 = vunpack.c.h.bf16 %v1164_v55  ;;  %v853_v60 = vpop.permute.xlu0 %852 }
  0x89   :  { %v536_v12 = vmax.f32 %v472_v47, 0.0  ;;  %v535_v43 = vmax.f32 %v471_v27, 0.0  ;;  %v860_v13 = vunpack.i.h.bf16 %v858_v24  ;;  %v859_v14 = vunpack.i.l.bf16 %v858_v24 }
  0x8a   :  { %v297_v40 = vmul.f32 %v1387_v21, %v2068_v46  ;;  %v298_v4 = vmul.f32 %v1387_v21, %v2069_v3  ;;  %v532_v11 = vmax.f32 %v468_v22, 0.0  ;;  %v531_v32 = vmax.f32 %v467_v48, 0.0 }
  0x8b   :  { %v855_v25 = vunpack.i.h.bf16 %v853_v60  ;;  %v854_v53 = vunpack.i.l.bf16 %v853_v60  ;;  %600 = vst [vmem:[%s2009_s2 + $0x38] sm:$0xff] %v536_v12  ;;  %v350_v16 = vmul.f32 %v1398_v56, %v860_v13  ;;  %v349_v55 = vmul.f32 %v1398_v56, %v859_v14 }
  0x8c   :  { %v488_v8 = vadd.f32 %v1405_v44, %v422_v2  ;;  %v487_v23 = vadd.f32 %v1405_v44, %v421_v1  ;;  %599 = vst [vmem:[%s2009_s2 + $0x30] sm:$0xff] %v535_v43  ;;  %v895_v37 = vunpack.i.h.bf16 %v893_v34  ;;  %v894_v45 = vunpack.i.l.bf16 %v893_v34 }
  0x8d   :  { %v348_v35 = vmul.f32 %v1398_v56, %v855_v25  ;;  %v347_v36 = vmul.f32 %v1398_v56, %v854_v53  ;;  %596 = vst [vmem:[%s2009_s2 + $0x18] sm:$0xff] %v532_v11  ;;  %v414_v28 = vadd.f32 %v350_v16, %v1465_v6  ;;  %v413_v10 = vadd.f32 %v349_v55, %v1460_v5 }
  0x8e   :  { %v552_v0 = vmax.f32 %v488_v8, 0.0  ;;  %v551_v47 = vmax.f32 %v487_v23, 0.0  ;;  %595 = vst [vmem:[%s2009_s2 + $0x10] sm:$0xff] %v531_v32  ;;  %v364_v1 = vmul.f32 %v1398_v56, %v895_v37  ;;  %v363_v22 = vmul.f32 %v1398_v56, %v894_v45  ;;  %v908_v23 = vpop.permute.xlu2 %907 }
  0x8f   :  { %v412_v27 = vadd.f32 %v348_v35, %v1481_v31  ;;  %v411_v2 = vadd.f32 %v347_v36, %v1476_v26  ;;  %v480_v48 = vadd.f32 %v1405_v44, %v414_v28  ;;  %v479_v6 = vadd.f32 %v1405_v44, %v413_v10 }
  0x90   :  { %616 = vst [vmem:[%s2009_s2 + $0xb8] sm:$0xff] %v552_v0  ;;  %v2070_v5 = vunpack.c.l.bf16 %v1173_v57  ;;  %v2071_v31 = vunpack.c.h.bf16 %v1173_v57  ;;  %v873_v12 = vpop.permute.xlu1 %872  ;;  %v428_v43 = vadd.f32 %v364_v1, %v298_v4  ;;  %v427_v13 = vadd.f32 %v363_v22, %v297_v40  ;;  %v868_v32 = vpop.permute.xlu0 %867 }
  0x91   :  { %v478_v46 = vadd.f32 %v1405_v44, %v412_v27  ;;  %v477_v3 = vadd.f32 %v1405_v44, %v411_v2  ;;  %615 = vst [vmem:[%s2009_s2 + $0xb0] sm:$0xff] %v551_v47  ;;  %v544_v14 = vmax.f32 %v480_v48, 0.0  ;;  %v543_v60 = vmax.f32 %v479_v6, 0.0 }
  0x92   :  { %v1617_v24 = vmul.f32 %v1387_v21, %v2070_v5  ;;  %v1622_v26 = vmul.f32 %v1387_v21, %v2071_v31  ;;  %v875_v34 = vunpack.i.h.bf16 %v873_v12  ;;  %v874_v11 = vunpack.i.l.bf16 %v873_v12 }
  0x93   :  { %v542_v57 = vmax.f32 %v478_v46, 0.0  ;;  %v541_v25 = vmax.f32 %v477_v3, 0.0  ;;  %v870_v53 = vunpack.i.h.bf16 %v868_v32  ;;  %v869_v16 = vunpack.i.l.bf16 %v868_v32  ;;  %608 = vst [vmem:[%s2009_s2 + $0x78] sm:$0xff] %v544_v14 }
  0x94   :  { %v356_v55 = vmul.f32 %v1398_v56, %v875_v34  ;;  %v355_v8 = vmul.f32 %v1398_v56, %v874_v11  ;;  %v494_v4 = vadd.f32 %v1405_v44, %v428_v43  ;;  %v493_v40 = vadd.f32 %v1405_v44, %v427_v13  ;;  %607 = vst [vmem:[%s2009_s2 + $0x70] sm:$0xff] %v543_v60 }
  0x95   :  { %v354_v35 = vmul.f32 %v1398_v56, %v870_v53  ;;  %v353_v36 = vmul.f32 %v1398_v56, %v869_v16  ;;  %v2072_v37 = vunpack.c.l.bf16 %v1178_v58  ;;  %v2073_v28 = vunpack.c.h.bf16 %v1178_v58  ;;  %606 = vst [vmem:[%s2009_s2 + $0x68] sm:$0xff] %v542_v57 }
  0x96   :  { %v420_v0 = vadd.f32 %v356_v55, %v1501_v51  ;;  %v419_v47 = vadd.f32 %v355_v8, %v1496_v9  ;;  %v558_v27 = vmax.f32 %v494_v4, 0.0  ;;  %v557_v2 = vmax.f32 %v493_v40, 0.0  ;;  %605 = vst [vmem:[%s2009_s2 + $0x60] sm:$0xff] %v541_v25 }
  0x97   :  { %v1644_v45 = vmul.f32 %v1387_v21, %v2072_v37  ;;  %v1649_v10 = vmul.f32 %v1387_v21, %v2073_v28  ;;  %v418_v1 = vadd.f32 %v354_v35, %v1513_v33  ;;  %v417_v58 = vadd.f32 %v353_v36, %v1508_v39 }
  0x98   :  { %v2074_v22 = vunpack.c.l.bf16 %v1200_v19  ;;  %v2075_v6 = vunpack.c.h.bf16 %v1200_v19  ;;  %v486_v9 = vadd.f32 %v1405_v44, %v420_v0  ;;  %v485_v5 = vadd.f32 %v1405_v44, %v419_v47  ;;  %622 = vst [vmem:[%s2009_s2 + $0xe8] sm:$0xff] %v558_v27  ;;  %v888_v3 = vpop.permute.xlu1 %887  ;;  %v883_v32 = vpop.permute.xlu0 %882 }
  0x99   :  { %v910_v31 = vunpack.i.h.bf16 %v908_v23  ;;  %v909_v33 = vunpack.i.l.bf16 %v908_v23  ;;  %v484_v39 = vadd.f32 %v1405_v44, %v418_v1  ;;  %v483_v46 = vadd.f32 %v1405_v44, %v417_v58  ;;  %621 = vst [vmem:[%s2009_s2 + $0xe0] sm:$0xff] %v557_v2  ;;  %v923_v1 = vpop.permute.xlu2 %922 }
  0x9a   :  { %v303_v48 = vmul.f32 %v1387_v21, %v2074_v22  ;;  %v304_v51 = vmul.f32 %v1387_v21, %v2075_v6  ;;  %v2076_v19 = vunpack.c.l.bf16 %v1209_v29  ;;  %v2077_v43 = vunpack.c.h.bf16 %v1209_v29 }
  0x9b   :  { %v550_v14 = vmax.f32 %v486_v9, 0.0  ;;  %v549_v60 = vmax.f32 %v485_v5, 0.0  ;;  %v890_v34 = vunpack.i.h.bf16 %v888_v3  ;;  %v889_v11 = vunpack.i.l.bf16 %v888_v3 }
  0x9c   :  { %v1680_v12 = vmul.f32 %v1387_v21, %v2076_v19  ;;  %v1685_v13 = vmul.f32 %v1387_v21, %v2077_v43  ;;  %v548_v57 = vmax.f32 %v484_v39, 0.0  ;;  %v547_v25 = vmax.f32 %v483_v46, 0.0 }
  0x9d   :  { %v885_v53 = vunpack.i.h.bf16 %v883_v32  ;;  %v884_v16 = vunpack.i.l.bf16 %v883_v32  ;;  %614 = vst [vmem:[%s2009_s2 + $0xa8] sm:$0xff] %v550_v14  ;;  %v362_v55 = vmul.f32 %v1398_v56, %v890_v34  ;;  %v361_v29 = vmul.f32 %v1398_v56, %v889_v11 }
  0x9e   :  { %v370_v8 = vmul.f32 %v1398_v56, %v910_v31  ;;  %v369_v4 = vmul.f32 %v1398_v56, %v909_v33  ;;  %613 = vst [vmem:[%s2009_s2 + $0xa0] sm:$0xff] %v549_v60  ;;  %v2078_v35 = vunpack.c.l.bf16 %v1214_v30  ;;  %v2079_v37 = vunpack.c.h.bf16 %v1214_v30 }
  0x9f   :  { %v360_v40 = vmul.f32 %v1398_v56, %v885_v53  ;;  %v359_v23 = vmul.f32 %v1398_v56, %v884_v16  ;;  %612 = vst [vmem:[%s2009_s2 + $0x98] sm:$0xff] %v548_v57  ;;  %v426_v0 = vadd.f32 %v362_v55, %v1548_v18  ;;  %v425_v47 = vadd.f32 %v361_v29, %v1543_v20 }
  0xa0   :  { %v1702_v36 = vmul.f32 %v1387_v21, %v2078_v35  ;;  %v1707_v28 = vmul.f32 %v1387_v21, %v2079_v37  ;;  %v434_v27 = vadd.f32 %v370_v8, %v304_v51  ;;  %v433_v2 = vadd.f32 %v369_v4, %v303_v48  ;;  %611 = vst [vmem:[%s2009_s2 + $0x90] sm:$0xff] %v547_v25  ;;  %v903_v31 = vpop.permute.xlu1 %902  ;;  %v898_v43 = vpop.permute.xlu0 %897 }
  0xa1   :  { %v424_v30 = vadd.f32 %v360_v40, %v1570_v38  ;;  %v423_v58 = vadd.f32 %v359_v23, %v1565_v15  ;;  %v2080_v22 = vunpack.c.l.bf16 %v1236_v17  ;;  %v2081_v9 = vunpack.c.h.bf16 %v1236_v17 }
  0xa2   :  { %v492_v20 = vadd.f32 %v1405_v44, %v426_v0  ;;  %v491_v48 = vadd.f32 %v1405_v44, %v425_v47  ;;  %v500_v51 = vadd.f32 %v1405_v44, %v434_v27  ;;  %v499_v5 = vadd.f32 %v1405_v44, %v433_v2 }
  0xa3   :  { %v309_v6 = vmul.f32 %v1387_v21, %v2080_v22  ;;  %v310_v18 = vmul.f32 %v1387_v21, %v2081_v9  ;;  %v490_v38 = vadd.f32 %v1405_v44, %v424_v30  ;;  %v489_v15 = vadd.f32 %v1405_v44, %v423_v58 }
  0xa4   :  { %v925_v33 = vunpack.i.h.bf16 %v923_v1  ;;  %v924_v39 = vunpack.i.l.bf16 %v923_v1  ;;  %v556_v46 = vmax.f32 %v492_v20, 0.0  ;;  %v555_v3 = vmax.f32 %v491_v48, 0.0 }
  0xa5   :  { %v905_v17 = vunpack.i.h.bf16 %v903_v31  ;;  %v904_v19 = vunpack.i.l.bf16 %v903_v31  ;;  %v554_v14 = vmax.f32 %v490_v38, 0.0  ;;  %v553_v60 = vmax.f32 %v489_v15, 0.0  ;;  %v938_v38 = vpop.permute.xlu2 %937 }
  0xa6   :  { %v900_v34 = vunpack.i.h.bf16 %v898_v43  ;;  %v899_v11 = vunpack.i.l.bf16 %v898_v43  ;;  %620 = vst [vmem:[%s2009_s2 + $0xd8] sm:$0xff] %v556_v46  ;;  %v564_v25 = vmax.f32 %v500_v51, 0.0  ;;  %v563_v53 = vmax.f32 %v499_v5, 0.0 }
  0xa7   :  { %v368_v32 = vmul.f32 %v1398_v56, %v905_v17  ;;  %v367_v57 = vmul.f32 %v1398_v56, %v904_v19  ;;  %619 = vst [vmem:[%s2009_s2 + $0xd0] sm:$0xff] %v555_v3  ;;  %v376_v29 = vmul.f32 %v1398_v56, %v925_v33  ;;  %v375_v8 = vmul.f32 %v1398_v56, %v924_v39 }
  0xa8   :  { %v366_v16 = vmul.f32 %v1398_v56, %v900_v34  ;;  %v365_v55 = vmul.f32 %v1398_v56, %v899_v11  ;;  %618 = vst [vmem:[%s2009_s2 + $0xc8] sm:$0xff] %v554_v14  ;;  %v2082_v23 = vunpack.c.l.bf16 %v1245_v7  ;;  %v2083_v37 = vunpack.c.h.bf16 %v1245_v7  ;;  %v913_v5 = vpop.permute.xlu0 %912 }
  0xa9   :  { %v432_v4 = vadd.f32 %v368_v32, %v1622_v26  ;;  %v431_v40 = vadd.f32 %v367_v57, %v1617_v24  ;;  %617 = vst [vmem:[%s2009_s2 + $0xc0] sm:$0xff] %v553_v60  ;;  %v440_v27 = vadd.f32 %v376_v29, %v310_v18  ;;  %v439_v24 = vadd.f32 %v375_v8, %v309_v6  ;;  %v918_v6 = vpop.permute.xlu1 %917 }
  0xaa   :  { %v1751_v35 = vmul.f32 %v1387_v21, %v2082_v23  ;;  %v1756_v0 = vmul.f32 %v1387_v21, %v2083_v37  ;;  %v430_v47 = vadd.f32 %v366_v16, %v1649_v10  ;;  %v429_v26 = vadd.f32 %v365_v55, %v1644_v45  ;;  %628 = vst [vmem:[%s2009_s2 + $0x118] sm:$0xff] %v564_v25 }
  0xab   :  { %v498_v2 = vadd.f32 %v1405_v44, %v432_v4  ;;  %v497_v1 = vadd.f32 %v1405_v44, %v431_v40  ;;  %v2084_v7 = vunpack.c.l.bf16 %v1250_v41  ;;  %v2085_v58 = vunpack.c.h.bf16 %v1250_v41  ;;  %627 = vst [vmem:[%s2009_s2 + $0x110] sm:$0xff] %v563_v53 }
  0xac   :  { %v496_v45 = vadd.f32 %v1405_v44, %v430_v47  ;;  %v495_v22 = vadd.f32 %v1405_v44, %v429_v26  ;;  %v506_v9 = vadd.f32 %v1405_v44, %v440_v27  ;;  %v505_v18 = vadd.f32 %v1405_v44, %v439_v24 }
  0xad   :  { %v1771_v30 = vmul.f32 %v1387_v21, %v2084_v7  ;;  %v1776_v10 = vmul.f32 %v1387_v21, %v2085_v58  ;;  %v562_v20 = vmax.f32 %v498_v2, 0.0  ;;  %v561_v48 = vmax.f32 %v497_v1, 0.0 }
  0xae   :  { %v920_v51 = vunpack.i.h.bf16 %v918_v6  ;;  %v919_v41 = vunpack.i.l.bf16 %v918_v6  ;;  %v560_v15 = vmax.f32 %v496_v45, 0.0  ;;  %v559_v31 = vmax.f32 %v495_v22, 0.0 }
  0xaf   :  { %v915_v33 = vunpack.i.h.bf16 %v913_v5  ;;  %v914_v39 = vunpack.i.l.bf16 %v913_v5  ;;  %626 = vst [vmem:[%s2009_s2 + $0x108] sm:$0xff] %v562_v20  ;;  %v570_v17 = vmax.f32 %v506_v9, 0.0  ;;  %v569_v19 = vmax.f32 %v505_v18, 0.0 }
  0xb0   :  { %v374_v46 = vmul.f32 %v1398_v56, %v920_v51  ;;  %v373_v3 = vmul.f32 %v1398_v56, %v919_v41  ;;  %625 = vst [vmem:[%s2009_s2 + $0x100] sm:$0xff] %v561_v48  ;;  %v2086_v60 = vunpack.c.l.bf16 %v1272_v62  ;;  %v2087_v11 = vunpack.c.h.bf16 %v1272_v62  ;;  %v928_v45 = vpop.permute.xlu0 %927  ;;  %v953_v41 = vpop.permute.xlu2 %952 }
  0xb1   :  { %v372_v43 = vmul.f32 %v1398_v56, %v915_v33  ;;  %v371_v14 = vmul.f32 %v1398_v56, %v914_v39  ;;  %624 = vst [vmem:[%s2009_s2 + $0xf8] sm:$0xff] %v560_v15  ;;  %v940_v53 = vunpack.i.h.bf16 %v938_v38  ;;  %v939_v16 = vunpack.i.l.bf16 %v938_v38 }
  0xb2   :  { %v315_v34 = vmul.f32 %v1387_v21, %v2086_v60  ;;  %v316_v32 = vmul.f32 %v1387_v21, %v2087_v11  ;;  %v438_v57 = vadd.f32 %v374_v46, %v1685_v13  ;;  %v437_v25 = vadd.f32 %v373_v3, %v1680_v12  ;;  %623 = vst [vmem:[%s2009_s2 + $0xf0] sm:$0xff] %v559_v31 }
  0xb3   :  { %v436_v55 = vadd.f32 %v372_v43, %v1707_v28  ;;  %v435_v62 = vadd.f32 %v371_v14, %v1702_v36  ;;  %v2088_v29 = vunpack.c.l.bf16 %v1281_v61  ;;  %v2089_v4 = vunpack.c.h.bf16 %v1281_v61  ;;  %634 = vst [vmem:[%s2009_s2 + $0x148] sm:$0xff] %v570_v17  ;;  %v933_v61 = vpop.permute.xlu1 %932 }
  0xb4   :  { %v504_v12 = vadd.f32 %v1405_v44, %v438_v57  ;;  %v503_v40 = vadd.f32 %v1405_v44, %v437_v25  ;;  %v382_v36 = vmul.f32 %v1398_v56, %v940_v53  ;;  %v381_v28 = vmul.f32 %v1398_v56, %v939_v16  ;;  %633 = vst [vmem:[%s2009_s2 + $0x140] sm:$0xff] %v569_v19 }
  0xb5   :  { %v1814_v8 = vmul.f32 %v1387_v21, %v2088_v29  ;;  %v1819_v13 = vmul.f32 %v1387_v21, %v2089_v4  ;;  %v502_v23 = vadd.f32 %v1405_v44, %v436_v55  ;;  %v501_v37 = vadd.f32 %v1405_v44, %v435_v62 }
  0xb6   :  { %v2090_v47 = vunpack.c.l.bf16 %v1286_v42  ;;  %v2091_v27 = vunpack.c.h.bf16 %v1286_v42  ;;  %v568_v2 = vmax.f32 %v504_v12, 0.0  ;;  %v567_v1 = vmax.f32 %v503_v40, 0.0 }
  0xb7   :  { %v935_v7 = vunpack.i.h.bf16 %v933_v61  ;;  %v934_v58 = vunpack.i.l.bf16 %v933_v61  ;;  %v566_v22 = vmax.f32 %v502_v23, 0.0  ;;  %v565_v6 = vmax.f32 %v501_v37, 0.0 }
  0xb8   :  { %v1836_v26 = vmul.f32 %v1387_v21, %v2090_v47  ;;  %v1841_v24 = vmul.f32 %v1387_v21, %v2091_v27  ;;  %v930_v9 = vunpack.i.h.bf16 %v928_v45  ;;  %v929_v18 = vunpack.i.l.bf16 %v928_v45  ;;  %632 = vst [vmem:[%s2009_s2 + $0x138] sm:$0xff] %v568_v2  ;;  %v943_v29 = vpop.permute.xlu0 %942 }
  0xb9   :  { %v380_v20 = vmul.f32 %v1398_v56, %v935_v7  ;;  %v379_v42 = vmul.f32 %v1398_v56, %v934_v58  ;;  %v446_v48 = vadd.f32 %v382_v36, %v316_v32  ;;  %v445_v51 = vadd.f32 %v381_v28, %v315_v34  ;;  %631 = vst [vmem:[%s2009_s2 + $0x130] sm:$0xff] %v567_v1 }
  0xba   :  { %v378_v5 = vmul.f32 %v1398_v56, %v930_v9  ;;  %v377_v38 = vmul.f32 %v1398_v56, %v929_v18  ;;  %v2092_v15 = vunpack.c.l.bf16 %v1308_v59  ;;  %v2093_v33 = vunpack.c.h.bf16 %v1308_v59  ;;  %630 = vst [vmem:[%s2009_s2 + $0x128] sm:$0xff] %v566_v22 }
  0xbb   :  { %v444_v46 = vadd.f32 %v380_v20, %v1756_v0  ;;  %v443_v3 = vadd.f32 %v379_v42, %v1751_v35  ;;  %v512_v17 = vadd.f32 %v1405_v44, %v446_v48  ;;  %v511_v19 = vadd.f32 %v1405_v44, %v445_v51  ;;  %629 = vst [vmem:[%s2009_s2 + $0x120] sm:$0xff] %v565_v6  ;;  %v948_v25 = vpop.permute.xlu1 %947 }
  0xbc   :  { %v321_v31 = vmul.f32 %v1387_v21, %v2092_v15  ;;  %v322_v39 = vmul.f32 %v1387_v21, %v2093_v33  ;;  %v442_v59 = vadd.f32 %v378_v5, %v1776_v10  ;;  %v441_v43 = vadd.f32 %v377_v38, %v1771_v30 }
  0xbd   :  { %v955_v14 = vunpack.i.h.bf16 %v953_v41  ;;  %v954_v60 = vunpack.i.l.bf16 %v953_v41  ;;  %v510_v34 = vadd.f32 %v1405_v44, %v444_v46  ;;  %v509_v0 = vadd.f32 %v1405_v44, %v443_v3 }
  0xbe   :  { %v576_v11 = vmax.f32 %v512_v17, 0.0  ;;  %v575_v35 = vmax.f32 %v511_v19, 0.0  ;;  %v508_v32 = vadd.f32 %v1405_v44, %v442_v59  ;;  %v507_v57 = vadd.f32 %v1405_v44, %v441_v43 }
  0xbf   :  { %v388_v53 = vmul.f32 %v1398_v56, %v955_v14  ;;  %v387_v16 = vmul.f32 %v1398_v56, %v954_v60  ;;  %v574_v10 = vmax.f32 %v510_v34, 0.0  ;;  %v573_v55 = vmax.f32 %v509_v0, 0.0 }
  0xc0   :  { %640 = vst [vmem:[%s2009_s2 + $0x178] sm:$0xff] %v576_v11  ;;  %v950_v30 = vunpack.i.h.bf16 %v948_v25  ;;  %v949_v62 = vunpack.i.l.bf16 %v948_v25  ;;  %v572_v4 = vmax.f32 %v508_v32, 0.0  ;;  %v571_v12 = vmax.f32 %v507_v57, 0.0  ;;  %v958_v59 = vpop.permute.xlu0 %957 }
  0xc1   :  { %639 = vst [vmem:[%s2009_s2 + $0x170] sm:$0xff] %v575_v35  ;;  %v945_v40 = vunpack.i.h.bf16 %v943_v29  ;;  %v944_v36 = vunpack.i.l.bf16 %v943_v29  ;;  %v452_v37 = vadd.f32 %v388_v53, %v322_v39  ;;  %v451_v61 = vadd.f32 %v387_v16, %v321_v31  ;;  %v968_v39 = vpop.permute.xlu2 %967 }
  0xc2   :  { %638 = vst [vmem:[%s2009_s2 + $0x168] sm:$0xff] %v574_v10  ;;  %v386_v28 = vmul.f32 %v1398_v56, %v950_v30  ;;  %v385_v23 = vmul.f32 %v1398_v56, %v949_v62  ;;  %v2094_v2 = vunpack.c.l.bf16 %v1317_v52  ;;  %v2095_v7 = vunpack.c.h.bf16 %v1317_v52 }
  0xc3   :  { %637 = vst [vmem:[%s2009_s2 + $0x160] sm:$0xff] %v573_v55  ;;  %v384_v47 = vmul.f32 %v1398_v56, %v945_v40  ;;  %v383_v27 = vmul.f32 %v1398_v56, %v944_v36  ;;  %v518_v6 = vadd.f32 %v1405_v44, %v452_v37  ;;  %v517_v9 = vadd.f32 %v1405_v44, %v451_v61  ;;  %v963_v15 = vpop.permute.xlu1 %962 }
  0xc4   :  { %v325_v1 = vmul.f32 %v1387_v21, %v2094_v2  ;;  %v326_v58 = vmul.f32 %v1387_v21, %v2095_v7  ;;  %636 = vst [vmem:[%s2009_s2 + $0x158] sm:$0xff] %v572_v4  ;;  %v450_v45 = vadd.f32 %v386_v28, %v1819_v13  ;;  %v449_v22 = vadd.f32 %v385_v23, %v1814_v8 }
  0xc5   :  { %635 = vst [vmem:[%s2009_s2 + $0x150] sm:$0xff] %v571_v12  ;;  %v448_v52 = vadd.f32 %v384_v47, %v1841_v24  ;;  %v447_v18 = vadd.f32 %v383_v27, %v1836_v26  ;;  %v2096_v20 = vunpack.c.l.bf16 %v1322_v54  ;;  %v2097_v13 = vunpack.c.h.bf16 %v1322_v54 }
  0xc6   :  { %v516_v48 = vadd.f32 %v1405_v44, %v450_v45  ;;  %v515_v51 = vadd.f32 %v1405_v44, %v449_v22  ;;  %v582_v41 = vmax.f32 %v518_v6, 0.0  ;;  %v581_v5 = vmax.f32 %v517_v9, 0.0 }
  0xc7   :  { %v323_v42 = vmul.f32 %v1387_v21, %v2096_v20  ;;  %v324_v8 = vmul.f32 %v1387_v21, %v2097_v13  ;;  %v514_v38 = vadd.f32 %v1405_v44, %v448_v52  ;;  %v513_v24 = vadd.f32 %v1405_v44, %v447_v18 }
  0xc8   :  { %v2098_v26 = vunpack.c.l.bf16 %v1344_v50  ;;  %v2099_v33 = vunpack.c.h.bf16 %v1344_v50  ;;  %v580_v46 = vmax.f32 %v516_v48, 0.0  ;;  %v579_v3 = vmax.f32 %v515_v51, 0.0  ;;  %646 = vst [vmem:[%s2009_s2 + $0x1a8] sm:$0xff] %v582_v41  ;;  %v973_v22 = vpop.permute.xlu0 %972 }
  0xc9   :  { %v965_v17 = vunpack.i.h.bf16 %v963_v15  ;;  %v964_v19 = vunpack.i.l.bf16 %v963_v15  ;;  %v578_v43 = vmax.f32 %v514_v38, 0.0  ;;  %v577_v14 = vmax.f32 %v513_v24, 0.0  ;;  %645 = vst [vmem:[%s2009_s2 + $0x1a0] sm:$0xff] %v581_v5 }
  0xca   :  { %v327_v31 = vmul.f32 %v1387_v21, %v2098_v26  ;;  %v328_v54 = vmul.f32 %v1387_v21, %v2099_v33  ;;  %v960_v60 = vunpack.i.h.bf16 %v958_v59  ;;  %v959_v50 = vunpack.i.l.bf16 %v958_v59  ;;  %644 = vst [vmem:[%s2009_s2 + $0x198] sm:$0xff] %v580_v46 }
  0xcb   :  { %v392_v34 = vmul.f32 %v1398_v56, %v965_v17  ;;  %v391_v0 = vmul.f32 %v1398_v56, %v964_v19  ;;  %v970_v11 = vunpack.i.h.bf16 %v968_v39  ;;  %v969_v35 = vunpack.i.l.bf16 %v968_v39  ;;  %643 = vst [vmem:[%s2009_s2 + $0x190] sm:$0xff] %v579_v3  ;;  %v978_v47 = vpop.permute.xlu1 %977 }
  0xcc   :  { %v390_v32 = vmul.f32 %v1398_v56, %v960_v60  ;;  %v389_v57 = vmul.f32 %v1398_v56, %v959_v50  ;;  %642 = vst [vmem:[%s2009_s2 + $0x188] sm:$0xff] %v578_v43  ;;  %v2100_v62 = vunpack.c.l.bf16 %v1353_v49  ;;  %v2101_v37 = vunpack.c.h.bf16 %v1353_v49 }
  0xcd   :  { %v456_v25 = vadd.f32 %v392_v34, %v326_v58  ;;  %v455_v53 = vadd.f32 %v391_v0, %v325_v1  ;;  %v394_v16 = vmul.f32 %v1398_v56, %v970_v11  ;;  %v393_v10 = vmul.f32 %v1398_v56, %v969_v35  ;;  %641 = vst [vmem:[%s2009_s2 + $0x180] sm:$0xff] %v577_v14 }
  0xce   :  { %v454_v55 = vadd.f32 %v390_v32, %v324_v8  ;;  %v453_v30 = vadd.f32 %v389_v57, %v323_v42  ;;  %v331_v29 = vmul.f32 %v1387_v21, %v2100_v62  ;;  %v332_v61 = vmul.f32 %v1387_v21, %v2101_v37 }
  0xcf   :  { %v522_v4 = vadd.f32 %v1405_v44, %v456_v25  ;;  %v521_v12 = vadd.f32 %v1405_v44, %v455_v53  ;;  %v458_v40 = vadd.f32 %v394_v16, %v328_v54  ;;  %v457_v36 = vadd.f32 %v393_v10, %v327_v31 }
  0xd0   :  { %v520_v28 = vadd.f32 %v1405_v44, %v454_v55  ;;  %v519_v23 = vadd.f32 %v1405_v44, %v453_v30  ;;  %v2102_v27 = vunpack.c.l.bf16 %v1358_v63  ;;  %v980_v52 = vunpack.i.h.bf16 %v978_v47 }
  0xd1   :  { %v586_v1 = vmax.f32 %v522_v4, 0.0  ;;  %v585_v7 = vmax.f32 %v521_v12, 0.0  ;;  %v524_v58 = vadd.f32 %v1405_v44, %v458_v40  ;;  %v523_v45 = vadd.f32 %v1405_v44, %v457_v36 }
  0xd2   :  { %v329_v2 = vmul.f32 %v1387_v21, %v2102_v27  ;;  %v584_v6 = vmax.f32 %v520_v28, 0.0  ;;  %v583_v9 = vmax.f32 %v519_v23, 0.0  ;;  %v979_v18 = vunpack.i.l.bf16 %v978_v47 }
  0xd3   :  { %650 = vst [vmem:[%s2009_s2 + $0x1c8] sm:$0xff] %v586_v1  ;;  %v588_v49 = vmax.f32 %v524_v58, 0.0  ;;  %v2103_v20 = vunpack.c.h.bf16 %v1358_v63  ;;  %v975_v13 = vunpack.i.h.bf16 %v973_v22  ;;  %v974_v8 = vunpack.i.l.bf16 %v973_v22 }
  0xd4   :  { %649 = vst [vmem:[%s2009_s2 + $0x1c0] sm:$0xff] %v585_v7  ;;  %v587_v48 = vmax.f32 %v523_v45, 0.0  ;;  %v398_v51 = vmul.f32 %v1398_v56, %v980_v52  ;;  %v397_v41 = vmul.f32 %v1398_v56, %v979_v18 }
  0xd5   :  { %v330_v42 = vmul.f32 %v1387_v21, %v2103_v20  ;;  %648 = vst [vmem:[%s2009_s2 + $0x1b8] sm:$0xff] %v584_v6  ;;  %v396_v5 = vmul.f32 %v1398_v56, %v975_v13  ;;  %v395_v63 = vmul.f32 %v1398_v56, %v974_v8 }
  0xd6   :  { %647 = vst [vmem:[%s2009_s2 + $0x1b0] sm:$0xff] %v583_v9  ;;  %v462_v21 = vadd.f32 %v398_v51, %v332_v61  ;;  %v461_v38 = vadd.f32 %v397_v41, %v331_v29 }
  0xd7   :  { %652 = vst [vmem:[%s2009_s2 + $0x1d8] sm:$0xff] %v588_v49  ;;  %v460_v24 = vadd.f32 %v396_v5, %v330_v42  ;;  %v459_v15 = vadd.f32 %v395_v63, %v329_v2 }
  0xd8   :  { %651 = vst [vmem:[%s2009_s2 + $0x1d0] sm:$0xff] %v587_v48  ;;  %v528_v26 = vadd.f32 %v1405_v44, %v462_v21  ;;  %v527_v56 = vadd.f32 %v1405_v44, %v461_v38 }
  0xd9   :  { %v526_v31 = vadd.f32 %v1405_v44, %v460_v24  ;;  %v525_v33 = vadd.f32 %v1405_v44, %v459_v15 }
  0xda   :  { %v592_v54 = vmax.f32 %v528_v26, 0.0  ;;  %v591_v39 = vmax.f32 %v527_v56, 0.0 }
  0xdb   :  { %v590_v46 = vmax.f32 %v526_v31, 0.0  ;;  %v589_v3 = vmax.f32 %v525_v33, 0.0 }
  0xdc   :  { %656 = vst [vmem:[%s2009_s2 + $0x1f8] sm:$0xff] %v592_v54 }
  0xdd   :  { %655 = vst [vmem:[%s2009_s2 + $0x1f0] sm:$0xff] %v591_v39 }
  0xde   :  { %654 = vst [vmem:[%s2009_s2 + $0x1e8] sm:$0xff] %v590_v46 }
  0xdf   :  { %653 = vst [vmem:[%s2009_s2 + $0x1e0] sm:$0xff] %v589_v3 }

// kernel: custom-call
= control target key start
LH: loop header
LB: loop body
LE: loop exit
PB: predicated region body
PF: predicated region fallthrough
CT: control target
= control target key end

     0   :  { %s105_s0 = inlined_call_operand.vmem [shape: f32[2,64,16,16], index: 0, kind: input, shape index: {}]   ;;  %s106_s1 = inlined_call_operand.vmem [shape: f32[2,64,16,16], index: 1, kind: input, shape index: {}]   ;;  %s107_s2 = inlined_call_operand.hbm [shape: c64[2,64,16,16], index: 2, kind: output, shape index: {}]  }
   0x1   :  { %s3_s11 = scalar_lea.hbm %s107_s2, 512 }
   0x2   :  { %4 = vsyncpa [#allocation0], 0  ;;  %s6_s14 = sshll.u32 %s105_s0, 4  ;;  %s8_s17 = sshll.u32 %s107_s2, 4  ;;  %s7_s14 = int_to_ptr.vmem [resolvable:$true] %s6_s14  ;;  %s9_s17 = int_to_ptr.hbm [resolvable:$true] %s8_s17 }
   0x3   :  { %11 = dma.vmem_to_hbm [thread:$0]  %s7_s14, 8192, %s9_s17, [#allocation0] }
   0x4   :  { %74 = dma.done.wait [#allocation0], 8192  }
   0x5   :  { %75 = vsyncadd [#allocation0], 4294959104 }
   0x6   :  { %14 = vsyncpa [#allocation0], 1 }
   0x7   :  { %15 = vsyncpa [#allocation1], 0  ;;  %s17_s20 = sshll.u32 %s106_s1, 4  ;;  %s19_s21 = sshll.u32 %s3_s11, 4  ;;  %s18_s20 = int_to_ptr.vmem [resolvable:$true] %s17_s20  ;;  %s20_s21 = int_to_ptr.hbm [resolvable:$true] %s19_s21 }
   0x8   :  { %22 = dma.vmem_to_hbm [thread:$0]  %s18_s20, 8192, %s20_s21, [#allocation1] }
   0x9   :  { %76 = dma.done.wait [#allocation1], 8192  }
   0xa   :  { %77 = vsyncadd [#allocation1], 4294959104 }
   0xb   :  { %25 = vsyncpa [#allocation1], 1 }

// kernel: complex_double_conv_forward.4
= control target key start
LH: loop header
LB: loop body
LE: loop exit
PB: predicated region body
PF: predicated region fallthrough
CT: control target
= control target key end

     0   :  { %s6158_s15 = smov 0   ;;  %s7809_s0 = inlined_call_operand.vmem [shape: bf16[2,18,18,8], index: 0, kind: input, shape index: {}]   ;;  %s7810_s1 = inlined_call_operand.vmem [shape: bf16[9,8,128], index: 1, kind: input, shape index: {}]   ;;  %s7811_s2 = inlined_call_operand.vmem [shape: f32[1,128], index: 2, kind: input, shape index: {}]   ;;  %s7812_s3 = inlined_call_operand.vmem [shape: bf16[512,128], index: 3, kind: output, shape index: {0}]   ;;  %s7813_s4 = inlined_call_operand.vmem [shape: f32[2,8,128], index: 4, kind: output, shape index: {1}]  }
   0x1 LB: > { %s6164_s16 = sadd.s32 4294967295, %s6130_s15   ;;  %p5311_p0 = scmp.ge.s32.totalorder %s6130_s15, 1  ;;  %s6130_s15 = sphi %s6158_s15, %s15_s15  }
   0x2   : > { %p165_p1 = scmp.lt.s32.totalorder %s6130_s15, 3 }
   0x4   : > { %p166_p2 = pnand %p5311_p0, %p165_p1 }
   0x6   : > { %169 = sbr.rel (%p166_p2) target bundleno = 861 (0x35d), region = 32 }
   0xb   : > { %v243_v0 = vld [vmem:[%s7810_s1] sm:$0xf]  ;;  %vm373_vm0 = vcmask 1043456   ;;  %p195_p3 = scmp.lt.s32.totalorder %s6164_s16, 1  ;;  %v5429_v2 = vld [vmem:[%s7810_s1 + $0x8] sm:$0xf] }
   0xc   : > { %v375_v1 = vsel %vm373_vm0, %v243_v0, 0  ;;  %v5478_v3 = vld [vmem:[%s7810_s1 + $0xc] sm:$0xf]  ;;  %v1529_v4 = vsel %vm373_vm0, %v5429_v2, 0  ;;  %v5396_v6 = vld [vmem:[%s7810_s1 + $0x4] sm:$0xf] }
   0xd   : > { %6109 = vmatpush.bf16.msra.mxu1 %v375_v1  ;;  %6110 = vmatpush.bf16.msra.mxu2 %v375_v1  ;;  %s6180_s23 = scalar_select %p195_p3, %s6164_s16, 1  ;;  %v1880_v5 = vsel %vm373_vm0, %v5478_v3, 0  ;;  %v1032_v7 = vsel %vm373_vm0, %v5396_v6, 0  ;;  %v5607_v8 = vld [vmem:[%s7810_s1 + $0x10] sm:$0xf]  ;;  %vm324_vm1 = vcmask 64512  }
   0xe   : > { %6111 = vmatpush.bf16.msra.mxu3 %v375_v1  ;;  %384 = vmatpush.bf16.msra.mxu0 %v375_v1  ;;  %v2598_v9 = vsel %vm373_vm0, %v5607_v8, 0  ;;  %v5737_v28 = vld [vmem:[%s7810_s1 + $0x18] sm:$0xf]  ;;  %v5866_v29 = vld [vmem:[%s7810_s1 + $0x1c] sm:$0xf]  ;;  %vm1315_vm4 = vcmask 1042432  }
   0xf   : > { %s6112_s28 = smul.u32 216, %s6180_s23  ;;  %v3443_v30 = vsel %vm373_vm0, %v5737_v28, 0  ;;  %v4161_v31 = vsel %vm373_vm0, %v5866_v29, 0  ;;  %v5688_v32 = vld [vmem:[%s7810_s1 + $0x14] sm:$0xf]  ;;  %vm1316_vm5 = vcmask 1046532  }
  0x10   : > { %v5947_v33 = vld [vmem:[%s7810_s1 + $0x20] sm:$0xf]  ;;  %v3092_v36 = vsel %vm373_vm0, %v5688_v32, 0  ;;  %vm546_vm2 = vsmask.f32 3328  ;;  %vm6258_vm7 = vmor %vm1315_vm4, %vm1316_vm5  ;;  %s5313_s14 = sshll.u32 %s6164_s16, 5 }
  0x11   : > { %1538 = vmatpush.bf16.msrb.mxu2 %v1529_v4  ;;  %1041 = vmatpush.bf16.msrb.mxu1 %v1032_v7  ;;  %s6196_s5 = scalar_lea.vmem %s7809_s0, %s6112_s28  ;;  %v4655_v37 = vsel %vm373_vm0, %v5947_v33, 0  ;;  %vm547_vm3 = vsmask.f32 7440  ;;  %p7237_p4 = scmp.lt.s32.totalorder %s5313_s14, 63  ;;  %vm5213_vm8 = vcmask 1040384   ;;  %vm5215_vm9 = vcmask 1041408  }
  0x12   : > { %1889 = vmatpush.bf16.msrb.mxu3 %v1880_v5  ;;  %2607 = vmatpush.bf16.msrb.mxu0 %v2598_v9  ;;  %v5970_v10 = vld [vmem:[%s6196_s5 + $0x30] sm:$0xff]  ;;  %v5974_v11 = vld [vmem:[%s6196_s5 + $0x60] sm:$0xff]  ;;  %v5972_v18 = vld [vmem:[%s6196_s5 + $0x48] sm:$0xff]  ;;  %s6132_s20 = smov 64   ;;  %s5315_s27 = sshll.u32 %s6180_s23, 3 }
  0x13   : > { %v5978_v12 = vld [vmem:[%s6196_s5 + $0x90] sm:$0xff]  ;;  %v5966_v13 = vld [vmem:[%s6196_s5] sm:$0xff]  ;;  %5384 = vmatmul.msk.bf16.vlgmr.msra.gmra.mxu1 %vm324_vm1, %v5970_v10  ;;  %5388 = vmatmul.msk.bf16.vlgmr.msra.gmra.mxu2 %vm324_vm1, %v5974_v11  ;;  %v5976_v19 = vld [vmem:[%s6196_s5 + $0x78] sm:$0xff]  ;;  %s7840_s14 = smov (!%p7237_p4, %s5313_s14), 63  ;;  %s209_s30 = scalar_lea.vmem %s7813_s4, %s5315_s27 }
  0x14   : > { %5392 = vmatmul.msk.bf16.vlgmr.msra.gmra.mxu3 %vm324_vm1, %v5978_v12  ;;  %5380 = vmatmul.msk.bf16.vlgmr.msra.gmra.mxu0 %vm324_vm1, %v5966_v13  ;;  %v5971_v14 = vld [vmem:[%s6196_s5 + $0x3c] sm:$0xff]  ;;  %v5975_v15 = vld [vmem:[%s6196_s5 + $0x6c] sm:$0xff]  ;;  %v499_v23 = vld [vmem:[%s6196_s5 + $0x4] sm:$0xf]  ;;  %s5314_s16 = sshll.u32 %s7840_s14, 2 }
  0x15   : > { %v5979_v16 = vld [vmem:[%s6196_s5 + $0x9c] sm:$0xff]  ;;  %v5967_v17 = vld [vmem:[%s6196_s5 + $0xc] sm:$0xff]  ;;  %v559_v26 = vshll.u32 %v499_v23, 16  ;;  %v563_v27 = vshrl.u32 %v499_v23, 16  ;;  %3452 = vmatpush.bf16.msra.mxu2 %v3443_v30  ;;  %3101 = vmatpush.bf16.msra.mxu1 %v3092_v36  ;;  %v500_v38 = vld [vmem:[%s6196_s5 + $0x8] sm:$0x1]  ;;  %s7275_s24 = scalar_lea.vmem %s7812_s3, %s5314_s16 }
  0x16   : > { %v5980_v20 = vld [vmem:[%s6196_s5 + $0xa8] sm:$0xff]  ;;  %v5968_v21 = vld [vmem:[%s6196_s5 + $0x18] sm:$0xff]  ;;  %v498_v22 = vld [vmem:[%s6196_s5] sm:$0xf]  ;;  %4170 = vmatpush.bf16.msra.mxu3 %v4161_v31  ;;  %4664 = vmatpush.bf16.msra.mxu0 %v4655_v37  ;;  %v569_v48 = vshll.u32 %v500_v38, 16 }
  0x17   : > { %v550_v24 = vshrl.u32 %v498_v22, 16  ;;  %v553_v25 = vshll.u32 %v498_v22, 16  ;;  %v5559_v34 = vld [vmem:[%s6196_s5 + $0xc] sm:$0xf]  ;;  %v5560_v35 = vld [vmem:[%s6196_s5 + $0x10] sm:$0xf]  ;;  %vm6253_vm6 = vmor %vm546_vm2, %vm547_vm3 }
  0x18   : > { %v561_v41 = vrot.slane %v559_v26, 5  ;;  %v565_v42 = vrot.slane %v563_v27, 4  ;;  %v1220_v43 = vld [vmem:[%s6196_s5 + $0x4] sm:$0xf]  ;;  %v2116_v44 = vshrl.u32 %v5559_v34, 16  ;;  %v2119_v45 = vshll.u32 %v5559_v34, 16 }
  0x19   : > { %v552_v39 = vrot.slane %v550_v24, 4  ;;  %v555_v40 = vrot.slane %v553_v25, 5  ;;  %v2125_v46 = vshll.u32 %v5560_v35, 16  ;;  %v2129_v47 = vshrl.u32 %v5560_v35, 16  ;;  %v1219_v52 = vld [vmem:[%s6196_s5] sm:$0xe] }
  0x1a   : > { %v566_v50 = vor.u32 %v565_v42, %v561_v41  ;;  %v1320_v51 = vrot.slane %v1220_v43, 5  ;;  %v2118_v53 = vrot.slane %v2116_v44, 4  ;;  %v2121_v54 = vrot.slane %v2119_v45, 5  ;;  %v1221_v57 = vld [vmem:[%s6196_s5 + $0x8] sm:$0x1]  ;;  %v5973_v59 = vld [vmem:[%s6196_s5 + $0x54] sm:$0xff] }
  0x1b   : > { %v556_v49 = vor.u32 %v555_v40, %v552_v39  ;;  %v2127_v55 = vrot.slane %v2125_v46, 5  ;;  %v2131_v56 = vrot.slane %v2129_v47, 4  ;;  %v5561_v58 = vld [vmem:[%s6196_s5 + $0x14] sm:$0x1]  ;;  %v5977_v60 = vld [vmem:[%s6196_s5 + $0x84] sm:$0xff]  ;;  %v571_v61 = vrot.slane %v569_v48, 5 }
  0x1c   : > { %v5981_v62 = vld [vmem:[%s6196_s5 + $0xb4] sm:$0xff]  ;;  %v5969_v63 = vld [vmem:[%s6196_s5 + $0x24] sm:$0xff]  ;;  %v567_v2 = vrot.slane %v566_v50, 4  ;;  %v5413_v3 = vrot.slane %v1219_v52, 9  ;;  %v1322_v4 = vrot.slane %v1320_v51, 4  ;;  %v1323_v6 = vrot.slane %v1221_v57, 5 }
  0x1d   : > { %v557_v1 = vrot.slane %v556_v49, 4  ;;  %v2122_v7 = vor.u32 %v2121_v54, %v2118_v53  ;;  %v2132_v8 = vor.u32 %v2131_v56, %v2127_v55  ;;  %v2135_v9 = vshll.u32 %v5561_v58, 16  ;;  %v501_v10 = vld [vmem:[%s6196_s5 + $0xc] sm:$0xf]  ;;  %v502_v11 = vld [vmem:[%s6196_s5 + $0x10] sm:$0xf] }
  0x1e   : > { %v572_v13 = vsel %vm6253_vm6, %v567_v2, %v571_v61  ;;  %v577_v22 = vshll.u32 %v501_v10, 16  ;;  %v583_v23 = vshll.u32 %v502_v11, 16  ;;  %v587_v24 = vshrl.u32 %v502_v11, 16  ;;  %v503_v35 = vld [vmem:[%s6196_s5 + $0x14] sm:$0x1] }
  0x1f   : > { %v562_v12 = vsel %vm6253_vm6, %v557_v1, %v561_v41  ;;  %v936_v30 = vunpack.c.l.b16 %v572_v13  ;;  %v1223_v40 = vld [vmem:[%s6196_s5 + $0x10] sm:$0xf]  ;;  %v5564_v47 = vld [vmem:[%s6196_s5 + $0x20] sm:$0x1]  ;;  %v593_v48 = vshll.u32 %v503_v35, 16 }
  0x20   : > { %v935_v29 = vunpack.c.l.b16 %v562_v12  ;;  %v579_v37 = vrot.slane %v577_v22, 5  ;;  %v585_v38 = vrot.slane %v583_v23, 5  ;;  %v589_v39 = vrot.slane %v587_v24, 4  ;;  %v1222_v54 = vld [vmem:[%s6196_s5 + $0xc] sm:$0xe] }
  0x21   : > { %v1327_v52 = vrot.slane %v1223_v40, 5  ;;  %v2159_v58 = vshll.u32 %v5564_v47, 16  ;;  %v595_v61 = vrot.slane %v593_v48, 5  ;;  %v5414_v2 = vrot.slane %v1222_v54, 9  ;;  %v1226_v40 = vld [vmem:[%s6196_s5 + $0x1c] sm:$0xf] }
  0x22   : > { %v967_v49 = vpack.c.b16 %v936_v30, %v935_v29  ;;  %v590_v53 = vor.u32 %v589_v39, %v585_v38  ;;  %v5983_v48 = vld [vmem:[%s6196_s5 + $0x18] sm:$0xff] }
  0x23   : > { %5385 = vmatmul.msk.bf16.gmra.mxu1 %vm324_vm1, %v5971_v14  ;;  %5389 = vmatmul.msk.bf16.gmra.mxu2 %vm324_vm1, %v5975_v15  ;;  %v1321_v14 = vsel %vm6258_vm7, %v5413_v3, %v1320_v51  ;;  %v5562_v15 = vld [vmem:[%s6196_s5 + $0x18] sm:$0xf]  ;;  %v1329_v3 = vrot.slane %v1327_v52, 4 }
  0x24   : > { %5393 = vmatmul.msk.bf16.gmra.mxu3 %vm324_vm1, %v5979_v16  ;;  %5381 = vmatmul.msk.bf16.gmra.mxu0 %vm324_vm1, %v5967_v17  ;;  %v5563_v16 = vld [vmem:[%s6196_s5 + $0x1c] sm:$0xf]  ;;  %v1324_v17 = vsel %vm6258_vm7, %v1322_v4, %v1323_v6  ;;  %v2140_v25 = vshrl.u32 %v5562_v15, 16  ;;  %v2143_v26 = vshll.u32 %v5562_v15, 16  ;;  %v1432_v31 = vunpack.c.l.b16 %v1321_v14  ;;  %v1225_v54 = vld [vmem:[%s6196_s5 + $0x18] sm:$0xe] }
  0x25   : > { %v2149_v27 = vshll.u32 %v5563_v16, 16  ;;  %v2153_v28 = vshrl.u32 %v5563_v16, 16  ;;  %v1433_v32 = vunpack.c.l.b16 %v1324_v17  ;;  %v591_v6 = vrot.slane %v590_v53, 4  ;;  %v5565_v16 = vld [vmem:[%s6196_s5 + $0x24] sm:$0xf] }
  0x26   : > { %v2142_v41 = vrot.slane %v2140_v25, 4  ;;  %v2145_v42 = vrot.slane %v2143_v26, 5  ;;  %v1328_v15 = vsel %vm6258_vm7, %v5414_v2, %v1327_v52  ;;  %v5566_v17 = vld [vmem:[%s6196_s5 + $0x28] sm:$0xf]  ;;  %v506_v26 = vld [vmem:[%s6196_s5 + $0x20] sm:$0x1] }
  0x27   : > { %v2151_v43 = vrot.slane %v2149_v27, 5  ;;  %v2155_v44 = vrot.slane %v2153_v28, 4  ;;  %v1464_v50 = vpack.c.b16 %v1433_v32, %v1432_v31  ;;  %v2164_v27 = vshrl.u32 %v5565_v16, 16  ;;  %v5568_v2 = vld [vmem:[%s6196_s5 + $0x30] sm:$0xf] }
  0x28   : > { %v2146_v56 = vor.u32 %v2145_v42, %v2142_v41  ;;  %v2167_v28 = vshll.u32 %v5565_v16, 16  ;;  %v2173_v29 = vshll.u32 %v5566_v17, 16  ;;  %v2177_v30 = vshrl.u32 %v5566_v17, 16 }
  0x29   : > { %v2156_v57 = vor.u32 %v2155_v44, %v2151_v43  ;;  %v617_v39 = vshll.u32 %v506_v26, 16  ;;  %v2166_v41 = vrot.slane %v2164_v27, 4  ;;  %v1334_v52 = vrot.slane %v1226_v40, 5 }
  0x2a   : > { %v2169_v42 = vrot.slane %v2167_v28, 5  ;;  %v2179_v44 = vrot.slane %v2177_v30, 4 }
  0x33   : > { %5386 = vmatmul.msk.bf16.gmra.mxu1 %vm324_vm1, %v5972_v18  ;;  %5390 = vmatmul.msk.bf16.gmra.mxu2 %vm324_vm1, %v5976_v19  ;;  %v2123_v18 = vrot.slane %v2122_v7, 4  ;;  %v2133_v19 = vrot.slane %v2132_v8, 4  ;;  %v2147_v7 = vrot.slane %v2146_v56, 4  ;;  %v2157_v8 = vrot.slane %v2156_v57, 4 }
  0x34   : > { %5394 = vmatmul.msk.bf16.gmra.mxu3 %vm324_vm1, %v5980_v20  ;;  %5382 = vmatmul.msk.bf16.gmra.mxu0 %vm324_vm1, %v5968_v21  ;;  %v2137_v20 = vrot.slane %v2135_v9, 5  ;;  %v574_v21 = vshrl.u32 %v501_v10, 16  ;;  %v2161_v9 = vrot.slane %v2159_v58, 5  ;;  %v2170_v56 = vor.u32 %v2169_v42, %v2166_v41 }
  0x35   : > { %v2128_v33 = vsel %vm6253_vm6, %v2123_v18, %v2127_v55  ;;  %v1224_v55 = vld [vmem:[%s6196_s5 + $0x14] sm:$0x1]  ;;  %v596_v18 = vsel %vm6253_vm6, %v591_v6, %v595_v61 }
  0x36   : > { %v2138_v34 = vsel %vm6253_vm6, %v2133_v19, %v2137_v20  ;;  %v576_v36 = vrot.slane %v574_v21, 4  ;;  %v2501_v45 = vunpack.c.l.b16 %v2128_v33  ;;  %v1330_v4 = vrot.slane %v1224_v55, 5  ;;  %v1227_v55 = vld [vmem:[%s6196_s5 + $0x20] sm:$0x1] }
  0x37   : > { %v2502_v46 = vunpack.c.l.b16 %v2138_v34  ;;  %v2152_v20 = vsel %vm6253_vm6, %v2147_v7, %v2151_v43  ;;  %v2162_v21 = vsel %vm6253_vm6, %v2157_v8, %v2161_v9  ;;  %v938_v32 = vunpack.c.l.b16 %v596_v18  ;;  %v5569_v8 = vld [vmem:[%s6196_s5 + $0x34] sm:$0xf] }
  0x38   : > { %v580_v51 = vor.u32 %v579_v37, %v576_v36  ;;  %v1331_v19 = vsel %vm6258_vm7, %v1329_v3, %v1330_v4  ;;  %v1434_v33 = vunpack.c.l.b16 %v1328_v15  ;;  %v2503_v35 = vunpack.c.l.b16 %v2152_v20 }
  0x39   : > { %v1435_v34 = vunpack.c.l.b16 %v1331_v19  ;;  %v2504_v36 = vunpack.c.l.b16 %v2162_v21  ;;  %v2175_v43 = vrot.slane %v2173_v29, 5  ;;  %v2171_v4 = vrot.slane %v2170_v56, 4  ;;  %v509_v29 = vld [vmem:[%s6196_s5 + $0x2c] sm:$0x1] }
  0x3a   : > { %v581_v1 = vrot.slane %v580_v51, 4  ;;  %v619_v51 = vrot.slane %v617_v39, 5  ;;  %v2197_v17 = vshll.u32 %v5569_v8, 16  ;;  %v2201_v18 = vshrl.u32 %v5569_v8, 16 }
  0x3b   : > { %v1465_v47 = vpack.c.b16 %v1435_v34, %v1434_v33  ;;  %v2180_v57 = vor.u32 %v2179_v44, %v2175_v43  ;;  %v2176_v21 = vsel %vm6253_vm6, %v2171_v4, %v2175_v43  ;;  %v1229_v34 = vld [vmem:[%s6196_s5 + $0x28] sm:$0xf]  ;;  %v641_v40 = vshll.u32 %v509_v29, 16  ;;  %v5572_v4 = vld [vmem:[%s6196_s5 + $0x40] sm:$0xf] }
  0x3c   : > { %v586_v14 = vsel %vm6253_vm6, %v581_v1, %v585_v38  ;;  %v1337_v1 = vrot.slane %v1227_v55, 5  ;;  %v1341_v43 = vrot.slane %v1229_v34, 5  ;;  %v1231_v29 = vld [vmem:[%s6196_s5 + $0x30] sm:$0xe] }
  0x3d   : > { %v937_v31 = vunpack.c.l.b16 %v586_v14  ;;  %v2181_v6 = vrot.slane %v2180_v57, 4  ;;  %v2191_v14 = vshll.u32 %v5568_v2, 16 }
  0x3e   : > { %v1343_v56 = vrot.slane %v1341_v43, 4 }
  0x43   : > { %5387 = vmatmul.msk.bf16.gmra.mxu1 %vm324_vm1, %v5973_v59  ;;  %5391 = vmatmul.msk.bf16.gmra.mxu2 %vm324_vm1, %v5977_v60  ;;  %v5982_v59 = vld [vmem:[%s6196_s5 + $0xc] sm:$0xff]  ;;  %v2533_v60 = vpack.c.b16 %v2502_v46, %v2501_v45  ;;  %v968_v46 = vpack.c.b16 %v938_v32, %v937_v31  ;;  %v2193_v31 = vrot.slane %v2191_v14, 5  ;;  %v2505_v32 = vunpack.c.l.b16 %v2176_v21 }
  0x44   : > { %5395 = vmatmul.msk.bf16.gmra.mxu3 %vm324_vm1, %v5981_v62  ;;  %5383 = vmatmul.msk.bf16.gmra.mxu0 %vm324_vm1, %v5969_v63  ;;  %v504_v62 = vld [vmem:[%s6196_s5 + $0x18] sm:$0xf]  ;;  %v505_v63 = vld [vmem:[%s6196_s5 + $0x1c] sm:$0xf]  ;;  %v5567_v45 = vld [vmem:[%s6196_s5 + $0x2c] sm:$0x1] }
  0x45   : > { %v598_v10 = vshrl.u32 %v504_v62, 16  ;;  %v601_v11 = vshll.u32 %v504_v62, 16  ;;  %v607_v12 = vshll.u32 %v505_v63, 16  ;;  %v611_v13 = vshrl.u32 %v505_v63, 16 }
  0x46   : > { %v2183_v58 = vshll.u32 %v5567_v45, 16  ;;  %v5415_v62 = vrot.slane %v1225_v54, 9  ;;  %v1336_v63 = vrot.slane %v1334_v52, 4  ;;  %v5984_v45 = vld [vmem:[%s6196_s5 + $0x24] sm:$0xff]  ;;  %v643_v54 = vrot.slane %v641_v40, 5 }
  0x47   : > { %v600_v22 = vrot.slane %v598_v10, 4  ;;  %v603_v23 = vrot.slane %v601_v11, 5  ;;  %v609_v24 = vrot.slane %v607_v12, 5  ;;  %v613_v25 = vrot.slane %v611_v13, 4  ;;  %v1233_v40 = vld [vmem:[%s6196_s5 + $0x38] sm:$0x1] }
  0x48   : > { %v2185_v7 = vrot.slane %v2183_v58, 5  ;;  %v2188_v13 = vshrl.u32 %v5568_v2, 16  ;;  %v1335_v15 = vsel %vm6258_vm7, %v5415_v62, %v1334_v52  ;;  %v1338_v16 = vsel %vm6258_vm7, %v1336_v63, %v1337_v1 }
  0x49   : > { %v604_v37 = vor.u32 %v603_v23, %v600_v22  ;;  %v614_v38 = vor.u32 %v613_v25, %v609_v24  ;;  %v1436_v27 = vunpack.c.l.b16 %v1335_v15  ;;  %v1437_v28 = vunpack.c.l.b16 %v1338_v16 }
  0x4a   : > { %v2186_v22 = vsel %vm6253_vm6, %v2181_v6, %v2185_v7  ;;  %v2190_v30 = vrot.slane %v2188_v13, 4  ;;  %v2221_v16 = vshll.u32 %v5572_v4, 16 }
  0x4b   : > { %v615_v53 = vrot.slane %v614_v38, 4  ;;  %v2506_v33 = vunpack.c.l.b16 %v2186_v22  ;;  %v1466_v42 = vpack.c.b16 %v1437_v28, %v1436_v27 }
  0x4c   : > { %v2194_v44 = vor.u32 %v2193_v31, %v2190_v30  ;;  %v5573_v30 = vld [vmem:[%s6196_s5 + $0x44] sm:$0x1] }
  0x4d   : > { %v620_v3 = vsel %vm6253_vm6, %v615_v53, %v619_v51  ;;  %v510_v51 = vld [vmem:[%s6196_s5 + $0x30] sm:$0xf] }
  0x4e   : > { %v940_v20 = vunpack.c.l.b16 %v620_v3  ;;  %v2195_v58 = vrot.slane %v2194_v44, 4  ;;  %v646_v62 = vshrl.u32 %v510_v51, 16  ;;  %v649_v63 = vshll.u32 %v510_v51, 16  ;;  %v5571_v3 = vld [vmem:[%s6196_s5 + $0x3c] sm:$0xf] }
  0x4f   : > { %v2212_v14 = vshrl.u32 %v5571_v3, 16  ;;  %v2215_v15 = vshll.u32 %v5571_v3, 16  ;;  %v5417_v44 = vrot.slane %v1231_v29, 9  ;;  %v1351_v51 = vrot.slane %v1233_v40, 5  ;;  %v5986_v40 = vld [vmem:[%s6196_s5 + $0x3c] sm:$0xff] }
  0x50   : > { %v651_v13 = vrot.slane %v649_v63, 5 }
  0x51   : > { %v2214_v31 = vrot.slane %v2212_v14, 4 }
  0x53   : > { %5397 = vmatmul.msk.bf16.vlgmr.msrb.gmra.mxu1 %vm324_vm1, %v967_v49  ;;  %5430 = vmatmul.msk.bf16.vlgmr.msrb.gmra.mxu2 %vm324_vm1, %v1464_v50  ;;  %v2534_v49 = vpack.c.b16 %v2504_v36, %v2503_v35  ;;  %v605_v50 = vrot.slane %v604_v37, 4  ;;  %v2199_v35 = vrot.slane %v2197_v17, 5  ;;  %v2203_v36 = vrot.slane %v2201_v18, 4  ;;  %v5570_v37 = vld [vmem:[%s6196_s5 + $0x38] sm:$0x1] }
  0x54   : > { %5543 = vmatmul.msk.bf16.vlgmr.msrb.gmra.mxu3 %vm324_vm1, %v5982_v59  ;;  %5608 = vmatmul.msk.bf16.vlgmr.msrb.gmra.mxu0 %vm324_vm1, %v2533_v60  ;;  %v507_v59 = vld [vmem:[%s6196_s5 + $0x24] sm:$0xf]  ;;  %v508_v60 = vld [vmem:[%s6196_s5 + $0x28] sm:$0xf]  ;;  %v2225_v17 = vshrl.u32 %v5572_v4, 16 }
  0x55   : > { %v610_v61 = vsel %vm6253_vm6, %v605_v50, %v609_v24  ;;  %v622_v9 = vshrl.u32 %v507_v59, 16  ;;  %v625_v10 = vshll.u32 %v507_v59, 16  ;;  %v631_v11 = vshll.u32 %v508_v60, 16  ;;  %v511_v59 = vld [vmem:[%s6196_s5 + $0x34] sm:$0xf] }
  0x56   : > { %v635_v12 = vshrl.u32 %v508_v60, 16  ;;  %v939_v19 = vunpack.c.l.b16 %v610_v61  ;;  %v2207_v50 = vshll.u32 %v5570_v37, 16  ;;  %v655_v1 = vshll.u32 %v511_v59, 16 }
  0x57   : > { %v624_v23 = vrot.slane %v622_v9, 4  ;;  %v627_v24 = vrot.slane %v625_v10, 5  ;;  %v633_v25 = vrot.slane %v631_v11, 5  ;;  %v659_v2 = vshrl.u32 %v511_v59, 16 }
  0x58   : > { %v637_v26 = vrot.slane %v635_v12, 4  ;;  %v969_v41 = vpack.c.b16 %v940_v20, %v939_v19  ;;  %v2209_v61 = vrot.slane %v2207_v50, 5  ;;  %v2200_v10 = vsel %vm6253_vm6, %v2195_v58, %v2199_v35  ;;  %v5575_v58 = vld [vmem:[%s6196_s5 + $0x4c] sm:$0xf] }
  0x59   : > { %v628_v38 = vor.u32 %v627_v24, %v624_v23  ;;  %v648_v12 = vrot.slane %v646_v62, 4  ;;  %v657_v18 = vrot.slane %v655_v1, 5  ;;  %v661_v19 = vrot.slane %v659_v2, 4  ;;  %v512_v24 = vld [vmem:[%s6196_s5 + $0x38] sm:$0x1] }
  0x5a   : > { %v638_v39 = vor.u32 %v637_v26, %v633_v25  ;;  %v2507_v26 = vunpack.c.l.b16 %v2200_v10  ;;  %v2227_v34 = vrot.slane %v2225_v17, 4  ;;  %v515_v17 = vld [vmem:[%s6196_s5 + $0x44] sm:$0x1] }
  0x5b   : > { %v629_v52 = vrot.slane %v628_v38, 4  ;;  %v652_v28 = vor.u32 %v651_v13, %v648_v12 }
  0x5c   : > { %v639_v53 = vrot.slane %v638_v39, 4 }
  0x5d   : > { %v634_v6 = vsel %vm6253_vm6, %v629_v52, %v633_v25  ;;  %v1232_v25 = vld [vmem:[%s6196_s5 + $0x34] sm:$0xf]  ;;  %v513_v52 = vld [vmem:[%s6196_s5 + $0x3c] sm:$0xf] }
  0x5e   : > { %v644_v7 = vsel %vm6253_vm6, %v639_v53, %v643_v54  ;;  %v941_v20 = vunpack.c.l.b16 %v634_v6  ;;  %v1348_v37 = vrot.slane %v1232_v25, 5  ;;  %v514_v53 = vld [vmem:[%s6196_s5 + $0x40] sm:$0xf]  ;;  %v673_v62 = vshll.u32 %v513_v52, 16 }
  0x5f   : > { %v942_v21 = vunpack.c.l.b16 %v644_v7  ;;  %v679_v2 = vshll.u32 %v514_v53, 16  ;;  %v683_v3 = vshrl.u32 %v514_v53, 16  ;;  %v2245_v7 = vshll.u32 %v5575_v58, 16  ;;  %v517_v53 = vld [vmem:[%s6196_s5 + $0x4c] sm:$0xf] }
  0x60   : > { %v1350_v50 = vrot.slane %v1348_v37, 4  ;;  %v675_v14 = vrot.slane %v673_v62, 5 }
  0x61   : > { %v970_v38 = vpack.c.b16 %v942_v21, %v941_v20  ;;  %v1235_v20 = vld [vmem:[%s6196_s5 + $0x40] sm:$0xf] }
  0x62   : > { %v1352_v1 = vsel %vm6258_vm7, %v1350_v50, %v1351_v51 }
  0x63   : > { %5398 = vmatmul.msk.bf16.gmra.mxu1 %vm324_vm1, %v968_v46  ;;  %5431 = vmatmul.msk.bf16.gmra.mxu2 %vm324_vm1, %v1465_v47  ;;  %v2535_v46 = vpack.c.b16 %v2506_v33, %v2505_v32  ;;  %v1228_v47 = vld [vmem:[%s6196_s5 + $0x24] sm:$0xe]  ;;  %v2217_v32 = vrot.slane %v2215_v15, 5  ;;  %v2223_v33 = vrot.slane %v2221_v16, 5  ;;  %v1441_v16 = vunpack.c.l.b16 %v1352_v1 }
  0x64   : > { %5544 = vmatmul.msk.bf16.gmra.mxu3 %vm324_vm1, %v5983_v48  ;;  %5609 = vmatmul.msk.bf16.gmra.mxu0 %vm324_vm1, %v2534_v49  ;;  %v1230_v48 = vld [vmem:[%s6196_s5 + $0x2c] sm:$0x1]  ;;  %v2204_v49 = vor.u32 %v2203_v36, %v2199_v35  ;;  %v5416_v55 = vrot.slane %v1228_v47, 9  ;;  %v662_v35 = vor.u32 %v661_v19, %v657_v18  ;;  %v665_v36 = vshll.u32 %v512_v24, 16 }
  0x65   : > { %v1344_v57 = vrot.slane %v1230_v48, 5  ;;  %v2228_v47 = vor.u32 %v2227_v34, %v2223_v33  ;;  %v685_v19 = vrot.slane %v683_v3, 4  ;;  %v703_v3 = vshll.u32 %v517_v53, 16 }
  0x66   : > { %v2205_v60 = vrot.slane %v2204_v49, 4  ;;  %v1342_v8 = vsel %vm6258_vm7, %v5416_v55, %v1341_v43  ;;  %v653_v43 = vrot.slane %v652_v28, 4  ;;  %v663_v48 = vrot.slane %v662_v35, 4  ;;  %v1236_v35 = vld [vmem:[%s6196_s5 + $0x44] sm:$0x1] }
  0x67   : > { %v1345_v9 = vsel %vm6258_vm7, %v1343_v56, %v1344_v57  ;;  %v1438_v22 = vunpack.c.l.b16 %v1342_v8  ;;  %v667_v49 = vrot.slane %v665_v36, 5  ;;  %v1349_v55 = vsel %vm6258_vm7, %v5417_v44, %v1348_v37  ;;  %v5574_v57 = vld [vmem:[%s6196_s5 + $0x48] sm:$0xf] }
  0x68   : > { %v2210_v11 = vsel %vm6253_vm6, %v2205_v60, %v2209_v61  ;;  %v1439_v23 = vunpack.c.l.b16 %v1345_v9  ;;  %v658_v54 = vsel %vm6253_vm6, %v653_v43, %v657_v18  ;;  %v2229_v60 = vrot.slane %v2228_v47, 4 }
  0x69   : > { %v2508_v27 = vunpack.c.l.b16 %v2210_v11  ;;  %v670_v61 = vshrl.u32 %v513_v52, 16  ;;  %v668_v63 = vsel %vm6253_vm6, %v663_v48, %v667_v49  ;;  %v2236_v4 = vshrl.u32 %v5574_v57, 16  ;;  %v516_v52 = vld [vmem:[%s6196_s5 + $0x48] sm:$0xf] }
  0x6a   : > { %v1467_v39 = vpack.c.b16 %v1439_v23, %v1438_v22  ;;  %v2239_v6 = vshll.u32 %v5574_v57, 16  ;;  %v2249_v8 = vshrl.u32 %v5575_v58, 16  ;;  %v943_v9 = vunpack.c.l.b16 %v658_v54  ;;  %v5578_v57 = vld [vmem:[%s6196_s5 + $0x58] sm:$0xf] }
  0x6b   : > { %v1440_v10 = vunpack.c.l.b16 %v1349_v55  ;;  %v672_v13 = vrot.slane %v670_v61, 4  ;;  %v944_v15 = vunpack.c.l.b16 %v668_v63  ;;  %v681_v18 = vrot.slane %v679_v2, 5 }
  0x6c   : > { %v2238_v21 = vrot.slane %v2236_v4, 4  ;;  %v2241_v22 = vrot.slane %v2239_v6, 5  ;;  %v2247_v23 = vrot.slane %v2245_v7, 5  ;;  %v2251_v24 = vrot.slane %v2249_v8, 4 }
  0x6d   : > { %v676_v28 = vor.u32 %v675_v14, %v672_v13  ;;  %v971_v29 = vpack.c.b16 %v944_v15, %v943_v9  ;;  %v1468_v34 = vpack.c.b16 %v1441_v16, %v1440_v10  ;;  %v1358_v48 = vrot.slane %v1236_v35, 5 }
  0x6e   : > { %v2242_v36 = vor.u32 %v2241_v22, %v2238_v21  ;;  %v2252_v37 = vor.u32 %v2251_v24, %v2247_v23  ;;  %v694_v61 = vshrl.u32 %v516_v52, 16  ;;  %v697_v62 = vshll.u32 %v516_v52, 16  ;;  %v5579_v24 = vld [vmem:[%s6196_s5 + $0x5c] sm:$0x1] }
  0x6f   : > { %v677_v43 = vrot.slane %v676_v28, 4  ;;  %v707_v4 = vshrl.u32 %v517_v53, 16  ;;  %v2269_v9 = vshll.u32 %v5578_v57, 16  ;;  %v2273_v10 = vshrl.u32 %v5578_v57, 16 }
  0x70   : > { %v2243_v49 = vrot.slane %v2242_v36, 4  ;;  %v2253_v50 = vrot.slane %v2252_v37, 4  ;;  %v696_v16 = vrot.slane %v694_v61, 4  ;;  %v6425_v21 = vrot.slane %v703_v3, 5  ;;  %v1237_v36 = vld [vmem:[%s6196_s5 + $0x48] sm:$0xe] }
  0x71   : > { %v682_v54 = vsel %vm6253_vm6, %v677_v43, %v681_v18  ;;  %v709_v22 = vrot.slane %v707_v4, 4  ;;  %v2275_v28 = vrot.slane %v2273_v10, 4  ;;  %v5580_v3 = vld [vmem:[%s6196_s5 + $0x60] sm:$0xf]  ;;  %v5581_v4 = vld [vmem:[%s6196_s5 + $0x64] sm:$0xf] }
  0x72   : > { %v2248_v1 = vsel %vm6253_vm6, %v2243_v49, %v2247_v23  ;;  %v1238_v23 = vld [vmem:[%s6196_s5 + $0x4c] sm:$0xf] }
  0x73   : > { %5399 = vmatmul.msk.bf16.gmra.mxu1 %vm324_vm1, %v969_v41  ;;  %5432 = vmatmul.msk.bf16.gmra.mxu2 %vm324_vm1, %v1466_v42  ;;  %v5985_v41 = vld [vmem:[%s6196_s5 + $0x30] sm:$0xff]  ;;  %v2536_v42 = vpack.c.b16 %v2508_v27, %v2507_v26  ;;  %v710_v35 = vor.u32 %v709_v22, %v6425_v21  ;;  %v1362_v37 = vrot.slane %v1238_v23, 5  ;;  %v2297_v22 = vshrl.u32 %v5581_v4, 16 }
  0x74   : > { %5545 = vmatmul.msk.bf16.gmra.mxu3 %vm324_vm1, %v5984_v45  ;;  %5610 = vmatmul.msk.bf16.gmra.mxu0 %vm324_vm1, %v2535_v46  ;;  %v2231_v45 = vshll.u32 %v5573_v30, 16  ;;  %v2218_v46 = vor.u32 %v2217_v32, %v2214_v31  ;;  %v5576_v27 = vld [vmem:[%s6196_s5 + $0x50] sm:$0x1]  ;;  %v686_v30 = vor.u32 %v685_v19, %v681_v18  ;;  %v689_v31 = vshll.u32 %v515_v17, 16  ;;  %v1234_v32 = vld [vmem:[%s6196_s5 + $0x3c] sm:$0xe] }
  0x75   : > { %v5418_v44 = vrot.slane %v1234_v32, 9  ;;  %v699_v17 = vrot.slane %v697_v62, 5  ;;  %v2511_v18 = vunpack.c.l.b16 %v2248_v1  ;;  %v711_v52 = vrot.slane %v710_v35, 4 }
  0x76   : > { %v2233_v56 = vrot.slane %v2231_v45, 5  ;;  %v2219_v59 = vrot.slane %v2218_v46, 4  ;;  %v687_v45 = vrot.slane %v686_v30, 4  ;;  %v691_v46 = vrot.slane %v689_v31, 5 }
  0x77   : > { %v700_v31 = vor.u32 %v699_v17, %v696_v16  ;;  %v1364_v53 = vrot.slane %v1362_v37, 4 }
  0x78   : > { %v2224_v11 = vsel %vm6253_vm6, %v2219_v59, %v2223_v33  ;;  %v2234_v12 = vsel %vm6253_vm6, %v2229_v60, %v2233_v56  ;;  %v1355_v33 = vrot.slane %v1235_v20, 5  ;;  %v5577_v56 = vld [vmem:[%s6196_s5 + $0x54] sm:$0xf]  ;;  %v692_v59 = vsel %vm6253_vm6, %v687_v45, %v691_v46  ;;  %v518_v20 = vld [vmem:[%s6196_s5 + $0x50] sm:$0x1] }
  0x79   : > { %v2509_v25 = vunpack.c.l.b16 %v2224_v11  ;;  %v2510_v26 = vunpack.c.l.b16 %v2234_v12  ;;  %v2260_v7 = vshrl.u32 %v5577_v56, 16  ;;  %v2263_v8 = vshll.u32 %v5577_v56, 16  ;;  %v520_v56 = vld [vmem:[%s6196_s5 + $0x58] sm:$0xf] }
  0x7a   : > { %v1357_v47 = vrot.slane %v1355_v33, 4  ;;  %v1356_v55 = vsel %vm6258_vm7, %v5418_v44, %v1355_v33  ;;  %v945_v12 = vunpack.c.l.b16 %v682_v54  ;;  %v946_v14 = vunpack.c.l.b16 %v692_v59  ;;  %v1239_v44 = vld [vmem:[%s6196_s5 + $0x50] sm:$0x1] }
  0x7b   : > { %v1442_v13 = vunpack.c.l.b16 %v1356_v55  ;;  %v713_v32 = vshll.u32 %v518_v20, 16  ;;  %v701_v49 = vrot.slane %v700_v31, 4  ;;  %v1365_v54 = vrot.slane %v1239_v44, 5  ;;  %v1241_v31 = vld [vmem:[%s6196_s5 + $0x58] sm:$0xf] }
  0x7c   : > { %v1359_v60 = vsel %vm6258_vm7, %v1357_v47, %v1358_v48  ;;  %v972_v30 = vpack.c.b16 %v946_v14, %v945_v12  ;;  %v519_v48 = vld [vmem:[%s6196_s5 + $0x54] sm:$0xf]  ;;  %v727_v1 = vshll.u32 %v520_v56, 16  ;;  %v2287_v20 = vshll.u32 %v5580_v3, 16 }
  0x7d   : > { %v1443_v15 = vunpack.c.l.b16 %v1359_v60  ;;  %v718_v60 = vshrl.u32 %v519_v48, 16  ;;  %v721_v61 = vshll.u32 %v519_v48, 16  ;;  %v1366_v12 = vsel %vm6258_vm7, %v1364_v53, %v1365_v54  ;;  %v1242_v53 = vld [vmem:[%s6196_s5 + $0x5c] sm:$0x1] }
  0x7e   : > { %v6474_v23 = vrot.slane %v727_v1, 5  ;;  %v2299_v44 = vrot.slane %v2297_v22, 4 }
  0x7f   : > { %v720_v16 = vrot.slane %v718_v60, 4  ;;  %v723_v17 = vrot.slane %v721_v61, 5 }
  0x81   : > { %v724_v35 = vor.u32 %v723_v17, %v720_v16  ;;  %v5583_v17 = vld [vmem:[%s6196_s5 + $0x6c] sm:$0xf] }
  0x83   : > { %5400 = vmatmul.msk.bf16.gmra.mxu1 %vm324_vm1, %v970_v38  ;;  %5433 = vmatmul.msk.bf16.gmra.mxu2 %vm324_vm1, %v1467_v39  ;;  %v2255_v38 = vshll.u32 %v5576_v27, 16  ;;  %v6429_v27 = vrot.slane %v2269_v9, 5 }
  0x84   : > { %5546 = vmatmul.msk.bf16.gmra.mxu3 %vm324_vm1, %v5985_v41  ;;  %5611 = vmatmul.msk.bf16.gmra.mxu0 %vm324_vm1, %v2536_v42  ;;  %v2537_v41 = vpack.c.b16 %v2510_v26, %v2509_v25  ;;  %v2262_v25 = vrot.slane %v2260_v7, 4  ;;  %v2265_v26 = vrot.slane %v2263_v8, 5  ;;  %v706_v8 = vsel %vm6253_vm6, %v701_v49, %v6425_v21 }
  0x85   : > { %v2257_v51 = vrot.slane %v2255_v38, 5  ;;  %v2279_v38 = vshll.u32 %v5579_v24, 16  ;;  %v2276_v46 = vor.u32 %v2275_v28, %v6429_v27  ;;  %v2293_v21 = vshll.u32 %v5581_v4, 16 }
  0x86   : > { %v2266_v45 = vor.u32 %v2265_v26, %v2262_v25  ;;  %v947_v25 = vunpack.c.l.b16 %v706_v8  ;;  %v1445_v28 = vunpack.c.l.b16 %v1366_v12  ;;  %v1369_v49 = vrot.slane %v1241_v31, 5  ;;  %v523_v12 = vld [vmem:[%s6196_s5 + $0x64] sm:$0xf] }
  0x87   : > { %v2258_v2 = vsel %vm6253_vm6, %v2253_v50, %v2257_v51  ;;  %v715_v50 = vrot.slane %v713_v32, 5  ;;  %v5419_v51 = vrot.slane %v1237_v36, 9  ;;  %v2281_v55 = vrot.slane %v2279_v38, 5  ;;  %v1240_v36 = vld [vmem:[%s6196_s5 + $0x54] sm:$0xe] }
  0x88   : > { %v2512_v19 = vunpack.c.l.b16 %v2258_v2  ;;  %v2267_v57 = vrot.slane %v2266_v45, 4  ;;  %v2277_v59 = vrot.slane %v2276_v46, 4  ;;  %v731_v2 = vshrl.u32 %v520_v56, 16 }
  0x89   : > { %v716_v9 = vsel %vm6253_vm6, %v711_v52, %v715_v50  ;;  %v1363_v10 = vsel %vm6258_vm7, %v5419_v51, %v1362_v37  ;;  %v5582_v37 = vld [vmem:[%s6196_s5 + $0x68] sm:$0x1]  ;;  %v1371_v8 = vrot.slane %v1369_v49, 4  ;;  %v2308_v31 = vshrl.u32 %v5583_v17, 16 }
  0x8a   : > { %v2538_v43 = vpack.c.b16 %v2512_v19, %v2511_v18  ;;  %v2272_v14 = vsel %vm6253_vm6, %v2267_v57, %v6429_v27  ;;  %v2284_v19 = vshrl.u32 %v5580_v3, 16  ;;  %v733_v24 = vrot.slane %v731_v2, 4 }
  0x8b   : > { %v948_v26 = vunpack.c.l.b16 %v716_v9  ;;  %v1444_v27 = vunpack.c.l.b16 %v1363_v10  ;;  %v2513_v32 = vunpack.c.l.b16 %v2272_v14  ;;  %v725_v57 = vrot.slane %v724_v35, 4  ;;  %v522_v10 = vld [vmem:[%s6196_s5 + $0x60] sm:$0xf] }
  0x8c   : > { %v2286_v38 = vrot.slane %v2284_v19, 4  ;;  %v734_v46 = vor.u32 %v733_v24, %v6474_v23  ;;  %v2303_v60 = vshll.u32 %v5582_v37, 16  ;;  %v1372_v9 = vrot.slane %v1242_v53, 5  ;;  %v5584_v19 = vld [vmem:[%s6196_s5 + $0x70] sm:$0xf] }
  0x8d   : > { %v973_v51 = vpack.c.b16 %v948_v26, %v947_v25  ;;  %v1470_v52 = vpack.c.b16 %v1445_v28, %v1444_v27  ;;  %v730_v14 = vsel %vm6253_vm6, %v725_v57, %v6474_v23  ;;  %v742_v22 = vshrl.u32 %v522_v10, 16  ;;  %v524_v53 = vld [vmem:[%s6196_s5 + $0x68] sm:$0x1]  ;;  %v1244_v57 = vld [vmem:[%s6196_s5 + $0x64] sm:$0xf] }
  0x8e   : > { %v735_v3 = vrot.slane %v734_v46, 4  ;;  %v2305_v16 = vrot.slane %v2303_v60, 5  ;;  %v745_v24 = vshll.u32 %v522_v10, 16  ;;  %v1373_v27 = vsel %vm6258_vm7, %v1371_v8, %v1372_v9 }
  0x8f   : > { %v751_v28 = vshll.u32 %v523_v12, 16  ;;  %v755_v23 = vshrl.u32 %v523_v12, 16  ;;  %v2321_v35 = vshrl.u32 %v5584_v19, 16  ;;  %v949_v37 = vunpack.c.l.b16 %v730_v14 }
  0x90   : > { %v6391_v39 = vpop.f32.mrf.mxu1  ;;  %v761_v14 = vshll.u32 %v524_v53, 16 }
  0x91   : > { %v6394_v42 = vpop.f32.mrf.mxu0 }
  0x93   : > { %5401 = vmatmul.msk.bf16.gmra.mxu1 %vm324_vm1, %v971_v29  ;;  %5434 = vmatmul.msk.bf16.gmra.mxu2 %vm324_vm1, %v1468_v34  ;;  %v1469_v34 = vpack.c.b16 %v1443_v15, %v1442_v13  ;;  %v2282_v15 = vsel %vm6253_vm6, %v2277_v59, %v2281_v55  ;;  %v5988_v55 = vld [vmem:[%s6196_s5 + $0x54] sm:$0xff]  ;;  %v5420_v59 = vrot.slane %v1240_v36, 9 }
  0x94   : > { %5547 = vmatmul.msk.bf16.gmra.mxu3 %vm324_vm1, %v5986_v40  ;;  %5612 = vmatmul.msk.bf16.gmra.mxu0 %vm324_vm1, %v2537_v41  ;;  %v5987_v41 = vld [vmem:[%s6196_s5 + $0x48] sm:$0xff] }
  0x96   : > { %v6408_v58 = vpop.f32.mrf.mxu2 }
  0x97   : > { %v6414_v63 = vpop.f32.mrf.mxu3 }
  0x98   : > { %v6420_v6 = vpop.f32.mrf.mxu1 }
  0x99   : > { %v6422_v11 = vpop.f32.mrf.mxu0 }
  0x9e   : > { %v6431_v29 = vpop.f32.mrf.mxu2 }
  0x9f   : > { %v6433_v33 = vpop.f32.mrf.mxu3 }
  0xa0   : > { %7818 = vst [vmem:[#allocation3_spill] sm:$0xff] %v6433_v33  ;;  %v6437_v40 = vpop.f32.mrf.mxu1 }
  0xa1   : > { %v6442_v47 = vpop.f32.mrf.mxu0 }
  0xa3   : > { %5402 = vmatmul.msk.bf16.gmra.mxu1 %vm324_vm1, %v972_v30  ;;  %5435 = vmatmul.msk.bf16.gmra.mxu2 %vm324_vm1, %v1469_v34  ;;  %v521_v30 = vld [vmem:[%s6196_s5 + $0x5c] sm:$0x1]  ;;  %v2514_v34 = vunpack.c.l.b16 %v2282_v15  ;;  %v1370_v15 = vsel %vm6258_vm7, %v5420_v59, %v1369_v49  ;;  %v747_v49 = vrot.slane %v745_v24, 5  ;;  %v2310_v59 = vrot.slane %v2308_v31, 4 }
  0xa4   : > { %5548 = vmatmul.msk.bf16.gmra.mxu3 %vm324_vm1, %v5987_v41  ;;  %5613 = vmatmul.msk.bf16.gmra.mxu0 %vm324_vm1, %v2538_v43  ;;  %v2289_v41 = vrot.slane %v2287_v20, 5  ;;  %v6480_v43 = vrot.slane %v2293_v21, 5  ;;  %v737_v48 = vshll.u32 %v521_v30, 16 }
  0xa5   : > { %v2539_v56 = vpack.c.b16 %v2514_v34, %v2513_v32  ;;  %v2311_v32 = vshll.u32 %v5583_v17, 16  ;;  %v2317_v34 = vshll.u32 %v5584_v19, 16  ;;  %v1243_v19 = vld [vmem:[%s6196_s5 + $0x60] sm:$0xe] }
  0xa6   : > { %v6450_v62 = vpop.f32.mrf.mxu2  ;;  %v2290_v1 = vor.u32 %v2289_v41, %v2286_v38  ;;  %v2300_v2 = vor.u32 %v2299_v44, %v6480_v43  ;;  %v739_v4 = vrot.slane %v737_v48, 5  ;;  %v1446_v38 = vunpack.c.l.b16 %v1370_v15 }
  0xa7   : > { %v6454_v7 = vpop.f32.mrf.mxu3  ;;  %v744_v48 = vrot.slane %v742_v22, 4  ;;  %v2313_v60 = vrot.slane %v2311_v32, 5  ;;  %v1376_v15 = vrot.slane %v1244_v57, 5  ;;  %v5587_v57 = vld [vmem:[%s6196_s5 + $0x7c] sm:$0xf] }
  0xa8   : > { %7819 = vst [vmem:[#allocation4_spill] sm:$0xff] %v6454_v7  ;;  %v6465_v13 = vpop.f32.mrf.mxu1  ;;  %v2291_v20 = vrot.slane %v2290_v1, 4  ;;  %v2301_v21 = vrot.slane %v2300_v2, 4  ;;  %v740_v26 = vsel %vm6253_vm6, %v735_v3, %v739_v4  ;;  %v6528_v1 = vrot.slane %v2317_v34, 5  ;;  %v5585_v4 = vld [vmem:[%s6196_s5 + $0x74] sm:$0x1] }
  0xa9   : > { %v6472_v18 = vpop.f32.mrf.mxu0  ;;  %v2323_v2 = vrot.slane %v2321_v35, 4  ;;  %v748_v8 = vor.u32 %v747_v49, %v744_v48  ;;  %v2327_v22 = vshll.u32 %v5585_v4, 16  ;;  %v763_v34 = vrot.slane %v761_v14, 5  ;;  %v531_v7 = vld [vmem:[%s6196_s5 + $0x84] sm:$0xf] }
  0xaa   : > { %v2296_v44 = vsel %vm6253_vm6, %v2291_v20, %v6480_v43  ;;  %v2306_v46 = vsel %vm6253_vm6, %v2301_v21, %v2305_v16  ;;  %v2314_v20 = vor.u32 %v2313_v60, %v2310_v59  ;;  %v5421_v35 = vrot.slane %v1243_v19, 9 }
  0xab   : > { %v2515_v43 = vunpack.c.l.b16 %v2296_v44  ;;  %v2516_v3 = vunpack.c.l.b16 %v2306_v46  ;;  %v2324_v21 = vor.u32 %v2323_v2, %v6528_v1  ;;  %v749_v31 = vrot.slane %v748_v8, 4 }
  0xac   : > { %v2315_v46 = vrot.slane %v2314_v20, 4  ;;  %v2329_v49 = vrot.slane %v2327_v22, 5  ;;  %v1377_v2 = vsel %vm6258_vm7, %v5421_v35, %v1376_v15  ;;  %v2341_v19 = vshll.u32 %v5587_v57, 16 }
  0xad   : > { %v2325_v48 = vrot.slane %v2324_v21, 4  ;;  %v2345_v20 = vshrl.u32 %v5587_v57, 16 }
  0xae   : > { %v6482_v45 = vpop.f32.mrf.mxu2 }
  0xaf   : > { %v6485_v50 = vpop.f32.mrf.mxu3 }
  0xb0   : > { %7820 = vst [vmem:[#allocation5_spill] sm:$0xff] %v6485_v50  ;;  %v6488_v54 = vpop.f32.mrf.mxu1  ;;  %v1251_v50 = vld [vmem:[%s6196_s5 + $0x80] sm:$0x1] }
  0xb1   : > { %v6491_v61 = vpop.f32.mrf.mxu0 }
  0xb3   : > { %5403 = vmatmul.msk.bf16.gmra.mxu1 %vm324_vm1, %v973_v51  ;;  %5436 = vmatmul.msk.bf16.gmra.mxu2 %vm324_vm1, %v1470_v52  ;;  %v950_v51 = vunpack.c.l.b16 %v740_v26  ;;  %v1447_v52 = vunpack.c.l.b16 %v1373_v27  ;;  %v5989_v26 = vld [vmem:[%s6196_s5 + $0x60] sm:$0xff]  ;;  %v2540_v27 = vpack.c.b16 %v2516_v3, %v2515_v43 }
  0xb4   : > { %5549 = vmatmul.msk.bf16.gmra.mxu3 %vm324_vm1, %v5988_v55  ;;  %5614 = vmatmul.msk.bf16.gmra.mxu0 %vm324_vm1, %v2539_v56  ;;  %v6525_v55 = vrot.slane %v751_v28, 5  ;;  %v757_v56 = vrot.slane %v755_v23, 4  ;;  %v1245_v28 = vld [vmem:[%s6196_s5 + $0x68] sm:$0x1] }
  0xb5   : > { %v974_v10 = vpack.c.b16 %v950_v51, %v949_v37  ;;  %v1471_v17 = vpack.c.b16 %v1447_v52, %v1446_v38  ;;  %v1378_v37 = vrot.slane %v1376_v15, 4  ;;  %v525_v38 = vld [vmem:[%s6196_s5 + $0x6c] sm:$0xf]  ;;  %v1379_v44 = vrot.slane %v1245_v28, 5  ;;  %v526_v51 = vld [vmem:[%s6196_s5 + $0x70] sm:$0xf] }
  0xb6   : > { %v6507_v25 = vpop.f32.mrf.mxu2  ;;  %v758_v12 = vor.u32 %v757_v56, %v6525_v55  ;;  %v766_v52 = vshrl.u32 %v525_v38, 16  ;;  %v769_v53 = vshll.u32 %v525_v38, 16  ;;  %v5586_v56 = vld [vmem:[%s6196_s5 + $0x78] sm:$0xf]  ;;  %v754_v60 = vsel %vm6253_vm6, %v749_v31, %v6525_v55  ;;  %v527_v38 = vld [vmem:[%s6196_s5 + $0x74] sm:$0x1] }
  0xb7   : > { %v6513_v30 = vpop.f32.mrf.mxu3  ;;  %v775_v43 = vshll.u32 %v526_v51, 16  ;;  %v779_v3 = vshrl.u32 %v526_v51, 16  ;;  %v2330_v55 = vsel %vm6253_vm6, %v2325_v48, %v2329_v49  ;;  %v2332_v15 = vshrl.u32 %v5586_v56, 16 }
  0xb8   : > { %7821 = vst [vmem:[#allocation6_spill] sm:$0xff] %v6513_v30  ;;  %v6515_v36 = vpop.f32.mrf.mxu1  ;;  %v759_v32 = vrot.slane %v758_v12, 4  ;;  %v2320_v12 = vsel %vm6253_vm6, %v2315_v46, %v6528_v1  ;;  %v768_v22 = vrot.slane %v766_v52, 4  ;;  %v1448_v28 = vunpack.c.l.b16 %v1377_v2  ;;  %v5588_v46 = vld [vmem:[%s6196_s5 + $0x80] sm:$0x1] }
  0xb9   : > { %v6517_v41 = vpop.f32.mrf.mxu0  ;;  %v6574_v31 = vrot.slane %v775_v43, 5  ;;  %v781_v1 = vrot.slane %v779_v3, 4  ;;  %v2517_v35 = vunpack.c.l.b16 %v2320_v12  ;;  %v2334_v48 = vrot.slane %v2332_v15, 4  ;;  %v5990_v15 = vld [vmem:[%s6196_s5 + $0x6c] sm:$0xff] }
  0xba   : > { %v764_v8 = vsel %vm6253_vm6, %v759_v32, %v763_v34  ;;  %v6579_v51 = vrot.slane %v2341_v19, 5  ;;  %v2347_v52 = vrot.slane %v2345_v20, 4  ;;  %v2351_v12 = vshll.u32 %v5588_v46, 16  ;;  %v1248_v19 = vld [vmem:[%s6196_s5 + $0x74] sm:$0x1] }
  0xbb   : > { %v952_v32 = vunpack.c.l.b16 %v764_v8  ;;  %v782_v57 = vor.u32 %v781_v1, %v6574_v31  ;;  %v529_v46 = vld [vmem:[%s6196_s5 + $0x7c] sm:$0xf] }
  0xbe   : > { %v6531_v9 = vpop.f32.mrf.mxu2 }
  0xbf   : > { %v6534_v16 = vpop.f32.mrf.mxu3 }
  0xc0   : > { %7822 = vst [vmem:[#allocation7_spill] sm:$0xff] %v6534_v16  ;;  %v6538_v24 = vpop.f32.mrf.mxu1 }
  0xc1   : > { %v6542_v23 = vpop.f32.mrf.mxu0 }
  0xc3   : > { %5404 = vmatmul.msk.bf16.gmra.mxu1 %vm324_vm1, %v974_v10  ;;  %5437 = vmatmul.msk.bf16.gmra.mxu2 %vm324_vm1, %v1471_v17  ;;  %v1380_v10 = vsel %vm6258_vm7, %v1378_v37, %v1379_v44  ;;  %v2335_v17 = vshll.u32 %v5586_v56, 16  ;;  %v2518_v37 = vunpack.c.l.b16 %v2330_v55  ;;  %v1247_v44 = vld [vmem:[%s6196_s5 + $0x70] sm:$0xf] }
  0xc4   : > { %5550 = vmatmul.msk.bf16.gmra.mxu3 %vm324_vm1, %v5989_v26  ;;  %5615 = vmatmul.msk.bf16.gmra.mxu0 %vm324_vm1, %v2540_v27  ;;  %v771_v26 = vrot.slane %v769_v53, 5  ;;  %v951_v27 = vunpack.c.l.b16 %v754_v60  ;;  %v1449_v34 = vunpack.c.l.b16 %v1380_v10  ;;  %v785_v60 = vshll.u32 %v527_v38, 16  ;;  %v1246_v10 = vld [vmem:[%s6196_s5 + $0x6c] sm:$0xe] }
  0xc5   : > { %v2337_v49 = vrot.slane %v2335_v17, 5  ;;  %v1383_v2 = vrot.slane %v1247_v44, 5  ;;  %v2541_v17 = vpack.c.b16 %v2518_v37, %v2517_v35  ;;  %v528_v44 = vld [vmem:[%s6196_s5 + $0x78] sm:$0xf]  ;;  %v1386_v35 = vrot.slane %v1248_v19, 5 }
  0xc6   : > { %v6552_v59 = vpop.f32.mrf.mxu2  ;;  %v772_v53 = vor.u32 %v771_v26, %v768_v22  ;;  %v975_v3 = vpack.c.b16 %v952_v32, %v951_v27  ;;  %v1472_v8 = vpack.c.b16 %v1449_v34, %v1448_v28  ;;  %v2348_v22 = vor.u32 %v2347_v52, %v6579_v51 }
  0xc7   : > { %v6559_v4 = vpop.f32.mrf.mxu3  ;;  %v2338_v20 = vor.u32 %v2337_v49, %v2334_v48  ;;  %v783_v27 = vrot.slane %v782_v57, 4  ;;  %v787_v28 = vrot.slane %v785_v60, 5  ;;  %v5422_v32 = vrot.slane %v1246_v10, 9  ;;  %v5589_v48 = vld [vmem:[%s6196_s5 + $0x84] sm:$0xf] }
  0xc8   : > { %7823 = vst [vmem:[#allocation8_spill] sm:$0xff] %v6559_v4  ;;  %v6570_v14 = vpop.f32.mrf.mxu1  ;;  %v773_v38 = vrot.slane %v772_v53, 4  ;;  %v1385_v34 = vrot.slane %v1383_v2, 4  ;;  %v2353_v37 = vrot.slane %v2351_v12, 5  ;;  %v5590_v49 = vld [vmem:[%s6196_s5 + $0x88] sm:$0xf] }
  0xc9   : > { %v6572_v21 = vpop.f32.mrf.mxu0  ;;  %v2349_v52 = vrot.slane %v2348_v22, 4  ;;  %v790_v53 = vshrl.u32 %v528_v44, 16  ;;  %v793_v57 = vshll.u32 %v528_v44, 16  ;;  %v799_v10 = vshll.u32 %v529_v46, 16 }
  0xca   : > { %v778_v60 = vsel %vm6253_vm6, %v773_v38, %v6574_v31  ;;  %v2359_v19 = vshll.u32 %v5589_v48, 16  ;;  %v2365_v12 = vshll.u32 %v5590_v49, 16  ;;  %v1387_v31 = vsel %vm6258_vm7, %v1385_v34, %v1386_v35  ;;  %v1250_v34 = vld [vmem:[%s6196_s5 + $0x7c] sm:$0xf] }
  0xcb   : > { %v2354_v44 = vsel %vm6253_vm6, %v2349_v52, %v2353_v37  ;;  %v1390_v30 = vrot.slane %v1250_v34, 5 }
  0xcc   : > { %v6620_v16 = vrot.slane %v2365_v12, 5 }
  0xce   : > { %v6581_v56 = vpop.f32.mrf.mxu2 }
  0xcf   : > { %v6584_v43 = vpop.f32.mrf.mxu3 }
  0xd0   : > { %7824 = vst [vmem:[#allocation9_spill] sm:$0xff] %v6584_v43  ;;  %v1043_v55 = vpop.f32.mrf.mxu1  ;;  %v2369_v43 = vshrl.u32 %v5590_v49, 16  ;;  %v530_v49 = vld [vmem:[%s6196_s5 + $0x80] sm:$0x1] }
  0xd1   : > { %v1155_v26 = vadd.f32 %v1043_v55, %v6394_v42  ;;  %v6591_v1 = vpop.f32.mrf.mxu0  ;;  %v2339_v42 = vrot.slane %v2338_v20, 4  ;;  %v1384_v20 = vsel %vm6258_vm7, %v5422_v32, %v1383_v2  ;;  %v6617_v2 = vrot.slane %v799_v10, 5 }
  0xd2   : > { %v1450_v52 = vunpack.c.l.b16 %v1384_v20  ;;  %v809_v10 = vshll.u32 %v530_v49, 16 }
  0xd3   : > { %5405 = vmatmul.msk.bf16.gmra.mxu1 %vm324_vm1, %v975_v3  ;;  %5438 = vmatmul.msk.bf16.gmra.mxu2 %vm324_vm1, %v1472_v8  ;;  %v803_v3 = vshrl.u32 %v529_v46, 16  ;;  %v2356_v8 = vshrl.u32 %v5589_v48, 16  ;;  %v2344_v38 = vsel %vm6253_vm6, %v2339_v42, %v6579_v51  ;;  %v795_v46 = vrot.slane %v793_v57, 5  ;;  %v5591_v57 = vld [vmem:[%s6196_s5 + $0x8c] sm:$0x1] }
  0xd4   : > { %5551 = vmatmul.msk.bf16.gmra.mxu3 %vm324_vm1, %v5990_v15  ;;  %5616 = vmatmul.msk.bf16.gmra.mxu0 %vm324_vm1, %v2541_v17  ;;  %v788_v17 = vsel %vm6253_vm6, %v783_v27, %v787_v28  ;;  %v2371_v51 = vrot.slane %v2369_v43, 4  ;;  %v953_v42 = vunpack.c.l.b16 %v778_v60  ;;  %v2375_v60 = vshll.u32 %v5591_v57, 16 }
  0xd5   : > { %v805_v32 = vrot.slane %v803_v3, 4  ;;  %v2358_v35 = vrot.slane %v2356_v8, 4  ;;  %v954_v37 = vunpack.c.l.b16 %v788_v17  ;;  %v811_v49 = vrot.slane %v809_v10, 5 }
  0xd6   : > { %v1540_v55 = vpop.f32.mrf.mxu2  ;;  %v2372_v43 = vor.u32 %v2371_v51, %v6620_v16  ;;  %v1392_v51 = vrot.slane %v1390_v30, 4  ;;  %v814_v57 = vshrl.u32 %v531_v7, 16 }
  0xd7   : > { %v1652_v4 = vadd.f32 %v1540_v55, %v1155_v26  ;;  %v1891_v15 = vpop.f32.mrf.mxu3  ;;  %v792_v26 = vrot.slane %v790_v53, 4  ;;  %v2361_v55 = vrot.slane %v2359_v19, 5  ;;  %v1451_v53 = vunpack.c.l.b16 %v1387_v31 }
  0xd8   : > { %v1045_v22 = vpop.f32.mrf.mxu1  ;;  %v806_v3 = vor.u32 %v805_v32, %v6617_v2  ;;  %v976_v20 = vpack.c.b16 %v954_v37, %v953_v42  ;;  %v2373_v37 = vrot.slane %v2372_v43, 4 }
  0xd9   : > { %v2003_v48 = vadd.f32 %v1891_v15, %v1652_v4  ;;  %v1156_v27 = vadd.f32 %v1045_v22, %v6422_v11  ;;  %v2611_v28 = vpop.f32.mrf.mxu0  ;;  %v2519_v4 = vunpack.c.l.b16 %v2344_v38  ;;  %v2520_v11 = vunpack.c.l.b16 %v2354_v44  ;;  %v1249_v22 = vld [vmem:[%s6196_s5 + $0x78] sm:$0xe] }
  0xda   : > { %v796_v15 = vor.u32 %v795_v46, %v792_v26  ;;  %v2362_v19 = vor.u32 %v2361_v55, %v2358_v35  ;;  %v1473_v31 = vpack.c.b16 %v1451_v53, %v1450_v52  ;;  %v5991_v44 = vld [vmem:[%s6196_s5 + $0x78] sm:$0xff]  ;;  %v5423_v32 = vrot.slane %v1249_v22, 9  ;;  %v532_v53 = vld [vmem:[%s6196_s5 + $0x88] sm:$0xf]  ;;  %v5593_v22 = vld [vmem:[%s6196_s5 + $0x94] sm:$0xf] }
  0xdb   : > { %v2542_v26 = vpack.c.b16 %v2520_v11, %v2519_v4  ;;  %v807_v55 = vrot.slane %v806_v3, 4  ;;  %v2377_v52 = vrot.slane %v2375_v60, 5  ;;  %v817_v4 = vshll.u32 %v531_v7, 16  ;;  %v5592_v3 = vld [vmem:[%s6196_s5 + $0x90] sm:$0xf] }
  0xdc   : > { %v797_v46 = vrot.slane %v796_v15, 4  ;;  %v2363_v42 = vrot.slane %v2362_v19, 4  ;;  %v6636_v11 = vadd.f32 %v6591_v1, %v2003_v48  ;;  %v823_v15 = vshll.u32 %v532_v53, 16 }
  0xdd   : > { %v827_v10 = vshrl.u32 %v532_v53, 16  ;;  %v812_v7 = vsel %vm6253_vm6, %v807_v55, %v811_v49  ;;  %v1391_v1 = vsel %vm6258_vm7, %v5423_v32, %v1390_v30  ;;  %v2378_v43 = vsel %vm6253_vm6, %v2373_v37, %v2377_v52  ;;  %v1253_v52 = vld [vmem:[%s6196_s5 + $0x88] sm:$0xf] }
  0xde   : > { %v1542_v8 = vpop.f32.mrf.mxu2  ;;  %v816_v60 = vrot.slane %v814_v57, 4  ;;  %v2389_v30 = vshll.u32 %v5593_v22, 16  ;;  %v6660_v32 = vrot.slane %v823_v15, 5  ;;  %v1452_v55 = vunpack.c.l.b16 %v1391_v1 }
  0xdf   : > { %v1653_v12 = vadd.f32 %v1542_v8, %v1156_v27  ;;  %v1893_v17 = vpop.f32.mrf.mxu3  ;;  %v1393_v27 = vrot.slane %v1251_v50, 5  ;;  %v802_v50 = vsel %vm6253_vm6, %v797_v46, %v6617_v2 }
  0xe0   : > { %v1048_v38 = vpop.f32.mrf.mxu1 }
  0xe1   : > { %v2004_v34 = vadd.f32 %v1893_v17, %v1653_v12  ;;  %v1157_v33 = vadd.f32 %v1048_v38, %v6442_v47  ;;  %v6630_v35 = vpop.f32.mrf.mxu0  ;;  %v1394_v48 = vsel %vm6258_vm7, %v1392_v51, %v1393_v27  ;;  %v819_v12 = vrot.slane %v817_v4, 5 }
  0xe2   : > { %v2383_v38 = vshll.u32 %v5592_v3, 16  ;;  %v1453_v51 = vunpack.c.l.b16 %v1394_v48  ;;  %v6663_v4 = vrot.slane %v2389_v30, 5 }
  0xe3   : > { %5406 = vmatmul.msk.bf16.gmra.mxu1 %vm324_vm1, %v976_v20  ;;  %5439 = vmatmul.msk.bf16.gmra.mxu2 %vm324_vm1, %v1473_v31  ;;  %v6638_v47 = vadd.f32 %v2611_v28, %v2004_v34  ;;  %v2368_v28 = vsel %vm6253_vm6, %v2363_v42, %v6620_v16  ;;  %v533_v20 = vld [vmem:[%s6196_s5 + $0x8c] sm:$0x1]  ;;  %v2380_v31 = vshrl.u32 %v5592_v3, 16  ;;  %v955_v16 = vunpack.c.l.b16 %v802_v50 }
  0xe4   : > { %5552 = vmatmul.msk.bf16.gmra.mxu3 %vm324_vm1, %v5991_v44  ;;  %5617 = vmatmul.msk.bf16.gmra.mxu0 %vm324_vm1, %v2542_v26  ;;  %v2393_v44 = vshrl.u32 %v5593_v22, 16  ;;  %v956_v34 = vunpack.c.l.b16 %v812_v7  ;;  %v2521_v27 = vunpack.c.l.b16 %v2368_v28  ;;  %v2522_v42 = vunpack.c.l.b16 %v2378_v43  ;;  %v5594_v22 = vld [vmem:[%s6196_s5 + $0x98] sm:$0x1] }
  0xe5   : > { %v833_v37 = vshll.u32 %v533_v20, 16  ;;  %v2382_v53 = vrot.slane %v2380_v31, 4  ;;  %v2385_v57 = vrot.slane %v2383_v38, 5  ;;  %v820_v15 = vor.u32 %v819_v12, %v816_v60  ;;  %v1254_v20 = vld [vmem:[%s6196_s5 + $0x8c] sm:$0x1] }
  0xe6   : > { %v1545_v8 = vpop.f32.mrf.mxu2  ;;  %v1474_v7 = vpack.c.b16 %v1453_v51, %v1452_v55  ;;  %v2543_v28 = vpack.c.b16 %v2522_v42, %v2521_v27  ;;  %v2399_v38 = vshll.u32 %v5594_v22, 16  ;;  %v1400_v51 = vrot.slane %v1254_v20, 5  ;;  %v535_v27 = vld [vmem:[%s6196_s5 + $0x94] sm:$0xf]  ;;  %v5595_v42 = vld [vmem:[%s6196_s5 + $0x9c] sm:$0xf] }
  0xe7   : > { %v1654_v2 = vadd.f32 %v1545_v8, %v1157_v33  ;;  %v1896_v19 = vpop.f32.mrf.mxu3  ;;  %v829_v33 = vrot.slane %v827_v10, 4  ;;  %v1252_v10 = vld [vmem:[%s6196_s5 + $0x84] sm:$0xe]  ;;  %v977_v8 = vpack.c.b16 %v956_v34, %v955_v16  ;;  %v2386_v60 = vor.u32 %v2385_v57, %v2382_v53  ;;  %v534_v34 = vld [vmem:[%s6196_s5 + $0x90] sm:$0xf] }
  0xe8   : > { %v1050_v17 = vpop.f32.mrf.mxu1  ;;  %v5424_v31 = vrot.slane %v1252_v10, 9  ;;  %v847_v22 = vshll.u32 %v535_v27, 16 }
  0xe9   : > { %v2005_v26 = vadd.f32 %v1896_v19, %v1654_v2  ;;  %v1158_v46 = vadd.f32 %v1050_v17, %v6472_v18  ;;  %v2616_v49 = vpop.f32.mrf.mxu0  ;;  %v2395_v18 = vrot.slane %v2393_v44, 4  ;;  %v830_v3 = vor.u32 %v829_v33, %v6660_v32  ;;  %v5992_v17 = vld [vmem:[%s6196_s5 + $0x84] sm:$0xff] }
  0xea   : > { %v835_v2 = vrot.slane %v833_v37, 5  ;;  %v1397_v19 = vrot.slane %v1253_v52, 5  ;;  %v2387_v53 = vrot.slane %v2386_v60, 4 }
  0xeb   : > { %v2396_v12 = vor.u32 %v2395_v18, %v6663_v4  ;;  %v831_v16 = vrot.slane %v830_v3, 4  ;;  %v6680_v37 = vadd.f32 %v6630_v35, %v2005_v26  ;;  %v2401_v18 = vrot.slane %v2399_v38, 5 }
  0xec   : > { %v1399_v55 = vrot.slane %v1397_v19, 4  ;;  %v838_v26 = vshrl.u32 %v534_v34, 16 }
  0xed   : > { %v2397_v57 = vrot.slane %v2396_v12, 4  ;;  %v836_v35 = vsel %vm6253_vm6, %v831_v16, %v835_v2  ;;  %v2392_v2 = vsel %vm6253_vm6, %v2387_v53, %v6663_v4  ;;  %v6703_v16 = vrot.slane %v847_v22, 5  ;;  %v1255_v22 = vld [vmem:[%s6196_s5 + $0x90] sm:$0xe] }
  0xee   : > { %v1547_v50 = vpop.f32.mrf.mxu2  ;;  %v958_v20 = vunpack.c.l.b16 %v836_v35 }
  0xef   : > { %v1655_v1 = vadd.f32 %v1547_v50, %v1158_v46  ;;  %v1898_v48 = vpop.f32.mrf.mxu3  ;;  %v821_v46 = vrot.slane %v820_v15, 4  ;;  %v5596_v15 = vld [vmem:[%s6196_s5 + $0xa0] sm:$0xf]  ;;  %v851_v50 = vshrl.u32 %v535_v27, 16 }
  0xf0   : > { %v1053_v43 = vpop.f32.mrf.mxu1 }
  0xf1   : > { %v2006_v30 = vadd.f32 %v1898_v48, %v1655_v1  ;;  %v1159_v44 = vadd.f32 %v1053_v43, %v6491_v61  ;;  %v6672_v33 = vpop.f32.mrf.mxu0  ;;  %v1398_v61 = vsel %vm6258_vm7, %v5424_v31, %v1397_v19  ;;  %v826_v3 = vsel %vm6253_vm6, %v821_v46, %v6660_v32 }
  0xf2   : > { %v2413_v19 = vshll.u32 %v5596_v15, 16  ;;  %v2417_v43 = vshrl.u32 %v5596_v15, 16  ;;  %v957_v32 = vunpack.c.l.b16 %v826_v3  ;;  %v2402_v31 = vsel %vm6253_vm6, %v2397_v57, %v2401_v18  ;;  %v5597_v3 = vld [vmem:[%s6196_s5 + $0xa4] sm:$0x1] }
  0xf3   : > { %5407 = vmatmul.msk.bf16.gmra.mxu1 %vm324_vm1, %v977_v8  ;;  %5440 = vmatmul.msk.bf16.gmra.mxu2 %vm324_vm1, %v1474_v7  ;;  %v6682_v52 = vadd.f32 %v2616_v49, %v2006_v30  ;;  %v841_v49 = vshll.u32 %v534_v34, 16  ;;  %v2404_v8 = vshrl.u32 %v5595_v42, 16  ;;  %v2407_v7 = vshll.u32 %v5595_v42, 16  ;;  %v536_v30 = vld [vmem:[%s6196_s5 + $0x98] sm:$0x1] }
  0xf4   : > { %5553 = vmatmul.msk.bf16.gmra.mxu3 %vm324_vm1, %v5992_v17  ;;  %5618 = vmatmul.msk.bf16.gmra.mxu0 %vm324_vm1, %v2543_v28  ;;  %v1401_v28 = vsel %vm6258_vm7, %v1399_v55, %v1400_v51  ;;  %v853_v34 = vrot.slane %v851_v50, 4  ;;  %v1454_v27 = vunpack.c.l.b16 %v1398_v61  ;;  %v1256_v42 = vld [vmem:[%s6196_s5 + $0x94] sm:$0xf]  ;;  %v6706_v53 = vrot.slane %v2413_v19, 5  ;;  %v1257_v50 = vld [vmem:[%s6196_s5 + $0x98] sm:$0x1] }
  0xf5   : > { %v843_v46 = vrot.slane %v841_v49, 5  ;;  %v2406_v55 = vrot.slane %v2404_v8, 4  ;;  %v2409_v51 = vrot.slane %v2407_v7, 5  ;;  %v1455_v4 = vunpack.c.l.b16 %v1401_v28 }
  0xf6   : > { %v1550_v10 = vpop.f32.mrf.mxu2  ;;  %v2419_v57 = vrot.slane %v2417_v43, 4  ;;  %v2523_v18 = vunpack.c.l.b16 %v2392_v2  ;;  %v857_v15 = vshll.u32 %v536_v30, 16  ;;  %v978_v35 = vpack.c.b16 %v958_v20, %v957_v32 }
  0xf7   : > { %v1656_v1 = vadd.f32 %v1550_v10, %v1159_v44  ;;  %v1901_v48 = vpop.f32.mrf.mxu3  ;;  %v840_v44 = vrot.slane %v838_v26, 4  ;;  %v854_v10 = vor.u32 %v853_v34, %v6703_v16  ;;  %v1404_v8 = vrot.slane %v1256_v42, 5  ;;  %v537_v34 = vld [vmem:[%s6196_s5 + $0x9c] sm:$0xf] }
  0xf8   : > { %v1055_v17 = vpop.f32.mrf.mxu1  ;;  %v2410_v61 = vor.u32 %v2409_v51, %v2406_v55  ;;  %v2420_v28 = vor.u32 %v2419_v57, %v6706_v53  ;;  %v2423_v19 = vshll.u32 %v5597_v3, 16 }
  0xf9   : > { %v2007_v60 = vadd.f32 %v1901_v48, %v1656_v1  ;;  %v1160_v12 = vadd.f32 %v1055_v17, %v6517_v41  ;;  %v2621_v38 = vpop.f32.mrf.mxu0  ;;  %v2524_v41 = vunpack.c.l.b16 %v2402_v31  ;;  %v844_v49 = vor.u32 %v843_v46, %v840_v44  ;;  %v5993_v17 = vld [vmem:[%s6196_s5 + $0x90] sm:$0xff] }
  0xfa   : > { %v1475_v48 = vpack.c.b16 %v1455_v4, %v1454_v27  ;;  %v859_v31 = vrot.slane %v857_v15, 5  ;;  %v5425_v44 = vrot.slane %v1255_v22, 9  ;;  %v1407_v46 = vrot.slane %v1257_v50, 5 }
  0xfb   : > { %v2544_v2 = vpack.c.b16 %v2524_v41, %v2523_v18  ;;  %v845_v55 = vrot.slane %v844_v49, 4  ;;  %v1406_v51 = vrot.slane %v1404_v8, 4  ;;  %v2411_v27 = vrot.slane %v2410_v61, 4  ;;  %v538_v18 = vld [vmem:[%s6196_s5 + $0xa0] sm:$0xf] }
  0xfc   : > { %v2421_v4 = vrot.slane %v2420_v28, 4  ;;  %v2425_v42 = vrot.slane %v2423_v19, 5  ;;  %v862_v41 = vshrl.u32 %v537_v34, 16  ;;  %v865_v15 = vshll.u32 %v537_v34, 16 }
  0xfd   : > { %v1405_v3 = vsel %vm6258_vm7, %v5425_v44, %v1404_v8  ;;  %v850_v49 = vsel %vm6253_vm6, %v845_v55, %v6703_v16  ;;  %v871_v61 = vshll.u32 %v538_v18, 16 }
  0xfe   : > { %v1552_v26 = vpop.f32.mrf.mxu2  ;;  %v2426_v8 = vsel %vm6253_vm6, %v2421_v4, %v2425_v42  ;;  %v864_v16 = vrot.slane %v862_v41, 4  ;;  %v1456_v44 = vunpack.c.l.b16 %v1405_v3  ;;  %v1259_v42 = vld [vmem:[%s6196_s5 + $0xa0] sm:$0xf] }
  0xff   : > { %v1657_v7 = vadd.f32 %v1552_v26, %v1160_v12  ;;  %v1903_v1 = vpop.f32.mrf.mxu3  ;;  %v855_v12 = vrot.slane %v854_v10, 4  ;;  %v5599_v10 = vld [vmem:[%s6196_s5 + $0xac] sm:$0xf]  ;;  %v6745_v34 = vrot.slane %v871_v61, 5 }
 0x100   : > { %v1058_v43 = vpop.f32.mrf.mxu1 }
 0x101   : > { %v2008_v32 = vadd.f32 %v1903_v1, %v1657_v7  ;;  %v1161_v20 = vadd.f32 %v1058_v43, %v6542_v23  ;;  %v6715_v30 = vpop.f32.mrf.mxu0  ;;  %v6721_v23 = vadd.f32 %v6672_v33, %v2007_v60  ;;  %v860_v33 = vsel %vm6253_vm6, %v855_v12, %v859_v31 }
 0x102   : > { %v1408_v60 = vsel %vm6258_vm7, %v1406_v51, %v1407_v46  ;;  %v875_v7 = vshrl.u32 %v538_v18, 16  ;;  %v2441_v31 = vshrl.u32 %v5599_v10, 16  ;;  %v2526_v51 = vunpack.c.l.b16 %v2426_v8  ;;  %v1258_v18 = vld [vmem:[%s6196_s5 + $0x9c] sm:$0xe] }
 0x103   : > { %5408 = vmatmul.msk.bf16.gmra.mxu1 %vm324_vm1, %v978_v35  ;;  %5441 = vmatmul.msk.bf16.gmra.mxu2 %vm324_vm1, %v1475_v48  ;;  %v6723_v57 = vadd.f32 %v2621_v38, %v2008_v32  ;;  %v5598_v35 = vld [vmem:[%s6196_s5 + $0xa8] sm:$0xf]  ;;  %v2416_v38 = vsel %vm6253_vm6, %v2411_v27, %v6706_v53  ;;  %v867_v48 = vrot.slane %v865_v15, 5  ;;  %v959_v32 = vunpack.c.l.b16 %v850_v49  ;;  %v539_v27 = vld [vmem:[%s6196_s5 + $0xa4] sm:$0x1]  ;;  %v5994_v8 = vld [vmem:[%s6196_s5 + $0x9c] sm:$0xff] }
 0x104   : > { %5554 = vmatmul.msk.bf16.gmra.mxu3 %vm324_vm1, %v5993_v17  ;;  %5619 = vmatmul.msk.bf16.gmra.mxu0 %vm324_vm1, %v2544_v2  ;;  %v2428_v28 = vshrl.u32 %v5598_v35, 16  ;;  %v2431_v19 = vshll.u32 %v5598_v35, 16  ;;  %v2437_v2 = vshll.u32 %v5599_v10, 16  ;;  %v1457_v46 = vunpack.c.l.b16 %v1408_v60  ;;  %v5600_v49 = vld [vmem:[%s6196_s5 + $0xb0] sm:$0x1] }
 0x105   : > { %v877_v55 = vrot.slane %v875_v7, 4  ;;  %v2525_v12 = vunpack.c.l.b16 %v2416_v38  ;;  %v868_v4 = vor.u32 %v867_v48, %v864_v16  ;;  %v2443_v35 = vrot.slane %v2441_v31, 4 }
 0x106   : > { %v1555_v26 = vpop.f32.mrf.mxu2  ;;  %v2430_v41 = vrot.slane %v2428_v28, 4  ;;  %v6750_v15 = vrot.slane %v2437_v2, 5  ;;  %v1476_v10 = vpack.c.b16 %v1457_v46, %v1456_v44  ;;  %v1411_v16 = vrot.slane %v1259_v42, 5  ;;  %v540_v44 = vld [vmem:[%s6196_s5 + $0xa8] sm:$0xf] }
 0x107   : > { %v1658_v22 = vadd.f32 %v1555_v26, %v1161_v20  ;;  %v1906_v50 = vpop.f32.mrf.mxu3  ;;  %v960_v20 = vunpack.c.l.b16 %v860_v33  ;;  %v878_v38 = vor.u32 %v877_v55, %v6745_v34  ;;  %v2545_v61 = vpack.c.b16 %v2526_v51, %v2525_v12  ;;  %v541_v46 = vld [vmem:[%s6196_s5 + $0xac] sm:$0xf] }
 0x108   : > { %v1060_v1 = vpop.f32.mrf.mxu1  ;;  %v869_v7 = vrot.slane %v868_v4, 4  ;;  %v2447_v31 = vshll.u32 %v5600_v49, 16  ;;  %v1413_v4 = vrot.slane %v1411_v16, 4  ;;  %v895_v49 = vshll.u32 %v541_v46, 16 }
 0x109   : > { %v2009_v43 = vadd.f32 %v1906_v50, %v1658_v22  ;;  %v1162_v17 = vadd.f32 %v1060_v1, %v6572_v21  ;;  %v2626_v53 = vpop.f32.mrf.mxu0  ;;  %v2433_v21 = vrot.slane %v2431_v19, 5  ;;  %v979_v3 = vpack.c.b16 %v960_v20, %v959_v32  ;;  %v1260_v19 = vld [vmem:[%s6196_s5 + $0xa4] sm:$0x1] }
 0x10a   : > { %v881_v22 = vshll.u32 %v539_v27, 16  ;;  %v5426_v1 = vrot.slane %v1258_v18, 9  ;;  %v879_v32 = vrot.slane %v878_v38, 4  ;;  %v874_v51 = vsel %vm6253_vm6, %v869_v7, %v6745_v34  ;;  %v5601_v18 = vld [vmem:[%s6196_s5 + $0xb4] sm:$0xf] }
 0x10b   : > { %v2434_v2 = vor.u32 %v2433_v21, %v2430_v41  ;;  %v6764_v55 = vadd.f32 %v6715_v30, %v2009_v43  ;;  %v1414_v42 = vrot.slane %v1260_v19, 5  ;;  %v5602_v21 = vld [vmem:[%s6196_s5 + $0xb8] sm:$0xf]  ;;  %v2452_v38 = vshrl.u32 %v5601_v18, 16 }
 0x10c   : > { %v883_v20 = vrot.slane %v881_v22, 5  ;;  %v1412_v27 = vsel %vm6258_vm7, %v5426_v1, %v1411_v16  ;;  %v2455_v22 = vshll.u32 %v5601_v18, 16  ;;  %v2465_v7 = vshrl.u32 %v5602_v21, 16 }
 0x10d   : > { %v2435_v30 = vrot.slane %v2434_v2, 4 }
 0x10e   : > { %v1557_v26 = vpop.f32.mrf.mxu2 }
 0x10f   : > { %v1659_v33 = vadd.f32 %v1557_v26, %v1162_v17  ;;  %v1908_v60 = vpop.f32.mrf.mxu3  ;;  %v2444_v17 = vor.u32 %v2443_v35, %v6750_v15  ;;  %v886_v26 = vshrl.u32 %v540_v44, 16  ;;  %v2440_v19 = vsel %vm6253_vm6, %v2435_v30, %v6750_v15 }
 0x110   : > { %v1063_v50 = vpop.f32.mrf.mxu1  ;;  %v2527_v18 = vunpack.c.l.b16 %v2440_v19  ;;  %v2467_v30 = vrot.slane %v2465_v7, 4  ;;  %v5995_v19 = vld [vmem:[%s6196_s5 + $0xa8] sm:$0xff] }
 0x111   : > { %v2010_v48 = vadd.f32 %v1908_v60, %v1659_v33  ;;  %v6755_v28 = vpop.f32.mrf.mxu0  ;;  %v1163_v41 = vadd.f32 %v1063_v50, %v6391_v39  ;;  %v2445_v43 = vrot.slane %v2444_v17, 4  ;;  %v899_v33 = vshrl.u32 %v541_v46, 16  ;;  %v542_v17 = vld [vmem:[%s6196_s5 + $0xb0] sm:$0x1] }
 0x112   : > { %v1415_v39 = vsel %vm6258_vm7, %v1413_v4, %v1414_v42  ;;  %v1458_v50 = vunpack.c.l.b16 %v1412_v27  ;;  %v1262_v4 = vld [vmem:[%s6196_s5 + $0xac] sm:$0xf]  ;;  %v2454_v42 = vrot.slane %v2452_v38, 4 }
 0x113   : > { %5409 = vmatmul.msk.bf16.gmra.mxu1 %vm324_vm1, %v979_v3  ;;  %5442 = vmatmul.msk.bf16.gmra.mxu2 %vm324_vm1, %v1476_v10  ;;  %v6766_v12 = vadd.f32 %v2626_v53, %v2010_v48  ;;  %v2449_v53 = vrot.slane %v2447_v31, 5  ;;  %v889_v3 = vshll.u32 %v540_v44, 16  ;;  %v884_v10 = vsel %vm6253_vm6, %v879_v32, %v883_v20 }
 0x114   : > { %5555 = vmatmul.msk.bf16.gmra.mxu3 %vm324_vm1, %v5994_v8  ;;  %5620 = vmatmul.msk.bf16.gmra.mxu0 %vm324_vm1, %v2545_v61  ;;  %v2461_v61 = vshll.u32 %v5602_v21, 16  ;;  %v961_v48 = vunpack.c.l.b16 %v874_v51  ;;  %v888_v31 = vrot.slane %v886_v26, 4  ;;  %v6788_v20 = vrot.slane %v895_v49, 5  ;;  %v5603_v21 = vld [vmem:[%s6196_s5 + $0xbc] sm:$0x1] }
 0x115   : > { %v2450_v2 = vsel %vm6253_vm6, %v2445_v43, %v2449_v53  ;;  %v891_v32 = vrot.slane %v889_v3, 5  ;;  %v901_v44 = vrot.slane %v899_v33, 4  ;;  %v962_v46 = vunpack.c.l.b16 %v884_v10  ;;  %v1261_v49 = vld [vmem:[%s6196_s5 + $0xa8] sm:$0xe] }
 0x116   : > { %v1560_v35 = vpop.f32.mrf.mxu2  ;;  %v1459_v27 = vunpack.c.l.b16 %v1415_v39  ;;  %v2457_v51 = vrot.slane %v2455_v22, 5  ;;  %v6791_v15 = vrot.slane %v2461_v61, 5  ;;  %v905_v53 = vshll.u32 %v542_v17, 16  ;;  %v1263_v22 = vld [vmem:[%s6196_s5 + $0xb0] sm:$0x1] }
 0x117   : > { %v1660_v60 = vadd.f32 %v1560_v35, %v1163_v41  ;;  %v1911_v34 = vpop.f32.mrf.mxu3  ;;  %v2528_v41 = vunpack.c.l.b16 %v2450_v2  ;;  %v892_v26 = vor.u32 %v891_v32, %v888_v31  ;;  %v902_v3 = vor.u32 %v901_v44, %v6788_v20 }
 0x118   : > { %v1065_v8 = vpop.f32.mrf.mxu1  ;;  %v1418_v33 = vrot.slane %v1262_v4, 5  ;;  %v980_v10 = vpack.c.b16 %v962_v46, %v961_v48  ;;  %v1477_v38 = vpack.c.b16 %v1459_v27, %v1458_v50  ;;  %v2458_v39 = vor.u32 %v2457_v51, %v2454_v42 }
 0x119   : > { %v2011_v1 = vadd.f32 %v1911_v34, %v1660_v60  ;;  %v2631_v16 = vpop.f32.mrf.mxu0  ;;  %v1164_v43 = vadd.f32 %v1065_v8, %v6420_v6  ;;  %v2546_v7 = vpack.c.b16 %v2528_v41, %v2527_v18  ;;  %v2468_v2 = vor.u32 %v2467_v30, %v6791_v15  ;;  %v543_v18 = vld [vmem:[%s6196_s5 + $0xb4] sm:$0xf]  ;;  %v544_v30 = vld [vmem:[%s6196_s5 + $0xb8] sm:$0xf] }
 0x11a   : > { %v2471_v6 = vshll.u32 %v5603_v21, 16  ;;  %v907_v31 = vrot.slane %v905_v53, 5  ;;  %v5427_v32 = vrot.slane %v1261_v49, 9  ;;  %v893_v44 = vrot.slane %v892_v26, 4  ;;  %v5604_v53 = vld [vmem:[%s6196_s5 + $0xc0] sm:$0xf] }
 0x11b   : > { %v903_v4 = vrot.slane %v902_v3, 4  ;;  %v1421_v48 = vrot.slane %v1263_v22, 5  ;;  %v2459_v50 = vrot.slane %v2458_v39, 4  ;;  %v6803_v46 = vadd.f32 %v6755_v28, %v2011_v1  ;;  %v5605_v26 = vld [vmem:[%s6196_s5 + $0xc4] sm:$0xf] }
 0x11c   : > { %v2469_v42 = vrot.slane %v2468_v2, 4  ;;  %v2473_v51 = vrot.slane %v2471_v6, 5  ;;  %v1419_v1 = vsel %vm6258_vm7, %v5427_v32, %v1418_v33  ;;  %v923_v22 = vshrl.u32 %v544_v30, 16 }
 0x11d   : > { %v908_v28 = vsel %vm6253_vm6, %v903_v4, %v907_v31  ;;  %v2489_v2 = vshrl.u32 %v5605_v26, 16  ;;  %v545_v4 = vld [vmem:[%s6196_s5 + $0xbc] sm:$0x1] }
 0x11e   : > { %v1562_v35 = vpop.f32.mrf.mxu2 }
 0x11f   : > { %v1661_v60 = vadd.f32 %v1562_v35, %v1164_v43  ;;  %v1913_v34 = vpop.f32.mrf.mxu3  ;;  %v1420_v43 = vrot.slane %v1418_v33, 4  ;;  %v898_v35 = vsel %vm6253_vm6, %v893_v44, %v6788_v20  ;;  %v2474_v20 = vsel %vm6253_vm6, %v2469_v42, %v2473_v51  ;;  %v1265_v51 = vld [vmem:[%s6196_s5 + $0xb8] sm:$0xf] }
 0x120   : > { %v1068_v61 = vpop.f32.mrf.mxu1  ;;  %v2476_v33 = vshrl.u32 %v5604_v53, 16  ;;  %v963_v6 = vunpack.c.l.b16 %v898_v35  ;;  %v2530_v44 = vunpack.c.l.b16 %v2474_v20  ;;  %v925_v42 = vrot.slane %v923_v22, 4 }
 0x121   : > { %v2012_v8 = vadd.f32 %v1913_v34, %v1661_v60  ;;  %v2634_v17 = vpop.f32.mrf.mxu0  ;;  %v1165_v41 = vadd.f32 %v1068_v61, %v6437_v40  ;;  %v2464_v40 = vsel %vm6253_vm6, %v2459_v50, %v6791_v15  ;;  %v910_v60 = vshrl.u32 %v543_v18, 16 }
 0x122   : > { %v913_v34 = vshll.u32 %v543_v18, 16  ;;  %v1460_v15 = vunpack.c.l.b16 %v1419_v1  ;;  %v2529_v32 = vunpack.c.l.b16 %v2464_v40  ;;  %v2478_v18 = vrot.slane %v2476_v33, 4 }
 0x123   : > { %5410 = vmatmul.msk.bf16.gmra.mxu1 %vm324_vm1, %v980_v10  ;;  %5443 = vmatmul.msk.bf16.gmra.mxu2 %vm324_vm1, %v1477_v38  ;;  %v6805_v27 = vadd.f32 %v2631_v16, %v2012_v8  ;;  %v1422_v16 = vsel %vm6258_vm7, %v1420_v43, %v1421_v48  ;;  %v919_v38 = vshll.u32 %v544_v30, 16  ;;  %v964_v8 = vunpack.c.l.b16 %v908_v28 }
 0x124   : > { %5556 = vmatmul.msk.bf16.gmra.mxu3 %vm324_vm1, %v5995_v19  ;;  %5621 = vmatmul.msk.bf16.gmra.mxu0 %vm324_vm1, %v2546_v7  ;;  %v2479_v19 = vshll.u32 %v5604_v53, 16  ;;  %v2485_v7 = vshll.u32 %v5605_v26, 16  ;;  %v1461_v31 = vunpack.c.l.b16 %v1422_v16  ;;  %v912_v43 = vrot.slane %v910_v60, 4  ;;  %v1264_v53 = vld [vmem:[%s6196_s5 + $0xb4] sm:$0xe] }
 0x125   : > { %v915_v48 = vrot.slane %v913_v34, 5  ;;  %v6829_v50 = vrot.slane %v919_v38, 5  ;;  %v2491_v28 = vrot.slane %v2489_v2, 4  ;;  %v981_v16 = vpack.c.b16 %v964_v8, %v963_v6  ;;  %v5606_v26 = vld [vmem:[%s6196_s5 + $0xc8] sm:$0x1] }
 0x126   : > { %v1565_v21 = vpop.f32.mrf.mxu2  ;;  %v6836_v35 = vrot.slane %v2485_v7, 5  ;;  %v1478_v40 = vpack.c.b16 %v1461_v31, %v1460_v15  ;;  %v2547_v60 = vpack.c.b16 %v2530_v44, %v2529_v32  ;;  %v929_v34 = vshll.u32 %v545_v4, 16  ;;  %v5818_v31 = vld [vmem:[%s6196_s5 + $0x18] sm:$0xf]  ;;  %v5819_v32 = vld [vmem:[%s6196_s5 + $0x1c] sm:$0xf] }
 0x127   : > { %v1662_v3 = vadd.f32 %v1565_v21, %v1165_v41  ;;  %v1916_v49 = vpop.f32.mrf.mxu3  ;;  %v2481_v21 = vrot.slane %v2479_v19, 5  ;;  %v916_v38 = vor.u32 %v915_v48, %v912_v43  ;;  %v5428_v22 = vrot.slane %v1264_v53, 9 }
 0x128   : > { %v1070_v10 = vpop.f32.mrf.mxu1  ;;  %v1425_v33 = vrot.slane %v1265_v51, 5  ;;  %v2492_v2 = vor.u32 %v2491_v28, %v6836_v35  ;;  %v2495_v6 = vshll.u32 %v5606_v26, 16  ;;  %v931_v8 = vrot.slane %v929_v34, 5 }
 0x129   : > { %v2013_v39 = vadd.f32 %v1916_v49, %v1662_v3  ;;  %v2636_v61 = vpop.f32.mrf.mxu0  ;;  %v1166_v30 = vadd.f32 %v1070_v10, %v6465_v13  ;;  %v926_v13 = vor.u32 %v925_v42, %v6829_v50  ;;  %v1266_v10 = vld [vmem:[%s6196_s5 + $0xbc] sm:$0x1]  ;;  %v2482_v7 = vor.u32 %v2481_v21, %v2478_v18 }
 0x12a   : > { %v1428_v15 = vrot.slane %v1266_v10, 5  ;;  %v917_v4 = vrot.slane %v916_v38, 4  ;;  %v1426_v48 = vsel %vm6258_vm7, %v5428_v22, %v1425_v33  ;;  %v1427_v42 = vrot.slane %v1425_v33, 4  ;;  %v5625_v10 = vld [vmem:[%s6196_s5 + $0x10] sm:$0xf] }
 0x12b   : > { %v6832_v41 = vadd.f32 %v2634_v17, %v2013_v39  ;;  %v5996_v17 = vld [vmem:[%s6196_s5 + $0xb4] sm:$0xff]  ;;  %v927_v43 = vrot.slane %v926_v13, 4  ;;  %v2483_v18 = vrot.slane %v2482_v7, 4  ;;  %v2497_v53 = vrot.slane %v2495_v6, 5 }
 0x12c   : > { %v3679_v28 = vshrl.u32 %v5818_v31, 16 }
 0x12d   : > { %v2488_v38 = vsel %vm6253_vm6, %v2483_v18, %v6836_v35  ;;  %v5884_v35 = vld [vmem:[%s6196_s5 + $0x1c] sm:$0xf] }
 0x12e   : > { %v1567_v1 = vpop.f32.mrf.mxu2 }
 0x12f   : > { %v1663_v3 = vadd.f32 %v1567_v1, %v1166_v30  ;;  %v1918_v49 = vpop.f32.mrf.mxu3  ;;  %v2493_v30 = vrot.slane %v2492_v2, 4  ;;  %v3688_v1 = vshll.u32 %v5819_v32, 16 }
 0x130   : > { %v1073_v20 = vpop.f32.mrf.mxu1 }
 0x131   : > { %v2014_v39 = vadd.f32 %v1918_v49, %v1663_v3  ;;  %v2639_v19 = vpop.f32.mrf.mxu0  ;;  %v1167_v51 = vadd.f32 %v1073_v20, %v6488_v54  ;;  %v932_v54 = vsel %vm6253_vm6, %v927_v43, %v931_v8  ;;  %v2498_v13 = vsel %vm6253_vm6, %v2493_v30, %v2497_v53  ;;  %v5820_v8 = vld [vmem:[%s6196_s5 + $0x20] sm:$0x1] }
 0x132   : > { %v6867_v33 = vrot.slane %v3688_v1, 5  ;;  %v966_v2 = vunpack.c.l.b16 %v932_v54  ;;  %v2883_v43 = vrot.slane %v5625_v10, 5  ;;  %v3698_v30 = vshll.u32 %v5820_v8, 16  ;;  %v5822_v8 = vld [vmem:[%s6196_s5 + $0x28] sm:$0xf] }
 0x133   : > { %5411 = vmatmul.msk.bf16.gmra.mxu1 %vm324_vm1, %v981_v16  ;;  %5444 = vmatmul.msk.bf16.gmra.mxu2 %vm324_vm1, %v1478_v40  ;;  %v6847_v44 = vadd.f32 %v2636_v61, %v2014_v39  ;;  %v3682_v61 = vshll.u32 %v5818_v31, 16  ;;  %v3692_v16 = vshrl.u32 %v5819_v32, 16  ;;  %v922_v40 = vsel %vm6253_vm6, %v917_v4, %v6829_v50 }
 0x134   : > { %5557 = vmatmul.msk.bf16.gmra.mxu3 %vm324_vm1, %v5996_v17  ;;  %5622 = vmatmul.msk.bf16.gmra.mxu0 %vm324_vm1, %v2547_v60  ;;  %v1429_v60 = vsel %vm6258_vm7, %v1427_v42, %v1428_v15  ;;  %v1462_v17 = vunpack.c.l.b16 %v1426_v48  ;;  %v3681_v50 = vrot.slane %v3679_v28, 4  ;;  %v965_v7 = vunpack.c.l.b16 %v922_v40  ;;  %v5624_v42 = vld [vmem:[%s6196_s5 + $0xc] sm:$0xe]  ;;  %v5883_v40 = vld [vmem:[%s6196_s5 + $0x18] sm:$0xe] }
 0x135   : > { %v3684_v22 = vrot.slane %v3682_v61, 5  ;;  %v3694_v39 = vrot.slane %v3692_v16, 4  ;;  %v1463_v6 = vunpack.c.l.b16 %v1429_v60  ;;  %v2531_v31 = vunpack.c.l.b16 %v2488_v38  ;;  %v5626_v61 = vld [vmem:[%s6196_s5 + $0x14] sm:$0x1] }
 0x136   : > { %v1570_v21 = vpop.f32.mrf.mxu2  ;;  %v2532_v32 = vunpack.c.l.b16 %v2498_v13  ;;  %v982_v28 = vpack.c.b16 %v966_v2, %v965_v7  ;;  %v4446_v1 = vrot.slane %v5884_v35, 5  ;;  %v5672_v60 = vrot.slane %v5624_v42, 9 }
 0x137   : > { %v1664_v26 = vadd.f32 %v1570_v21, %v1167_v51  ;;  %v1921_v3 = vpop.f32.mrf.mxu3  ;;  %v3685_v51 = vor.u32 %v3684_v22, %v3681_v50  ;;  %v3695_v18 = vor.u32 %v3694_v39, %v6867_v33  ;;  %v2886_v38 = vrot.slane %v5626_v61, 5 }
 0x138   : > { %v1075_v49 = vpop.f32.mrf.mxu1  ;;  %v3700_v50 = vrot.slane %v3698_v30, 5  ;;  %v4448_v22 = vrot.slane %v4446_v1, 4 }
 0x139   : > { %v2015_v34 = vadd.f32 %v1921_v3, %v1664_v26  ;;  %v2641_v20 = vpop.f32.mrf.mxu0  ;;  %v1168_v4 = vadd.f32 %v1075_v49, %v6515_v36  ;;  %v5997_v26 = vld [vmem:[%s6196_s5 + $0xc0] sm:$0xff]  ;;  %v2548_v3 = vpack.c.b16 %v2532_v32, %v2531_v31  ;;  %v3686_v13 = vrot.slane %v3685_v51, 4 }
 0x13a   : > { %v5885_v36 = vld [vmem:[%s6196_s5 + $0x20] sm:$0x1]  ;;  %v3696_v10 = vrot.slane %v3695_v18, 4  ;;  %v2884_v32 = vsel %vm6258_vm7, %v5672_v60, %v2883_v43 }
 0x13b   : > { %v6870_v15 = vadd.f32 %v2639_v19, %v2015_v34  ;;  %v1479_v19 = vpack.c.b16 %v1463_v6, %v1462_v17  ;;  %v2885_v34 = vrot.slane %v2883_v43, 4  ;;  %v5931_v17 = vrot.slane %v5883_v40, 9  ;;  %v5821_v6 = vld [vmem:[%s6196_s5 + $0x24] sm:$0xf] }
 0x13c   : > { %v4449_v39 = vrot.slane %v5885_v36, 5  ;;  %v3701_v42 = vsel %vm6253_vm6, %v3696_v10, %v3700_v50  ;;  %v3703_v18 = vshrl.u32 %v5821_v6, 16  ;;  %v3706_v30 = vshll.u32 %v5821_v6, 16  ;;  %v5628_v36 = vld [vmem:[%s6196_s5 + $0x1c] sm:$0xf] }
 0x13d   : > { %v2887_v35 = vsel %vm6258_vm7, %v2885_v34, %v2886_v38  ;;  %v5823_v10 = vld [vmem:[%s6196_s5 + $0x2c] sm:$0x1] }
 0x13e   : > { %v1572_v48 = vpop.f32.mrf.mxu2  ;;  %v4450_v51 = vsel %vm6258_vm7, %v4448_v22, %v4449_v39  ;;  %v2996_v61 = vunpack.c.l.b16 %v2887_v35  ;;  %v3708_v60 = vrot.slane %v3706_v30, 5  ;;  %v5627_v35 = vld [vmem:[%s6196_s5 + $0x18] sm:$0xe] }
 0x13f   : > { %v1665_v53 = vadd.f32 %v1572_v48, %v1168_v4  ;;  %v1923_v21 = vpop.f32.mrf.mxu3  ;;  %v5673_v30 = vrot.slane %v5627_v35, 9 }
 0x140   : > { %v1078_v16 = vpop.f32.mrf.mxu1 }
 0x141   : > { %v2016_v49 = vadd.f32 %v1923_v21, %v1665_v53  ;;  %v2644_v54 = vpop.f32.mrf.mxu0  ;;  %v1169_v2 = vadd.f32 %v1078_v16, %v6538_v24  ;;  %v4447_v24 = vsel %vm6258_vm7, %v5931_v17, %v4446_v1  ;;  %v3712_v53 = vshll.u32 %v5822_v8, 16  ;;  %v5887_v17 = vld [vmem:[%s6196_s5 + $0x28] sm:$0xf] }
 0x142   : > { %v3716_v21 = vshrl.u32 %v5822_v8, 16  ;;  %v4559_v1 = vunpack.c.l.b16 %v4450_v51  ;;  %v2890_v8 = vrot.slane %v5628_v36, 5  ;;  %v4453_v51 = vrot.slane %v5887_v17, 5 }
 0x143   : > { %5412 = vmatmul.msk.bf16.gmra.mxu1 %vm324_vm1, %v982_v28  ;;  %5445 = vmatmul.msk.bf16.gmra.mxu2 %vm324_vm1, %v1479_v19  ;;  %v6882_v7 = vadd.f32 %v2641_v20, %v2016_v49  ;;  %v3691_v20 = vsel %vm6253_vm6, %v3686_v13, %v6867_v33  ;;  %v2995_v19 = vunpack.c.l.b16 %v2884_v32  ;;  %v3705_v49 = vrot.slane %v3703_v18, 4  ;;  %v5888_v18 = vld [vmem:[%s6196_s5 + $0x2c] sm:$0x1] }
 0x144   : > { %5558 = vmatmul.msk.bf16.gmra.mxu3 %vm324_vm1, %v5997_v26  ;;  %5623 = vmatmul.msk.bf16.gmra.mxu0 %vm324_vm1, %v2548_v3  ;;  %v4064_v16 = vunpack.c.l.b16 %v3691_v20  ;;  %v4065_v26 = vunpack.c.l.b16 %v3701_v42  ;;  %v4558_v3 = vunpack.c.l.b16 %v4447_v24  ;;  %v6905_v34 = vrot.slane %v3712_v53, 5  ;;  %v5629_v24 = vld [vmem:[%s6196_s5 + $0x20] sm:$0x1] }
 0x145   : > { %v3718_v38 = vrot.slane %v3716_v21, 4  ;;  %v3709_v20 = vor.u32 %v3708_v60, %v3705_v49  ;;  %v2892_v53 = vrot.slane %v2890_v8, 4  ;;  %v5824_v21 = vld [vmem:[%s6196_s5 + $0x30] sm:$0xf]  ;;  %v4455_v49 = vrot.slane %v4453_v51, 4 }
 0x146   : > { %v1575_v31 = vpop.f32.mrf.mxu2  ;;  %v4096_v6 = vpack.c.b16 %v4065_v26, %v4064_v16  ;;  %v4590_v32 = vpack.c.b16 %v4559_v1, %v4558_v3  ;;  %v4456_v60 = vrot.slane %v5888_v18, 5  ;;  %v5826_v18 = vld [vmem:[%s6196_s5 + $0x38] sm:$0x1] }
 0x147   : > { %v1666_v4 = vadd.f32 %v1575_v31, %v1169_v2  ;;  %v1926_v48 = vpop.f32.mrf.mxu3  ;;  %v3027_v2 = vpack.c.b16 %v2996_v61, %v2995_v19  ;;  %v2893_v61 = vrot.slane %v5629_v24, 5  ;;  %v3710_v16 = vrot.slane %v3709_v20, 4 }
 0x148   : > { %v1080_v43 = vpop.f32.mrf.mxu1  ;;  %v4457_v20 = vsel %vm6258_vm7, %v4455_v49, %v4456_v60  ;;  %v3746_v60 = vshll.u32 %v5826_v18, 16 }
 0x149   : > { %v2017_v28 = vadd.f32 %v1926_v48, %v1666_v4  ;;  %v2646_v33 = vpop.f32.mrf.mxu0  ;;  %v1170_v13 = vadd.f32 %v1080_v43, %v6570_v14  ;;  %v3719_v14 = vor.u32 %v3718_v38, %v6905_v34  ;;  %v3722_v4 = vshll.u32 %v5823_v10, 16  ;;  %v5886_v43 = vld [vmem:[%s6196_s5 + $0x24] sm:$0xe] }
 0x14a   : > { %v5932_v36 = vrot.slane %v5886_v43, 9  ;;  %v3730_v10 = vshll.u32 %v5824_v21, 16 }
 0x14b   : > { %v6902_v40 = vadd.f32 %v2644_v54, %v2017_v28  ;;  %v5998_v54 = vld [vmem:[%s6196_s5 + $0x18] sm:$0xff]  ;;  %v5825_v28 = vld [vmem:[%s6196_s5 + $0x34] sm:$0xf]  ;;  %v3720_v26 = vrot.slane %v3719_v14, 4  ;;  %v3724_v3 = vrot.slane %v3722_v4, 5 }
 0x14c   : > { %v4454_v35 = vsel %vm6258_vm7, %v5932_v36, %v4453_v51  ;;  %v3732_v4 = vrot.slane %v3730_v10, 5  ;;  %v5999_v10 = vld [vmem:[%s6196_s5 + $0x24] sm:$0xff] }
 0x14d   : > { %v4560_v51 = vunpack.c.l.b16 %v4454_v35 }
 0x14e   : > { %v1577_v50 = vpop.f32.mrf.mxu2 }
 0x14f   : > { %v1667_v22 = vadd.f32 %v1577_v50, %v1170_v13  ;;  %v1928_v39 = vpop.f32.mrf.mxu3  ;;  %v3727_v13 = vshrl.u32 %v5824_v21, 16  ;;  %v3736_v50 = vshll.u32 %v5825_v28, 16 }
 0x150   : > { %v1083_v31 = vpop.f32.mrf.mxu1 }
 0x151   : > { %v2018_v48 = vadd.f32 %v1928_v39, %v1667_v22  ;;  %v2649_v42 = vpop.f32.mrf.mxu0  ;;  %v1171_v1 = vadd.f32 %v1083_v31, %v6408_v58  ;;  %v3715_v58 = vsel %vm6253_vm6, %v3710_v16, %v6905_v34  ;;  %v3729_v14 = vrot.slane %v3727_v13, 4 }
 0x153   : > { %5689 = vmatmul.msk.bf16.vlgmr.msra.gmra.mxu1 %vm324_vm1, %v3027_v2  ;;  %5802 = vmatmul.msk.bf16.vlgmr.msra.gmra.mxu2 %vm324_vm1, %v5998_v54  ;;  %v6920_v19 = vadd.f32 %v2646_v33, %v2018_v48  ;;  %v3740_v33 = vshrl.u32 %v5825_v28, 16  ;;  %v2891_v2 = vsel %vm6258_vm7, %v5673_v30, %v2890_v8  ;;  %v2894_v54 = vsel %vm6258_vm7, %v2892_v53, %v2893_v61  ;;  %v5631_v8 = vld [vmem:[%s6196_s5 + $0x28] sm:$0xf]  ;;  %v5890_v61 = vld [vmem:[%s6196_s5 + $0x34] sm:$0xf] }
 0x154   : > { %5867 = vmatmul.msk.bf16.vlgmr.msra.gmra.mxu3 %vm324_vm1, %v4096_v6  ;;  %5948 = vmatmul.msk.bf16.vlgmr.msra.gmra.mxu0 %vm324_vm1, %v4590_v32  ;;  %v3725_v32 = vsel %vm6253_vm6, %v3720_v26, %v3724_v3  ;;  %v6939_v48 = vrot.slane %v3736_v50, 5  ;;  %v2997_v34 = vunpack.c.l.b16 %v2891_v2  ;;  %v2998_v43 = vunpack.c.l.b16 %v2894_v54  ;;  %v5632_v50 = vld [vmem:[%s6196_s5 + $0x2c] sm:$0x1]  ;;  %v5889_v54 = vld [vmem:[%s6196_s5 + $0x30] sm:$0xe] }
 0x155   : > { %v3742_v24 = vrot.slane %v3740_v33, 4  ;;  %v4066_v53 = vunpack.c.l.b16 %v3715_v58  ;;  %v4067_v21 = vunpack.c.l.b16 %v3725_v32  ;;  %v4561_v28 = vunpack.c.l.b16 %v4457_v20 }
 0x156   : > { %v1580_v38 = vpop.f32.mrf.mxu2  ;;  %v2897_v26 = vrot.slane %v5631_v8, 5  ;;  %v3733_v36 = vor.u32 %v3732_v4, %v3729_v14  ;;  %v3028_v13 = vpack.c.b16 %v2998_v43, %v2997_v34  ;;  %v4460_v33 = vrot.slane %v5890_v61, 5 }
 0x157   : > { %v1668_v17 = vadd.f32 %v1580_v38, %v1171_v1  ;;  %v1931_v22 = vpop.f32.mrf.mxu3  ;;  %v5630_v1 = vld [vmem:[%s6196_s5 + $0x24] sm:$0xe]  ;;  %v3743_v49 = vor.u32 %v3742_v24, %v6939_v48  ;;  %v4591_v2 = vpack.c.b16 %v4561_v28, %v4560_v51  ;;  %v2900_v35 = vrot.slane %v5632_v50, 5 }
 0x158   : > { %v1085_v39 = vpop.f32.mrf.mxu1  ;;  %v2899_v32 = vrot.slane %v2897_v26, 4  ;;  %v3734_v20 = vrot.slane %v3733_v36, 4  ;;  %v3748_v14 = vrot.slane %v3746_v60, 5  ;;  %v5933_v4 = vrot.slane %v5889_v54, 9 }
 0x159   : > { %v2019_v6 = vadd.f32 %v1931_v22, %v1668_v17  ;;  %v2651_v31 = vpop.f32.mrf.mxu0  ;;  %v1172_v16 = vadd.f32 %v1085_v39, %v6431_v29  ;;  %v4097_v22 = vpack.c.b16 %v4067_v21, %v4066_v53  ;;  %v5891_v29 = vld [vmem:[%s6196_s5 + $0x38] sm:$0x1]  ;;  %v3744_v8 = vrot.slane %v3743_v49, 4  ;;  %v5827_v53 = vld [vmem:[%s6196_s5 + $0x3c] sm:$0xf] }
 0x15a   : > { %v4462_v24 = vrot.slane %v4460_v33, 4  ;;  %v4463_v34 = vrot.slane %v5891_v29, 5  ;;  %v5828_v21 = vld [vmem:[%s6196_s5 + $0x40] sm:$0xf]  ;;  %v2901_v61 = vsel %vm6258_vm7, %v2899_v32, %v2900_v35  ;;  %v3751_v49 = vshrl.u32 %v5827_v53, 16 }
 0x15b   : > { %v6942_v30 = vadd.f32 %v2649_v42, %v2019_v6  ;;  %v5674_v6 = vrot.slane %v5630_v1, 9  ;;  %v3749_v1 = vsel %vm6253_vm6, %v3744_v8, %v3748_v14  ;;  %v3754_v60 = vshll.u32 %v5827_v53, 16  ;;  %v5634_v29 = vld [vmem:[%s6196_s5 + $0x34] sm:$0xf]  ;;  %v5829_v8 = vld [vmem:[%s6196_s5 + $0x44] sm:$0x1] }
 0x15c   : > { %v4464_v36 = vsel %vm6258_vm7, %v4462_v24, %v4463_v34  ;;  %v3000_v50 = vunpack.c.l.b16 %v2901_v61  ;;  %v5633_v61 = vld [vmem:[%s6196_s5 + $0x30] sm:$0xe] }
 0x15d   : > { %v2898_v28 = vsel %vm6258_vm7, %v5674_v6, %v2897_v26  ;;  %v3756_v6 = vrot.slane %v3754_v60, 5  ;;  %v5675_v60 = vrot.slane %v5633_v61, 9 }
 0x15e   : > { %v1582_v3 = vpop.f32.mrf.mxu2 }
 0x15f   : > { %v1669_v42 = vadd.f32 %v1582_v3, %v1172_v16  ;;  %v1933_v38 = vpop.f32.mrf.mxu3 }
 0x160   : > { %v1088_v17 = vpop.f32.mrf.mxu1 }
 0x161   : > { %v2020_v39 = vadd.f32 %v1933_v38, %v1669_v42  ;;  %v2654_v58 = vpop.f32.mrf.mxu0  ;;  %v1173_v18 = vadd.f32 %v1088_v17, %v6450_v62  ;;  %v4461_v62 = vsel %vm6258_vm7, %v5933_v4, %v4460_v33  ;;  %v3760_v42 = vshll.u32 %v5828_v21, 16  ;;  %v5893_v4 = vld [vmem:[%s6196_s5 + $0x40] sm:$0xf] }
 0x162   : > { %v3764_v38 = vshrl.u32 %v5828_v21, 16  ;;  %v4563_v33 = vunpack.c.l.b16 %v4464_v36  ;;  %v2904_v21 = vrot.slane %v5634_v29, 5  ;;  %v4467_v36 = vrot.slane %v5893_v4, 5 }
 0x163   : > { %5690 = vmatmul.msk.bf16.gmra.mxu1 %vm324_vm1, %v3028_v13  ;;  %5803 = vmatmul.msk.bf16.gmra.mxu2 %vm324_vm1, %v5999_v10  ;;  %v6954_v43 = vadd.f32 %v2651_v31, %v2020_v39  ;;  %v3739_v31 = vsel %vm6253_vm6, %v3734_v20, %v6939_v48  ;;  %v2999_v10 = vunpack.c.l.b16 %v2898_v28  ;;  %v3753_v39 = vrot.slane %v3751_v49, 4  ;;  %v5894_v49 = vld [vmem:[%s6196_s5 + $0x44] sm:$0x1] }
 0x164   : > { %5868 = vmatmul.msk.bf16.gmra.mxu3 %vm324_vm1, %v4097_v22  ;;  %5949 = vmatmul.msk.bf16.gmra.mxu0 %vm324_vm1, %v4591_v2  ;;  %v4068_v17 = vunpack.c.l.b16 %v3739_v31  ;;  %v4069_v22 = vunpack.c.l.b16 %v3749_v1  ;;  %v4562_v2 = vunpack.c.l.b16 %v4461_v62  ;;  %v6977_v32 = vrot.slane %v3760_v42, 5  ;;  %v5635_v62 = vld [vmem:[%s6196_s5 + $0x38] sm:$0x1] }
 0x165   : > { %v3766_v35 = vrot.slane %v3764_v38, 4  ;;  %v3757_v31 = vor.u32 %v3756_v6, %v3753_v39  ;;  %v2906_v42 = vrot.slane %v2904_v21, 4  ;;  %v5830_v38 = vld [vmem:[%s6196_s5 + $0x48] sm:$0xf]  ;;  %v4469_v39 = vrot.slane %v4467_v36, 4 }
 0x166   : > { %v1585_v51 = vpop.f32.mrf.mxu2  ;;  %v4098_v53 = vpack.c.b16 %v4069_v22, %v4068_v17  ;;  %v4592_v28 = vpack.c.b16 %v4563_v33, %v4562_v2  ;;  %v4470_v6 = vrot.slane %v5894_v49, 5  ;;  %v5832_v49 = vld [vmem:[%s6196_s5 + $0x50] sm:$0x1] }
 0x167   : > { %v1670_v16 = vadd.f32 %v1585_v51, %v1173_v18  ;;  %v1936_v3 = vpop.f32.mrf.mxu3  ;;  %v3029_v18 = vpack.c.b16 %v3000_v50, %v2999_v10  ;;  %v2907_v50 = vrot.slane %v5635_v62, 5  ;;  %v3758_v17 = vrot.slane %v3757_v31, 4 }
 0x168   : > { %v1090_v26 = vpop.f32.mrf.mxu1  ;;  %v4471_v31 = vsel %vm6258_vm7, %v4469_v39, %v4470_v6  ;;  %v3794_v6 = vshll.u32 %v5832_v49, 16 }
 0x169   : > { %v2021_v13 = vadd.f32 %v1936_v3, %v1670_v16  ;;  %v2656_v48 = vpop.f32.mrf.mxu0  ;;  %v1174_v20 = vadd.f32 %v1090_v26, %v6482_v45  ;;  %v3767_v45 = vor.u32 %v3766_v35, %v6977_v32  ;;  %v3770_v16 = vshll.u32 %v5829_v8, 16  ;;  %v5892_v26 = vld [vmem:[%s6196_s5 + $0x3c] sm:$0xe] }
 0x16a   : > { %v5934_v29 = vrot.slane %v5892_v26, 9  ;;  %v3778_v8 = vshll.u32 %v5830_v38, 16 }
 0x16b   : > { %v6974_v54 = vadd.f32 %v2654_v58, %v2021_v13  ;;  %v6000_v58 = vld [vmem:[%s6196_s5 + $0x30] sm:$0xff]  ;;  %v5831_v13 = vld [vmem:[%s6196_s5 + $0x4c] sm:$0xf]  ;;  %v3768_v22 = vrot.slane %v3767_v45, 4  ;;  %v3772_v2 = vrot.slane %v3770_v16, 5 }
 0x16c   : > { %v4468_v61 = vsel %vm6258_vm7, %v5934_v29, %v4467_v36  ;;  %v3780_v16 = vrot.slane %v3778_v8, 5  ;;  %v6001_v8 = vld [vmem:[%s6196_s5 + $0x3c] sm:$0xff] }
 0x16d   : > { %v4564_v36 = vunpack.c.l.b16 %v4468_v61 }
 0x16e   : > { %v1587_v14 = vpop.f32.mrf.mxu2 }
 0x16f   : > { %v1671_v24 = vadd.f32 %v1587_v14, %v1174_v20  ;;  %v1938_v34 = vpop.f32.mrf.mxu3  ;;  %v3775_v20 = vshrl.u32 %v5830_v38, 16  ;;  %v3784_v14 = vshll.u32 %v5831_v13, 16 }
 0x170   : > { %v1093_v51 = vpop.f32.mrf.mxu1 }
 0x171   : > { %v2022_v3 = vadd.f32 %v1938_v34, %v1671_v24  ;;  %v2659_v1 = vpop.f32.mrf.mxu0  ;;  %v1175_v33 = vadd.f32 %v1093_v51, %v6507_v25  ;;  %v3763_v25 = vsel %vm6253_vm6, %v3758_v17, %v6977_v32  ;;  %v3777_v45 = vrot.slane %v3775_v20, 4 }
 0x173   : > { %5691 = vmatmul.msk.bf16.gmra.mxu1 %vm324_vm1, %v3029_v18  ;;  %5804 = vmatmul.msk.bf16.gmra.mxu2 %vm324_vm1, %v6000_v58  ;;  %v6992_v10 = vadd.f32 %v2656_v48, %v2022_v3  ;;  %v3788_v48 = vshrl.u32 %v5831_v13, 16  ;;  %v2905_v18 = vsel %vm6258_vm7, %v5675_v60, %v2904_v21  ;;  %v2908_v58 = vsel %vm6258_vm7, %v2906_v42, %v2907_v50  ;;  %v5637_v21 = vld [vmem:[%s6196_s5 + $0x40] sm:$0xf]  ;;  %v5896_v50 = vld [vmem:[%s6196_s5 + $0x4c] sm:$0xf] }
 0x174   : > { %5869 = vmatmul.msk.bf16.gmra.mxu3 %vm324_vm1, %v4098_v53  ;;  %5950 = vmatmul.msk.bf16.gmra.mxu0 %vm324_vm1, %v4592_v28  ;;  %v3773_v28 = vsel %vm6253_vm6, %v3768_v22, %v3772_v2  ;;  %v7011_v3 = vrot.slane %v3784_v14, 5  ;;  %v3001_v32 = vunpack.c.l.b16 %v2905_v18  ;;  %v3002_v26 = vunpack.c.l.b16 %v2908_v58  ;;  %v5638_v14 = vld [vmem:[%s6196_s5 + $0x44] sm:$0x1]  ;;  %v5895_v58 = vld [vmem:[%s6196_s5 + $0x48] sm:$0xe] }
 0x175   : > { %v3790_v62 = vrot.slane %v3788_v48, 4  ;;  %v4070_v42 = vunpack.c.l.b16 %v3763_v25  ;;  %v4071_v38 = vunpack.c.l.b16 %v3773_v28  ;;  %v4565_v13 = vunpack.c.l.b16 %v4471_v31 }
 0x176   : > { %v1590_v35 = vpop.f32.mrf.mxu2  ;;  %v2911_v22 = vrot.slane %v5637_v21, 5  ;;  %v3781_v29 = vor.u32 %v3780_v16, %v3777_v45  ;;  %v3030_v20 = vpack.c.b16 %v3002_v26, %v3001_v32  ;;  %v4474_v48 = vrot.slane %v5896_v50, 5 }
 0x177   : > { %v1672_v4 = vadd.f32 %v1590_v35, %v1175_v33  ;;  %v1941_v24 = vpop.f32.mrf.mxu3  ;;  %v5636_v33 = vld [vmem:[%s6196_s5 + $0x3c] sm:$0xe]  ;;  %v3791_v39 = vor.u32 %v3790_v62, %v7011_v3  ;;  %v4593_v18 = vpack.c.b16 %v4565_v13, %v4564_v36  ;;  %v2914_v61 = vrot.slane %v5638_v14, 5 }
 0x178   : > { %v1095_v34 = vpop.f32.mrf.mxu1  ;;  %v2913_v28 = vrot.slane %v2911_v22, 4  ;;  %v3782_v31 = vrot.slane %v3781_v29, 4  ;;  %v3796_v45 = vrot.slane %v3794_v6, 5  ;;  %v5935_v16 = vrot.slane %v5895_v58, 9 }
 0x179   : > { %v2023_v53 = vadd.f32 %v1941_v24, %v1672_v4  ;;  %v2661_v51 = vpop.f32.mrf.mxu0  ;;  %v1176_v17 = vadd.f32 %v1095_v34, %v6531_v9  ;;  %v4099_v24 = vpack.c.b16 %v4071_v38, %v4070_v42  ;;  %v5897_v9 = vld [vmem:[%s6196_s5 + $0x50] sm:$0x1]  ;;  %v3792_v21 = vrot.slane %v3791_v39, 4  ;;  %v5833_v42 = vld [vmem:[%s6196_s5 + $0x54] sm:$0xf] }
 0x17a   : > { %v4476_v62 = vrot.slane %v4474_v48, 4  ;;  %v4477_v32 = vrot.slane %v5897_v9, 5  ;;  %v5834_v38 = vld [vmem:[%s6196_s5 + $0x58] sm:$0xf]  ;;  %v2915_v50 = vsel %vm6258_vm7, %v2913_v28, %v2914_v61  ;;  %v3799_v39 = vshrl.u32 %v5833_v42, 16 }
 0x17b   : > { %v7014_v60 = vadd.f32 %v2659_v1, %v2023_v53  ;;  %v5676_v53 = vrot.slane %v5636_v33, 9  ;;  %v3797_v33 = vsel %vm6253_vm6, %v3792_v21, %v3796_v45  ;;  %v3802_v6 = vshll.u32 %v5833_v42, 16  ;;  %v5640_v9 = vld [vmem:[%s6196_s5 + $0x4c] sm:$0xf]  ;;  %v5835_v21 = vld [vmem:[%s6196_s5 + $0x5c] sm:$0x1] }
 0x17c   : > { %v4478_v29 = vsel %vm6258_vm7, %v4476_v62, %v4477_v32  ;;  %v3004_v14 = vunpack.c.l.b16 %v2915_v50  ;;  %v5639_v50 = vld [vmem:[%s6196_s5 + $0x48] sm:$0xe] }
 0x17d   : > { %v2912_v13 = vsel %vm6258_vm7, %v5676_v53, %v2911_v22  ;;  %v3804_v53 = vrot.slane %v3802_v6, 5  ;;  %v5677_v6 = vrot.slane %v5639_v50, 9 }
 0x17e   : > { %v1592_v2 = vpop.f32.mrf.mxu2 }
 0x17f   : > { %v1673_v1 = vadd.f32 %v1592_v2, %v1176_v17  ;;  %v1943_v35 = vpop.f32.mrf.mxu3 }
 0x180   : > { %v1098_v4 = vpop.f32.mrf.mxu1 }
 0x181   : > { %v2024_v34 = vadd.f32 %v1943_v35, %v1673_v1  ;;  %v2664_v25 = vpop.f32.mrf.mxu0  ;;  %v1177_v49 = vadd.f32 %v1098_v4, %v6552_v59  ;;  %v4475_v59 = vsel %vm6258_vm7, %v5935_v16, %v4474_v48  ;;  %v3808_v1 = vshll.u32 %v5834_v38, 16  ;;  %v5899_v16 = vld [vmem:[%s6196_s5 + $0x58] sm:$0xf] }
 0x182   : > { %v3812_v35 = vshrl.u32 %v5834_v38, 16  ;;  %v4567_v48 = vunpack.c.l.b16 %v4478_v29  ;;  %v2918_v38 = vrot.slane %v5640_v9, 5  ;;  %v4481_v29 = vrot.slane %v5899_v16, 5 }
 0x183   : > { %5692 = vmatmul.msk.bf16.gmra.mxu1 %vm324_vm1, %v3030_v20  ;;  %5805 = vmatmul.msk.bf16.gmra.mxu2 %vm324_vm1, %v6001_v8  ;;  %v7026_v26 = vadd.f32 %v2661_v51, %v2024_v34  ;;  %v3787_v51 = vsel %vm6253_vm6, %v3782_v31, %v7011_v3  ;;  %v3003_v8 = vunpack.c.l.b16 %v2912_v13  ;;  %v3801_v34 = vrot.slane %v3799_v39, 4  ;;  %v5900_v39 = vld [vmem:[%s6196_s5 + $0x5c] sm:$0x1] }
 0x184   : > { %5870 = vmatmul.msk.bf16.gmra.mxu3 %vm324_vm1, %v4099_v24  ;;  %5951 = vmatmul.msk.bf16.gmra.mxu0 %vm324_vm1, %v4593_v18  ;;  %v4072_v4 = vunpack.c.l.b16 %v3787_v51  ;;  %v4073_v24 = vunpack.c.l.b16 %v3797_v33  ;;  %v4566_v18 = vunpack.c.l.b16 %v4475_v59  ;;  %v7049_v28 = vrot.slane %v3808_v1, 5  ;;  %v5641_v59 = vld [vmem:[%s6196_s5 + $0x50] sm:$0x1] }
 0x185   : > { %v3814_v61 = vrot.slane %v3812_v35, 4  ;;  %v3805_v51 = vor.u32 %v3804_v53, %v3801_v34  ;;  %v2920_v1 = vrot.slane %v2918_v38, 4  ;;  %v5836_v35 = vld [vmem:[%s6196_s5 + $0x60] sm:$0xf]  ;;  %v4483_v34 = vrot.slane %v4481_v29, 4 }
 0x186   : > { %v1595_v36 = vpop.f32.mrf.mxu2  ;;  %v4100_v42 = vpack.c.b16 %v4073_v24, %v4072_v4  ;;  %v4594_v13 = vpack.c.b16 %v4567_v48, %v4566_v18  ;;  %v4484_v53 = vrot.slane %v5900_v39, 5  ;;  %v5838_v39 = vld [vmem:[%s6196_s5 + $0x68] sm:$0x1] }
 0x187   : > { %v1674_v17 = vadd.f32 %v1595_v36, %v1177_v49  ;;  %v1946_v2 = vpop.f32.mrf.mxu3  ;;  %v3031_v49 = vpack.c.b16 %v3004_v14, %v3003_v8  ;;  %v2921_v14 = vrot.slane %v5641_v59, 5  ;;  %v3806_v4 = vrot.slane %v3805_v51, 4 }
 0x188   : > { %v1100_v22 = vpop.f32.mrf.mxu1  ;;  %v4485_v51 = vsel %vm6258_vm7, %v4483_v34, %v4484_v53 }
 0x189   : > { %v2025_v20 = vadd.f32 %v1946_v2, %v1674_v17  ;;  %v2666_v3 = vpop.f32.mrf.mxu0  ;;  %v1178_v31 = vadd.f32 %v1100_v22, %v6581_v56  ;;  %v3815_v56 = vor.u32 %v3814_v61, %v7049_v28  ;;  %v3818_v17 = vshll.u32 %v5835_v21, 16  ;;  %v5898_v22 = vld [vmem:[%s6196_s5 + $0x54] sm:$0xe] }
 0x18a   : > { %v5936_v9 = vrot.slane %v5898_v22, 9  ;;  %v3826_v21 = vshll.u32 %v5836_v35, 16 }
 0x18b   : > { %v7046_v58 = vadd.f32 %v2664_v25, %v2025_v20  ;;  %v6002_v25 = vld [vmem:[%s6196_s5 + $0x48] sm:$0xff]  ;;  %v5837_v20 = vld [vmem:[%s6196_s5 + $0x64] sm:$0xf]  ;;  %v3816_v24 = vrot.slane %v3815_v56, 4  ;;  %v3820_v18 = vrot.slane %v3818_v17, 5 }
 0x18c   : > { %v4482_v50 = vsel %vm6258_vm7, %v5936_v9, %v4481_v29  ;;  %v3828_v17 = vrot.slane %v3826_v21, 5  ;;  %v5642_v9 = vld [vmem:[%s6196_s5 + $0x54] sm:$0xe] }
 0x18d   : > { %v4568_v29 = vunpack.c.l.b16 %v4482_v50  ;;  %v5678_v50 = vrot.slane %v5642_v9, 9 }
 0x18e   : > { %v1597_v45 = vpop.f32.mrf.mxu2 }
 0x18f   : > { %v1675_v62 = vadd.f32 %v1597_v45, %v1178_v31  ;;  %v1948_v32 = vpop.f32.mrf.mxu3  ;;  %v3823_v31 = vshrl.u32 %v5836_v35, 16  ;;  %v3832_v45 = vshll.u32 %v5837_v20, 16 }
 0x190   : > { %v1103_v36 = vpop.f32.mrf.mxu1 }
 0x191   : > { %v2026_v2 = vadd.f32 %v1948_v32, %v1675_v62  ;;  %v2669_v33 = vpop.f32.mrf.mxu0  ;;  %v1179_v48 = vadd.f32 %v1103_v36, %v6414_v63  ;;  %v3811_v63 = vsel %vm6253_vm6, %v3806_v4, %v7049_v28  ;;  %v3825_v56 = vrot.slane %v3823_v31, 4  ;;  %v7825_v4 = vld [vmem:[#allocation3_spill] sm:$0xff] }
 0x193   : > { %5693 = vmatmul.msk.bf16.gmra.mxu1 %vm324_vm1, %v3031_v49  ;;  %5806 = vmatmul.msk.bf16.gmra.mxu2 %vm324_vm1, %v6002_v25  ;;  %v7064_v8 = vadd.f32 %v2666_v3, %v2026_v2  ;;  %v3836_v3 = vshrl.u32 %v5837_v20, 16  ;;  %v2919_v49 = vsel %vm6258_vm7, %v5677_v6, %v2918_v38  ;;  %v2922_v25 = vsel %vm6258_vm7, %v2920_v1, %v2921_v14  ;;  %v5643_v38 = vld [vmem:[%s6196_s5 + $0x58] sm:$0xf]  ;;  %v5902_v14 = vld [vmem:[%s6196_s5 + $0x64] sm:$0xf] }
 0x194   : > { %5871 = vmatmul.msk.bf16.gmra.mxu3 %vm324_vm1, %v4100_v42  ;;  %5952 = vmatmul.msk.bf16.gmra.mxu0 %vm324_vm1, %v4594_v13  ;;  %v3821_v13 = vsel %vm6253_vm6, %v3816_v24, %v3820_v18  ;;  %v7083_v2 = vrot.slane %v3832_v45, 5  ;;  %v3005_v28 = vunpack.c.l.b16 %v2919_v49  ;;  %v3006_v22 = vunpack.c.l.b16 %v2922_v25  ;;  %v6003_v45 = vld [vmem:[%s6196_s5 + $0x54] sm:$0xff] }
 0x195   : > { %v3838_v59 = vrot.slane %v3836_v3, 4  ;;  %v4074_v1 = vunpack.c.l.b16 %v3811_v63  ;;  %v4075_v35 = vunpack.c.l.b16 %v3821_v13  ;;  %v4569_v20 = vunpack.c.l.b16 %v4485_v51  ;;  %v5644_v3 = vld [vmem:[%s6196_s5 + $0x5c] sm:$0x1]  ;;  %v5901_v63 = vld [vmem:[%s6196_s5 + $0x60] sm:$0xe] }
 0x196   : > { %v1600_v61 = vpop.f32.mrf.mxu2  ;;  %v2925_v18 = vrot.slane %v5643_v38, 5  ;;  %v3829_v34 = vor.u32 %v3828_v17, %v3825_v56  ;;  %v3032_v21 = vpack.c.b16 %v3006_v22, %v3005_v28  ;;  %v2928_v38 = vrot.slane %v5644_v3, 5 }
 0x197   : > { %v1676_v16 = vadd.f32 %v1600_v61, %v1179_v48  ;;  %v1951_v62 = vpop.f32.mrf.mxu3  ;;  %v3839_v53 = vor.u32 %v3838_v59, %v7083_v2  ;;  %v3842_v61 = vshll.u32 %v5838_v39, 16  ;;  %v4101_v49 = vpack.c.b16 %v4075_v35, %v4074_v1  ;;  %v7826_v35 = vld [vmem:[#allocation4_spill] sm:$0xff] }
 0x198   : > { %v1105_v32 = vpop.f32.mrf.mxu1  ;;  %v4595_v25 = vpack.c.b16 %v4569_v20, %v4568_v29  ;;  %v2927_v51 = vrot.slane %v2925_v18, 4  ;;  %v3830_v56 = vrot.slane %v3829_v34, 4  ;;  %v5937_v28 = vrot.slane %v5901_v63, 9  ;;  %v5839_v20 = vld [vmem:[%s6196_s5 + $0x6c] sm:$0xf] }
 0x199   : > { %v2027_v42 = vadd.f32 %v1951_v62, %v1676_v16  ;;  %v2671_v36 = vpop.f32.mrf.mxu0  ;;  %v1180_v24 = vadd.f32 %v1105_v32, %v7825_v4  ;;  %v4488_v16 = vrot.slane %v5902_v14, 5  ;;  %v5903_v32 = vld [vmem:[%s6196_s5 + $0x68] sm:$0x1]  ;;  %v3840_v17 = vrot.slane %v3839_v53, 4  ;;  %v5840_v14 = vld [vmem:[%s6196_s5 + $0x70] sm:$0xf] }
 0x19a   : > { %v3844_v59 = vrot.slane %v3842_v61, 5  ;;  %v4491_v39 = vrot.slane %v5903_v32, 5  ;;  %v3860_v3 = vshrl.u32 %v5840_v14, 16 }
 0x19b   : > { %v7086_v6 = vadd.f32 %v2669_v33, %v2027_v42  ;;  %v4490_v22 = vrot.slane %v4488_v16, 4  ;;  %v4489_v61 = vsel %vm6258_vm7, %v5937_v28, %v4488_v16  ;;  %v7827_v28 = vld [vmem:[#allocation5_spill] sm:$0xff] }
 0x19c   : > { %v3845_v53 = vsel %vm6253_vm6, %v3840_v17, %v3844_v59  ;;  %v3862_v59 = vrot.slane %v3860_v3, 4  ;;  %v5904_v3 = vld [vmem:[%s6196_s5 + $0x6c] sm:$0xe] }
 0x19d   : > { %v4077_v32 = vunpack.c.l.b16 %v3845_v53 }
 0x19e   : > { %v1602_v48 = vpop.f32.mrf.mxu2 }
 0x19f   : > { %v1677_v33 = vadd.f32 %v1602_v48, %v1180_v24  ;;  %v1953_v31 = vpop.f32.mrf.mxu3  ;;  %v2926_v24 = vsel %vm6258_vm7, %v5678_v50, %v2925_v18  ;;  %v2929_v48 = vsel %vm6258_vm7, %v2927_v51, %v2928_v38  ;;  %v5646_v51 = vld [vmem:[%s6196_s5 + $0x64] sm:$0xf] }
 0x1a0   : > { %v1108_v62 = vpop.f32.mrf.mxu1 }
 0x1a1   : > { %v2028_v42 = vadd.f32 %v1953_v31, %v1677_v33  ;;  %v2674_v13 = vpop.f32.mrf.mxu0  ;;  %v1181_v29 = vadd.f32 %v1108_v62, %v7826_v35  ;;  %v4492_v33 = vsel %vm6258_vm7, %v4490_v22, %v4491_v39  ;;  %v3847_v31 = vshrl.u32 %v5839_v20, 16  ;;  %v5841_v39 = vld [vmem:[%s6196_s5 + $0x74] sm:$0x1] }
 0x1a2   : > { %v4571_v16 = vunpack.c.l.b16 %v4492_v33  ;;  %v3866_v33 = vshll.u32 %v5841_v39, 16 }
 0x1a3   : > { %5694 = vmatmul.msk.bf16.gmra.mxu1 %vm324_vm1, %v3032_v21  ;;  %5807 = vmatmul.msk.bf16.gmra.mxu2 %vm324_vm1, %v6003_v45  ;;  %v7098_v1 = vadd.f32 %v2671_v36, %v2028_v42  ;;  %v3835_v36 = vsel %vm6253_vm6, %v3830_v56, %v7083_v2  ;;  %v3850_v21 = vshll.u32 %v5839_v20, 16  ;;  %v3856_v45 = vshll.u32 %v5840_v14, 16 }
 0x1a4   : > { %5872 = vmatmul.msk.bf16.gmra.mxu3 %vm324_vm1, %v4101_v49  ;;  %5953 = vmatmul.msk.bf16.gmra.mxu0 %vm324_vm1, %v4595_v25  ;;  %v3007_v49 = vunpack.c.l.b16 %v2926_v24  ;;  %v3008_v25 = vunpack.c.l.b16 %v2929_v48  ;;  %v4076_v63 = vunpack.c.l.b16 %v3835_v36  ;;  %v4570_v42 = vunpack.c.l.b16 %v4489_v61 }
 0x1a5   : > { %v3849_v38 = vrot.slane %v3847_v31, 4  ;;  %v3852_v56 = vrot.slane %v3850_v21, 5  ;;  %v7121_v17 = vrot.slane %v3856_v45, 5  ;;  %v2932_v48 = vrot.slane %v5646_v51, 5  ;;  %v5647_v21 = vld [vmem:[%s6196_s5 + $0x68] sm:$0x1] }
 0x1a6   : > { %v1605_v4 = vpop.f32.mrf.mxu2  ;;  %v4102_v24 = vpack.c.b16 %v4077_v32, %v4076_v63  ;;  %v5842_v63 = vld [vmem:[%s6196_s5 + $0x78] sm:$0xf]  ;;  %v5843_v32 = vld [vmem:[%s6196_s5 + $0x7c] sm:$0xf] }
 0x1a7   : > { %v1678_v9 = vadd.f32 %v1605_v4, %v1181_v29  ;;  %v1956_v34 = vpop.f32.mrf.mxu3  ;;  %v5905_v29 = vld [vmem:[%s6196_s5 + $0x70] sm:$0xf]  ;;  %v3033_v4 = vpack.c.b16 %v3008_v25, %v3007_v49  ;;  %v3853_v53 = vor.u32 %v3852_v56, %v3849_v38  ;;  %v3863_v61 = vor.u32 %v3862_v59, %v7121_v17  ;;  %v7829_v59 = vld [vmem:[#allocation6_spill] sm:$0xff] }
 0x1a8   : > { %v1110_v18 = vpop.f32.mrf.mxu1  ;;  %v4495_v45 = vrot.slane %v5905_v29, 5  ;;  %v2934_v25 = vrot.slane %v2932_v48, 4  ;;  %v3868_v56 = vrot.slane %v3866_v33, 5 }
 0x1a9   : > { %v2029_v62 = vadd.f32 %v1956_v34, %v1678_v9  ;;  %v2676_v2 = vpop.f32.mrf.mxu0  ;;  %v1182_v22 = vadd.f32 %v1110_v18, %v7827_v28  ;;  %v4596_v9 = vpack.c.b16 %v4571_v16, %v4570_v42  ;;  %v5645_v34 = vld [vmem:[%s6196_s5 + $0x60] sm:$0xe]  ;;  %v2935_v16 = vrot.slane %v5647_v21, 5 }
 0x1aa   : > { %v5679_v49 = vrot.slane %v5645_v34, 9  ;;  %v3854_v51 = vrot.slane %v3853_v53, 4  ;;  %v3864_v38 = vrot.slane %v3863_v61, 4  ;;  %v4497_v39 = vrot.slane %v4495_v45, 4 }
 0x1ab   : > { %v7118_v50 = vadd.f32 %v2674_v13, %v2029_v62  ;;  %v6004_v13 = vld [vmem:[%s6196_s5 + $0x60] sm:$0xff]  ;;  %v5906_v62 = vld [vmem:[%s6196_s5 + $0x74] sm:$0x1]  ;;  %v2936_v53 = vsel %vm6258_vm7, %v2934_v25, %v2935_v16 }
 0x1ac   : > { %v5844_v16 = vld [vmem:[%s6196_s5 + $0x80] sm:$0x1] }
 0x1ae   : > { %v1607_v35 = vpop.f32.mrf.mxu2 }
 0x1af   : > { %v1679_v20 = vadd.f32 %v1607_v35, %v1182_v22  ;;  %v1958_v14 = vpop.f32.mrf.mxu3  ;;  %v5938_v22 = vrot.slane %v5904_v3, 9  ;;  %v4498_v35 = vrot.slane %v5906_v62, 5 }
 0x1b0   : > { %v1113_v36 = vpop.f32.mrf.mxu1 }
 0x1b1   : > { %v2030_v18 = vadd.f32 %v1958_v14, %v1679_v20  ;;  %v2679_v31 = vpop.f32.mrf.mxu0  ;;  %v1183_v28 = vadd.f32 %v1113_v36, %v7829_v59  ;;  %v3871_v20 = vshrl.u32 %v5842_v63, 16  ;;  %v3874_v14 = vshll.u32 %v5842_v63, 16 }
 0x1b2   : > { %v3859_v36 = vsel %vm6253_vm6, %v3854_v51, %v7121_v17  ;;  %v4496_v21 = vsel %vm6258_vm7, %v5938_v22, %v4495_v45  ;;  %v4499_v3 = vsel %vm6258_vm7, %v4497_v39, %v4498_v35  ;;  %v3010_v63 = vunpack.c.l.b16 %v2936_v53  ;;  %v7831_v22 = vld [vmem:[#allocation7_spill] sm:$0xff]  ;;  %v6005_v53 = vld [vmem:[%s6196_s5 + $0x6c] sm:$0xff] }
 0x1b3   : > { %5695 = vmatmul.msk.bf16.gmra.mxu1 %vm324_vm1, %v3033_v4  ;;  %5808 = vmatmul.msk.bf16.gmra.mxu2 %vm324_vm1, %v6004_v13  ;;  %v7136_v42 = vadd.f32 %v2676_v2, %v2030_v18  ;;  %v3880_v4 = vshll.u32 %v5843_v32, 16  ;;  %v3884_v13 = vshrl.u32 %v5843_v32, 16  ;;  %v3869_v18 = vsel %vm6253_vm6, %v3864_v38, %v3868_v56  ;;  %v5649_v32 = vld [vmem:[%s6196_s5 + $0x70] sm:$0xf] }
 0x1b4   : > { %5873 = vmatmul.msk.bf16.gmra.mxu3 %vm324_vm1, %v4102_v24  ;;  %5954 = vmatmul.msk.bf16.gmra.mxu0 %vm324_vm1, %v4596_v9  ;;  %v2933_v9 = vsel %vm6258_vm7, %v5679_v49, %v2932_v48  ;;  %v3873_v48 = vrot.slane %v3871_v20, 4  ;;  %v3876_v62 = vrot.slane %v3874_v14, 5  ;;  %v4078_v38 = vunpack.c.l.b16 %v3859_v36  ;;  %v5650_v20 = vld [vmem:[%s6196_s5 + $0x74] sm:$0x1] }
 0x1b5   : > { %7828 = vst [vmem:[#allocation3_spill] sm:$0xff] %v7136_v42  ;;  %v7154_v49 = vrot.slane %v3880_v4, 5  ;;  %v3886_v25 = vrot.slane %v3884_v13, 4  ;;  %v3009_v17 = vunpack.c.l.b16 %v2933_v9  ;;  %v4079_v56 = vunpack.c.l.b16 %v3869_v18 }
 0x1b6   : > { %v1610_v29 = vpop.f32.mrf.mxu2  ;;  %v4572_v45 = vunpack.c.l.b16 %v4496_v21  ;;  %v4573_v59 = vunpack.c.l.b16 %v4499_v3  ;;  %v2939_v14 = vrot.slane %v5649_v32, 5  ;;  %v3877_v4 = vor.u32 %v3876_v62, %v3873_v48  ;;  %v5907_v3 = vld [vmem:[%s6196_s5 + $0x78] sm:$0xe] }
 0x1b7   : > { %v1680_v2 = vadd.f32 %v1610_v29, %v1183_v28  ;;  %v1961_v34 = vpop.f32.mrf.mxu3  ;;  %v5908_v28 = vld [vmem:[%s6196_s5 + $0x7c] sm:$0xf]  ;;  %v5648_v29 = vld [vmem:[%s6196_s5 + $0x6c] sm:$0xe]  ;;  %v3887_v13 = vor.u32 %v3886_v25, %v7154_v49  ;;  %v3034_v9 = vpack.c.b16 %v3010_v63, %v3009_v17  ;;  %v4103_v18 = vpack.c.b16 %v4079_v56, %v4078_v38 }
 0x1b8   : > { %v1115_v24 = vpop.f32.mrf.mxu1  ;;  %v4502_v36 = vrot.slane %v5908_v28, 5  ;;  %v4597_v21 = vpack.c.b16 %v4573_v59, %v4572_v45  ;;  %v5680_v42 = vrot.slane %v5648_v29, 9  ;;  %v2942_v32 = vrot.slane %v5650_v20, 5  ;;  %v7832_v45 = vld [vmem:[#allocation8_spill] sm:$0xff]  ;;  %v5845_v28 = vld [vmem:[%s6196_s5 + $0x84] sm:$0xf] }
 0x1b9   : > { %v2031_v61 = vadd.f32 %v1961_v34, %v1680_v2  ;;  %v2681_v33 = vpop.f32.mrf.mxu0  ;;  %v1184_v39 = vadd.f32 %v1115_v24, %v7831_v22  ;;  %v3890_v2 = vshll.u32 %v5844_v16, 16  ;;  %v5909_v24 = vld [vmem:[%s6196_s5 + $0x80] sm:$0x1]  ;;  %v2941_v48 = vrot.slane %v2939_v14, 4 }
 0x1ba   : > { %v3878_v62 = vrot.slane %v3877_v4, 4  ;;  %v3888_v25 = vrot.slane %v3887_v13, 4  ;;  %v5939_v17 = vrot.slane %v5907_v3, 9  ;;  %v4504_v63 = vrot.slane %v4502_v36, 4 }
 0x1bb   : > { %v7158_v51 = vadd.f32 %v2679_v31, %v2031_v61  ;;  %v3892_v16 = vrot.slane %v3890_v2, 5  ;;  %v4505_v38 = vrot.slane %v5909_v24, 5  ;;  %v2940_v29 = vsel %vm6258_vm7, %v5680_v42, %v2939_v14 }
 0x1bc   : > { %v2943_v20 = vsel %vm6258_vm7, %v2941_v48, %v2942_v32  ;;  %v3895_v14 = vshrl.u32 %v5845_v28, 16 }
 0x1bd   : > { %7830 = vst [vmem:[#allocation4_spill] sm:$0xff] %v7158_v51  ;;  %v3893_v2 = vsel %vm6253_vm6, %v3888_v25, %v3892_v16  ;;  %v3012_v3 = vunpack.c.l.b16 %v2943_v20 }
 0x1be   : > { %v1612_v35 = vpop.f32.mrf.mxu2  ;;  %v3897_v25 = vrot.slane %v3895_v14, 4 }
 0x1bf   : > { %v1681_v31 = vadd.f32 %v1612_v35, %v1184_v39  ;;  %v1963_v34 = vpop.f32.mrf.mxu3  ;;  %v5846_v39 = vld [vmem:[%s6196_s5 + $0x88] sm:$0xf] }
 0x1c0   : > { %v1118_v61 = vpop.f32.mrf.mxu1 }
 0x1c1   : > { %v2032_v22 = vadd.f32 %v1963_v34, %v1681_v31  ;;  %v2684_v51 = vpop.f32.mrf.mxu0  ;;  %v1185_v59 = vadd.f32 %v1118_v61, %v7832_v45  ;;  %v4503_v31 = vsel %vm6258_vm7, %v5939_v17, %v4502_v36  ;;  %v4506_v34 = vsel %vm6258_vm7, %v4504_v63, %v4505_v38  ;;  %v7833_v38 = vld [vmem:[#allocation9_spill] sm:$0xff] }
 0x1c2   : > { %v3908_v61 = vshrl.u32 %v5846_v39, 16  ;;  %v4574_v32 = vunpack.c.l.b16 %v4503_v31  ;;  %v4575_v36 = vunpack.c.l.b16 %v4506_v34  ;;  %v5651_v31 = vld [vmem:[%s6196_s5 + $0x78] sm:$0xe] }
 0x1c3   : > { %5696 = vmatmul.msk.bf16.gmra.mxu1 %vm324_vm1, %v3034_v9  ;;  %5809 = vmatmul.msk.bf16.gmra.mxu2 %vm324_vm1, %v6005_v53  ;;  %v7170_v56 = vadd.f32 %v2681_v33, %v2032_v22  ;;  %v3883_v33 = vsel %vm6253_vm6, %v3878_v62, %v7154_v49  ;;  %v3898_v9 = vshll.u32 %v5845_v28, 16  ;;  %v3904_v53 = vshll.u32 %v5846_v39, 16  ;;  %v5652_v62 = vld [vmem:[%s6196_s5 + $0x7c] sm:$0xf]  ;;  %v5911_v39 = vld [vmem:[%s6196_s5 + $0x88] sm:$0xf] }
 0x1c4   : > { %5874 = vmatmul.msk.bf16.gmra.mxu3 %vm324_vm1, %v4103_v18  ;;  %5955 = vmatmul.msk.bf16.gmra.mxu0 %vm324_vm1, %v4597_v21  ;;  %v3011_v21 = vunpack.c.l.b16 %v2940_v29  ;;  %v4080_v24 = vunpack.c.l.b16 %v3883_v33  ;;  %v4081_v22 = vunpack.c.l.b16 %v3893_v2  ;;  %v3910_v63 = vrot.slane %v3908_v61, 4  ;;  %v5653_v61 = vld [vmem:[%s6196_s5 + $0x80] sm:$0x1] }
 0x1c5   : > { %v3900_v16 = vrot.slane %v3898_v9, 5  ;;  %v7193_v17 = vrot.slane %v3904_v53, 5  ;;  %v4598_v2 = vpack.c.b16 %v4575_v36, %v4574_v32  ;;  %v2949_v36 = vrot.slane %v5653_v61, 5 }
 0x1c6   : > { %v1615_v35 = vpop.f32.mrf.mxu2  ;;  %v3035_v20 = vpack.c.b16 %v3012_v3, %v3011_v21  ;;  %v4104_v33 = vpack.c.b16 %v4081_v22, %v4080_v24  ;;  %v5681_v21 = vrot.slane %v5651_v31, 9  ;;  %v5848_v24 = vld [vmem:[%s6196_s5 + $0x90] sm:$0xf]  ;;  %v5849_v22 = vld [vmem:[%s6196_s5 + $0x94] sm:$0xf] }
 0x1c7   : > { %v1682_v4 = vadd.f32 %v1615_v35, %v1185_v59  ;;  %v1966_v13 = vpop.f32.mrf.mxu3  ;;  %v5847_v59 = vld [vmem:[%s6196_s5 + $0x8c] sm:$0x1]  ;;  %v3901_v34 = vor.u32 %v3900_v16, %v3897_v25 }
 0x1c8   : > { %v1120_v42 = vpop.f32.mrf.mxu1  ;;  %v3914_v14 = vshll.u32 %v5847_v59, 16 }
 0x1c9   : > { %v2033_v18 = vadd.f32 %v1966_v13, %v1682_v4  ;;  %v2686_v49 = vpop.f32.mrf.mxu0  ;;  %v1186_v45 = vadd.f32 %v1120_v42, %v7833_v38  ;;  %v2946_v4 = vrot.slane %v5652_v62, 5  ;;  %v3911_v42 = vor.u32 %v3910_v63, %v7193_v17  ;;  %v5910_v38 = vld [vmem:[%s6196_s5 + $0x84] sm:$0xe] }
 0x1ca   : > { %v3902_v62 = vrot.slane %v3901_v34, 4  ;;  %v3916_v16 = vrot.slane %v3914_v14, 5  ;;  %v5940_v59 = vrot.slane %v5910_v38, 9 }
 0x1cb   : > { %v7190_v48 = vadd.f32 %v2684_v51, %v2033_v18  ;;  %v6006_v51 = vld [vmem:[%s6196_s5 + $0x78] sm:$0xff]  ;;  %v4509_v18 = vrot.slane %v5911_v39, 5  ;;  %v2948_v3 = vrot.slane %v2946_v4, 4  ;;  %v3912_v25 = vrot.slane %v3911_v42, 4  ;;  %v7224_v42 = vld [vmem:[%s7811_s2] ss:$0 sm:$0xff] }
 0x1cd   : > { %v3917_v61 = vsel %vm6253_vm6, %v3912_v25, %v3916_v16 }
 0x1ce   : > { %v1617_v28 = vpop.f32.mrf.mxu2  ;;  %v4083_v16 = vunpack.c.l.b16 %v3917_v61 }
 0x1cf   : > { %v1683_v35 = vadd.f32 %v1617_v28, %v1186_v45  ;;  %v1968_v29 = vpop.f32.mrf.mxu3  ;;  %v5912_v45 = vld [vmem:[%s6196_s5 + $0x8c] sm:$0x1]  ;;  %v4511_v28 = vrot.slane %v4509_v18, 4 }
 0x1d0   : > { %v3103_v13 = vpop.f32.mrf.mxu1  ;;  %v4512_v39 = vrot.slane %v5912_v45, 5  ;;  %v5655_v45 = vld [vmem:[%s6196_s5 + $0x88] sm:$0xf] }
 0x1d1   : > { %v2034_v9 = vadd.f32 %v1968_v29, %v1683_v35  ;;  %v4666_v53 = vpop.f32.mrf.mxu0  ;;  %v3215_v63 = vadd.f32 %v3103_v13, %v6636_v11  ;;  %v3919_v29 = vshrl.u32 %v5848_v24, 16  ;;  %v2950_v11 = vsel %vm6258_vm7, %v2948_v3, %v2949_v36 }
 0x1d2   : > { %v3907_v13 = vsel %vm6253_vm6, %v3902_v62, %v7193_v17  ;;  %v4513_v38 = vsel %vm6258_vm7, %v4511_v28, %v4512_v39  ;;  %v3014_v62 = vunpack.c.l.b16 %v2950_v11  ;;  %v5914_v28 = vld [vmem:[%s6196_s5 + $0x94] sm:$0xf]  ;;  %v5656_v11 = vld [vmem:[%s6196_s5 + $0x8c] sm:$0x1] }
 0x1d3   : > { %5697 = vmatmul.msk.bf16.gmra.mxu1 %vm324_vm1, %v3035_v20  ;;  %5810 = vmatmul.msk.bf16.gmra.mxu2 %vm324_vm1, %v6006_v51  ;;  %v7208_v32 = vadd.f32 %v2686_v49, %v2034_v9  ;;  %v3922_v20 = vshll.u32 %v5848_v24, 16  ;;  %v3928_v49 = vshll.u32 %v5849_v22, 16  ;;  %v3932_v51 = vshrl.u32 %v5849_v22, 16 }
 0x1d4   : > { %5875 = vmatmul.msk.bf16.gmra.mxu3 %vm324_vm1, %v4104_v33  ;;  %5956 = vmatmul.msk.bf16.gmra.mxu0 %vm324_vm1, %v4598_v2  ;;  %v2947_v2 = vsel %vm6258_vm7, %v5681_v21, %v2946_v4  ;;  %v4510_v4 = vsel %vm6258_vm7, %v5940_v59, %v4509_v18  ;;  %v3921_v17 = vrot.slane %v3919_v29, 4  ;;  %v5850_v18 = vld [vmem:[%s6196_s5 + $0x98] sm:$0x1]  ;;  %v4082_v25 = vunpack.c.l.b16 %v3907_v13 }
 0x1d5   : > { %7834 = vst [vmem:[#allocation5_spill] sm:$0xff] %v7208_v32  ;;  %v3924_v21 = vrot.slane %v3922_v20, 5  ;;  %v7233_v3 = vrot.slane %v3928_v49, 5  ;;  %v3934_v24 = vrot.slane %v3932_v51, 4  ;;  %v3013_v36 = vunpack.c.l.b16 %v2947_v2  ;;  %v5654_v20 = vld [vmem:[%s6196_s5 + $0x84] sm:$0xe] }
 0x1d6   : > { %v3454_v35 = vpop.f32.mrf.mxu2  ;;  %v4577_v59 = vunpack.c.l.b16 %v4513_v38  ;;  %v4516_v13 = vrot.slane %v5914_v28, 5  ;;  %v4105_v61 = vpack.c.b16 %v4083_v16, %v4082_v25  ;;  %v5913_v38 = vld [vmem:[%s6196_s5 + $0x90] sm:$0xe]  ;;  %v5851_v28 = vld [vmem:[%s6196_s5 + $0x9c] sm:$0xf] }
 0x1d7   : > { %v3566_v31 = vadd.f32 %v3454_v35, %v3215_v63  ;;  %v4172_v33 = vpop.f32.mrf.mxu3  ;;  %v4576_v63 = vunpack.c.l.b16 %v4510_v4  ;;  %v2953_v35 = vrot.slane %v5655_v45, 5  ;;  %v3925_v49 = vor.u32 %v3924_v21, %v3921_v17  ;;  %v5915_v45 = vld [vmem:[%s6196_s5 + $0x98] sm:$0x1] }
 0x1d8   : > { %v3105_v9 = vpop.f32.mrf.mxu1  ;;  %v3935_v51 = vor.u32 %v3934_v24, %v7233_v3  ;;  %v5682_v24 = vrot.slane %v5654_v20, 9  ;;  %v4518_v25 = vrot.slane %v4516_v13, 4  ;;  %v4519_v16 = vrot.slane %v5915_v45, 5  ;;  %v5852_v20 = vld [vmem:[%s6196_s5 + $0xa0] sm:$0xf] }
 0x1d9   : > { %v4284_v34 = vadd.f32 %v4172_v33, %v3566_v31  ;;  %v4668_v14 = vpop.f32.mrf.mxu0  ;;  %v3938_v31 = vshll.u32 %v5850_v18, 16  ;;  %v4599_v4 = vpack.c.b16 %v4577_v59, %v4576_v63  ;;  %v2956_v18 = vrot.slane %v5656_v11, 5 }
 0x1db   : > { %v4778_v22 = vadd.f32 %v4666_v53, %v4284_v34  ;;  %v3216_v53 = vadd.f32 %v3105_v9, %v6638_v47  ;;  %v3036_v47 = vpack.c.b16 %v3014_v62, %v3013_v36  ;;  %v6007_v9 = vld [vmem:[%s6196_s5 + $0x84] sm:$0xff]  ;;  %v3940_v32 = vrot.slane %v3938_v31, 5 }
 0x1dc   : > { %v5941_v62 = vrot.slane %v5913_v38, 9 }
 0x1dd   : > { %v7244_v39 = vadd.f32 %v7224_v42, %v4778_v22  ;;  %v2955_v22 = vrot.slane %v2953_v35, 4 }
 0x1de   : > { %v3456_v29 = vpop.f32.mrf.mxu2 }
 0x1df   : > { %v3567_v33 = vadd.f32 %v3456_v29, %v3216_v53  ;;  %v4174_v2 = vpop.f32.mrf.mxu3  ;;  %4974 = vrot.lane.b32.xlu0 %v7244_v39, %s6132_s20  ;;  %v3926_v53 = vrot.slane %v3925_v49, 4  ;;  %v3936_v29 = vrot.slane %v3935_v51, 4  ;;  %v2954_v49 = vsel %vm6258_vm7, %v5682_v24, %v2953_v35 }
 0x1e0   : > { %v3108_v34 = vpop.f32.mrf.mxu1  ;;  %v2957_v51 = vsel %vm6258_vm7, %v2955_v22, %v2956_v18  ;;  %v4517_v35 = vsel %vm6258_vm7, %v5941_v62, %v4516_v13  ;;  %v3015_v45 = vunpack.c.l.b16 %v2954_v49 }
 0x1e1   : > { %v4285_v17 = vadd.f32 %v4174_v2, %v3567_v33  ;;  %v4671_v21 = vpop.f32.mrf.mxu0  ;;  %v3217_v59 = vadd.f32 %v3108_v34, %v6680_v37  ;;  %v3931_v31 = vsel %vm6253_vm6, %v3926_v53, %v7233_v3  ;;  %v3941_v37 = vsel %vm6253_vm6, %v3936_v29, %v3940_v32  ;;  %v5658_v29 = vld [vmem:[%s6196_s5 + $0x94] sm:$0xf] }
 0x1e2   : > { %v3943_v3 = vshrl.u32 %v5851_v28, 16  ;;  %v3946_v34 = vshll.u32 %v5851_v28, 16  ;;  %v3956_v32 = vshrl.u32 %v5852_v20, 16  ;;  %v4084_v24 = vunpack.c.l.b16 %v3931_v31 }
 0x1e3   : > { %v4779_v36 = vadd.f32 %v4668_v14, %v4285_v17  ;;  %5698 = vmatmul.msk.bf16.gmra.mxu1 %vm324_vm1, %v3036_v47  ;;  %5811 = vmatmul.msk.bf16.gmra.mxu2 %vm324_vm1, %v6007_v9  ;;  %v4520_v9 = vsel %vm6258_vm7, %v4518_v25, %v4519_v16  ;;  %v3016_v17 = vunpack.c.l.b16 %v2957_v51  ;;  %v4085_v18 = vunpack.c.l.b16 %v3941_v37  ;;  %v6008_v37 = vld [vmem:[%s6196_s5 + $0x90] sm:$0xff] }
 0x1e4   : > { %5876 = vmatmul.msk.bf16.gmra.mxu3 %vm324_vm1, %v4105_v61  ;;  %5957 = vmatmul.msk.bf16.gmra.mxu0 %vm324_vm1, %v4599_v4  ;;  %v3952_v61 = vshll.u32 %v5852_v20, 16  ;;  %v4578_v13 = vunpack.c.l.b16 %v4517_v35  ;;  %v4579_v53 = vunpack.c.l.b16 %v4520_v9  ;;  %v3948_v62 = vrot.slane %v3946_v34, 5  ;;  %v5853_v20 = vld [vmem:[%s6196_s5 + $0xa4] sm:$0x1] }
 0x1e5   : > { %v7267_v63 = vadd.f32 %v7224_v42, %v4779_v36  ;;  %v3945_v36 = vrot.slane %v3943_v3, 4  ;;  %v3958_v16 = vrot.slane %v3956_v32, 4  ;;  %v3037_v31 = vpack.c.b16 %v3016_v17, %v3015_v45  ;;  %v5659_v3 = vld [vmem:[%s6196_s5 + $0x98] sm:$0x1]  ;;  %v5918_v45 = vld [vmem:[%s6196_s5 + $0xa4] sm:$0x1] }
 0x1e6   : > { %v3459_v14 = vpop.f32.mrf.mxu2  ;;  %v7296_v25 = vrot.slane %v3952_v61, 5  ;;  %v4600_v9 = vpack.c.b16 %v4579_v53, %v4578_v13  ;;  %v3962_v34 = vshll.u32 %v5853_v20, 16  ;;  %v5854_v13 = vld [vmem:[%s6196_s5 + $0xa8] sm:$0xf] }
 0x1e7   : > { %v6017_v33 = vpack.c.bf16 %v7267_v63, %v7244_v39  ;;  %v3568_v2 = vadd.f32 %v3459_v14, %v3217_v59  ;;  %v4177_v47 = vpop.f32.mrf.mxu3  ;;  %4976 = vrot.lane.b32.xlu0 %v7267_v63, %s6132_s20 }
 0x1e8   : > { %v3110_v11 = vpop.f32.mrf.mxu1 }
 0x1e9   : > { %6018 = vst [vmem:[%s7275_s24] sm:$0xff] %v6017_v33   ;;  %v4286_v4 = vadd.f32 %v4177_v47, %v3568_v2  ;;  %v4673_v38 = vpop.f32.mrf.mxu0  ;;  %v3218_v28 = vadd.f32 %v3110_v11, %v6682_v52  ;;  %v4106_v33 = vpack.c.b16 %v4085_v18, %v4084_v24  ;;  %v5657_v2 = vld [vmem:[%s6196_s5 + $0x90] sm:$0xe]  ;;  %v2960_v47 = vrot.slane %v5658_v29, 5 }
 0x1ea   : > { %v3949_v52 = vor.u32 %v3948_v62, %v3945_v36  ;;  %v3959_v11 = vor.u32 %v3958_v16, %v7296_v25  ;;  %v2963_v18 = vrot.slane %v5659_v3, 5  ;;  %v3964_v36 = vrot.slane %v3962_v34, 5  ;;  %v5855_v16 = vld [vmem:[%s6196_s5 + $0xac] sm:$0xf] }
 0x1eb   : > { %v4780_v22 = vadd.f32 %v4671_v21, %v4286_v4  ;;  %v5917_v21 = vld [vmem:[%s6196_s5 + $0xa0] sm:$0xf]  ;;  %v5916_v4 = vld [vmem:[%s6196_s5 + $0x9c] sm:$0xe]  ;;  %v2962_v24 = vrot.slane %v2960_v47, 4  ;;  %v3976_v3 = vshll.u32 %v5855_v16, 16 }
 0x1ec   : > { %v3950_v53 = vrot.slane %v3949_v52, 4  ;;  %v3960_v29 = vrot.slane %v3959_v11, 4  ;;  %v5942_v62 = vrot.slane %v5916_v4, 9 }
 0x1ed   : > { %v7299_v59 = vadd.f32 %v7224_v42, %v4780_v22  ;;  %v4523_v22 = vrot.slane %v5917_v21, 5  ;;  %v4526_v21 = vrot.slane %v5918_v45, 5  ;;  %v2964_v52 = vsel %vm6258_vm7, %v2962_v24, %v2963_v18 }
 0x1ee   : > { %v3461_v14 = vpop.f32.mrf.mxu2 }
 0x1ef   : > { %v3569_v49 = vadd.f32 %v3461_v14, %v3218_v28  ;;  %v4179_v51 = vpop.f32.mrf.mxu3  ;;  %4978 = vrot.lane.b32.xlu1 %v7299_v59, %s6132_s20  ;;  %v5683_v28 = vrot.slane %v5657_v2, 9  ;;  %v4525_v14 = vrot.slane %v4523_v22, 4  ;;  %v4524_v4 = vsel %vm6258_vm7, %v5942_v62, %v4523_v22  ;;  %v5920_v62 = vld [vmem:[%s6196_s5 + $0xac] sm:$0xf] }
 0x1f0   : > { %v3113_v35 = vpop.f32.mrf.mxu1 }
 0x1f1   : > { %v4287_v61 = vadd.f32 %v4179_v51, %v3569_v49  ;;  %v4676_v32 = vpop.f32.mrf.mxu0  ;;  %v2961_v51 = vsel %vm6258_vm7, %v5683_v28, %v2960_v47  ;;  %v3955_v47 = vsel %vm6253_vm6, %v3950_v53, %v7296_v25  ;;  %v4527_v28 = vsel %vm6258_vm7, %v4525_v14, %v4526_v21  ;;  %v5856_v53 = vld [vmem:[%s6196_s5 + $0xb0] sm:$0x1] }
 0x1f2   : > { %v3017_v45 = vunpack.c.l.b16 %v2961_v51  ;;  %v3018_v25 = vunpack.c.l.b16 %v2964_v52  ;;  %v4581_v22 = vunpack.c.l.b16 %v4527_v28  ;;  %v5662_v52 = vld [vmem:[%s6196_s5 + $0xa4] sm:$0x1]  ;;  %v5921_v28 = vld [vmem:[%s6196_s5 + $0xb0] sm:$0x1] }
 0x1f3   : > { %v4781_v17 = vadd.f32 %v4673_v38, %v4287_v61  ;;  %5699 = vmatmul.msk.bf16.gmra.mxu1 %vm324_vm1, %v3037_v31  ;;  %5812 = vmatmul.msk.bf16.gmra.mxu2 %vm324_vm1, %v6008_v37  ;;  %v3219_v38 = vadd.f32 %v3113_v35, %v6721_v23  ;;  %v3967_v31 = vshrl.u32 %v5854_v13, 16  ;;  %v3970_v37 = vshll.u32 %v5854_v13, 16 }
 0x1f4   : > { %5877 = vmatmul.msk.bf16.gmra.mxu3 %vm324_vm1, %v4106_v33  ;;  %5958 = vmatmul.msk.bf16.gmra.mxu0 %vm324_vm1, %v4600_v9  ;;  %v3980_v23 = vshrl.u32 %v5855_v16, 16  ;;  %v3965_v61 = vsel %vm6253_vm6, %v3960_v29, %v3964_v36  ;;  %v7342_v16 = vrot.slane %v3976_v3, 5  ;;  %v4580_v36 = vunpack.c.l.b16 %v4524_v4 }
 0x1f5   : > { %v7319_v20 = vadd.f32 %v7224_v42, %v4781_v17  ;;  %v5661_v17 = vld [vmem:[%s6196_s5 + $0xa0] sm:$0xf]  ;;  %v3969_v24 = vrot.slane %v3967_v31, 4  ;;  %v3972_v18 = vrot.slane %v3970_v37, 5  ;;  %v4087_v29 = vunpack.c.l.b16 %v3965_v61  ;;  %v5660_v31 = vld [vmem:[%s6196_s5 + $0x9c] sm:$0xe] }
 0x1f6   : > { %v3464_v49 = vpop.f32.mrf.mxu2  ;;  %v2967_v51 = vrot.slane %v5661_v17, 5  ;;  %v3038_v3 = vpack.c.b16 %v3018_v25, %v3017_v45  ;;  %v4530_v61 = vrot.slane %v5920_v62, 5 }
 0x1f7   : > { %v6022_v33 = vpack.c.bf16 %v7319_v20, %v7299_v59  ;;  %v3570_v2 = vadd.f32 %v3464_v49, %v3219_v38  ;;  %v4182_v9 = vpop.f32.mrf.mxu3  ;;  %4980 = vrot.lane.b32.xlu1 %v7319_v20, %s6132_s20  ;;  %v3982_v38 = vrot.slane %v3980_v23, 4  ;;  %v4086_v49 = vunpack.c.l.b16 %v3955_v47  ;;  %v6009_v23 = vld [vmem:[%s6196_s5 + $0x9c] sm:$0xff] }
 0x1f8   : > { %v3115_v35 = vpop.f32.mrf.mxu1  ;;  %v3973_v37 = vor.u32 %v3972_v18, %v3969_v24  ;;  %v5684_v24 = vrot.slane %v5660_v31, 9  ;;  %v2969_v18 = vrot.slane %v2967_v51, 4  ;;  %v4532_v62 = vrot.slane %v4530_v61, 4  ;;  %v5858_v31 = vld [vmem:[%s6196_s5 + $0xb8] sm:$0xf] }
 0x1f9   : > { %6094 = vst [vmem:[%s7275_s24 + $0x8] sm:$0xff] %v6022_v33   ;;  %v4288_v11 = vadd.f32 %v4182_v9, %v3570_v2  ;;  %v4678_v34 = vpop.f32.mrf.mxu0  ;;  %v3220_v21 = vadd.f32 %v3115_v35, %v6723_v57  ;;  %v3986_v33 = vshll.u32 %v5856_v53, 16  ;;  %v3983_v47 = vor.u32 %v3982_v38, %v7342_v16 }
 0x1fa   : > { %v4107_v57 = vpack.c.b16 %v4087_v29, %v4086_v49  ;;  %v4601_v35 = vpack.c.b16 %v4581_v22, %v4580_v36  ;;  %v2970_v53 = vrot.slane %v5662_v52, 5  ;;  %v4533_v49 = vrot.slane %v5921_v28, 5  ;;  %v5857_v22 = vld [vmem:[%s6196_s5 + $0xb4] sm:$0xf] }
 0x1fb   : > { %v4782_v13 = vadd.f32 %v4676_v32, %v4288_v11  ;;  %v5919_v11 = vld [vmem:[%s6196_s5 + $0xa8] sm:$0xe]  ;;  %v3984_v38 = vrot.slane %v3983_v47, 4 }
 0x1fc   : > { %v5943_v45 = vrot.slane %v5919_v11, 9  ;;  %v4534_v52 = vsel %vm6258_vm7, %v4532_v62, %v4533_v49  ;;  %v3994_v11 = vshll.u32 %v5857_v22, 16 }
 0x1fd   : > { %v7346_v14 = vadd.f32 %v7224_v42, %v4782_v13 }
 0x1fe   : > { %v3466_v32 = vpop.f32.mrf.mxu2 }
 0x1ff   : > { %v3571_v2 = vadd.f32 %v3466_v32, %v3220_v21  ;;  %v4184_v9 = vpop.f32.mrf.mxu3  ;;  %4982 = vrot.lane.b32.xlu2 %v7346_v14, %s6132_s20  ;;  %v3974_v21 = vrot.slane %v3973_v37, 4  ;;  %v3988_v32 = vrot.slane %v3986_v33, 5  ;;  %v2971_v33 = vsel %vm6258_vm7, %v2969_v18, %v2970_v53 }
 0x200   : > { %v3118_v4 = vpop.f32.mrf.mxu1 }
 0x201   : > { %v4289_v17 = vadd.f32 %v4184_v9, %v3571_v2  ;;  %v4681_v13 = vpop.f32.mrf.mxu0  ;;  %v3221_v36 = vadd.f32 %v3118_v4, %v6764_v55  ;;  %v3979_v2 = vsel %vm6253_vm6, %v3974_v21, %v7342_v16  ;;  %v4531_v9 = vsel %vm6258_vm7, %v5943_v45, %v4530_v61  ;;  %v5664_v45 = vld [vmem:[%s6196_s5 + $0xac] sm:$0xf] }
 0x202   : > { %v3991_v16 = vshrl.u32 %v5857_v22, 16  ;;  %v4000_v4 = vshll.u32 %v5858_v31, 16  ;;  %v4004_v61 = vshrl.u32 %v5858_v31, 16  ;;  %v4582_v21 = vunpack.c.l.b16 %v4531_v9  ;;  %v5859_v31 = vld [vmem:[%s6196_s5 + $0xbc] sm:$0x1]  ;;  %v6010_v9 = vld [vmem:[%s6196_s5 + $0xa8] sm:$0xff] }
 0x203   : > { %v4783_v25 = vadd.f32 %v4678_v34, %v4289_v17  ;;  %5700 = vmatmul.msk.bf16.gmra.mxu1 %vm324_vm1, %v3038_v3  ;;  %5813 = vmatmul.msk.bf16.gmra.mxu2 %vm324_vm1, %v6009_v23  ;;  %v2968_v34 = vsel %vm6258_vm7, %v5684_v24, %v2967_v51  ;;  %v3989_v51 = vsel %vm6253_vm6, %v3984_v38, %v3988_v32  ;;  %v3020_v17 = vunpack.c.l.b16 %v2971_v33 }
 0x204   : > { %5878 = vmatmul.msk.bf16.gmra.mxu3 %vm324_vm1, %v4107_v57  ;;  %5959 = vmatmul.msk.bf16.gmra.mxu0 %vm324_vm1, %v4601_v35  ;;  %v3019_v28 = vunpack.c.l.b16 %v2968_v34  ;;  %v4088_v24 = vunpack.c.l.b16 %v3979_v2  ;;  %v4089_v53 = vunpack.c.l.b16 %v3989_v51  ;;  %v4583_v32 = vunpack.c.l.b16 %v4534_v52 }
 0x205   : > { %v7362_v29 = vadd.f32 %v7224_v42, %v4783_v25  ;;  %v3993_v25 = vrot.slane %v3991_v16, 4  ;;  %v3996_v38 = vrot.slane %v3994_v11, 5  ;;  %v7386_v62 = vrot.slane %v4000_v4, 5  ;;  %v5665_v16 = vld [vmem:[%s6196_s5 + $0xb0] sm:$0x1] }
 0x206   : > { %v3469_v37 = vpop.f32.mrf.mxu2  ;;  %v4006_v49 = vrot.slane %v4004_v61, 4  ;;  %v3039_v2 = vpack.c.b16 %v3020_v17, %v3019_v28  ;;  %v4602_v52 = vpack.c.b16 %v4583_v32, %v4582_v21  ;;  %v4010_v11 = vshll.u32 %v5859_v31, 16  ;;  %v5924_v28 = vld [vmem:[%s6196_s5 + $0xbc] sm:$0x1]  ;;  %v5860_v21 = vld [vmem:[%s6196_s5 + $0xc0] sm:$0xf] }
 0x207   : > { %v6027_v55 = vpack.c.bf16 %v7362_v29, %v7346_v14  ;;  %v3572_v3 = vadd.f32 %v3469_v37, %v3221_v36  ;;  %v4187_v23 = vpop.f32.mrf.mxu3  ;;  %4984 = vrot.lane.b32.xlu2 %v7362_v29, %s6132_s20 }
 0x208   : > { %v3120_v47 = vpop.f32.mrf.mxu1 }
 0x209   : > { %6095 = vst [vmem:[%s7275_s24 + $0x10] sm:$0xff] %v6027_v55   ;;  %v4290_v57 = vadd.f32 %v4187_v23, %v3572_v3  ;;  %v4683_v35 = vpop.f32.mrf.mxu0  ;;  %v3222_v22 = vadd.f32 %v3120_v47, %v6766_v12  ;;  %v4108_v55 = vpack.c.b16 %v4089_v53, %v4088_v24  ;;  %v5663_v3 = vld [vmem:[%s6196_s5 + $0xa8] sm:$0xe]  ;;  %v2974_v23 = vrot.slane %v5664_v45, 5 }
 0x20a   : > { %v3997_v12 = vor.u32 %v3996_v38, %v3993_v25  ;;  %v4007_v47 = vor.u32 %v4006_v49, %v7386_v62  ;;  %v2977_v53 = vrot.slane %v5665_v16, 5  ;;  %v4012_v25 = vrot.slane %v4010_v11, 5  ;;  %v5861_v49 = vld [vmem:[%s6196_s5 + $0xc4] sm:$0xf] }
 0x20b   : > { %v4784_v18 = vadd.f32 %v4681_v13, %v4290_v57  ;;  %v5923_v13 = vld [vmem:[%s6196_s5 + $0xb8] sm:$0xf]  ;;  %v5922_v57 = vld [vmem:[%s6196_s5 + $0xb4] sm:$0xe]  ;;  %v2976_v24 = vrot.slane %v2974_v23, 4  ;;  %v4024_v16 = vshll.u32 %v5861_v49, 16 }
 0x20c   : > { %v3998_v32 = vrot.slane %v3997_v12, 4  ;;  %v4008_v45 = vrot.slane %v4007_v47, 4  ;;  %v5944_v38 = vrot.slane %v5922_v57, 9 }
 0x20d   : > { %v7389_v36 = vadd.f32 %v7224_v42, %v4784_v18  ;;  %v4537_v18 = vrot.slane %v5923_v13, 5  ;;  %v4540_v13 = vrot.slane %v5924_v28, 5  ;;  %v2978_v12 = vsel %vm6258_vm7, %v2976_v24, %v2977_v53 }
 0x20e   : > { %v3471_v37 = vpop.f32.mrf.mxu2 }
 0x20f   : > { %v3573_v34 = vadd.f32 %v3471_v37, %v3222_v22  ;;  %v4189_v33 = vpop.f32.mrf.mxu3  ;;  %4986 = vrot.lane.b32.xlu0 %v7389_v36, %s6132_s20  ;;  %v5685_v22 = vrot.slane %v5663_v3, 9  ;;  %v4539_v37 = vrot.slane %v4537_v18, 4  ;;  %v4538_v57 = vsel %vm6258_vm7, %v5944_v38, %v4537_v18  ;;  %v5926_v38 = vld [vmem:[%s6196_s5 + $0xc4] sm:$0xf] }
 0x210   : > { %v3123_v51 = vpop.f32.mrf.mxu1 }
 0x211   : > { %v4291_v4 = vadd.f32 %v4189_v33, %v3573_v34  ;;  %v4686_v61 = vpop.f32.mrf.mxu0  ;;  %v2975_v33 = vsel %vm6258_vm7, %v5685_v22, %v2974_v23  ;;  %v4003_v23 = vsel %vm6253_vm6, %v3998_v32, %v7386_v62  ;;  %v4541_v22 = vsel %vm6258_vm7, %v4539_v37, %v4540_v13  ;;  %v5862_v32 = vld [vmem:[%s6196_s5 + $0xc8] sm:$0x1] }
 0x212   : > { %v3021_v28 = vunpack.c.l.b16 %v2975_v33  ;;  %v3022_v62 = vunpack.c.l.b16 %v2978_v12  ;;  %v4585_v18 = vunpack.c.l.b16 %v4541_v22  ;;  %v5668_v12 = vld [vmem:[%s6196_s5 + $0xbc] sm:$0x1]  ;;  %v5927_v22 = vld [vmem:[%s6196_s5 + $0xc8] sm:$0x1] }
 0x213   : > { %v4785_v17 = vadd.f32 %v4683_v35, %v4291_v4  ;;  %5701 = vmatmul.msk.bf16.gmra.mxu1 %vm324_vm1, %v3039_v2  ;;  %5814 = vmatmul.msk.bf16.gmra.mxu2 %vm324_vm1, %v6010_v9  ;;  %v3223_v35 = vadd.f32 %v3123_v51, %v6803_v46  ;;  %v4015_v2 = vshrl.u32 %v5860_v21, 16  ;;  %v4018_v9 = vshll.u32 %v5860_v21, 16 }
 0x214   : > { %5879 = vmatmul.msk.bf16.gmra.mxu3 %vm324_vm1, %v4108_v55  ;;  %5960 = vmatmul.msk.bf16.gmra.mxu0 %vm324_vm1, %v4602_v52  ;;  %v4028_v46 = vshrl.u32 %v5861_v49, 16  ;;  %v4013_v4 = vsel %vm6253_vm6, %v4008_v45, %v4012_v25  ;;  %v7432_v49 = vrot.slane %v4024_v16, 5  ;;  %v4584_v25 = vunpack.c.l.b16 %v4538_v57 }
 0x215   : > { %v7409_v31 = vadd.f32 %v7224_v42, %v4785_v17  ;;  %v5667_v17 = vld [vmem:[%s6196_s5 + $0xb8] sm:$0xf]  ;;  %v4017_v24 = vrot.slane %v4015_v2, 4  ;;  %v4020_v53 = vrot.slane %v4018_v9, 5  ;;  %v4091_v45 = vunpack.c.l.b16 %v4013_v4  ;;  %v5666_v2 = vld [vmem:[%s6196_s5 + $0xb4] sm:$0xe] }
 0x216   : > { %v3474_v34 = vpop.f32.mrf.mxu2  ;;  %v2981_v33 = vrot.slane %v5667_v17, 5  ;;  %v3040_v16 = vpack.c.b16 %v3022_v62, %v3021_v28  ;;  %v4544_v4 = vrot.slane %v5926_v38, 5 }
 0x217   : > { %v6032_v55 = vpack.c.bf16 %v7409_v31, %v7389_v36  ;;  %v3574_v3 = vadd.f32 %v3474_v34, %v3223_v35  ;;  %v4192_v52 = vpop.f32.mrf.mxu3  ;;  %4988 = vrot.lane.b32.xlu1 %v7409_v31, %s6132_s20  ;;  %v4030_v35 = vrot.slane %v4028_v46, 4  ;;  %v4090_v34 = vunpack.c.l.b16 %v4003_v23  ;;  %v6011_v46 = vld [vmem:[%s6196_s5 + $0xb4] sm:$0xff] }
 0x218   : > { %v3125_v51 = vpop.f32.mrf.mxu1  ;;  %v4021_v9 = vor.u32 %v4020_v53, %v4017_v24  ;;  %v5686_v24 = vrot.slane %v5666_v2, 9  ;;  %v2983_v53 = vrot.slane %v2981_v33, 4  ;;  %v4546_v38 = vrot.slane %v4544_v4, 4  ;;  %v5864_v2 = vld [vmem:[%s6196_s5 + $0xd0] sm:$0xf] }
 0x219   : > { %6096 = vst [vmem:[%s7275_s24 + $0x18] sm:$0xff] %v6032_v55   ;;  %v4292_v47 = vadd.f32 %v4192_v52, %v3574_v3  ;;  %v4688_v11 = vpop.f32.mrf.mxu0  ;;  %v3224_v13 = vadd.f32 %v3125_v51, %v6805_v27  ;;  %v4034_v55 = vshll.u32 %v5862_v32, 16  ;;  %v4031_v23 = vor.u32 %v4030_v35, %v7432_v49 }
 0x21a   : > { %v4109_v27 = vpack.c.b16 %v4091_v45, %v4090_v34  ;;  %v4603_v51 = vpack.c.b16 %v4585_v18, %v4584_v25  ;;  %v2984_v32 = vrot.slane %v5668_v12, 5  ;;  %v4547_v34 = vrot.slane %v5927_v22, 5  ;;  %v5863_v18 = vld [vmem:[%s6196_s5 + $0xcc] sm:$0xf] }
 0x21b   : > { %v4786_v21 = vadd.f32 %v4686_v61, %v4292_v47  ;;  %v5925_v47 = vld [vmem:[%s6196_s5 + $0xc0] sm:$0xe]  ;;  %v4032_v35 = vrot.slane %v4031_v23, 4 }
 0x21c   : > { %v5945_v28 = vrot.slane %v5925_v47, 9  ;;  %v4548_v12 = vsel %vm6258_vm7, %v4546_v38, %v4547_v34  ;;  %v4042_v47 = vshll.u32 %v5863_v18, 16 }
 0x21d   : > { %v7436_v37 = vadd.f32 %v7224_v42, %v4786_v21 }
 0x21e   : > { %v3476_v61 = vpop.f32.mrf.mxu2 }
 0x21f   : > { %v3575_v3 = vadd.f32 %v3476_v61, %v3224_v13  ;;  %v4194_v52 = vpop.f32.mrf.mxu3  ;;  %4990 = vrot.lane.b32.xlu2 %v7436_v37, %s6132_s20  ;;  %v4022_v13 = vrot.slane %v4021_v9, 4  ;;  %v4036_v61 = vrot.slane %v4034_v55, 5  ;;  %v2985_v55 = vsel %vm6258_vm7, %v2983_v53, %v2984_v32 }
 0x220   : > { %v3128_v57 = vpop.f32.mrf.mxu1 }
 0x221   : > { %v4293_v17 = vadd.f32 %v4194_v52, %v3575_v3  ;;  %v4691_v21 = vpop.f32.mrf.mxu0  ;;  %v3225_v25 = vadd.f32 %v3128_v57, %v6832_v41  ;;  %v4027_v3 = vsel %vm6253_vm6, %v4022_v13, %v7432_v49  ;;  %v4545_v52 = vsel %vm6258_vm7, %v5945_v28, %v4544_v4  ;;  %v5670_v28 = vld [vmem:[%s6196_s5 + $0xc4] sm:$0xf] }
 0x222   : > { %v4039_v49 = vshrl.u32 %v5863_v18, 16  ;;  %v4048_v57 = vshll.u32 %v5864_v2, 16  ;;  %v4052_v4 = vshrl.u32 %v5864_v2, 16  ;;  %v4586_v13 = vunpack.c.l.b16 %v4545_v52  ;;  %v5865_v2 = vld [vmem:[%s6196_s5 + $0xd4] sm:$0x1]  ;;  %v6012_v52 = vld [vmem:[%s6196_s5 + $0xc0] sm:$0xff] }
 0x223   : > { %v4787_v62 = vadd.f32 %v4688_v11, %v4293_v17  ;;  %5702 = vmatmul.msk.bf16.gmra.mxu1 %vm324_vm1, %v3040_v16  ;;  %5815 = vmatmul.msk.bf16.gmra.mxu2 %vm324_vm1, %v6011_v46  ;;  %v2982_v11 = vsel %vm6258_vm7, %v5686_v24, %v2981_v33  ;;  %v4037_v33 = vsel %vm6253_vm6, %v4032_v35, %v4036_v61  ;;  %v3024_v17 = vunpack.c.l.b16 %v2985_v55 }
 0x224   : > { %5880 = vmatmul.msk.bf16.gmra.mxu3 %vm324_vm1, %v4109_v27  ;;  %5961 = vmatmul.msk.bf16.gmra.mxu0 %vm324_vm1, %v4603_v51  ;;  %v3023_v22 = vunpack.c.l.b16 %v2982_v11  ;;  %v4092_v24 = vunpack.c.l.b16 %v4027_v3  ;;  %v4093_v32 = vunpack.c.l.b16 %v4037_v33  ;;  %v4587_v61 = vunpack.c.l.b16 %v4548_v12  ;;  %v5929_v11 = vld [vmem:[%s6196_s5 + $0xd0] sm:$0xf]  ;;  %v5669_v12 = vld [vmem:[%s6196_s5 + $0xc0] sm:$0xe] }
 0x225   : > { %v7452_v45 = vadd.f32 %v7224_v42, %v4787_v62  ;;  %v4041_v62 = vrot.slane %v4039_v49, 4  ;;  %v4044_v35 = vrot.slane %v4042_v47, 5  ;;  %v4050_v38 = vrot.slane %v4048_v57, 5  ;;  %v5671_v49 = vld [vmem:[%s6196_s5 + $0xc8] sm:$0x1] }
 0x226   : > { %v3479_v9 = vpop.f32.mrf.mxu2  ;;  %v4054_v34 = vrot.slane %v4052_v4, 4  ;;  %v3041_v3 = vpack.c.b16 %v3024_v17, %v3023_v22  ;;  %v4604_v33 = vpack.c.b16 %v4587_v61, %v4586_v13  ;;  %v5687_v22 = vrot.slane %v5669_v12, 9 }
 0x227   : > { %v6037_v41 = vpack.c.bf16 %v7452_v45, %v7436_v37  ;;  %v3576_v16 = vadd.f32 %v3479_v9, %v3225_v25  ;;  %v4197_v46 = vpop.f32.mrf.mxu3  ;;  %4992 = vrot.lane.b32.xlu0 %v7452_v45, %s6132_s20  ;;  %v4045_v47 = vor.u32 %v4044_v35, %v4041_v62 }
 0x228   : > { %v3130_v23 = vpop.f32.mrf.mxu1 }
 0x229   : > { %6097 = vst [vmem:[%s7275_s24 + $0x20] sm:$0xff] %v6037_v41   ;;  %v4294_v27 = vadd.f32 %v4197_v46, %v3576_v16  ;;  %v4693_v51 = vpop.f32.mrf.mxu0  ;;  %v3226_v18 = vadd.f32 %v3130_v23, %v6847_v44  ;;  %v4110_v41 = vpack.c.b16 %v4093_v32, %v4092_v24  ;;  %v2988_v16 = vrot.slane %v5670_v28, 5 }
 0x22a   : > { %v4055_v44 = vor.u32 %v4054_v34, %v4050_v38  ;;  %v4058_v23 = vshll.u32 %v5865_v2, 16  ;;  %v2991_v24 = vrot.slane %v5671_v49, 5  ;;  %v4046_v32 = vrot.slane %v4045_v47, 4 }
 0x22b   : > { %v4788_v53 = vadd.f32 %v4691_v21, %v4294_v27  ;;  %v5928_v27 = vld [vmem:[%s6196_s5 + $0xcc] sm:$0xe]  ;;  %v2990_v17 = vrot.slane %v2988_v16, 4 }
 0x22c   : > { %v4056_v13 = vrot.slane %v4055_v44, 4  ;;  %v4060_v61 = vrot.slane %v4058_v23, 5  ;;  %v5946_v28 = vrot.slane %v5928_v27, 9 }
 0x22d   : > { %v7477_v25 = vadd.f32 %v7224_v42, %v4788_v53  ;;  %v4551_v53 = vrot.slane %v5929_v11, 5 }
 0x22e   : > { %v3481_v9 = vpop.f32.mrf.mxu2  ;;  %v4061_v12 = vsel %vm6253_vm6, %v4056_v13, %v4060_v61 }
 0x22f   : > { %v3577_v21 = vadd.f32 %v3481_v9, %v3226_v18  ;;  %v4199_v55 = vpop.f32.mrf.mxu3  ;;  %4994 = vrot.lane.b32.xlu1 %v7477_v25, %s6132_s20  ;;  %v5930_v18 = vld [vmem:[%s6196_s5 + $0xd4] sm:$0x1]  ;;  %v4553_v35 = vrot.slane %v4551_v53, 4  ;;  %v4552_v49 = vsel %vm6258_vm7, %v5946_v28, %v4551_v53  ;;  %v4095_v27 = vunpack.c.l.b16 %v4061_v12  ;;  %v6013_v53 = vld [vmem:[%s6196_s5 + $0xcc] sm:$0xff] }
 0x230   : > { %v3133_v46 = vpop.f32.mrf.mxu1  ;;  %v4554_v34 = vrot.slane %v5930_v18, 5  ;;  %v4588_v18 = vunpack.c.l.b16 %v4552_v49 }
 0x231   : > { %v4295_v57 = vadd.f32 %v4199_v55, %v3577_v21  ;;  %v4696_v4 = vpop.f32.mrf.mxu0 }
 0x232   : > { %v4555_v47 = vsel %vm6258_vm7, %v4553_v35, %v4554_v34 }
 0x233   : > { %v4789_v9 = vadd.f32 %v4693_v51, %v4295_v57  ;;  %5703 = vmatmul.msk.bf16.gmra.mxu1 %vm324_vm1, %v3041_v3  ;;  %5816 = vmatmul.msk.bf16.gmra.mxu2 %vm324_vm1, %v6012_v52  ;;  %v3227_v51 = vadd.f32 %v3133_v46, %v6870_v15  ;;  %v2989_v52 = vsel %vm6258_vm7, %v5687_v22, %v2988_v16 }
 0x234   : > { %5881 = vmatmul.msk.bf16.gmra.mxu3 %vm324_vm1, %v4110_v41  ;;  %5962 = vmatmul.msk.bf16.gmra.mxu0 %vm324_vm1, %v4604_v33  ;;  %v2992_v41 = vsel %vm6258_vm7, %v2990_v17, %v2991_v24  ;;  %v4051_v15 = vsel %vm6253_vm6, %v4046_v32, %v4050_v38  ;;  %v3025_v44 = vunpack.c.l.b16 %v2989_v52  ;;  %v4589_v38 = vunpack.c.l.b16 %v4555_v47 }
 0x235   : > { %v7494_v62 = vadd.f32 %v7224_v42, %v4789_v9  ;;  %v3026_v23 = vunpack.c.l.b16 %v2992_v41  ;;  %v4094_v57 = vunpack.c.l.b16 %v4051_v15 }
 0x236   : > { %v3484_v2 = vpop.f32.mrf.mxu2  ;;  %v4605_v13 = vpack.c.b16 %v4589_v38, %v4588_v18 }
 0x237   : > { %v6042_v11 = vpack.c.bf16 %v7494_v62, %v7477_v25  ;;  %v3578_v21 = vadd.f32 %v3484_v2, %v3227_v51  ;;  %v4202_v55 = vpop.f32.mrf.mxu3  ;;  %4996 = vrot.lane.b32.xlu2 %v7494_v62, %s6132_s20  ;;  %v3042_v5 = vpack.c.b16 %v3026_v23, %v3025_v44  ;;  %v4111_v32 = vpack.c.b16 %v4095_v27, %v4094_v57 }
 0x238   : > { %v3135_v3 = vpop.f32.mrf.mxu1 }
 0x239   : > { %6098 = vst [vmem:[%s7275_s24 + $0x28] sm:$0xff] %v6042_v11   ;;  %v4296_v46 = vadd.f32 %v4202_v55, %v3578_v21  ;;  %v4698_v33 = vpop.f32.mrf.mxu0  ;;  %v3228_v0 = vadd.f32 %v3135_v3, %v6882_v7 }
 0x23b   : > { %v4790_v16 = vadd.f32 %v4696_v4, %v4296_v46 }
 0x23d   : > { %v7515_v9 = vadd.f32 %v7224_v42, %v4790_v16 }
 0x23e   : > { %v3486_v22 = vpop.f32.mrf.mxu2 }
 0x23f   : > { %v3579_v17 = vadd.f32 %v3486_v22, %v3228_v0  ;;  %v4204_v24 = vpop.f32.mrf.mxu3  ;;  %4998 = vrot.lane.b32.xlu0 %v7515_v9, %s6132_s20 }
 0x240   : > { %v3138_v4 = vpop.f32.mrf.mxu1 }
 0x241   : > { %v4297_v61 = vadd.f32 %v4204_v24, %v3579_v17  ;;  %v4701_v28 = vpop.f32.mrf.mxu0  ;;  %v3229_v35 = vadd.f32 %v3138_v4, %v6902_v40 }
 0x243   : > { %v4791_v51 = vadd.f32 %v4698_v33, %v4297_v61  ;;  %5704 = vmatmul.msk.bf16.gmra.mxu1 %vm324_vm1, %v3042_v5  ;;  %5817 = vmatmul.msk.bf16.gmra.mxu2 %vm324_vm1, %v6013_v53 }
 0x244   : > { %5882 = vmatmul.msk.bf16.gmra.mxu3 %vm324_vm1, %v4111_v32  ;;  %5963 = vmatmul.msk.bf16.gmra.mxu0 %vm324_vm1, %v4605_v13 }
 0x245   : > { %v7526_v7 = vadd.f32 %v7224_v42, %v4791_v51 }
 0x246   : > { %v3489_v34 = vpop.f32.mrf.mxu2 }
 0x247   : > { %v6047_v2 = vpack.c.bf16 %v7526_v7, %v7515_v9  ;;  %v3580_v11 = vadd.f32 %v3489_v34, %v3229_v35  ;;  %v4207_v21 = vpop.f32.mrf.mxu3  ;;  %5000 = vrot.lane.b32.xlu1 %v7526_v7, %s6132_s20 }
 0x248   : > { %v3140_v55 = vpop.f32.mrf.mxu1 }
 0x249   : > { %6099 = vst [vmem:[%s7275_s24 + $0x30] sm:$0xff] %v6047_v2   ;;  %v4298_v3 = vadd.f32 %v4207_v21, %v3580_v11  ;;  %v4703_v52 = vpop.f32.mrf.mxu0  ;;  %v3230_v46 = vadd.f32 %v3140_v55, %v6920_v19 }
 0x24b   : > { %v4792_v41 = vadd.f32 %v4701_v28, %v4298_v3 }
 0x24d   : > { %v7535_v15 = vadd.f32 %v7224_v42, %v4792_v41 }
 0x24e   : > { %v3491_v40 = vpop.f32.mrf.mxu2 }
 0x24f   : > { %v3581_v33 = vadd.f32 %v3491_v40, %v3230_v46  ;;  %v4209_v12 = vpop.f32.mrf.mxu3  ;;  %5002 = vrot.lane.b32.xlu2 %v7535_v15, %s6132_s20 }
 0x250   : > { %v3143_v49 = vpop.f32.mrf.mxu1 }
 0x251   : > { %v4299_v47 = vadd.f32 %v4209_v12, %v3581_v33  ;;  %v4706_v16 = vpop.f32.mrf.mxu0  ;;  %v3231_v57 = vadd.f32 %v3143_v49, %v6942_v30 }
 0x253   : > { %v4793_v44 = vadd.f32 %v4703_v52, %v4299_v47 }
 0x255   : > { %v7541_v23 = vadd.f32 %v7224_v42, %v4793_v44 }
 0x256   : > { %v3494_v27 = vpop.f32.mrf.mxu2 }
 0x257   : > { %v6052_v19 = vpack.c.bf16 %v7541_v23, %v7535_v15  ;;  %v3582_v18 = vadd.f32 %v3494_v27, %v3231_v57  ;;  %v4212_v38 = vpop.f32.mrf.mxu3  ;;  %5004 = vrot.lane.b32.xlu0 %v7541_v23, %s6132_s20 }
 0x258   : > { %v3145_v0 = vpop.f32.mrf.mxu1 }
 0x259   : > { %6100 = vst [vmem:[%s7275_s24 + $0x38] sm:$0xff] %v6052_v19   ;;  %v4300_v22 = vadd.f32 %v4212_v38, %v3582_v18  ;;  %v4708_v17 = vpop.f32.mrf.mxu0  ;;  %v3232_v53 = vadd.f32 %v3145_v0, %v6954_v43 }
 0x25b   : > { %v4794_v24 = vadd.f32 %v4706_v16, %v4300_v22 }
 0x25d   : > { %v7550_v5 = vadd.f32 %v7224_v42, %v4794_v24 }
 0x25e   : > { %v3496_v30 = vpop.f32.mrf.mxu2 }
 0x25f   : > { %v3583_v4 = vadd.f32 %v3496_v30, %v3232_v53  ;;  %v4214_v32 = vpop.f32.mrf.mxu3  ;;  %5006 = vrot.lane.b32.xlu1 %v7550_v5, %s6132_s20 }
 0x260   : > { %v3148_v13 = vpop.f32.mrf.mxu1 }
 0x261   : > { %v4301_v61 = vadd.f32 %v4214_v32, %v3583_v4  ;;  %v4711_v28 = vpop.f32.mrf.mxu0  ;;  %v3233_v34 = vadd.f32 %v3148_v13, %v6974_v54 }
 0x263   : > { %v4795_v51 = vadd.f32 %v4708_v17, %v4301_v61 }
 0x265   : > { %v7556_v35 = vadd.f32 %v7224_v42, %v4795_v51  ;;  %v7567_v42 = vld [vmem:[%s7811_s2] ss:$0 sm:$0xff] }
 0x266   : > { %v3499_v2 = vpop.f32.mrf.mxu2 }
 0x267   : > { %v6057_v43 = vpack.c.bf16 %v7556_v35, %v7550_v5  ;;  %v3584_v11 = vadd.f32 %v3499_v2, %v3233_v34  ;;  %v4217_v21 = vpop.f32.mrf.mxu3  ;;  %5008 = vrot.lane.b32.xlu2 %v7556_v35, %s6132_s20 }
 0x268   : > { %v3150_v55 = vpop.f32.mrf.mxu1 }
 0x269   : > { %6101 = vst [vmem:[%s7275_s24 + $0x40] sm:$0xff] %v6057_v43   ;;  %v4302_v3 = vadd.f32 %v4217_v21, %v3584_v11  ;;  %v4713_v52 = vpop.f32.mrf.mxu0  ;;  %v3234_v46 = vadd.f32 %v3150_v55, %v6992_v10 }
 0x26b   : > { %v4796_v41 = vadd.f32 %v4711_v28, %v4302_v3 }
 0x26d   : > { %v7570_v54 = vadd.f32 %v7567_v42, %v4796_v41 }
 0x26e   : > { %v3501_v40 = vpop.f32.mrf.mxu2 }
 0x26f   : > { %v3585_v33 = vadd.f32 %v3501_v40, %v3234_v46  ;;  %v4219_v12 = vpop.f32.mrf.mxu3  ;;  %5010 = vrot.lane.b32.xlu0 %v7570_v54, %s6132_s20 }
 0x270   : > { %v3153_v49 = vpop.f32.mrf.mxu1 }
 0x271   : > { %v4303_v47 = vadd.f32 %v4219_v12, %v3585_v33  ;;  %v4716_v16 = vpop.f32.mrf.mxu0  ;;  %v3235_v27 = vadd.f32 %v3153_v49, %v7014_v60 }
 0x273   : > { %v4797_v44 = vadd.f32 %v4713_v52, %v4303_v47 }
 0x275   : > { %v7576_v57 = vadd.f32 %v7567_v42, %v4797_v44 }
 0x276   : > { %v3504_v19 = vpop.f32.mrf.mxu2 }
 0x277   : > { %v6062_v10 = vpack.c.bf16 %v7576_v57, %v7570_v54  ;;  %v3586_v18 = vadd.f32 %v3504_v19, %v3235_v27  ;;  %v4222_v38 = vpop.f32.mrf.mxu3  ;;  %5012 = vrot.lane.b32.xlu1 %v7576_v57, %s6132_s20 }
 0x278   : > { %v3155_v0 = vpop.f32.mrf.mxu1 }
 0x279   : > { %6102 = vst [vmem:[%s7275_s24 + $0x48] sm:$0xff] %v6062_v10   ;;  %v4304_v22 = vadd.f32 %v4222_v38, %v3586_v18  ;;  %v4718_v17 = vpop.f32.mrf.mxu0  ;;  %v3236_v30 = vadd.f32 %v3155_v0, %v7026_v26 }
 0x27b   : > { %v4798_v24 = vadd.f32 %v4716_v16, %v4304_v22 }
 0x27d   : > { %v7585_v53 = vadd.f32 %v7567_v42, %v4798_v24 }
 0x27e   : > { %v3506_v60 = vpop.f32.mrf.mxu2 }
 0x27f   : > { %v3587_v4 = vadd.f32 %v3506_v60, %v3236_v30  ;;  %v4224_v32 = vpop.f32.mrf.mxu3  ;;  %5014 = vrot.lane.b32.xlu2 %v7585_v53, %s6132_s20 }
 0x280   : > { %v3158_v13 = vpop.f32.mrf.mxu1 }
 0x281   : > { %v4305_v61 = vadd.f32 %v4224_v32, %v3587_v4  ;;  %v4721_v28 = vpop.f32.mrf.mxu0  ;;  %v3237_v2 = vadd.f32 %v3158_v13, %v7046_v58 }
 0x283   : > { %v4799_v51 = vadd.f32 %v4718_v17, %v4305_v61 }
 0x285   : > { %v7591_v34 = vadd.f32 %v7567_v42, %v4799_v51 }
 0x286   : > { %v3509_v43 = vpop.f32.mrf.mxu2 }
 0x287   : > { %v6067_v26 = vpack.c.bf16 %v7591_v34, %v7585_v53  ;;  %v3588_v11 = vadd.f32 %v3509_v43, %v3237_v2  ;;  %v4227_v21 = vpop.f32.mrf.mxu3  ;;  %5016 = vrot.lane.b32.xlu0 %v7591_v34, %s6132_s20 }
 0x288   : > { %v3160_v55 = vpop.f32.mrf.mxu1 }
 0x289   : > { %6103 = vst [vmem:[%s7275_s24 + $0x50] sm:$0xff] %v6067_v26   ;;  %v4306_v3 = vadd.f32 %v4227_v21, %v3588_v11  ;;  %v4723_v52 = vpop.f32.mrf.mxu0  ;;  %v3238_v40 = vadd.f32 %v3160_v55, %v7064_v8 }
 0x28b   : > { %v4800_v41 = vadd.f32 %v4721_v28, %v4306_v3 }
 0x28d   : > { %v7600_v46 = vadd.f32 %v7567_v42, %v4800_v41 }
 0x28e   : > { %v3511_v58 = vpop.f32.mrf.mxu2 }
 0x28f   : > { %v3589_v33 = vadd.f32 %v3511_v58, %v3238_v40  ;;  %v4229_v12 = vpop.f32.mrf.mxu3  ;;  %5018 = vrot.lane.b32.xlu1 %v7600_v46, %s6132_s20  ;;  %v7836_v58 = vld [vmem:[#allocation3_spill] sm:$0xff] }
 0x290   : > { %v3163_v49 = vpop.f32.mrf.mxu1 }
 0x291   : > { %v4307_v47 = vadd.f32 %v4229_v12, %v3589_v33  ;;  %v4726_v16 = vpop.f32.mrf.mxu0  ;;  %v3239_v19 = vadd.f32 %v3163_v49, %v7086_v6 }
 0x293   : > { %v4801_v44 = vadd.f32 %v4723_v52, %v4307_v47 }
 0x295   : > { %v7606_v27 = vadd.f32 %v7567_v42, %v4801_v44 }
 0x296   : > { %v3514_v10 = vpop.f32.mrf.mxu2 }
 0x297   : > { %v6072_v8 = vpack.c.bf16 %v7606_v27, %v7600_v46  ;;  %v3590_v18 = vadd.f32 %v3514_v10, %v3239_v19  ;;  %v4232_v38 = vpop.f32.mrf.mxu3  ;;  %5020 = vrot.lane.b32.xlu2 %v7606_v27, %s6132_s20 }
 0x298   : > { %v3165_v0 = vpop.f32.mrf.mxu1 }
 0x299   : > { %6104 = vst [vmem:[%s7275_s24 + $0x58] sm:$0xff] %v6072_v8   ;;  %v4308_v22 = vadd.f32 %v4232_v38, %v3590_v18  ;;  %v4728_v17 = vpop.f32.mrf.mxu0  ;;  %v3240_v60 = vadd.f32 %v3165_v0, %v7098_v1  ;;  %v7837_v8 = vld [vmem:[#allocation4_spill] sm:$0xff] }
 0x29b   : > { %v4802_v24 = vadd.f32 %v4726_v16, %v4308_v22 }
 0x29d   : > { %v7615_v30 = vadd.f32 %v7567_v42, %v4802_v24 }
 0x29e   : > { %v3516_v6 = vpop.f32.mrf.mxu2 }
 0x29f   : > { %v3591_v4 = vadd.f32 %v3516_v6, %v3240_v60  ;;  %v4234_v32 = vpop.f32.mrf.mxu3  ;;  %5022 = vrot.lane.b32.xlu0 %v7615_v30, %s6132_s20 }
 0x2a0   : > { %v3168_v13 = vpop.f32.mrf.mxu1 }
 0x2a1   : > { %v4309_v61 = vadd.f32 %v4234_v32, %v3591_v4  ;;  %v4731_v28 = vpop.f32.mrf.mxu0  ;;  %v3241_v43 = vadd.f32 %v3168_v13, %v7118_v50 }
 0x2a3   : > { %v4803_v51 = vadd.f32 %v4728_v17, %v4309_v61 }
 0x2a5   : > { %v7621_v2 = vadd.f32 %v7567_v42, %v4803_v51 }
 0x2a6   : > { %v3519_v26 = vpop.f32.mrf.mxu2 }
 0x2a7   : > { %v6077_v1 = vpack.c.bf16 %v7621_v2, %v7615_v30  ;;  %v3592_v11 = vadd.f32 %v3519_v26, %v3241_v43  ;;  %v4237_v21 = vpop.f32.mrf.mxu3  ;;  %5024 = vrot.lane.b32.xlu1 %v7621_v2, %s6132_s20 }
 0x2a8   : > { %v3170_v55 = vpop.f32.mrf.mxu1 }
 0x2a9   : > { %6105 = vst [vmem:[%s7275_s24 + $0x60] sm:$0xff] %v6077_v1   ;;  %v4310_v3 = vadd.f32 %v4237_v21, %v3592_v11  ;;  %v4733_v52 = vpop.f32.mrf.mxu0  ;;  %v3242_v33 = vadd.f32 %v3170_v55, %v7836_v58 }
 0x2ab   : > { %v4804_v41 = vadd.f32 %v4731_v28, %v4310_v3 }
 0x2ad   : > { %v7630_v40 = vadd.f32 %v7567_v42, %v4804_v41 }
 0x2ae   : > { %v3521_v50 = vpop.f32.mrf.mxu2 }
 0x2af   : > { %v3593_v12 = vadd.f32 %v3521_v50, %v3242_v33  ;;  %v4239_v49 = vpop.f32.mrf.mxu3  ;;  %5026 = vrot.lane.b32.xlu2 %v7630_v40, %s6132_s20 }
 0x2b0   : > { %v3173_v47 = vpop.f32.mrf.mxu1 }
 0x2b1   : > { %v4311_v16 = vadd.f32 %v4239_v49, %v3593_v12  ;;  %v4736_v19 = vpop.f32.mrf.mxu0  ;;  %v3243_v18 = vadd.f32 %v3173_v47, %v7837_v8  ;;  %v7838_v49 = vld [vmem:[#allocation5_spill] sm:$0xff] }
 0x2b3   : > { %v4805_v44 = vadd.f32 %v4733_v52, %v4311_v16 }
 0x2b5   : > { %v7636_v10 = vadd.f32 %v7567_v42, %v4805_v44 }
 0x2b6   : > { %v3524_v38 = vpop.f32.mrf.mxu2 }
 0x2b7   : > { %v6082_v0 = vpack.c.bf16 %v7636_v10, %v7630_v40  ;;  %v3594_v22 = vadd.f32 %v3524_v38, %v3243_v18  ;;  %v4242_v17 = vpop.f32.mrf.mxu3  ;;  %5028 = vrot.lane.b32.xlu0 %v7636_v10, %s6132_s20 }
 0x2b8   : > { %v3175_v24 = vpop.f32.mrf.mxu1 }
 0x2b9   : > { %6106 = vst [vmem:[%s7275_s24 + $0x68] sm:$0xff] %v6082_v0   ;;  %v4312_v60 = vadd.f32 %v4242_v17, %v3594_v22  ;;  %v3244_v32 = vadd.f32 %v3175_v24, %v7170_v56  ;;  %v4738_v13 = vpop.f32.mrf.mxu0  ;;  %v4975_v22 = vpop.permute.xlu0 %4974 }
 0x2ba   : > { %v4979_v17 = vpop.permute.xlu1 %4978 }
 0x2bb   : > { %v4806_v6 = vadd.f32 %v4736_v19, %v4312_v60 }
 0x2bd   : > { %v7645_v4 = vadd.f32 %v7567_v42, %v4806_v6  ;;  %v4983_v6 = vpop.permute.xlu2 %4982 }
 0x2be   : > { %v3526_v61 = vpop.f32.mrf.mxu2 }
 0x2bf   : > { %v3595_v28 = vadd.f32 %v3526_v61, %v3244_v32  ;;  %v4244_v51 = vpop.f32.mrf.mxu3  ;;  %5030 = vrot.lane.b32.xlu1 %v7645_v4, %s6132_s20  ;;  %v5146_v61 = vmul.f32 %v4979_v17, %v7299_v59 }
 0x2c0   : > { %v3178_v43 = vpop.f32.mrf.mxu1 }
 0x2c1   : > { %v4313_v26 = vadd.f32 %v4244_v51, %v3595_v28  ;;  %v3245_v21 = vadd.f32 %v3178_v43, %v7190_v48  ;;  %v4741_v41 = vpop.f32.mrf.mxu0  ;;  %v4977_v24 = vpop.permute.xlu0 %4976  ;;  %v5076_v51 = vmul.f32 %v7267_v63, %v7267_v63 }
 0x2c2   : > { %v5145_v60 = vmul.f32 %v4977_v24, %v7267_v63  ;;  %v4981_v32 = vpop.permute.xlu1 %4980  ;;  %v5082_v24 = vmul.f32 %v7409_v31, %v7409_v31 }
 0x2c3   : > { %v4807_v1 = vadd.f32 %v4738_v13, %v4313_v26  ;;  %v5144_v13 = vmul.f32 %v4975_v22, %v7244_v39  ;;  %v5147_v28 = vmul.f32 %v4981_v32, %v7319_v20  ;;  %v5075_v26 = vmul.f32 %v7244_v39, %v7244_v39 }
 0x2c5   : > { %v7651_v11 = vadd.f32 %v7567_v42, %v4807_v1  ;;  %v5077_v1 = vmul.f32 %v7299_v59, %v7299_v59 }
 0x2c6   : > { %v3529_v55 = vpop.f32.mrf.mxu2 }
 0x2c7   : > { %v6087_v56 = vpack.c.bf16 %v7651_v11, %v7645_v4  ;;  %v3596_v3 = vadd.f32 %v3529_v55, %v3245_v21  ;;  %v4247_v52 = vpop.f32.mrf.mxu3  ;;  %5032 = vrot.lane.b32.xlu2 %v7651_v11, %s6132_s20  ;;  %v5107_v55 = vadd.f32 %v5076_v51, %v5075_v26 }
 0x2c8   : > { %v3180_v33 = vpop.f32.mrf.mxu1 }
 0x2c9   : > { %6107 = vst [vmem:[%s7275_s24 + $0x70] sm:$0xff] %v6087_v56   ;;  %v4314_v58 = vadd.f32 %v4247_v52, %v3596_v3  ;;  %v3246_v48 = vadd.f32 %v3180_v33, %v7838_v49  ;;  %v4743_v8 = vpop.f32.mrf.mxu0  ;;  %v5078_v56 = vmul.f32 %v7319_v20, %v7319_v20  ;;  %v5148_v3 = vmul.f32 %v4983_v6, %v7346_v14  ;;  %v4985_v33 = vpop.permute.xlu2 %4984 }
 0x2ca   : > { %v5038_v52 = vadd.f32 %v7267_v63, %v7244_v39 }
 0x2cb   : > { %v4808_v50 = vadd.f32 %v4741_v41, %v4314_v58  ;;  %v5108_v41 = vadd.f32 %v5107_v55, %v5077_v1  ;;  %v5079_v58 = vmul.f32 %v7346_v14, %v7346_v14  ;;  %v5085_v55 = vmul.f32 %v7477_v25, %v7477_v25 }
 0x2cd   : > { %v7660_v12 = vadd.f32 %v7567_v42, %v4808_v50  ;;  %v4987_v50 = vpop.permute.xlu0 %4986 }
 0x2ce   : > { %v3531_v47 = vpop.f32.mrf.mxu2 }
 0x2cf   : > { %v3597_v16 = vadd.f32 %v3531_v47, %v3246_v48  ;;  %5034 = vrot.lane.b32.xlu0 %v7660_v12, %s6132_s20  ;;  %v4249_v44 = vpop.f32.mrf.mxu3  ;;  %v5039_v48 = vadd.f32 %v5038_v52, %v7299_v59  ;;  %v5109_v47 = vadd.f32 %v5108_v41, %v5078_v56  ;;  %v5086_v41 = vmul.f32 %v7494_v62, %v7494_v62 }
 0x2d1   : > { %v4315_v19 = vadd.f32 %v4249_v44, %v3597_v16  ;;  %v5080_v16 = vmul.f32 %v7362_v29, %v7362_v29  ;;  %v4989_v44 = vpop.permute.xlu1 %4988  ;;  %v5040_v39 = vadd.f32 %v5039_v48, %v7319_v20  ;;  %v5110_v63 = vadd.f32 %v5109_v47, %v5079_v58 }
 0x2d2   : > { %v5151_v22 = vmul.f32 %v4989_v44, %v7409_v31  ;;  %v5083_v20 = vmul.f32 %v7436_v37, %v7436_v37 }
 0x2d3   : > { %v4809_v18 = vadd.f32 %v4743_v8, %v4315_v19  ;;  %v5149_v19 = vmul.f32 %v4985_v33, %v7362_v29  ;;  %v5150_v8 = vmul.f32 %v4987_v50, %v7389_v36  ;;  %v5041_v59 = vadd.f32 %v5040_v39, %v7346_v14 }
 0x2d4   : > { %v5111_v17 = vadd.f32 %v5110_v63, %v5080_v16  ;;  %v5084_v14 = vmul.f32 %v7452_v45, %v7452_v45 }
 0x2d5   : > { %v7666_v38 = vadd.f32 %v7567_v42, %v4809_v18  ;;  %v5176_v42 = vadd.f32 %v5145_v60, %v5144_v13  ;;  %v5081_v18 = vmul.f32 %v7389_v36, %v7389_v36  ;;  %v5042_v6 = vadd.f32 %v5041_v59, %v7362_v29  ;;  %v4991_v13 = vpop.permute.xlu2 %4990 }
 0x2d6   : > { %v5152_v26 = vmul.f32 %v4991_v13, %v7436_v37 }
 0x2d7   : > { %v6092_v0 = vpack.c.bf16 %v7666_v38, %v7660_v12  ;;  %5036 = vrot.lane.b32.xlu1 %v7666_v38, %s6132_s20  ;;  %v5177_v43 = vadd.f32 %v5176_v42, %v5146_v61  ;;  %v5112_v32 = vadd.f32 %v5111_v17, %v5081_v18  ;;  %v4993_v61 = vpop.permute.xlu0 %4992  ;;  %v5089_v18 = vmul.f32 %v7535_v15, %v7535_v15 }
 0x2d8   : > { %v5153_v1 = vmul.f32 %v4993_v61, %v7452_v45  ;;  %v5090_v17 = vmul.f32 %v7541_v23, %v7541_v23 }
 0x2d9   : > { %6108 = vst [vmem:[%s7275_s24 + $0x78] sm:$0xff] %v6092_v0   ;;  %v5178_v21 = vadd.f32 %v5177_v43, %v5147_v28  ;;  %v5043_v28 = vadd.f32 %v5042_v6, %v7389_v36  ;;  %v5113_v51 = vadd.f32 %v5112_v32, %v5082_v24  ;;  %v4995_v43 = vpop.permute.xlu1 %4994 }
 0x2db   : > { %v5179_v49 = vadd.f32 %v5178_v21, %v5148_v3  ;;  %v5044_v29 = vadd.f32 %v5043_v28, %v7409_v31  ;;  %v5114_v21 = vadd.f32 %v5113_v51, %v5083_v20  ;;  %v5154_v3 = vmul.f32 %v4995_v43, %v7477_v25 }
 0x2dc   : > { %v5087_v31 = vmul.f32 %v7515_v9, %v7515_v9 }
 0x2dd   : > { %v5180_v0 = vadd.f32 %v5179_v49, %v5149_v19  ;;  %v5045_v36 = vadd.f32 %v5044_v29, %v7436_v37  ;;  %v5115_v52 = vadd.f32 %v5114_v21, %v5084_v14  ;;  %v4997_v49 = vpop.permute.xlu2 %4996  ;;  %v5088_v37 = vmul.f32 %v7526_v7, %v7526_v7 }
 0x2df   : > { %v5181_v60 = vadd.f32 %v5180_v0, %v5150_v8  ;;  %v5046_v33 = vadd.f32 %v5045_v36, %v7452_v45  ;;  %v5116_v50 = vadd.f32 %v5115_v52, %v5085_v55  ;;  %v4999_v48 = vpop.permute.xlu0 %4998  ;;  %v5155_v8 = vmul.f32 %v4997_v49, %v7494_v62 }
 0x2e0   : > { %v5156_v39 = vmul.f32 %v4999_v48, %v7515_v9 }
 0x2e1   : > { %v5182_v42 = vadd.f32 %v5181_v60, %v5151_v22  ;;  %v5047_v16 = vadd.f32 %v5046_v33, %v7477_v25  ;;  %v5117_v44 = vadd.f32 %v5116_v50, %v5086_v41  ;;  %v5001_v19 = vpop.permute.xlu1 %5000 }
 0x2e2   : > { %v5157_v22 = vmul.f32 %v5001_v19, %v7526_v7 }
 0x2e3   : > { %v5183_v56 = vadd.f32 %v5182_v42, %v5152_v26  ;;  %v5048_v45 = vadd.f32 %v5047_v16, %v7494_v62  ;;  %v5118_v63 = vadd.f32 %v5117_v44, %v5087_v31  ;;  %v5091_v62 = vmul.f32 %v7550_v5, %v7550_v5 }
 0x2e4   : > { %v5093_v26 = vmul.f32 %v7570_v54, %v7570_v54  ;;  %v5097_v44 = vmul.f32 %v7600_v46, %v7600_v46 }
 0x2e5   : > { %v5184_v58 = vadd.f32 %v5183_v56, %v5153_v1  ;;  %v5049_v25 = vadd.f32 %v5048_v45, %v7515_v9  ;;  %v5119_v59 = vadd.f32 %v5118_v63, %v5088_v37  ;;  %v5003_v32 = vpop.permute.xlu2 %5002  ;;  %v5092_v9 = vmul.f32 %v7556_v35, %v7556_v35 }
 0x2e6   : > { %v5158_v51 = vmul.f32 %v5003_v32, %v7535_v15  ;;  %v5094_v56 = vmul.f32 %v7576_v57, %v7576_v57  ;;  %v5098_v45 = vmul.f32 %v7606_v27, %v7606_v27 }
 0x2e7   : > { %v5185_v47 = vadd.f32 %v5184_v58, %v5154_v3  ;;  %v5050_v60 = vadd.f32 %v5049_v25, %v7526_v7  ;;  %v5120_v6 = vadd.f32 %v5119_v59, %v5089_v18  ;;  %v5005_v20 = vpop.permute.xlu0 %5004 }
 0x2e8   : > { %v5159_v14 = vmul.f32 %v5005_v20, %v7541_v23  ;;  %v5101_v20 = vmul.f32 %v7630_v40, %v7630_v40 }
 0x2e9   : > { %v5186_v0 = vadd.f32 %v5185_v47, %v5155_v8  ;;  %v5051_v61 = vadd.f32 %v5050_v60, %v7535_v15  ;;  %v5121_v42 = vadd.f32 %v5120_v6, %v5090_v17  ;;  %v5007_v28 = vpop.permute.xlu1 %5006 }
 0x2ea   : > { %v5160_v29 = vmul.f32 %v5007_v28, %v7550_v5  ;;  %v5102_v28 = vmul.f32 %v7636_v10, %v7636_v10 }
 0x2eb   : > { %v5187_v24 = vadd.f32 %v5186_v0, %v5156_v39  ;;  %v5052_v7 = vadd.f32 %v5051_v61, %v7541_v23  ;;  %v5122_v43 = vadd.f32 %v5121_v42, %v5091_v62  ;;  %v5095_v23 = vmul.f32 %v7585_v53, %v7585_v53 }
 0x2ed   : > { %v5188_v13 = vadd.f32 %v5187_v24, %v5157_v22  ;;  %v5053_v21 = vadd.f32 %v5052_v7, %v7550_v5  ;;  %v5123_v55 = vadd.f32 %v5122_v43, %v5092_v9  ;;  %v5009_v52 = vpop.permute.xlu2 %5008  ;;  %v5096_v5 = vmul.f32 %v7591_v34, %v7591_v34 }
 0x2ee   : > { %v5161_v49 = vmul.f32 %v5009_v52, %v7556_v35 }
 0x2ef   : > { %v5189_v1 = vadd.f32 %v5188_v13, %v5158_v51  ;;  %v5054_v15 = vadd.f32 %v5053_v21, %v7556_v35  ;;  %v5124_v36 = vadd.f32 %v5123_v55, %v5093_v26  ;;  %v5011_v41 = vpop.permute.xlu0 %5010 }
 0x2f0   : > { %v5162_v48 = vmul.f32 %v5011_v41, %v7570_v54 }
 0x2f1   : > { %v5190_v3 = vadd.f32 %v5189_v1, %v5159_v14  ;;  %v5055_v33 = vadd.f32 %v5054_v15, %v7570_v54  ;;  %v5125_v50 = vadd.f32 %v5124_v36, %v5094_v56  ;;  %v5013_v31 = vpop.permute.xlu1 %5012  ;;  %v5099_v54 = vmul.f32 %v7615_v30, %v7615_v30 }
 0x2f2   : > { %v5163_v19 = vmul.f32 %v5013_v31, %v7576_v57  ;;  %v5105_v36 = vmul.f32 %v7660_v12, %v7660_v12 }
 0x2f3   : > { %v5191_v58 = vadd.f32 %v5190_v3, %v5160_v29  ;;  %v5056_v47 = vadd.f32 %v5055_v33, %v7576_v57  ;;  %v5126_v16 = vadd.f32 %v5125_v50, %v5095_v23  ;;  %v5100_v57 = vmul.f32 %v7621_v2, %v7621_v2 }
 0x2f4   : > { %v5106_v33 = vmul.f32 %v7666_v38, %v7666_v38 }
 0x2f5   : > { %v5192_v37 = vadd.f32 %v5191_v58, %v5161_v49  ;;  %v5057_v8 = vadd.f32 %v5056_v47, %v7585_v53  ;;  %v5127_v39 = vadd.f32 %v5126_v16, %v5096_v5  ;;  %v5015_v0 = vpop.permute.xlu2 %5014 }
 0x2f6   : > { %v5164_v60 = vmul.f32 %v5015_v0, %v7585_v53 }
 0x2f7   : > { %v5193_v63 = vadd.f32 %v5192_v37, %v5162_v48  ;;  %v5058_v35 = vadd.f32 %v5057_v8, %v7591_v34  ;;  %v5128_v18 = vadd.f32 %v5127_v39, %v5097_v44 }
 0x2f9   : > { %v5017_v22 = vpop.permute.xlu0 %5016  ;;  %v5194_v25 = vadd.f32 %v5193_v63, %v5163_v19  ;;  %v5059_v59 = vadd.f32 %v5058_v35, %v7600_v46  ;;  %v5129_v17 = vadd.f32 %v5128_v18, %v5098_v45 }
 0x2fa   : > { %v5165_v6 = vmul.f32 %v5017_v22, %v7591_v34  ;;  %v5103_v34 = vmul.f32 %v7645_v4, %v7645_v4 }
 0x2fb   : > { %v5060_v62 = vadd.f32 %v5059_v59, %v7606_v27  ;;  %v5130_v32 = vadd.f32 %v5129_v17, %v5099_v54  ;;  %v5195_v13 = vadd.f32 %v5194_v25, %v5164_v60 }
 0x2fd   : > { %v5061_v42 = vadd.f32 %v5060_v62, %v7615_v30  ;;  %v5131_v9 = vadd.f32 %v5130_v32, %v5100_v57  ;;  %v5196_v51 = vadd.f32 %v5195_v13, %v5165_v6  ;;  %v5021_v7 = vpop.permute.xlu2 %5020 }
 0x2fe   : > { %v5167_v55 = vmul.f32 %v5021_v7, %v7606_v27 }
 0x2ff   : > { %v5062_v53 = vadd.f32 %v5061_v42, %v7621_v2  ;;  %v5132_v14 = vadd.f32 %v5131_v9, %v5101_v20 }
 0x301   : > { %v5019_v24 = vpop.permute.xlu1 %5018  ;;  %v5063_v1 = vadd.f32 %v5062_v53, %v7630_v40  ;;  %v5133_v29 = vadd.f32 %v5132_v14, %v5102_v28 }
 0x302   : > { %v5166_v61 = vmul.f32 %v5019_v24, %v7600_v46  ;;  %v5104_v46 = vmul.f32 %v7651_v11, %v7651_v11 }
 0x303   : > { %v5064_v3 = vadd.f32 %v5063_v1, %v7636_v10  ;;  %v5134_v15 = vadd.f32 %v5133_v29, %v5103_v34 }
 0x304   : > { %v5197_v26 = vadd.f32 %v5196_v51, %v5166_v61 }
 0x305   : > { %v5065_v41 = vadd.f32 %v5064_v3, %v7645_v4  ;;  %v5135_v58 = vadd.f32 %v5134_v15, %v5104_v46 }
 0x306   : > { %v5198_v23 = vadd.f32 %v5197_v26, %v5167_v55 }
 0x307   : > { %v5066_v27 = vadd.f32 %v5065_v41, %v7651_v11  ;;  %v5136_v5 = vadd.f32 %v5135_v58, %v5105_v36 }
 0x309   : > { %v5067_v48 = vadd.f32 %v5066_v27, %v7660_v12  ;;  %v5137_v47 = vadd.f32 %v5136_v5, %v5106_v33 }
 0x30b   : > { %v5068_v37 = vadd.f32 %v5067_v48, %v7666_v38  ;;  %v5138_v39 = vrot.slane %v5137_v47, 4 }
 0x30d   : > { %v5069_v63 = vrot.slane %v5068_v37, 4  ;;  %v5139_v0 = vadd.f32 %v5138_v39, %v5137_v47 }
 0x30f   : > { %v5070_v59 = vadd.f32 %v5069_v63, %v5068_v37 }
 0x311   : > { %v5023_v43 = vpop.permute.xlu0 %5022 }
 0x312   : > { %v5168_v56 = vmul.f32 %v5023_v43, %v7615_v30  ;;  %v5027_v30 = vpop.permute.xlu2 %5026 }
 0x313   : > { %v5170_v44 = vmul.f32 %v5027_v30, %v7630_v40 }
 0x314   : > { %v5199_v50 = vadd.f32 %v5198_v23, %v5168_v56 }
 0x319   : > { %v5025_v21 = vpop.permute.xlu1 %5024 }
 0x31a   : > { %v5169_v52 = vmul.f32 %v5025_v21, %v7621_v2 }
 0x31c   : > { %v5200_v49 = vadd.f32 %v5199_v50, %v5169_v52 }
 0x31e   : > { %v5201_v19 = vadd.f32 %v5200_v49, %v5170_v44 }
 0x321   : > { %v5033_v35 = vpop.permute.xlu2 %5032 }
 0x322   : > { %v5173_v22 = vmul.f32 %v5033_v35, %v7651_v11 }
 0x329   : > { %v5029_v31 = vpop.permute.xlu0 %5028 }
 0x32a   : > { %v5171_v2 = vmul.f32 %v5029_v31, %v7636_v10  ;;  %v5140_v10 = vrot.slane %v5139_v0, 2 }
 0x32c   : > { %v5202_v45 = vadd.f32 %v5201_v19, %v5171_v2  ;;  %v5141_v6 = vadd.f32 %v5140_v10, %v5139_v0 }
 0x32e   : > { %v5142_v13 = vrot.slane %v5141_v6, 1 }
 0x330   : > { %v5143_v9 = vadd.f32 %v5142_v13, %v5141_v6 }
 0x331   : > { %v5031_v16 = vpop.permute.xlu1 %5030 }
 0x332   : > { %v5172_v8 = vmul.f32 %v5031_v16, %v7645_v4  ;;  %v5071_v4 = vrot.slane %v5070_v59, 2 }
 0x334   : > { %v5203_v54 = vadd.f32 %v5202_v45, %v5172_v8  ;;  %v5072_v32 = vadd.f32 %v5071_v4, %v5070_v59 }
 0x336   : > { %v5204_v40 = vadd.f32 %v5203_v54, %v5173_v22  ;;  %v5073_v42 = vrot.slane %v5072_v32, 1 }
 0x338   : > { %v5074_v28 = vadd.f32 %v5073_v42, %v5072_v32 }
 0x341   : > { %v5035_v18 = vpop.permute.xlu0 %5034 }
 0x342   : > { %v5174_v25 = vmul.f32 %v5035_v18, %v7660_v12 }
 0x344   : > { %v5205_v57 = vadd.f32 %v5204_v40, %v5174_v25 }
 0x349   : > { %v5037_v17 = vpop.permute.xlu1 %5036 }
 0x34a   : > { %v5175_v24 = vmul.f32 %v5037_v17, %v7666_v38  ;;  %v5214_v38 = vsel %vm5213_vm8, %v5074_v28, %v5143_v9 }
 0x34c   : > { %v5206_v60 = vadd.f32 %v5205_v57, %v5175_v24 }
 0x34e   : > { %v5207_v62 = vrot.slane %v5206_v60, 4 }
 0x350   : > { %v5208_v20 = vadd.f32 %v5207_v62, %v5206_v60 }
 0x352   : > { %v5209_v61 = vrot.slane %v5208_v20, 2 }
 0x354   : > { %v5210_v11 = vadd.f32 %v5209_v61, %v5208_v20 }
 0x356   : > { %v5211_v12 = vrot.slane %v5210_v11, 1 }
 0x358   : > { %v5212_v51 = vadd.f32 %v5211_v12, %v5210_v11 }
 0x35a   : > { %v5216_v53 = vsel %vm5215_vm9, %v5214_v38, %v5212_v51 }
 0x35b   : > { %v5218_v14 = vsel %vm1315_vm4, %v5216_v53, 0.0 }
 0x35c   : > { %5219 = vst [vmem:[%s209_s30] sm:$0xff] %v5218_v14 }
 0x35d PF: > { %s15_s15 = sadd.s32 1, %s6130_s15  }
 0x35e   : > { %p12_p5 = scmp.ge.s32.totalorder %s15_s15, 4  }
 0x360   :  { %14 = sbr.rel (!%p12_p5) target bundleno = 1 (0x1), region = 84 }

// kernel: complex_double_conv_forward.6
= control target key start
LH: loop header
LB: loop body
LE: loop exit
PB: predicated region body
PF: predicated region fallthrough
CT: control target
= control target key end

     0   :  { %s6764_s15 = smov 0   ;;  %s8489_s0 = inlined_call_operand.vmem [shape: bf16[2,18,18,128], index: 0, kind: input, shape index: {}]   ;;  %s8490_s1 = inlined_call_operand.vmem [shape: bf16[9,128,128], index: 1, kind: input, shape index: {}]   ;;  %s8491_s2 = inlined_call_operand.vmem [shape: f32[1,128], index: 2, kind: input, shape index: {}]   ;;  %s8492_s3 = inlined_call_operand.vmem [shape: bf16[512,128], index: 3, kind: output, shape index: {0}]   ;;  %s8493_s4 = inlined_call_operand.vmem [shape: f32[2,8,128], index: 4, kind: output, shape index: {1}]  }
   0x1 LB: > { %s6770_s16 = sadd.s32 4294967295, %s6736_s15   ;;  %p5560_p0 = scmp.ge.s32.totalorder %s6736_s15, 1  ;;  %s6736_s15 = sphi %s6764_s15, %s15_s15  }
   0x2   : > { %p165_p1 = scmp.lt.s32.totalorder %s6736_s15, 3 }
   0x4   : > { %p166_p2 = pnand %p5560_p0, %p165_p1 }
   0x6   : > { %169 = sbr.rel (%p166_p2) target bundleno = 885 (0x375), region = 32 }
   0xb   : > { %v6502_v0 = vld [vmem:[%s8490_s1 + $0x38] sm:$0xff]  ;;  %v6501_v1 = vld [vmem:[%s8490_s1 + $0x30] sm:$0xff]  ;;  %v6500_v2 = vld [vmem:[%s8490_s1 + $0x28] sm:$0xff]  ;;  %p195_p3 = scmp.lt.s32.totalorder %s6770_s16, 1  ;;  %vm571_vm0 = vsmask.f32 3328 }
   0xc   : > { %6694 = vmatpush.bf16.msra.mxu1 %v6502_v0  ;;  %6695 = vmatpush.bf16.msra.mxu2 %v6502_v0  ;;  %v6499_v3 = vld [vmem:[%s8490_s1 + $0x20] sm:$0xff]  ;;  %v6498_v4 = vld [vmem:[%s8490_s1 + $0x18] sm:$0xff]  ;;  %v6497_v5 = vld [vmem:[%s8490_s1 + $0x10] sm:$0xff]  ;;  %vm572_vm1 = vsmask.f32 7440  ;;  %vm1368_vm2 = vcmask 1042432  }
   0xd   : > { %6696 = vmatpush.bf16.msra.mxu3 %v6502_v0  ;;  %402 = vmatpush.bf16.msra.mxu0 %v6502_v0  ;;  %s6794_s29 = scalar_select %p195_p3, %s6770_s16, 1  ;;  %v6496_v6 = vld [vmem:[%s8490_s1 + $0x8] sm:$0xff]  ;;  %v6495_v7 = vld [vmem:[%s8490_s1] sm:$0xff]  ;;  %v6518_v8 = vld [vmem:[%s8490_s1 + $0xb8] sm:$0xff]  ;;  %vm1369_vm3 = vcmask 1046532   ;;  %vm5462_vm6 = vcmask 1040384  }
   0xe   : > { %v6542_v9 = vld [vmem:[%s8490_s1 + $0xf8] sm:$0xff]  ;;  %v6517_v16 = vld [vmem:[%s8490_s1 + $0xb0] sm:$0xff]  ;;  %v6516_v20 = vld [vmem:[%s8490_s1 + $0xa8] sm:$0xff]  ;;  %s5562_s7 = sshll.u32 %s6770_s16, 5  ;;  %s6738_s12 = smov 64   ;;  %vm5464_vm7 = vcmask 1041408  }
   0xf   : > { %s6718_s6 = smul.u32 216, %s6794_s29  ;;  %v6510_v14 = vld [vmem:[%s8490_s1 + $0x78] sm:$0xff]  ;;  %v6541_v17 = vld [vmem:[%s8490_s1 + $0xf0] sm:$0xff]  ;;  %v6540_v21 = vld [vmem:[%s8490_s1 + $0xe8] sm:$0xff]  ;;  %p7945_p4 = scmp.lt.s32.totalorder %s5562_s7, 63 }
  0x10   : > { %6697 = vmatpush.bf16.msra.mxu1 %v6501_v1  ;;  %6698 = vmatpush.bf16.msra.mxu2 %v6501_v1  ;;  %v6550_v15 = vld [vmem:[%s8490_s1 + $0x138] sm:$0xff]  ;;  %v6509_v18 = vld [vmem:[%s8490_s1 + $0x70] sm:$0xff]  ;;  %v6508_v22 = vld [vmem:[%s8490_s1 + $0x68] sm:$0xff]  ;;  %s5564_s19 = sshll.u32 %s6794_s29, 3 }
  0x11   : > { %6699 = vmatpush.bf16.msra.mxu3 %v6501_v1  ;;  %403 = vmatpush.bf16.msra.mxu0 %v6501_v1  ;;  %s6806_s11 = scalar_lea.vmem %s8489_s0, %s6718_s6  ;;  %v6549_v19 = vld [vmem:[%s8490_s1 + $0x130] sm:$0xff]  ;;  %v6548_v23 = vld [vmem:[%s8490_s1 + $0x128] sm:$0xff]  ;;  %v6515_v24 = vld [vmem:[%s8490_s1 + $0xa0] sm:$0xff]  ;;  %s8528_s7 = smov (!%p7945_p4, %s5562_s7), 63 }
  0x12   : > { %v6483_v10 = vld [vmem:[%s6806_s11 + $0x30] sm:$0xff]  ;;  %v6487_v11 = vld [vmem:[%s6806_s11 + $0x60] sm:$0xff]  ;;  %v6514_v28 = vld [vmem:[%s8490_s1 + $0x98] sm:$0xff]  ;;  %s5563_s16 = sshll.u32 %s8528_s7, 2  ;;  %s209_s22 = scalar_lea.vmem %s8493_s4, %s5564_s19 }
  0x13   : > { %v6491_v12 = vld [vmem:[%s6806_s11 + $0x90] sm:$0xff]  ;;  %v6479_v13 = vld [vmem:[%s6806_s11] sm:$0xff]  ;;  %v6538_v29 = vld [vmem:[%s8490_s1 + $0xd8] sm:$0xff]  ;;  %s7979_s17 = scalar_lea.vmem %s8492_s3, %s5563_s16 }
  0x14   : > { %6700 = vmatpush.bf16.msra.mxu1 %v6500_v2  ;;  %6701 = vmatpush.bf16.msra.mxu2 %v6500_v2  ;;  %v6539_v25 = vld [vmem:[%s8490_s1 + $0xe0] sm:$0xff]  ;;  %v6488_v31 = vld [vmem:[%s6806_s11 + $0x6c] sm:$0xff]  ;;  %v6506_v34 = vld [vmem:[%s8490_s1 + $0x58] sm:$0xff] }
  0x15   : > { %6702 = vmatpush.bf16.msra.mxu3 %v6500_v2  ;;  %404 = vmatpush.bf16.msra.mxu0 %v6500_v2  ;;  %v6507_v26 = vld [vmem:[%s8490_s1 + $0x60] sm:$0xff]  ;;  %v6480_v33 = vld [vmem:[%s6806_s11 + $0xc] sm:$0xff]  ;;  %v6546_v35 = vld [vmem:[%s8490_s1 + $0x118] sm:$0xff] }
  0x16   : > { %v6547_v27 = vld [vmem:[%s8490_s1 + $0x120] sm:$0xff]  ;;  %v6513_v36 = vld [vmem:[%s8490_s1 + $0x90] sm:$0xff]  ;;  %v6512_v40 = vld [vmem:[%s8490_s1 + $0x88] sm:$0xff] }
  0x17   : > { %v6484_v30 = vld [vmem:[%s6806_s11 + $0x3c] sm:$0xff]  ;;  %v6537_v37 = vld [vmem:[%s8490_s1 + $0xd0] sm:$0xff]  ;;  %v6536_v41 = vld [vmem:[%s8490_s1 + $0xc8] sm:$0xff] }
  0x18   : > { %6703 = vmatpush.bf16.msra.mxu1 %v6499_v3  ;;  %6704 = vmatpush.bf16.msra.mxu2 %v6499_v3  ;;  %v6492_v32 = vld [vmem:[%s6806_s11 + $0x9c] sm:$0xff]  ;;  %v6505_v38 = vld [vmem:[%s8490_s1 + $0x50] sm:$0xff]  ;;  %v6504_v42 = vld [vmem:[%s8490_s1 + $0x48] sm:$0xff] }
  0x19   : > { %6705 = vmatpush.bf16.msra.mxu3 %v6499_v3  ;;  %405 = vmatpush.bf16.msra.mxu0 %v6499_v3  ;;  %v6545_v39 = vld [vmem:[%s8490_s1 + $0x110] sm:$0xff]  ;;  %v6544_v43 = vld [vmem:[%s8490_s1 + $0x108] sm:$0xff]  ;;  %v6511_v44 = vld [vmem:[%s8490_s1 + $0x80] sm:$0xff] }
  0x1a   : > { %v6535_v45 = vld [vmem:[%s8490_s1 + $0xc0] sm:$0xff]  ;;  %v6485_v48 = vld [vmem:[%s6806_s11 + $0x48] sm:$0xff]  ;;  %v6489_v49 = vld [vmem:[%s6806_s11 + $0x78] sm:$0xff] }
  0x1b   : > { %v6503_v46 = vld [vmem:[%s8490_s1 + $0x40] sm:$0xff]  ;;  %v6493_v50 = vld [vmem:[%s6806_s11 + $0xa8] sm:$0xff]  ;;  %v6481_v51 = vld [vmem:[%s6806_s11 + $0x18] sm:$0xff] }
  0x1c   : > { %6706 = vmatpush.bf16.msra.mxu1 %v6498_v4  ;;  %6707 = vmatpush.bf16.msra.mxu2 %v6498_v4  ;;  %v6543_v47 = vld [vmem:[%s8490_s1 + $0x100] sm:$0xff]  ;;  %v6582_v54 = vld [vmem:[%s8490_s1 + $0x1b8] sm:$0xff]  ;;  %v5917_v57 = vld [vmem:[%s6806_s11 + $0xc] sm:$0xf] }
  0x1d   : > { %6708 = vmatpush.bf16.msra.mxu3 %v6498_v4  ;;  %406 = vmatpush.bf16.msra.mxu0 %v6498_v4  ;;  %v523_v52 = vld [vmem:[%s6806_s11] sm:$0xf]  ;;  %v524_v53 = vld [vmem:[%s6806_s11 + $0x4] sm:$0xf]  ;;  %v6590_v55 = vld [vmem:[%s8490_s1 + $0x1f8] sm:$0xff]  ;;  %v2225_v0 = vshrl.u32 %v5917_v57, 16 }
  0x1e   : > { %v6558_v56 = vld [vmem:[%s8490_s1 + $0x178] sm:$0xff]  ;;  %v5918_v58 = vld [vmem:[%s6806_s11 + $0x10] sm:$0xf]  ;;  %v575_v60 = vshrl.u32 %v523_v52, 16  ;;  %v578_v61 = vshll.u32 %v523_v52, 16  ;;  %v584_v62 = vshll.u32 %v524_v53, 16  ;;  %vm6950_vm4 = vmor %vm571_vm0, %vm572_vm1 }
  0x1f   : > { %v6598_v59 = vld [vmem:[%s8490_s1 + $0x238] sm:$0xff]  ;;  %v588_v63 = vshrl.u32 %v524_v53, 16  ;;  %v2228_v1 = vshll.u32 %v5917_v57, 16  ;;  %v2234_v2 = vshll.u32 %v5918_v58, 16  ;;  %v2238_v3 = vshrl.u32 %v5918_v58, 16  ;;  %vm6957_vm5 = vmor %vm1368_vm2, %vm1369_vm3 }
  0x20   : > { %6709 = vmatpush.bf16.msra.mxu1 %v6497_v5  ;;  %6710 = vmatpush.bf16.msra.mxu2 %v6497_v5  ;;  %v525_v4 = vld [vmem:[%s6806_s11 + $0x8] sm:$0x1]  ;;  %v528_v57 = vld [vmem:[%s6806_s11 + $0x14] sm:$0x1] }
  0x21   : > { %6711 = vmatpush.bf16.msra.mxu3 %v6497_v5  ;;  %407 = vmatpush.bf16.msra.mxu0 %v6497_v5  ;;  %v577_v5 = vrot.slane %v575_v60, 4 }
  0x24   : > { %6712 = vmatpush.bf16.msra.mxu1 %v6496_v6  ;;  %6713 = vmatpush.bf16.msra.mxu2 %v6496_v6 }
  0x25   : > { %6714 = vmatpush.bf16.msra.mxu3 %v6496_v6  ;;  %408 = vmatpush.bf16.msra.mxu0 %v6496_v6  ;;  %v580_v6 = vrot.slane %v578_v61, 5 }
  0x28   : > { %6715 = vmatpush.bf16.msra.mxu1 %v6495_v7  ;;  %6716 = vmatpush.bf16.msra.mxu2 %v6495_v7 }
  0x29   : > { %6717 = vmatpush.bf16.msra.mxu3 %v6495_v7  ;;  %409 = vmatpush.bf16.msra.mxu0 %v6495_v7  ;;  %v6933_v7 = vrot.slane %v584_v62, 5  ;;  %v1276_v62 = vld [vmem:[%s6806_s11 + $0x10] sm:$0xf] }
  0x2b   : > { %430 = vmatmul.bf16.vlgmr.msra.gmra.mxu1 %v6483_v10  ;;  %450 = vmatmul.bf16.vlgmr.msra.gmra.mxu2 %v6487_v11  ;;  %v2227_v10 = vrot.slane %v2225_v0, 4  ;;  %v2230_v11 = vrot.slane %v2228_v1, 5 }
  0x2c   : > { %1612 = vmatpush.bf16.msrb.mxu2 %v6518_v8  ;;  %470 = vmatmul.bf16.vlgmr.msra.gmra.mxu3 %v6491_v12  ;;  %v590_v8 = vrot.slane %v588_v63, 4  ;;  %v6936_v12 = vrot.slane %v2234_v2, 5 }
  0x2d   : > { %1991 = vmatpush.bf16.msrb.mxu3 %v6542_v9  ;;  %410 = vmatmul.bf16.vlgmr.msra.gmra.mxu0 %v6479_v13  ;;  %v1273_v9 = vld [vmem:[%s6806_s11 + $0x4] sm:$0xf]  ;;  %v2240_v13 = vrot.slane %v2238_v3, 4 }
  0x2e   : > { %1087 = vmatpush.bf16.msrb.mxu1 %v6510_v14  ;;  %2737 = vmatpush.bf16.msrb.mxu0 %v6550_v15  ;;  %v594_v14 = vshll.u32 %v525_v4, 16  ;;  %v5919_v15 = vld [vmem:[%s6806_s11 + $0x14] sm:$0x1] }
  0x30   : > { %1613 = vmatpush.bf16.msrb.mxu2 %v6517_v16  ;;  %v1373_v16 = vrot.slane %v1273_v9, 5 }
  0x31   : > { %1992 = vmatpush.bf16.msrb.mxu3 %v6541_v17  ;;  %v6486_v17 = vld [vmem:[%s6806_s11 + $0x54] sm:$0xff] }
  0x32   : > { %1088 = vmatpush.bf16.msrb.mxu1 %v6509_v18  ;;  %2738 = vmatpush.bf16.msrb.mxu0 %v6549_v19  ;;  %v6490_v18 = vld [vmem:[%s6806_s11 + $0x84] sm:$0xff]  ;;  %v581_v19 = vor.u32 %v580_v6, %v577_v5 }
  0x34   : > { %1614 = vmatpush.bf16.msrb.mxu2 %v6516_v20  ;;  %v591_v20 = vor.u32 %v590_v8, %v6933_v7 }
  0x35   : > { %1993 = vmatpush.bf16.msrb.mxu3 %v6540_v21  ;;  %v1272_v21 = vld [vmem:[%s6806_s11] sm:$0xe] }
  0x36   : > { %1089 = vmatpush.bf16.msrb.mxu1 %v6508_v22  ;;  %2739 = vmatpush.bf16.msrb.mxu0 %v6548_v23  ;;  %v6494_v22 = vld [vmem:[%s6806_s11 + $0xb4] sm:$0xff]  ;;  %v6482_v23 = vld [vmem:[%s6806_s11 + $0x24] sm:$0xff] }
  0x38   : > { %1615 = vmatpush.bf16.msrb.mxu2 %v6515_v24  ;;  %v2231_v24 = vor.u32 %v2230_v11, %v2227_v10  ;;  %v618_v10 = vshll.u32 %v528_v57, 16 }
  0x39   : > { %1994 = vmatpush.bf16.msrb.mxu3 %v6539_v25  ;;  %v2241_v25 = vor.u32 %v2240_v13, %v6936_v12  ;;  %v1380_v13 = vrot.slane %v1276_v62, 5  ;;  %v531_v62 = vld [vmem:[%s6806_s11 + $0x20] sm:$0x1] }
  0x3a   : > { %1090 = vmatpush.bf16.msrb.mxu1 %v6507_v26  ;;  %2740 = vmatpush.bf16.msrb.mxu0 %v6547_v27  ;;  %v2244_v26 = vshll.u32 %v5919_v15, 16  ;;  %v596_v27 = vrot.slane %v594_v14, 5  ;;  %v1275_v14 = vld [vmem:[%s6806_s11 + $0xc] sm:$0xe] }
  0x3b   : > { %435 = vmatmul.bf16.gmra.mxu1 %v6484_v30  ;;  %455 = vmatmul.bf16.gmra.mxu2 %v6488_v31  ;;  %v1375_v30 = vrot.slane %v1373_v16, 4  ;;  %v526_v31 = vld [vmem:[%s6806_s11 + $0xc] sm:$0xf] }
  0x3c   : > { %1616 = vmatpush.bf16.msrb.mxu2 %v6514_v28  ;;  %475 = vmatmul.bf16.gmra.mxu3 %v6492_v32  ;;  %v1274_v28 = vld [vmem:[%s6806_s11 + $0x8] sm:$0x1]  ;;  %v527_v32 = vld [vmem:[%s6806_s11 + $0x10] sm:$0xf] }
  0x3d   : > { %1995 = vmatpush.bf16.msrb.mxu3 %v6538_v29  ;;  %415 = vmatmul.bf16.gmra.mxu0 %v6480_v33  ;;  %v5709_v29 = vrot.slane %v1272_v21, 9  ;;  %v6519_v21 = vld [vmem:[%s6806_s11 + $0xc] sm:$0xff] }
  0x3e   : > { %1091 = vmatpush.bf16.msrb.mxu1 %v6506_v34  ;;  %2741 = vmatpush.bf16.msrb.mxu0 %v6546_v35  ;;  %v582_v34 = vrot.slane %v581_v19, 4  ;;  %v592_v35 = vrot.slane %v591_v20, 4  ;;  %v1277_v20 = vld [vmem:[%s6806_s11 + $0x14] sm:$0x1] }
  0x3f   : > { %v1374_v52 = vsel %vm6957_vm5, %v5709_v29, %v1373_v16 }
  0x40   : > { %1617 = vmatpush.bf16.msrb.mxu2 %v6513_v36  ;;  %v5920_v36 = vld [vmem:[%s6806_s11 + $0x18] sm:$0xf]  ;;  %v597_v53 = vsel %vm6950_vm4, %v592_v35, %v596_v27  ;;  %v1500_v5 = vunpack.c.l.b16 %v1374_v52  ;;  %v1382_v27 = vrot.slane %v1380_v13, 4  ;;  %v6581_v35 = vld [vmem:[%s8490_s1 + $0x1b0] sm:$0xff] }
  0x41   : > { %1996 = vmatpush.bf16.msrb.mxu3 %v6537_v37  ;;  %v5921_v37 = vld [vmem:[%s6806_s11 + $0x1c] sm:$0xf]  ;;  %v976_v4 = vunpack.c.l.b16 %v597_v53 }
  0x42   : > { %1092 = vmatpush.bf16.msrb.mxu1 %v6505_v38  ;;  %2742 = vmatpush.bf16.msrb.mxu0 %v6545_v39  ;;  %v1376_v39 = vrot.slane %v1274_v28, 5  ;;  %v1383_v28 = vrot.slane %v1277_v20, 5 }
  0x44   : > { %1618 = vmatpush.bf16.msrb.mxu2 %v6512_v40  ;;  %v2232_v40 = vrot.slane %v2231_v24, 4 }
  0x45   : > { %1997 = vmatpush.bf16.msrb.mxu3 %v6536_v41  ;;  %v2242_v41 = vrot.slane %v2241_v25, 4 }
  0x46   : > { %1093 = vmatpush.bf16.msrb.mxu1 %v6504_v42  ;;  %2743 = vmatpush.bf16.msrb.mxu0 %v6544_v43  ;;  %v2246_v42 = vrot.slane %v2244_v26, 5  ;;  %v599_v43 = vshrl.u32 %v526_v31, 16  ;;  %v5710_v26 = vrot.slane %v1275_v14, 9 }
  0x48   : > { %1619 = vmatpush.bf16.msrb.mxu2 %v6511_v44  ;;  %v602_v44 = vshll.u32 %v526_v31, 16  ;;  %v601_v58 = vrot.slane %v599_v43, 4  ;;  %v5924_v43 = vld [vmem:[%s6806_s11 + $0x28] sm:$0xf] }
  0x49   : > { %1998 = vmatpush.bf16.msrb.mxu3 %v6535_v45  ;;  %v608_v45 = vshll.u32 %v527_v32, 16 }
  0x4a   : > { %1094 = vmatpush.bf16.msrb.mxu1 %v6503_v46  ;;  %2744 = vmatpush.bf16.msrb.mxu0 %v6543_v47  ;;  %v612_v46 = vshrl.u32 %v527_v32, 16  ;;  %v2249_v47 = vshrl.u32 %v5920_v36, 16  ;;  %v529_v32 = vld [vmem:[%s6806_s11 + $0x18] sm:$0xf] }
  0x4b   : > { %440 = vmatmul.bf16.gmra.mxu1 %v6485_v48  ;;  %460 = vmatmul.bf16.gmra.mxu2 %v6489_v49  ;;  %v2252_v48 = vshll.u32 %v5920_v36, 16  ;;  %v2258_v49 = vshll.u32 %v5921_v37, 16  ;;  %v6976_v60 = vrot.slane %v608_v45, 5  ;;  %v6589_v36 = vld [vmem:[%s8490_s1 + $0x1f0] sm:$0xff]  ;;  %v1384_v45 = vsel %vm6957_vm5, %v1382_v27, %v1383_v28 }
  0x4c   : > { %480 = vmatmul.bf16.gmra.mxu3 %v6493_v50  ;;  %3638 = vmatpush.bf16.msra.mxu2 %v6582_v54  ;;  %v2262_v50 = vshrl.u32 %v5921_v37, 16  ;;  %v1377_v54 = vsel %vm6957_vm5, %v1375_v30, %v1376_v39  ;;  %v614_v61 = vrot.slane %v612_v46, 4  ;;  %v2251_v63 = vrot.slane %v2249_v47, 4  ;;  %v6557_v37 = vld [vmem:[%s8490_s1 + $0x170] sm:$0xff] }
  0x4d   : > { %420 = vmatmul.bf16.gmra.mxu0 %v6481_v51  ;;  %4384 = vmatpush.bf16.msra.mxu3 %v6590_v55  ;;  %v587_v51 = vsel %vm6950_vm4, %v582_v34, %v6933_v7  ;;  %v2237_v55 = vsel %vm6950_vm4, %v2232_v40, %v6936_v12  ;;  %v2254_v0 = vrot.slane %v2252_v48, 5  ;;  %v6979_v1 = vrot.slane %v2258_v49, 5  ;;  %v5922_v7 = vld [vmem:[%s6806_s11 + $0x20] sm:$0x1]  ;;  %v530_v34 = vld [vmem:[%s6806_s11 + $0x1c] sm:$0xf] }
  0x4e   : > { %3259 = vmatpush.bf16.msra.mxu1 %v6558_v56  ;;  %4906 = vmatpush.bf16.msra.mxu0 %v6598_v59  ;;  %v2247_v56 = vsel %vm6950_vm4, %v2242_v41, %v2246_v42  ;;  %v604_v59 = vrot.slane %v602_v44, 5  ;;  %v2264_v2 = vrot.slane %v2262_v50, 4  ;;  %v975_v3 = vunpack.c.l.b16 %v587_v51  ;;  %v5923_v42 = vld [vmem:[%s6806_s11 + $0x24] sm:$0xf]  ;;  %v6597_v44 = vld [vmem:[%s8490_s1 + $0x230] sm:$0xff] }
  0x4f   : > { %v1501_v6 = vunpack.c.l.b16 %v1377_v54  ;;  %v2625_v8 = vunpack.c.l.b16 %v2237_v55  ;;  %v2626_v9 = vunpack.c.l.b16 %v2247_v56  ;;  %v615_v12 = vor.u32 %v614_v61, %v6976_v60 }
  0x50   : > { %v605_v11 = vor.u32 %v604_v59, %v601_v58  ;;  %v2255_v15 = vor.u32 %v2254_v0, %v2251_v63  ;;  %v2265_v16 = vor.u32 %v2264_v2, %v6979_v1  ;;  %v1381_v41 = vsel %vm6957_vm5, %v5710_v26, %v1380_v13  ;;  %3639 = vmatpush.bf16.msra.mxu2 %v6581_v35  ;;  %v5927_v35 = vld [vmem:[%s6806_s11 + $0x34] sm:$0xf] }
  0x51   : > { %v1532_v19 = vpack.c.b16 %v1501_v6, %v1500_v5  ;;  %v616_v25 = vrot.slane %v615_v12, 4  ;;  %4385 = vmatpush.bf16.msra.mxu3 %v6589_v36  ;;  %v623_v48 = vshrl.u32 %v529_v32, 16  ;;  %v626_v49 = vshll.u32 %v529_v32, 16 }
  0x52   : > { %v606_v24 = vrot.slane %v605_v11, 4  ;;  %v2256_v29 = vrot.slane %v2255_v15, 4  ;;  %v2266_v30 = vrot.slane %v2265_v16, 4  ;;  %v632_v50 = vshll.u32 %v530_v34, 16  ;;  %3260 = vmatpush.bf16.msra.mxu1 %v6557_v37  ;;  %4907 = vmatpush.bf16.msra.mxu0 %v6597_v44  ;;  %v6520_v15 = vld [vmem:[%s6806_s11 + $0x18] sm:$0xff] }
  0x53   : > { %v636_v51 = vshrl.u32 %v530_v34, 16  ;;  %v2273_v52 = vshrl.u32 %v5923_v42, 16  ;;  %v2276_v53 = vshll.u32 %v5923_v42, 16  ;;  %v2282_v54 = vshll.u32 %v5924_v43, 16 }
  0x54   : > { %v611_v39 = vsel %vm6950_vm4, %v606_v24, %v6976_v60  ;;  %v2261_v46 = vsel %vm6950_vm4, %v2256_v29, %v6979_v1  ;;  %v2286_v55 = vshrl.u32 %v5924_v43, 16  ;;  %v1502_v58 = vunpack.c.l.b16 %v1381_v41  ;;  %v533_v24 = vld [vmem:[%s6806_s11 + $0x28] sm:$0xf]  ;;  %v5926_v29 = vld [vmem:[%s6806_s11 + $0x30] sm:$0xf] }
  0x55   : > { %v977_v56 = vunpack.c.l.b16 %v611_v39  ;;  %v1503_v59 = vunpack.c.l.b16 %v1384_v45  ;;  %v2627_v60 = vunpack.c.l.b16 %v2261_v46  ;;  %v625_v63 = vrot.slane %v623_v48, 4 }
  0x56   : > { %v628_v0 = vrot.slane %v626_v49, 5  ;;  %v634_v1 = vrot.slane %v632_v50, 5  ;;  %v638_v2 = vrot.slane %v636_v51, 4  ;;  %v2278_v5 = vrot.slane %v2276_v53, 5 }
  0x57   : > { %v2284_v6 = vrot.slane %v2282_v54, 5  ;;  %v1533_v11 = vpack.c.b16 %v1503_v59, %v1502_v58  ;;  %v656_v39 = vshll.u32 %v533_v24, 16  ;;  %v2297_v41 = vshrl.u32 %v5926_v29, 16 }
  0x58   : > { %v629_v12 = vor.u32 %v628_v0, %v625_v63  ;;  %v639_v13 = vor.u32 %v638_v2, %v634_v1  ;;  %v2300_v42 = vshll.u32 %v5926_v29, 16  ;;  %v2306_v45 = vshll.u32 %v5927_v35, 16 }
  0x59   : > { %v2310_v46 = vshrl.u32 %v5927_v35, 16  ;;  %v7039_v53 = vrot.slane %v656_v39, 5  ;;  %v2299_v58 = vrot.slane %v2297_v41, 4  ;;  %v5930_v41 = vld [vmem:[%s6806_s11 + $0x40] sm:$0xf] }
  0x5a   : > { %v640_v26 = vrot.slane %v639_v13, 4  ;;  %v2302_v59 = vrot.slane %v2300_v42, 5  ;;  %v7043_v63 = vrot.slane %v2306_v45, 5 }
  0x5b   : > { %445 = vmatmul.bf16.gmra.mxu1 %v6486_v17  ;;  %465 = vmatmul.bf16.gmra.mxu2 %v6490_v18  ;;  %v2268_v17 = vshll.u32 %v5922_v7, 16  ;;  %v1007_v18 = vpack.c.b16 %v976_v4, %v975_v3  ;;  %v1279_v3 = vld [vmem:[%s6806_s11 + $0x1c] sm:$0xf]  ;;  %v2275_v4 = vrot.slane %v2273_v52, 4  ;;  %v2288_v7 = vrot.slane %v2286_v55, 4 }
  0x5c   : > { %485 = vmatmul.bf16.gmra.mxu3 %v6494_v22  ;;  %v2657_v22 = vpack.c.b16 %v2626_v9, %v2625_v8  ;;  %v5925_v8 = vld [vmem:[%s6806_s11 + $0x2c] sm:$0x1]  ;;  %v1387_v14 = vrot.slane %v1279_v3, 5  ;;  %v2312_v0 = vrot.slane %v2310_v46, 4  ;;  %v5928_v3 = vld [vmem:[%s6806_s11 + $0x38] sm:$0x1] }
  0x5d   : > { %425 = vmatmul.bf16.gmra.mxu0 %v6482_v23  ;;  %v620_v23 = vrot.slane %v618_v10, 5  ;;  %v2270_v31 = vrot.slane %v2268_v17, 5  ;;  %v642_v10 = vshll.u32 %v531_v62, 16  ;;  %v1278_v17 = vld [vmem:[%s6806_s11 + $0x18] sm:$0xe]  ;;  %v2292_v20 = vshll.u32 %v5925_v8, 16 }
  0x5e   : > { %v5711_v27 = vrot.slane %v1278_v17, 9  ;;  %v1389_v28 = vrot.slane %v1387_v14, 4  ;;  %v1282_v62 = vld [vmem:[%s6806_s11 + $0x28] sm:$0xf]  ;;  %v2303_v8 = vor.u32 %v2302_v59, %v2299_v58  ;;  %v2313_v13 = vor.u32 %v2312_v0, %v7043_v63  ;;  %v535_v17 = vld [vmem:[%s6806_s11 + $0x30] sm:$0xf] }
  0x5f   : > { %v621_v40 = vsel %vm6950_vm4, %v616_v25, %v620_v23  ;;  %v2271_v47 = vsel %vm6950_vm4, %v2266_v30, %v2270_v31  ;;  %v532_v23 = vld [vmem:[%s6806_s11 + $0x24] sm:$0xf]  ;;  %v630_v25 = vrot.slane %v629_v12, 4  ;;  %v2294_v34 = vrot.slane %v2292_v20, 5  ;;  %v1283_v12 = vld [vmem:[%s6806_s11 + $0x2c] sm:$0x1] }
  0x60   : > { %v978_v57 = vunpack.c.l.b16 %v621_v40  ;;  %v2628_v61 = vunpack.c.l.b16 %v2271_v47  ;;  %v647_v36 = vshrl.u32 %v532_v23, 16  ;;  %v650_v37 = vshll.u32 %v532_v23, 16  ;;  %v6556_v46 = vld [vmem:[%s8490_s1 + $0x168] sm:$0xff] }
  0x61   : > { %v660_v40 = vshrl.u32 %v533_v24, 16  ;;  %v635_v43 = vsel %vm6950_vm4, %v630_v25, %v634_v1  ;;  %v1388_v47 = vsel %vm6957_vm5, %v5711_v27, %v1387_v14  ;;  %v2316_v14 = vshll.u32 %v5928_v3, 16  ;;  %3261 = vmatpush.bf16.msra.mxu1 %v6556_v46 }
  0x62   : > { %v1008_v9 = vpack.c.b16 %v978_v57, %v977_v56  ;;  %v2658_v16 = vpack.c.b16 %v2628_v61, %v2627_v60  ;;  %v649_v51 = vrot.slane %v647_v36, 4  ;;  %v652_v52 = vrot.slane %v650_v37, 5  ;;  %v534_v57 = vld [vmem:[%s6806_s11 + $0x2c] sm:$0x1]  ;;  %v5929_v36 = vld [vmem:[%s6806_s11 + $0x3c] sm:$0xf] }
  0x63   : > { %v662_v54 = vrot.slane %v660_v40, 4  ;;  %v979_v55 = vunpack.c.l.b16 %v635_v43  ;;  %v1504_v60 = vunpack.c.l.b16 %v1388_v47  ;;  %v1397_v24 = vrot.slane %v1283_v12, 5  ;;  %v6522_v12 = vld [vmem:[%s6806_s11 + $0x30] sm:$0xff] }
  0x64   : > { %v2304_v25 = vrot.slane %v2303_v8, 4  ;;  %v2318_v27 = vrot.slane %v2316_v14, 5  ;;  %v674_v29 = vshll.u32 %v535_v17, 16 }
  0x66   : > { %v2309_v42 = vsel %vm6950_vm4, %v2304_v25, %v7043_v63  ;;  %v676_v45 = vrot.slane %v674_v29, 5 }
  0x67   : > { %v2631_v59 = vunpack.c.l.b16 %v2309_v42 }
  0x6b   : > { %1095 = vmatmul.bf16.vlgmr.msrb.gmra.mxu1 %v1007_v18  ;;  %1620 = vmatmul.bf16.vlgmr.msrb.gmra.mxu2 %v1532_v19  ;;  %v2279_v18 = vor.u32 %v2278_v5, %v2275_v4  ;;  %v2289_v19 = vor.u32 %v2288_v7, %v2284_v6  ;;  %v653_v4 = vor.u32 %v652_v52, %v649_v51  ;;  %v1394_v7 = vrot.slane %v1282_v62, 5  ;;  %v537_v51 = vld [vmem:[%s6806_s11 + $0x38] sm:$0x1]  ;;  %v1285_v62 = vld [vmem:[%s6806_s11 + $0x34] sm:$0xf] }
  0x6c   : > { %1999 = vmatmul.bf16.vlgmr.msrb.gmra.mxu3 %v6519_v21  ;;  %v1280_v21 = vld [vmem:[%s6806_s11 + $0x20] sm:$0x1]  ;;  %v663_v5 = vor.u32 %v662_v54, %v7039_v53  ;;  %v2330_v52 = vshll.u32 %v5930_v41, 16  ;;  %v6596_v54 = vld [vmem:[%s8490_s1 + $0x228] sm:$0xff]  ;;  %v690_v0 = vshll.u32 %v537_v51, 16 }
  0x6d   : > { %2745 = vmatmul.bf16.vlgmr.msrb.gmra.mxu0 %v2657_v22  ;;  %v644_v22 = vrot.slane %v642_v10, 5  ;;  %v1390_v30 = vrot.slane %v1280_v21, 5  ;;  %v2280_v31 = vrot.slane %v2279_v18, 4  ;;  %v2290_v32 = vrot.slane %v2289_v19, 4  ;;  %v536_v21 = vld [vmem:[%s6806_s11 + $0x34] sm:$0xf] }
  0x6e   : > { %v654_v18 = vrot.slane %v653_v4, 4  ;;  %v664_v19 = vrot.slane %v663_v5, 4  ;;  %v1396_v23 = vrot.slane %v1394_v7, 4  ;;  %4908 = vmatpush.bf16.msra.mxu0 %v6596_v54  ;;  %v2332_v3 = vrot.slane %v2330_v52, 5  ;;  %v540_v51 = vld [vmem:[%s6806_s11 + $0x44] sm:$0x1] }
  0x6f   : > { %v645_v44 = vsel %vm6950_vm4, %v640_v26, %v644_v22  ;;  %v1391_v48 = vsel %vm6957_vm5, %v1389_v28, %v1390_v30  ;;  %v2285_v49 = vsel %vm6950_vm4, %v2280_v31, %v2284_v6  ;;  %v2295_v50 = vsel %vm6950_vm4, %v2290_v32, %v2294_v34  ;;  %v6580_v32 = vld [vmem:[%s8490_s1 + $0x1a8] sm:$0xff]  ;;  %v1288_v54 = vld [vmem:[%s6806_s11 + $0x40] sm:$0xf] }
  0x70   : > { %v980_v56 = vunpack.c.l.b16 %v645_v44  ;;  %v1505_v61 = vunpack.c.l.b16 %v1391_v48  ;;  %v2629_v1 = vunpack.c.l.b16 %v2285_v49  ;;  %v2630_v2 = vunpack.c.l.b16 %v2295_v50  ;;  %v6588_v34 = vld [vmem:[%s8490_s1 + $0x1e8] sm:$0xff]  ;;  %3640 = vmatpush.bf16.msra.mxu2 %v6580_v32 }
  0x71   : > { %v666_v6 = vshll.u32 %v534_v57, 16  ;;  %v2314_v26 = vrot.slane %v2313_v13, 4  ;;  %v671_v28 = vshrl.u32 %v535_v17, 16  ;;  %v680_v30 = vshll.u32 %v536_v21, 16  ;;  %4386 = vmatpush.bf16.msra.mxu3 %v6588_v34 }
  0x72   : > { %v1534_v10 = vpack.c.b16 %v1505_v61, %v1504_v60  ;;  %v684_v31 = vshrl.u32 %v536_v21, 16  ;;  %v659_v35 = vsel %vm6950_vm4, %v654_v18, %v7039_v53  ;;  %v1398_v40 = vsel %vm6957_vm5, %v1396_v23, %v1397_v24  ;;  %v539_v23 = vld [vmem:[%s6806_s11 + $0x40] sm:$0xf] }
  0x73   : > { %v668_v20 = vrot.slane %v666_v6, 5  ;;  %v2319_v43 = vsel %vm6950_vm4, %v2314_v26, %v2318_v27  ;;  %v673_v44 = vrot.slane %v671_v28, 4  ;;  %v7078_v47 = vrot.slane %v680_v30, 5  ;;  %v5931_v6 = vld [vmem:[%s6806_s11 + $0x44] sm:$0x1] }
  0x74   : > { %v686_v48 = vrot.slane %v684_v31, 4  ;;  %v2321_v49 = vshrl.u32 %v5929_v36, 16  ;;  %v2324_v50 = vshll.u32 %v5929_v36, 16  ;;  %v2334_v53 = vshrl.u32 %v5930_v41, 16  ;;  %v5932_v27 = vld [vmem:[%s6806_s11 + $0x48] sm:$0xf] }
  0x75   : > { %v669_v37 = vsel %vm6950_vm4, %v664_v19, %v668_v20  ;;  %v1507_v58 = vunpack.c.l.b16 %v1398_v40  ;;  %v2632_v60 = vunpack.c.l.b16 %v2319_v43  ;;  %v677_v61 = vor.u32 %v676_v45, %v673_v44  ;;  %v5933_v28 = vld [vmem:[%s6806_s11 + $0x4c] sm:$0xf] }
  0x76   : > { %v687_v63 = vor.u32 %v686_v48, %v7078_v47  ;;  %v2336_v4 = vrot.slane %v2334_v53, 4  ;;  %v1401_v5 = vrot.slane %v1285_v62, 5  ;;  %v2340_v18 = vshll.u32 %v5931_v6, 16 }
  0x77   : > { %v678_v13 = vrot.slane %v677_v61, 4  ;;  %v704_v36 = vshll.u32 %v539_v23, 16  ;;  %v2348_v40 = vshll.u32 %v5932_v27, 16  ;;  %v2354_v41 = vshll.u32 %v5933_v28, 16  ;;  %v5934_v61 = vld [vmem:[%s6806_s11 + $0x50] sm:$0x1] }
  0x78   : > { %v688_v14 = vrot.slane %v687_v63, 4  ;;  %v2337_v17 = vor.u32 %v2336_v4, %v2332_v3  ;;  %v1403_v20 = vrot.slane %v1401_v5, 4  ;;  %v2342_v30 = vrot.slane %v2340_v18, 5 }
  0x79   : > { %v683_v24 = vsel %vm6950_vm4, %v678_v13, %v7078_v47  ;;  %v2358_v42 = vshrl.u32 %v5933_v28, 16  ;;  %v7108_v52 = vrot.slane %v704_v36, 5  ;;  %v5935_v28 = vld [vmem:[%s6806_s11 + $0x54] sm:$0xf] }
  0x7a   : > { %v2338_v29 = vrot.slane %v2337_v17, 4  ;;  %v983_v43 = vunpack.c.l.b16 %v683_v24  ;;  %v6579_v24 = vld [vmem:[%s8490_s1 + $0x1a0] sm:$0xff] }
  0x7b   : > { %1100 = vmatmul.bf16.gmra.mxu1 %v1008_v9  ;;  %1625 = vmatmul.bf16.gmra.mxu2 %v1533_v11  ;;  %v1009_v9 = vpack.c.b16 %v980_v56, %v979_v55  ;;  %v1281_v11 = vld [vmem:[%s6806_s11 + $0x24] sm:$0xe]  ;;  %v981_v55 = vunpack.c.l.b16 %v659_v35  ;;  %v982_v56 = vunpack.c.l.b16 %v669_v37  ;;  %v708_v37 = vshrl.u32 %v539_v23, 16  ;;  %v542_v23 = vld [vmem:[%s6806_s11 + $0x4c] sm:$0xf] }
  0x7c   : > { %2004 = vmatmul.bf16.gmra.mxu3 %v6520_v15  ;;  %v6521_v15 = vld [vmem:[%s6806_s11 + $0x24] sm:$0xff]  ;;  %v5712_v22 = vrot.slane %v1281_v11, 9  ;;  %v1286_v11 = vld [vmem:[%s6806_s11 + $0x38] sm:$0x1]  ;;  %v2343_v46 = vsel %vm6950_vm4, %v2338_v29, %v2342_v30  ;;  %3641 = vmatpush.bf16.msra.mxu2 %v6579_v24 }
  0x7d   : > { %2750 = vmatmul.bf16.gmra.mxu0 %v2658_v16  ;;  %v2659_v16 = vpack.c.b16 %v2630_v2, %v2629_v1  ;;  %v2323_v1 = vrot.slane %v2321_v49, 4  ;;  %v2326_v2 = vrot.slane %v2324_v50, 5  ;;  %v1404_v21 = vrot.slane %v1286_v11, 5  ;;  %v5936_v29 = vld [vmem:[%s6806_s11 + $0x58] sm:$0xf] }
  0x7e   : > { %v1395_v39 = vsel %vm6957_vm5, %v5712_v22, %v1394_v7  ;;  %v1010_v7 = vpack.c.b16 %v982_v56, %v981_v55  ;;  %v538_v22 = vld [vmem:[%s6806_s11 + $0x3c] sm:$0xf]  ;;  %v710_v53 = vrot.slane %v708_v37, 4  ;;  %v2350_v56 = vrot.slane %v2348_v40, 5 }
  0x7f   : > { %v1506_v57 = vunpack.c.l.b16 %v1395_v39  ;;  %v695_v31 = vshrl.u32 %v538_v22, 16  ;;  %v698_v32 = vshll.u32 %v538_v22, 16  ;;  %v1405_v35 = vsel %vm6957_vm5, %v1403_v20, %v1404_v21  ;;  %v541_v22 = vld [vmem:[%s6806_s11 + $0x48] sm:$0xf] }
  0x80   : > { %v2345_v39 = vshrl.u32 %v5932_v27, 16  ;;  %v1509_v50 = vunpack.c.l.b16 %v1405_v35  ;;  %v722_v35 = vshll.u32 %v541_v22, 16  ;;  %v728_v40 = vshll.u32 %v542_v23, 16 }
  0x81   : > { %v1535_v8 = vpack.c.b16 %v1507_v58, %v1506_v57  ;;  %v697_v47 = vrot.slane %v695_v31, 4  ;;  %v700_v48 = vrot.slane %v698_v32, 5  ;;  %v7111_v57 = vrot.slane %v2354_v41, 5 }
  0x82   : > { %v2347_v55 = vrot.slane %v2345_v39, 4  ;;  %v2360_v58 = vrot.slane %v2358_v42, 4  ;;  %v732_v41 = vshrl.u32 %v542_v23, 16  ;;  %v6555_v42 = vld [vmem:[%s8490_s1 + $0x160] sm:$0xff] }
  0x83   : > { %v701_v62 = vor.u32 %v700_v48, %v697_v47  ;;  %v2382_v47 = vshrl.u32 %v5936_v29, 16  ;;  %3262 = vmatpush.bf16.msra.mxu1 %v6555_v42  ;;  %v5938_v42 = vld [vmem:[%s6806_s11 + $0x60] sm:$0xf] }
  0x84   : > { %v2351_v6 = vor.u32 %v2350_v56, %v2347_v55  ;;  %v724_v55 = vrot.slane %v722_v35, 5 }
  0x85   : > { %v702_v13 = vrot.slane %v701_v62, 4  ;;  %v5937_v62 = vld [vmem:[%s6806_s11 + $0x5c] sm:$0x1] }
  0x8b   : > { %1105 = vmatmul.bf16.gmra.mxu1 %v1009_v9  ;;  %1630 = vmatmul.bf16.gmra.mxu2 %v1534_v10  ;;  %v2660_v9 = vpack.c.b16 %v2632_v60, %v2631_v59  ;;  %v1284_v10 = vld [vmem:[%s6806_s11 + $0x30] sm:$0xe]  ;;  %v2634_v60 = vunpack.c.l.b16 %v2343_v46  ;;  %v2378_v46 = vshll.u32 %v5936_v29, 16 }
  0x8c   : > { %2009 = vmatmul.bf16.gmra.mxu3 %v6521_v15  ;;  %v692_v15 = vrot.slane %v690_v0, 5  ;;  %v5713_v19 = vrot.slane %v1284_v10, 9  ;;  %v711_v0 = vor.u32 %v710_v53, %v7108_v52  ;;  %v6523_v10 = vld [vmem:[%s6806_s11 + $0x3c] sm:$0xff] }
  0x8d   : > { %2755 = vmatmul.bf16.gmra.mxu0 %v2659_v16  ;;  %v2327_v16 = vor.u32 %v2326_v2, %v2323_v1  ;;  %v714_v1 = vshll.u32 %v540_v51, 16  ;;  %v1287_v2 = vld [vmem:[%s6806_s11 + $0x3c] sm:$0xe]  ;;  %v6595_v51 = vld [vmem:[%s8490_s1 + $0x220] sm:$0xff] }
  0x8e   : > { %v693_v25 = vsel %vm6950_vm4, %v688_v14, %v692_v15  ;;  %v1402_v34 = vsel %vm6957_vm5, %v5713_v19, %v1401_v5  ;;  %v1289_v5 = vld [vmem:[%s6806_s11 + $0x44] sm:$0x1]  ;;  %v5714_v14 = vrot.slane %v1287_v2, 9  ;;  %v712_v15 = vrot.slane %v711_v0, 4  ;;  %4909 = vmatpush.bf16.msra.mxu0 %v6595_v51 }
  0x8f   : > { %v2328_v26 = vrot.slane %v2327_v16, 4  ;;  %v984_v44 = vunpack.c.l.b16 %v693_v25  ;;  %v1508_v49 = vunpack.c.l.b16 %v1402_v34  ;;  %v716_v16 = vrot.slane %v714_v1, 5  ;;  %v6587_v25 = vld [vmem:[%s8490_s1 + $0x1e0] sm:$0xff] }
  0x90   : > { %v1411_v18 = vrot.slane %v1289_v5, 5  ;;  %v2352_v19 = vrot.slane %v2351_v6, 4  ;;  %v719_v34 = vshrl.u32 %v541_v22, 16  ;;  %4387 = vmatpush.bf16.msra.mxu3 %v6587_v25  ;;  %v7166_v1 = vrot.slane %v2378_v46, 5  ;;  %v544_v22 = vld [vmem:[%s6806_s11 + $0x54] sm:$0xf] }
  0x91   : > { %v2333_v45 = vsel %vm6950_vm4, %v2328_v26, %v2332_v3  ;;  %v1011_v63 = vpack.c.b16 %v984_v44, %v983_v43  ;;  %v1408_v3 = vrot.slane %v1288_v54, 5  ;;  %v1536_v4 = vpack.c.b16 %v1509_v50, %v1508_v49 }
  0x92   : > { %v2633_v59 = vunpack.c.l.b16 %v2333_v45  ;;  %v707_v26 = vsel %vm6950_vm4, %v702_v13, %v7108_v52  ;;  %v717_v31 = vsel %vm6950_vm4, %v712_v15, %v716_v16  ;;  %v2357_v37 = vsel %vm6950_vm4, %v2352_v19, %v7111_v57  ;;  %v6524_v16 = vld [vmem:[%s6806_s11 + $0x48] sm:$0xff] }
  0x93   : > { %v1410_v17 = vrot.slane %v1408_v3, 4  ;;  %v1409_v27 = vsel %vm6957_vm5, %v5714_v14, %v1408_v3  ;;  %v2369_v44 = vshrl.u32 %v5935_v28, 16  ;;  %v2372_v45 = vshll.u32 %v5935_v28, 16 }
  0x94   : > { %v2661_v11 = vpack.c.b16 %v2634_v60, %v2633_v59  ;;  %v985_v49 = vunpack.c.l.b16 %v707_v26  ;;  %v1510_v50 = vunpack.c.l.b16 %v1409_v27  ;;  %v986_v52 = vunpack.c.l.b16 %v717_v31  ;;  %v545_v31 = vld [vmem:[%s6806_s11 + $0x58] sm:$0xf] }
  0x95   : > { %v1412_v32 = vsel %vm6957_vm5, %v1410_v17, %v1411_v18  ;;  %v721_v54 = vrot.slane %v719_v34, 4  ;;  %v2635_v56 = vunpack.c.l.b16 %v2357_v37  ;;  %v7162_v59 = vrot.slane %v728_v40, 5  ;;  %v1292_v18 = vld [vmem:[%s6806_s11 + $0x50] sm:$0x1] }
  0x96   : > { %v1511_v53 = vunpack.c.l.b16 %v1412_v32  ;;  %v734_v60 = vrot.slane %v732_v41, 4  ;;  %v2374_v0 = vrot.slane %v2372_v45, 5  ;;  %v2384_v2 = vrot.slane %v2382_v47, 4 }
  0x97   : > { %v725_v5 = vor.u32 %v724_v55, %v721_v54  ;;  %v2388_v14 = vshll.u32 %v5937_v62, 16  ;;  %v1418_v28 = vrot.slane %v1292_v18, 5  ;;  %v743_v35 = vshrl.u32 %v544_v22, 16 }
  0x98   : > { %v746_v37 = vshll.u32 %v544_v22, 16  ;;  %v752_v40 = vshll.u32 %v545_v31, 16  ;;  %v756_v41 = vshrl.u32 %v545_v31, 16 }
  0x99   : > { %v726_v23 = vrot.slane %v725_v5, 4  ;;  %v2390_v29 = vrot.slane %v2388_v14, 5  ;;  %v745_v54 = vrot.slane %v743_v35, 4  ;;  %v1294_v5 = vld [vmem:[%s6806_s11 + $0x58] sm:$0xf] }
  0x9a   : > { %v748_v55 = vrot.slane %v746_v37, 5  ;;  %v758_v62 = vrot.slane %v756_v41, 4 }
  0x9b   : > { %1110 = vmatmul.bf16.gmra.mxu1 %v1010_v7  ;;  %1635 = vmatmul.bf16.gmra.mxu2 %v1535_v8  ;;  %v2361_v7 = vor.u32 %v2360_v58, %v7111_v57  ;;  %v2364_v8 = vshll.u32 %v5934_v61, 16  ;;  %v543_v58 = vld [vmem:[%s6806_s11 + $0x50] sm:$0x1]  ;;  %v1291_v61 = vld [vmem:[%s6806_s11 + $0x4c] sm:$0xf]  ;;  %v731_v46 = vsel %vm6950_vm4, %v726_v23, %v7162_v59  ;;  %v1422_v23 = vrot.slane %v1294_v5, 5 }
  0x9c   : > { %2014 = vmatmul.bf16.gmra.mxu3 %v6522_v12  ;;  %v738_v6 = vshll.u32 %v543_v58, 16  ;;  %v1415_v13 = vrot.slane %v1291_v61, 5  ;;  %v2396_v58 = vshll.u32 %v5938_v42, 16  ;;  %v7207_v61 = vrot.slane %v752_v40, 5 }
  0x9d   : > { %2760 = vmatmul.bf16.gmra.mxu0 %v2660_v9  ;;  %v2362_v20 = vrot.slane %v2361_v7, 4  ;;  %v2366_v21 = vrot.slane %v2364_v8, 5  ;;  %v1537_v8 = vpack.c.b16 %v1511_v53, %v1510_v50 }
  0x9e   : > { %v740_v24 = vrot.slane %v738_v6, 5  ;;  %v1417_v27 = vrot.slane %v1415_v13, 4 }
  0x9f   : > { %v2367_v39 = vsel %vm6950_vm4, %v2362_v20, %v2366_v21  ;;  %v2385_v20 = vor.u32 %v2384_v2, %v7166_v1 }
  0xa0   : > { %v2636_v57 = vunpack.c.l.b16 %v2367_v39  ;;  %v1419_v50 = vsel %vm6957_vm5, %v1417_v27, %v1418_v28  ;;  %v1295_v27 = vld [vmem:[%s6806_s11 + $0x5c] sm:$0x1] }
  0xa1   : > { %v2386_v34 = vrot.slane %v2385_v20, 4  ;;  %v1513_v2 = vunpack.c.l.b16 %v1419_v50  ;;  %v759_v20 = vor.u32 %v758_v62, %v7207_v61  ;;  %v548_v50 = vld [vmem:[%s6806_s11 + $0x64] sm:$0xf] }
  0xa2   : > { %v2662_v17 = vpack.c.b16 %v2636_v57, %v2635_v56  ;;  %v2393_v57 = vshrl.u32 %v5938_v42, 16  ;;  %v780_v5 = vshrl.u32 %v548_v50, 16 }
  0xa3   : > { %v2391_v53 = vsel %vm6950_vm4, %v2386_v34, %v2390_v29  ;;  %v6525_v29 = vld [vmem:[%s6806_s11 + $0x54] sm:$0xff]  ;;  %v760_v42 = vrot.slane %v759_v20, 4 }
  0xa4   : > { %v2395_v14 = vrot.slane %v2393_v57, 4  ;;  %v6578_v57 = vld [vmem:[%s8490_s1 + $0x198] sm:$0xff] }
  0xa5   : > { %3642 = vmatpush.bf16.msra.mxu2 %v6578_v57 }
  0xa8   : > { %v7118_v9 = vpop.f32.mrf.mxu1 }
  0xaa   : > { %v7121_v12 = vpop.f32.mrf.mxu0 }
  0xab   : > { %1115 = vmatmul.bf16.gmra.mxu1 %v1011_v63  ;;  %1640 = vmatmul.bf16.gmra.mxu2 %v1536_v4  ;;  %v2371_v63 = vrot.slane %v2369_v44, 4  ;;  %v1012_v4 = vpack.c.b16 %v986_v52, %v985_v49  ;;  %v5939_v44 = vld [vmem:[%s6806_s11 + $0x64] sm:$0xf] }
  0xac   : > { %2019 = vmatmul.bf16.gmra.mxu3 %v6523_v10  ;;  %v735_v10 = vor.u32 %v734_v60, %v7162_v59  ;;  %v2402_v59 = vshll.u32 %v5939_v44, 16  ;;  %v2406_v60 = vshrl.u32 %v5939_v44, 16 }
  0xad   : > { %2765 = vmatmul.bf16.gmra.mxu0 %v2661_v11  ;;  %v1290_v11 = vld [vmem:[%s6806_s11 + $0x48] sm:$0xe]  ;;  %v2375_v19 = vor.u32 %v2374_v0, %v2371_v63  ;;  %v987_v63 = vunpack.c.l.b16 %v731_v46  ;;  %v1424_v46 = vrot.slane %v1422_v23, 4 }
  0xae   : > { %v7138_v30 = vpop.f32.mrf.mxu2  ;;  %v5715_v25 = vrot.slane %v1290_v11, 9  ;;  %v736_v26 = vrot.slane %v735_v10, 4  ;;  %v749_v10 = vor.u32 %v748_v55, %v745_v54  ;;  %v1293_v11 = vld [vmem:[%s6806_s11 + $0x54] sm:$0xe]  ;;  %v2408_v18 = vrot.slane %v2406_v60, 4 }
  0xaf   : > { %v7144_v36 = vpop.f32.mrf.mxu3  ;;  %v2376_v32 = vrot.slane %v2375_v19, 4  ;;  %v5716_v34 = vrot.slane %v1293_v11, 9 }
  0xb0   : > { %v7154_v43 = vpop.f32.mrf.mxu1  ;;  %v741_v47 = vsel %vm6950_vm4, %v736_v26, %v740_v24  ;;  %v1416_v49 = vsel %vm6957_vm5, %v5715_v25, %v1415_v13  ;;  %v5940_v13 = vld [vmem:[%s6806_s11 + $0x68] sm:$0x1] }
  0xb1   : > { %v2381_v52 = vsel %vm6950_vm4, %v2376_v32, %v7166_v1  ;;  %v988_v0 = vunpack.c.l.b16 %v741_v47  ;;  %v1512_v1 = vunpack.c.l.b16 %v1416_v49  ;;  %v750_v32 = vrot.slane %v749_v10, 4  ;;  %v547_v49 = vld [vmem:[%s6806_s11 + $0x60] sm:$0xf] }
  0xb2   : > { %v7156_v48 = vpop.f32.mrf.mxu0  ;;  %v2637_v6 = vunpack.c.l.b16 %v2381_v52  ;;  %v2412_v35 = vshll.u32 %v5940_v13, 16  ;;  %v1425_v47 = vrot.slane %v1295_v27, 5  ;;  %v5941_v52 = vld [vmem:[%s6806_s11 + $0x6c] sm:$0xf]  ;;  %v1423_v54 = vsel %vm6957_vm5, %v5716_v34, %v1422_v23  ;;  %v6554_v27 = vld [vmem:[%s8490_s1 + $0x158] sm:$0xff] }
  0xb3   : > { %v1013_v25 = vpack.c.b16 %v988_v0, %v987_v63  ;;  %v1538_v26 = vpack.c.b16 %v1513_v2, %v1512_v1  ;;  %v767_v63 = vshrl.u32 %v547_v49, 16  ;;  %v770_v0 = vshll.u32 %v547_v49, 16  ;;  %v549_v34 = vld [vmem:[%s6806_s11 + $0x68] sm:$0x1]  ;;  %3263 = vmatpush.bf16.msra.mxu1 %v6554_v27 }
  0xb4   : > { %v2414_v55 = vrot.slane %v2412_v35, 5  ;;  %v1426_v2 = vsel %vm6957_vm5, %v1424_v46, %v1425_v47  ;;  %v2420_v10 = vshll.u32 %v5941_v52, 16  ;;  %v786_v57 = vshll.u32 %v549_v34, 16 }
  0xb6   : > { %v7168_v3 = vpop.f32.mrf.mxu2 }
  0xb7   : > { %v7170_v7 = vpop.f32.mrf.mxu3 }
  0xb8   : > { %v7174_v15 = vpop.f32.mrf.mxu1 }
  0xba   : > { %v7179_v21 = vpop.f32.mrf.mxu0 }
  0xbb   : > { %1120 = vmatmul.bf16.gmra.mxu1 %v1012_v4  ;;  %1645 = vmatmul.bf16.gmra.mxu2 %v1537_v8  ;;  %v546_v4 = vld [vmem:[%s6806_s11 + $0x5c] sm:$0x1]  ;;  %v2638_v8 = vunpack.c.l.b16 %v2391_v53  ;;  %v755_v53 = vsel %vm6950_vm4, %v750_v32, %v7207_v61  ;;  %v1515_v32 = vunpack.c.l.b16 %v1426_v2 }
  0xbc   : > { %2024 = vmatmul.bf16.gmra.mxu3 %v6524_v16  ;;  %v2398_v16 = vrot.slane %v2396_v58, 5  ;;  %v762_v22 = vshll.u32 %v546_v4, 16  ;;  %v5942_v58 = vld [vmem:[%s6806_s11 + $0x70] sm:$0xf]  ;;  %v776_v4 = vshll.u32 %v548_v50, 16 }
  0xbd   : > { %2770 = vmatmul.bf16.gmra.mxu0 %v2662_v17  ;;  %v7213_v17 = vrot.slane %v2402_v59, 5  ;;  %v2663_v31 = vpack.c.b16 %v2638_v8, %v2637_v6  ;;  %v6586_v59 = vld [vmem:[%s8490_s1 + $0x1d8] sm:$0xff]  ;;  %v2417_v8 = vshrl.u32 %v5941_v52, 16  ;;  %v2426_v11 = vshll.u32 %v5942_v58, 16  ;;  %v5943_v50 = vld [vmem:[%s6806_s11 + $0x74] sm:$0x1] }
  0xbe   : > { %v7183_v39 = vpop.f32.mrf.mxu2  ;;  %v2399_v40 = vor.u32 %v2398_v16, %v2395_v14  ;;  %v764_v44 = vrot.slane %v762_v22, 5  ;;  %4388 = vmatpush.bf16.msra.mxu3 %v6586_v59  ;;  %v2430_v13 = vshrl.u32 %v5942_v58, 16  ;;  %v989_v16 = vunpack.c.l.b16 %v755_v53 }
  0xbf   : > { %v7187_v45 = vpop.f32.mrf.mxu3  ;;  %v2409_v41 = vor.u32 %v2408_v18, %v7213_v17  ;;  %v1514_v18 = vunpack.c.l.b16 %v1423_v54  ;;  %v7266_v35 = vrot.slane %v776_v4, 5  ;;  %v6526_v4 = vld [vmem:[%s6806_s11 + $0x60] sm:$0xff] }
  0xc0   : > { %v7198_v51 = vpop.f32.mrf.mxu1  ;;  %v2400_v60 = vrot.slane %v2399_v40, 4  ;;  %v765_v61 = vsel %vm6950_vm4, %v760_v42, %v764_v44  ;;  %v1297_v40 = vld [vmem:[%s6806_s11 + $0x64] sm:$0xf]  ;;  %v2422_v42 = vrot.slane %v2420_v10, 5  ;;  %v7269_v44 = vrot.slane %v2426_v11, 5 }
  0xc1   : > { %v2410_v62 = vrot.slane %v2409_v41, 4  ;;  %v2419_v41 = vrot.slane %v2417_v8, 4  ;;  %v2432_v46 = vrot.slane %v2430_v13, 4  ;;  %v1429_v58 = vrot.slane %v1297_v40, 5  ;;  %v1298_v8 = vld [vmem:[%s6806_s11 + $0x68] sm:$0x1] }
  0xc2   : > { %v7205_v56 = vpop.f32.mrf.mxu0  ;;  %v2405_v22 = vsel %vm6950_vm4, %v2400_v60, %v7213_v17  ;;  %v782_v17 = vrot.slane %v780_v5, 4  ;;  %v1539_v60 = vpack.c.b16 %v1515_v32, %v1514_v18  ;;  %v550_v13 = vld [vmem:[%s6806_s11 + $0x6c] sm:$0xf]  ;;  %v1432_v18 = vrot.slane %v1298_v8, 5 }
  0xc3   : > { %v2415_v23 = vsel %vm6950_vm4, %v2410_v62, %v2414_v55  ;;  %v2639_v47 = vunpack.c.l.b16 %v2405_v22  ;;  %v1296_v62 = vld [vmem:[%s6806_s11 + $0x60] sm:$0xe]  ;;  %v791_v32 = vshrl.u32 %v550_v13, 16  ;;  %v794_v34 = vshll.u32 %v550_v13, 16 }
  0xc4   : > { %v2640_v49 = vunpack.c.l.b16 %v2415_v23  ;;  %v783_v55 = vor.u32 %v782_v17, %v7266_v35  ;;  %v788_v23 = vrot.slane %v786_v57, 5 }
  0xc6   : > { %v7215_v19 = vpop.f32.mrf.mxu2  ;;  %v2664_v5 = vpack.c.b16 %v2640_v49, %v2639_v47  ;;  %v784_v22 = vrot.slane %v783_v55, 4  ;;  %v5944_v47 = vld [vmem:[%s6806_s11 + $0x78] sm:$0xf]  ;;  %v5945_v49 = vld [vmem:[%s6806_s11 + $0x7c] sm:$0xf] }
  0xc7   : > { %v7218_v24 = vpop.f32.mrf.mxu3  ;;  %v2450_v8 = vshll.u32 %v5945_v49, 16 }
  0xc8   : > { %8504 = vst [vmem:[#allocation3_spill] sm:$0xff] %v7218_v24  ;;  %v7221_v28 = vpop.f32.mrf.mxu1 }
  0xca   : > { %v7224_v37 = vpop.f32.mrf.mxu0 }
  0xcb   : > { %1125 = vmatmul.bf16.gmra.mxu1 %v1013_v25  ;;  %1650 = vmatmul.bf16.gmra.mxu2 %v1538_v26  ;;  %v769_v25 = vrot.slane %v767_v63, 4  ;;  %v772_v26 = vrot.slane %v770_v0, 5  ;;  %v2423_v63 = vor.u32 %v2422_v42, %v2419_v41  ;;  %v2433_v0 = vor.u32 %v2432_v46, %v7269_v44 }
  0xcc   : > { %2029 = vmatmul.bf16.gmra.mxu3 %v6525_v29  ;;  %v6594_v29 = vld [vmem:[%s8490_s1 + $0x218] sm:$0xff] }
  0xcd   : > { %2775 = vmatmul.bf16.gmra.mxu0 %v2663_v31  ;;  %v990_v31 = vunpack.c.l.b16 %v765_v61  ;;  %v773_v52 = vor.u32 %v772_v26, %v769_v25  ;;  %v2436_v61 = vshll.u32 %v5943_v50, 16  ;;  %v5717_v25 = vrot.slane %v1296_v62, 9 }
  0xce   : > { %v7242_v1 = vpop.f32.mrf.mxu2  ;;  %4910 = vmatpush.bf16.msra.mxu0 %v6594_v29  ;;  %v1431_v26 = vrot.slane %v1429_v58, 4  ;;  %v2424_v27 = vrot.slane %v2423_v63, 4  ;;  %v2434_v29 = vrot.slane %v2433_v0, 4 }
  0xcf   : > { %v7248_v6 = vpop.f32.mrf.mxu3  ;;  %v1014_v54 = vpack.c.b16 %v990_v31, %v989_v16  ;;  %v774_v11 = vrot.slane %v773_v52, 4  ;;  %v551_v16 = vld [vmem:[%s6806_s11 + $0x70] sm:$0xf]  ;;  %v2438_v31 = vrot.slane %v2436_v61, 5  ;;  %v1430_v46 = vsel %vm6957_vm5, %v5717_v25, %v1429_v58  ;;  %v552_v61 = vld [vmem:[%s6806_s11 + $0x74] sm:$0x1] }
  0xd0   : > { %8505 = vst [vmem:[#allocation4_spill] sm:$0xff] %v7248_v6  ;;  %v7250_v14 = vpop.f32.mrf.mxu1  ;;  %v800_v17 = vshll.u32 %v551_v16, 16  ;;  %v804_v40 = vshrl.u32 %v551_v16, 16  ;;  %v789_v52 = vsel %vm6950_vm4, %v784_v22, %v788_v23  ;;  %v2429_v55 = vsel %vm6950_vm4, %v2424_v27, %v7269_v44 }
  0xd1   : > { %v779_v42 = vsel %vm6950_vm4, %v774_v11, %v7266_v35  ;;  %v2439_v35 = vsel %vm6950_vm4, %v2434_v29, %v2438_v31  ;;  %v793_v58 = vrot.slane %v791_v32, 4  ;;  %v2454_v11 = vshrl.u32 %v5945_v49, 16  ;;  %v1300_v29 = vld [vmem:[%s6806_s11 + $0x70] sm:$0xf]  ;;  %v1299_v31 = vld [vmem:[%s6806_s11 + $0x6c] sm:$0xe] }
  0xd2   : > { %v7252_v20 = vpop.f32.mrf.mxu0  ;;  %v7309_v62 = vrot.slane %v800_v17, 5  ;;  %v806_v63 = vrot.slane %v804_v40, 4  ;;  %v991_v44 = vunpack.c.l.b16 %v779_v42  ;;  %v1516_v13 = vunpack.c.l.b16 %v1430_v46  ;;  %v5946_v46 = vld [vmem:[%s6806_s11 + $0x80] sm:$0x1] }
  0xd3   : > { %v992_v16 = vunpack.c.l.b16 %v789_v52  ;;  %v2641_v23 = vunpack.c.l.b16 %v2429_v55  ;;  %v2642_v25 = vunpack.c.l.b16 %v2439_v35  ;;  %v810_v27 = vshll.u32 %v552_v61, 16 }
  0xd4   : > { %v7317_v17 = vrot.slane %v2450_v8, 5  ;;  %v2456_v40 = vrot.slane %v2454_v11, 4  ;;  %v1436_v35 = vrot.slane %v1300_v29, 5 }
  0xd5   : > { %v1015_v49 = vpack.c.b16 %v992_v16, %v991_v44  ;;  %v2665_v55 = vpack.c.b16 %v2642_v25, %v2641_v23  ;;  %v812_v61 = vrot.slane %v810_v27, 5  ;;  %v553_v16 = vld [vmem:[%s6806_s11 + $0x78] sm:$0xf]  ;;  %v554_v25 = vld [vmem:[%s6806_s11 + $0x7c] sm:$0xf] }
  0xd6   : > { %v7272_v53 = vpop.f32.mrf.mxu2  ;;  %v2457_v44 = vor.u32 %v2456_v40, %v7317_v17  ;;  %v815_v27 = vshrl.u32 %v553_v16, 16  ;;  %v818_v29 = vshll.u32 %v553_v16, 16 }
  0xd7   : > { %v7275_v59 = vpop.f32.mrf.mxu3 }
  0xd8   : > { %8506 = vst [vmem:[#allocation5_spill] sm:$0xff] %v7275_v59  ;;  %v7279_v2 = vpop.f32.mrf.mxu1 }
  0xda   : > { %v7283_v10 = vpop.f32.mrf.mxu0 }
  0xdb   : > { %1130 = vmatmul.bf16.gmra.mxu1 %v1014_v54  ;;  %1655 = vmatmul.bf16.gmra.mxu2 %v1539_v60  ;;  %v1433_v54 = vsel %vm6957_vm5, %v1431_v26, %v1432_v18  ;;  %v796_v60 = vrot.slane %v794_v34, 5  ;;  %v807_v18 = vor.u32 %v806_v63, %v7309_v62 }
  0xdc   : > { %2034 = vmatmul.bf16.gmra.mxu3 %v6526_v4  ;;  %v2441_v4 = vshrl.u32 %v5944_v47, 16  ;;  %v1517_v22 = vunpack.c.l.b16 %v1433_v54  ;;  %v6527_v54 = vld [vmem:[%s6806_s11 + $0x6c] sm:$0xff] }
  0xdd   : > { %2780 = vmatmul.bf16.gmra.mxu0 %v2664_v5  ;;  %v2444_v5 = vshll.u32 %v5944_v47, 16  ;;  %v797_v26 = vor.u32 %v796_v60, %v793_v58  ;;  %v808_v63 = vrot.slane %v807_v18, 4 }
  0xde   : > { %v7287_v41 = vpop.f32.mrf.mxu2  ;;  %v2443_v32 = vrot.slane %v2441_v4, 4  ;;  %v1540_v52 = vpack.c.b16 %v1517_v22, %v1516_v13  ;;  %v1301_v4 = vld [vmem:[%s6806_s11 + $0x74] sm:$0x1]  ;;  %v2460_v13 = vshll.u32 %v5946_v46, 16  ;;  %v1438_v22 = vrot.slane %v1436_v35, 4 }
  0xdf   : > { %v7296_v50 = vpop.f32.mrf.mxu3  ;;  %v2446_v34 = vrot.slane %v2444_v5, 5  ;;  %v798_v60 = vrot.slane %v797_v26, 4  ;;  %v5718_v5 = vrot.slane %v1299_v31, 9  ;;  %v1439_v23 = vrot.slane %v1301_v4, 5  ;;  %v5947_v26 = vld [vmem:[%s6806_s11 + $0x84] sm:$0xf] }
  0xe0   : > { %8507 = vst [vmem:[#allocation6_spill] sm:$0xff] %v7296_v50  ;;  %v7307_v57 = vpop.f32.mrf.mxu1  ;;  %v6577_v31 = vld [vmem:[%s8490_s1 + $0x190] sm:$0xff]  ;;  %v813_v40 = vsel %vm6950_vm4, %v808_v63, %v812_v61  ;;  %v817_v63 = vrot.slane %v815_v27, 4  ;;  %v820_v61 = vrot.slane %v818_v29, 5 }
  0xe1   : > { %v2447_v50 = vor.u32 %v2446_v34, %v2443_v32  ;;  %v1437_v18 = vsel %vm6957_vm5, %v5718_v5, %v1436_v35  ;;  %v5948_v32 = vld [vmem:[%s6806_s11 + $0x88] sm:$0xf]  ;;  %v6585_v34 = vld [vmem:[%s8490_s1 + $0x1d0] sm:$0xff]  ;;  %3643 = vmatpush.bf16.msra.mxu2 %v6577_v31  ;;  %v2465_v35 = vshrl.u32 %v5947_v26, 16  ;;  %v994_v6 = vunpack.c.l.b16 %v813_v40 }
  0xe2   : > { %v7311_v0 = vpop.f32.mrf.mxu0  ;;  %4389 = vmatpush.bf16.msra.mxu3 %v6585_v34  ;;  %v2474_v16 = vshll.u32 %v5948_v32, 16 }
  0xe3   : > { %v2448_v46 = vrot.slane %v2447_v50, 4  ;;  %v1440_v50 = vsel %vm6957_vm5, %v1438_v22, %v1439_v23  ;;  %v6593_v22 = vld [vmem:[%s8490_s1 + $0x210] sm:$0xff]  ;;  %v555_v23 = vld [vmem:[%s6806_s11 + $0x80] sm:$0x1] }
  0xe4   : > { %v1519_v31 = vunpack.c.l.b16 %v1440_v50  ;;  %v7365_v34 = vrot.slane %v2474_v16, 5  ;;  %4911 = vmatpush.bf16.msra.mxu0 %v6593_v22 }
  0xe6   : > { %v7319_v42 = vpop.f32.mrf.mxu2 }
  0xe7   : > { %v7322_v47 = vpop.f32.mrf.mxu3 }
  0xe8   : > { %8508 = vst [vmem:[#allocation7_spill] sm:$0xff] %v7322_v47  ;;  %v1096_v58 = vpop.f32.mrf.mxu1  ;;  %v2478_v47 = vshrl.u32 %v5948_v32, 16  ;;  %v1303_v32 = vld [vmem:[%s6806_s11 + $0x7c] sm:$0xf] }
  0xe9   : > { %v1208_v8 = vadd.f32 %v1096_v58, %v7121_v12  ;;  %v803_v12 = vsel %vm6950_vm4, %v798_v60, %v7309_v62  ;;  %v2462_v62 = vrot.slane %v2460_v13, 5  ;;  %v2468_v58 = vshll.u32 %v5947_v26, 16 }
  0xea   : > { %v7327_v11 = vpop.f32.mrf.mxu0  ;;  %v993_v5 = vunpack.c.l.b16 %v803_v12  ;;  %v6553_v12 = vld [vmem:[%s8490_s1 + $0x150] sm:$0xff]  ;;  %v2480_v40 = vrot.slane %v2478_v47, 4 }
  0xeb   : > { %1135 = vmatmul.bf16.gmra.mxu1 %v1015_v49  ;;  %1660 = vmatmul.bf16.gmra.mxu2 %v1540_v52  ;;  %v2458_v49 = vrot.slane %v2457_v44, 4  ;;  %v2470_v29 = vrot.slane %v2468_v58, 5  ;;  %v1302_v58 = vld [vmem:[%s6806_s11 + $0x78] sm:$0xe] }
  0xec   : > { %2039 = vmatmul.bf16.gmra.mxu3 %v6527_v54  ;;  %v824_v54 = vshll.u32 %v554_v25, 16  ;;  %3264 = vmatpush.bf16.msra.mxu1 %v6553_v12  ;;  %v1304_v12 = vld [vmem:[%s6806_s11 + $0x80] sm:$0x1]  ;;  %v2481_v22 = vor.u32 %v2480_v40, %v7365_v34  ;;  %v557_v40 = vld [vmem:[%s6806_s11 + $0x88] sm:$0xf] }
  0xed   : > { %2785 = vmatmul.bf16.gmra.mxu0 %v2665_v55  ;;  %v828_v55 = vshrl.u32 %v554_v25, 16  ;;  %v2463_v26 = vsel %vm6950_vm4, %v2458_v49, %v2462_v62  ;;  %v821_v62 = vor.u32 %v820_v61, %v817_v63  ;;  %v6528_v61 = vld [vmem:[%s6806_s11 + $0x78] sm:$0xff] }
  0xee   : > { %v1621_v52 = vpop.f32.mrf.mxu2  ;;  %v7362_v27 = vrot.slane %v824_v54, 5  ;;  %v2644_v49 = vunpack.c.l.b16 %v2463_v26  ;;  %v834_v54 = vshll.u32 %v555_v23, 16 }
  0xef   : > { %v1733_v60 = vadd.f32 %v1621_v52, %v1208_v8  ;;  %v2000_v4 = vpop.f32.mrf.mxu3  ;;  %v2453_v8 = vsel %vm6950_vm4, %v2448_v46, %v7317_v17  ;;  %v1518_v17 = vunpack.c.l.b16 %v1437_v18  ;;  %v5949_v52 = vld [vmem:[%s6806_s11 + $0x8c] sm:$0x1]  ;;  %v1443_v18 = vrot.slane %v1303_v32, 5 }
  0xf0   : > { %v1098_v59 = vpop.f32.mrf.mxu1  ;;  %v2643_v46 = vunpack.c.l.b16 %v2453_v8  ;;  %v2484_v8 = vshll.u32 %v5949_v52, 16  ;;  %v822_v23 = vrot.slane %v821_v62, 4  ;;  %v2482_v52 = vrot.slane %v2481_v22, 4 }
  0xf1   : > { %v2112_v44 = vadd.f32 %v2000_v4, %v1733_v60  ;;  %v1209_v13 = vadd.f32 %v1098_v59, %v7156_v48  ;;  %v830_v48 = vrot.slane %v828_v55, 4  ;;  %v2467_v59 = vrot.slane %v2465_v35, 4 }
  0xf2   : > { %v2748_v25 = vpop.f32.mrf.mxu0  ;;  %v1016_v55 = vpack.c.b16 %v994_v6, %v993_v5  ;;  %v1541_v47 = vpack.c.b16 %v1519_v31, %v1518_v17  ;;  %v2666_v26 = vpack.c.b16 %v2644_v49, %v2643_v46  ;;  %v1445_v17 = vrot.slane %v1443_v18, 4 }
  0xf3   : > { %v831_v35 = vor.u32 %v830_v48, %v7362_v27  ;;  %v2471_v4 = vor.u32 %v2470_v29, %v2467_v59  ;;  %v836_v48 = vrot.slane %v834_v54, 5  ;;  %v5719_v59 = vrot.slane %v1302_v58, 9  ;;  %v556_v29 = vld [vmem:[%s6806_s11 + $0x84] sm:$0xf] }
  0xf4   : > { %v1446_v31 = vrot.slane %v1304_v12, 5  ;;  %v2486_v46 = vrot.slane %v2484_v8, 5  ;;  %v7379_v49 = vadd.f32 %v7327_v11, %v2112_v44  ;;  %v839_v62 = vshrl.u32 %v556_v29, 16 }
  0xf5   : > { %v2472_v32 = vrot.slane %v2471_v4, 4  ;;  %v842_v54 = vshll.u32 %v556_v29, 16  ;;  %v848_v58 = vshll.u32 %v557_v40, 16  ;;  %v852_v4 = vshrl.u32 %v557_v40, 16  ;;  %v558_v29 = vld [vmem:[%s6806_s11 + $0x8c] sm:$0x1] }
  0xf6   : > { %v1623_v60 = vpop.f32.mrf.mxu2  ;;  %v1447_v11 = vsel %vm6957_vm5, %v1445_v17, %v1446_v31 }
  0xf7   : > { %v1734_v16 = vadd.f32 %v1623_v60, %v1209_v13  ;;  %v2002_v50 = vpop.f32.mrf.mxu3  ;;  %v832_v13 = vrot.slane %v831_v35, 4  ;;  %v5950_v60 = vld [vmem:[%s6806_s11 + $0x90] sm:$0xf]  ;;  %v827_v35 = vsel %vm6950_vm4, %v822_v23, %v7362_v27  ;;  %v2477_v44 = vsel %vm6950_vm4, %v2472_v32, %v7365_v34 }
  0xf8   : > { %v1101_v63 = vpop.f32.mrf.mxu1  ;;  %v2489_v12 = vshrl.u32 %v5950_v60, 16  ;;  %v2492_v22 = vshll.u32 %v5950_v60, 16  ;;  %v854_v34 = vrot.slane %v852_v4, 4  ;;  %v1521_v32 = vunpack.c.l.b16 %v1447_v11  ;;  %v1306_v60 = vld [vmem:[%s6806_s11 + $0x88] sm:$0xf] }
  0xf9   : > { %v2113_v24 = vadd.f32 %v2002_v50, %v1734_v16  ;;  %v1210_v6 = vadd.f32 %v1101_v63, %v7179_v21  ;;  %v837_v50 = vsel %vm6950_vm4, %v832_v13, %v836_v48  ;;  %v841_v63 = vrot.slane %v839_v62, 4  ;;  %v1305_v4 = vld [vmem:[%s6806_s11 + $0x84] sm:$0xe] }
  0xfa   : > { %v7374_v5 = vpop.f32.mrf.mxu0  ;;  %v7401_v13 = vrot.slane %v848_v58, 5  ;;  %v996_v17 = vunpack.c.l.b16 %v837_v50  ;;  %v2645_v40 = vunpack.c.l.b16 %v2477_v44  ;;  %v2494_v62 = vrot.slane %v2492_v22, 5 }
  0xfb   : > { %1140 = vmatmul.bf16.gmra.mxu1 %v1016_v55  ;;  %1665 = vmatmul.bf16.gmra.mxu2 %v1541_v47  ;;  %v7381_v21 = vadd.f32 %v2748_v25, %v2113_v24  ;;  %v5951_v55 = vld [vmem:[%s6806_s11 + $0x94] sm:$0xf]  ;;  %v1444_v24 = vsel %vm6957_vm5, %v5719_v59, %v1443_v18  ;;  %v2487_v47 = vsel %vm6950_vm4, %v2482_v52, %v2486_v46  ;;  %v2491_v46 = vrot.slane %v2489_v12, 4 }
  0xfc   : > { %2044 = vmatmul.bf16.gmra.mxu3 %v6528_v61  ;;  %v844_v61 = vrot.slane %v842_v54, 5  ;;  %v2502_v18 = vshrl.u32 %v5951_v55, 16  ;;  %v1520_v31 = vunpack.c.l.b16 %v1444_v24  ;;  %v2646_v52 = vunpack.c.l.b16 %v2487_v47  ;;  %v1307_v47 = vld [vmem:[%s6806_s11 + $0x8c] sm:$0x1] }
  0xfd   : > { %2790 = vmatmul.bf16.gmra.mxu0 %v2666_v26  ;;  %v2498_v26 = vshll.u32 %v5951_v55, 16  ;;  %v858_v54 = vshll.u32 %v558_v29, 16  ;;  %v1450_v12 = vrot.slane %v1306_v60, 5  ;;  %v2495_v22 = vor.u32 %v2494_v62, %v2491_v46  ;;  %v560_v62 = vld [vmem:[%s6806_s11 + $0x94] sm:$0xf] }
  0xfe   : > { %v1626_v16 = vpop.f32.mrf.mxu2  ;;  %v845_v58 = vor.u32 %v844_v61, %v841_v63  ;;  %v1542_v24 = vpack.c.b16 %v1521_v32, %v1520_v31  ;;  %v5720_v63 = vrot.slane %v1305_v4, 9  ;;  %v1453_v32 = vrot.slane %v1307_v47, 5  ;;  %v6576_v4 = vld [vmem:[%s8490_s1 + $0x188] sm:$0xff] }
  0xff   : > { %v1735_v25 = vadd.f32 %v1626_v16, %v1210_v6  ;;  %v2005_v27 = vpop.f32.mrf.mxu3  ;;  %v995_v6 = vunpack.c.l.b16 %v827_v35  ;;  %v7404_v55 = vrot.slane %v2498_v26, 5  ;;  %v855_v16 = vor.u32 %v854_v34, %v7401_v13  ;;  %v6529_v26 = vld [vmem:[%s6806_s11 + $0x84] sm:$0xff]  ;;  %3644 = vmatpush.bf16.msra.mxu2 %v6576_v4 }
 0x100   : > { %v1103_v8 = vpop.f32.mrf.mxu1  ;;  %v860_v29 = vrot.slane %v858_v54, 5  ;;  %v2496_v46 = vrot.slane %v2495_v22, 4  ;;  %v5953_v54 = vld [vmem:[%s6806_s11 + $0x9c] sm:$0xf] }
 0x101   : > { %v2114_v23 = vadd.f32 %v2005_v27, %v1735_v25  ;;  %v1211_v48 = vadd.f32 %v1103_v8, %v7205_v56  ;;  %v2504_v56 = vrot.slane %v2502_v18, 4  ;;  %v5952_v25 = vld [vmem:[%s6806_s11 + $0x98] sm:$0x1]  ;;  %v1017_v50 = vpack.c.b16 %v996_v17, %v995_v6 }
 0x102   : > { %v2753_v59 = vpop.f32.mrf.mxu0  ;;  %v2667_v27 = vpack.c.b16 %v2646_v52, %v2645_v40  ;;  %v2508_v18 = vshll.u32 %v5952_v25, 16  ;;  %v856_v31 = vrot.slane %v855_v16, 4  ;;  %v559_v40 = vld [vmem:[%s6806_s11 + $0x90] sm:$0xf]  ;;  %v1452_v52 = vrot.slane %v1450_v12, 4 }
 0x103   : > { %v2505_v61 = vor.u32 %v2504_v56, %v7404_v55  ;;  %v7419_v60 = vadd.f32 %v7374_v5, %v2114_v23  ;;  %v5954_v25 = vld [vmem:[%s6806_s11 + $0xa0] sm:$0xf]  ;;  %v2516_v47 = vshll.u32 %v5953_v54, 16 }
 0x104   : > { %v2510_v16 = vrot.slane %v2508_v18, 5  ;;  %v861_v23 = vsel %vm6950_vm4, %v856_v31, %v860_v29  ;;  %v2501_v18 = vsel %vm6950_vm4, %v2496_v46, %v7404_v55  ;;  %v6592_v55 = vld [vmem:[%s8490_s1 + $0x208] sm:$0xff] }
 0x105   : > { %v998_v29 = vunpack.c.l.b16 %v861_v23  ;;  %4912 = vmatpush.bf16.msra.mxu0 %v6592_v55  ;;  %v2647_v23 = vunpack.c.l.b16 %v2501_v18 }
 0x106   : > { %v1628_v35 = vpop.f32.mrf.mxu2 }
 0x107   : > { %v1736_v11 = vadd.f32 %v1628_v35, %v1211_v48  ;;  %v2007_v44 = vpop.f32.mrf.mxu3  ;;  %v846_v48 = vrot.slane %v845_v58, 4  ;;  %v2506_v58 = vrot.slane %v2505_v61, 4  ;;  %v6584_v35 = vld [vmem:[%s8490_s1 + $0x1c8] sm:$0xff] }
 0x108   : > { %v1106_v8 = vpop.f32.mrf.mxu1  ;;  %4390 = vmatpush.bf16.msra.mxu3 %v6584_v35 }
 0x109   : > { %v2115_v34 = vadd.f32 %v2007_v44, %v1736_v11  ;;  %v1212_v6 = vadd.f32 %v1106_v8, %v7224_v37  ;;  %v1451_v37 = vsel %vm6957_vm5, %v5720_v63, %v1450_v12  ;;  %v851_v5 = vsel %vm6950_vm4, %v846_v48, %v7401_v13 }
 0x10a   : > { %v7413_v17 = vpop.f32.mrf.mxu0  ;;  %v872_v11 = vshll.u32 %v560_v62, 16  ;;  %v876_v44 = vshrl.u32 %v560_v62, 16  ;;  %v1454_v8 = vsel %vm6957_vm5, %v1452_v52, %v1453_v32  ;;  %v2526_v13 = vshrl.u32 %v5954_v25, 16  ;;  %v6552_v52 = vld [vmem:[%s8490_s1 + $0x148] sm:$0xff] }
 0x10b   : > { %1145 = vmatmul.bf16.gmra.mxu1 %v1017_v50  ;;  %1670 = vmatmul.bf16.gmra.mxu2 %v1542_v24  ;;  %v7421_v56 = vadd.f32 %v2753_v59, %v2115_v34  ;;  %v863_v59 = vshrl.u32 %v559_v40, 16  ;;  %v866_v50 = vshll.u32 %v559_v40, 16  ;;  %v997_v61 = vunpack.c.l.b16 %v851_v5  ;;  %v561_v40 = vld [vmem:[%s6806_s11 + $0x98] sm:$0x1] }
 0x10c   : > { %2049 = vmatmul.bf16.gmra.mxu3 %v6529_v26  ;;  %v2522_v26 = vshll.u32 %v5954_v25, 16  ;;  %v2511_v34 = vsel %vm6950_vm4, %v2506_v58, %v2510_v16  ;;  %v7452_v46 = vrot.slane %v872_v11, 5  ;;  %v2518_v16 = vrot.slane %v2516_v47, 5  ;;  %v1309_v25 = vld [vmem:[%s6806_s11 + $0x94] sm:$0xf]  ;;  %3265 = vmatpush.bf16.msra.mxu1 %v6552_v52 }
 0x10d   : > { %8509 = vst [vmem:[#allocation8_spill] sm:$0xff] %v7421_v56  ;;  %2795 = vmatmul.bf16.gmra.mxu0 %v2667_v27  ;;  %v2513_v27 = vshrl.u32 %v5953_v54, 16  ;;  %v865_v62 = vrot.slane %v863_v59, 4  ;;  %v868_v32 = vrot.slane %v866_v50, 5  ;;  %v878_v54 = vrot.slane %v876_v44, 4 }
 0x10e   : > { %v1631_v24 = vpop.f32.mrf.mxu2  ;;  %v1523_v4 = vunpack.c.l.b16 %v1454_v8  ;;  %v7455_v35 = vrot.slane %v2522_v26, 5  ;;  %v2528_v5 = vrot.slane %v2526_v13, 4  ;;  %v2648_v59 = vunpack.c.l.b16 %v2511_v34  ;;  %v1308_v47 = vld [vmem:[%s6806_s11 + $0x90] sm:$0xe] }
 0x10f   : > { %v1737_v12 = vadd.f32 %v1631_v24, %v1212_v6  ;;  %v2010_v22 = vpop.f32.mrf.mxu3  ;;  %v2515_v58 = vrot.slane %v2513_v27, 4  ;;  %v882_v50 = vshll.u32 %v561_v40, 16  ;;  %v5955_v24 = vld [vmem:[%s6806_s11 + $0xa4] sm:$0x1]  ;;  %v1018_v11 = vpack.c.b16 %v998_v29, %v997_v61  ;;  %v6530_v40 = vld [vmem:[%s6806_s11 + $0x90] sm:$0xff] }
 0x110   : > { %v1108_v63 = vpop.f32.mrf.mxu1  ;;  %v869_v44 = vor.u32 %v868_v32, %v865_v62  ;;  %v879_v27 = vor.u32 %v878_v54, %v7452_v46  ;;  %v2529_v52 = vor.u32 %v2528_v5, %v7455_v35  ;;  %v2532_v18 = vshll.u32 %v5955_v24, 16 }
 0x111   : > { %v2116_v48 = vadd.f32 %v2010_v22, %v1737_v12  ;;  %v1213_v6 = vadd.f32 %v1108_v63, %v7252_v20  ;;  %v1522_v20 = vunpack.c.l.b16 %v1451_v37  ;;  %v1310_v37 = vld [vmem:[%s6806_s11 + $0x98] sm:$0x1]  ;;  %v1457_v22 = vrot.slane %v1309_v25, 5  ;;  %v562_v25 = vld [vmem:[%s6806_s11 + $0x9c] sm:$0xf] }
 0x112   : > { %v2758_v31 = vpop.f32.mrf.mxu0  ;;  %v2519_v8 = vor.u32 %v2518_v16, %v2515_v58  ;;  %v2668_v55 = vpack.c.b16 %v2648_v59, %v2647_v23  ;;  %v884_v56 = vrot.slane %v882_v50, 5  ;;  %v5721_v32 = vrot.slane %v1308_v47, 9  ;;  %v563_v59 = vld [vmem:[%s6806_s11 + $0xa0] sm:$0xf]  ;;  %v5957_v47 = vld [vmem:[%s6806_s11 + $0xac] sm:$0xf] }
 0x113   : > { %v1543_v13 = vpack.c.b16 %v1523_v4, %v1522_v20  ;;  %v1460_v54 = vrot.slane %v1310_v37, 5  ;;  %v870_v58 = vrot.slane %v869_v44, 4  ;;  %v1459_v16 = vrot.slane %v1457_v22, 4  ;;  %v5956_v44 = vld [vmem:[%s6806_s11 + $0xa8] sm:$0xf] }
 0x114   : > { %v2520_v20 = vrot.slane %v2519_v8, 4  ;;  %v2530_v4 = vrot.slane %v2529_v52, 4  ;;  %v2534_v5 = vrot.slane %v2532_v18, 5  ;;  %v7468_v23 = vadd.f32 %v7413_v17, %v2116_v48 }
 0x115   : > { %v887_v50 = vshrl.u32 %v562_v25, 16  ;;  %v890_v24 = vshll.u32 %v562_v25, 16  ;;  %v1461_v48 = vsel %vm6957_vm5, %v1459_v16, %v1460_v54  ;;  %v2540_v18 = vshll.u32 %v5956_v44, 16 }
 0x116   : > { %v1633_v12 = vpop.f32.mrf.mxu2  ;;  %v1525_v25 = vunpack.c.l.b16 %v1461_v48 }
 0x117   : > { %v1738_v26 = vadd.f32 %v1633_v12, %v1213_v6  ;;  %v2012_v63 = vpop.f32.mrf.mxu3  ;;  %v880_v6 = vrot.slane %v879_v27, 4  ;;  %v1458_v12 = vsel %vm6957_vm5, %v5721_v32, %v1457_v22  ;;  %v2535_v22 = vsel %vm6950_vm4, %v2530_v4, %v2534_v5  ;;  %v564_v4 = vld [vmem:[%s6806_s11 + $0xa4] sm:$0x1] }
 0x118   : > { %v1111_v34 = vpop.f32.mrf.mxu1  ;;  %v892_v52 = vrot.slane %v890_v24, 5  ;;  %v1524_v54 = vunpack.c.l.b16 %v1458_v12 }
 0x119   : > { %v2117_v61 = vadd.f32 %v2012_v63, %v1738_v26  ;;  %v1214_v29 = vadd.f32 %v1111_v34, %v7283_v10  ;;  %v885_v17 = vsel %vm6950_vm4, %v880_v6, %v884_v56  ;;  %v896_v26 = vshll.u32 %v563_v59, 16 }
 0x11a   : > { %v7464_v62 = vpop.f32.mrf.mxu0  ;;  %v900_v63 = vshrl.u32 %v563_v59, 16  ;;  %v2537_v56 = vshrl.u32 %v5956_v44, 16  ;;  %v1000_v32 = vunpack.c.l.b16 %v885_v17  ;;  %v1312_v59 = vld [vmem:[%s6806_s11 + $0xa0] sm:$0xf]  ;;  %v5958_v17 = vld [vmem:[%s6806_s11 + $0xb0] sm:$0x1] }
 0x11b   : > { %1150 = vmatmul.bf16.gmra.mxu1 %v1018_v11  ;;  %1675 = vmatmul.bf16.gmra.mxu2 %v1543_v13  ;;  %v7470_v10 = vadd.f32 %v2758_v31, %v2117_v61  ;;  %v875_v11 = vsel %vm6950_vm4, %v870_v58, %v7452_v46  ;;  %v2525_v31 = vsel %vm6950_vm4, %v2520_v20, %v7455_v35  ;;  %v889_v46 = vrot.slane %v887_v50, 4  ;;  %v1311_v50 = vld [vmem:[%s6806_s11 + $0x9c] sm:$0xe] }
 0x11c   : > { %2054 = vmatmul.bf16.gmra.mxu3 %v6530_v40  ;;  %v2550_v61 = vshrl.u32 %v5957_v47, 16  ;;  %v7490_v58 = vrot.slane %v896_v26, 5  ;;  %v902_v6 = vrot.slane %v900_v63, 4  ;;  %v2649_v16 = vunpack.c.l.b16 %v2525_v31  ;;  %v6531_v26 = vld [vmem:[%s6806_s11 + $0x9c] sm:$0xff] }
 0x11d   : > { %2800 = vmatmul.bf16.gmra.mxu0 %v2668_v55  ;;  %v2546_v55 = vshll.u32 %v5957_v47, 16  ;;  %v2650_v20 = vunpack.c.l.b16 %v2535_v22  ;;  %v893_v5 = vor.u32 %v892_v52, %v889_v46  ;;  %v2539_v24 = vrot.slane %v2537_v56, 4 }
 0x11e   : > { %v1636_v27 = vpop.f32.mrf.mxu2  ;;  %v903_v31 = vor.u32 %v902_v6, %v7490_v58  ;;  %v5722_v46 = vrot.slane %v1311_v50, 9  ;;  %v1464_v52 = vrot.slane %v1312_v59, 5  ;;  %v566_v6 = vld [vmem:[%s6806_s11 + $0xac] sm:$0xf] }
 0x11f   : > { %v1739_v37 = vadd.f32 %v1636_v27, %v1214_v29  ;;  %v2015_v8 = vpop.f32.mrf.mxu3  ;;  %v999_v29 = vunpack.c.l.b16 %v875_v11  ;;  %v7495_v44 = vrot.slane %v2546_v55, 5  ;;  %v2552_v27 = vrot.slane %v2550_v61, 4  ;;  %v1313_v55 = vld [vmem:[%s6806_s11 + $0xa4] sm:$0x1] }
 0x120   : > { %v1113_v13 = vpop.f32.mrf.mxu1  ;;  %v2669_v63 = vpack.c.b16 %v2650_v20, %v2649_v16  ;;  %v1466_v59 = vrot.slane %v1464_v52, 4  ;;  %v1467_v50 = vrot.slane %v1313_v55, 5 }
 0x121   : > { %v2118_v34 = vadd.f32 %v2015_v8, %v1739_v37  ;;  %v1215_v40 = vadd.f32 %v1113_v13, %v7311_v0  ;;  %v2542_v0 = vrot.slane %v2540_v18, 5  ;;  %v1019_v12 = vpack.c.b16 %v1000_v32, %v999_v29 }
 0x122   : > { %v2763_v35 = vpop.f32.mrf.mxu0  ;;  %v1544_v37 = vpack.c.b16 %v1525_v25, %v1524_v54  ;;  %v906_v8 = vshll.u32 %v564_v4, 16  ;;  %v894_v13 = vrot.slane %v893_v5, 4  ;;  %v2556_v29 = vshll.u32 %v5958_v17, 16  ;;  %v565_v25 = vld [vmem:[%s6806_s11 + $0xa8] sm:$0xf] }
 0x123   : > { %v2543_v61 = vor.u32 %v2542_v0, %v2539_v24  ;;  %v904_v32 = vrot.slane %v903_v31, 4  ;;  %v7507_v16 = vadd.f32 %v7464_v62, %v2118_v34  ;;  %v7516_v5 = vsel %vm6957_vm5, %v5722_v46, %v1464_v52  ;;  %v6575_v24 = vld [vmem:[%s8490_s1 + $0x180] sm:$0xff]  ;;  %v5959_v62 = vld [vmem:[%s6806_s11 + $0xb4] sm:$0xf] }
 0x124   : > { %v908_v54 = vrot.slane %v906_v8, 5  ;;  %v899_v4 = vsel %vm6950_vm4, %v894_v13, %v7490_v58  ;;  %v6583_v34 = vld [vmem:[%s8490_s1 + $0x1c0] sm:$0xff]  ;;  %v2558_v58 = vrot.slane %v2556_v29, 5  ;;  %v911_v17 = vshrl.u32 %v565_v25, 16  ;;  %3645 = vmatpush.bf16.msra.mxu2 %v6575_v24 }
 0x125   : > { %v2544_v0 = vrot.slane %v2543_v61, 4  ;;  %4391 = vmatpush.bf16.msra.mxu3 %v6583_v34  ;;  %v2564_v13 = vshll.u32 %v5959_v62, 16  ;;  %v1526_v46 = vunpack.c.l.b16 %v7516_v5 }
 0x126   : > { %v1638_v11 = vpop.f32.mrf.mxu2  ;;  %v913_v5 = vrot.slane %v911_v17, 4 }
 0x127   : > { %v1740_v48 = vadd.f32 %v1638_v11, %v1215_v40  ;;  %v2017_v47 = vpop.f32.mrf.mxu3  ;;  %v2553_v40 = vor.u32 %v2552_v27, %v7495_v44  ;;  %v5960_v11 = vld [vmem:[%s6806_s11 + $0xb8] sm:$0xf]  ;;  %v2549_v29 = vsel %vm6950_vm4, %v2544_v0, %v7495_v44 }
 0x128   : > { %v1116_v22 = vpop.f32.mrf.mxu1  ;;  %v2570_v52 = vshll.u32 %v5960_v11, 16  ;;  %v2651_v0 = vunpack.c.l.b16 %v2549_v29 }
 0x129   : > { %v2119_v56 = vadd.f32 %v2017_v47, %v1740_v48  ;;  %v2554_v27 = vrot.slane %v2553_v40, 4  ;;  %v914_v48 = vshll.u32 %v565_v25, 16  ;;  %v920_v47 = vshll.u32 %v566_v6, 16  ;;  %v6591_v25 = vld [vmem:[%s8490_s1 + $0x200] sm:$0xff] }
 0x12a   : > { %v7500_v18 = vpop.f32.mrf.mxu0  ;;  %v1001_v40 = vunpack.c.l.b16 %v899_v4  ;;  %4913 = vmatpush.bf16.msra.mxu0 %v6591_v25  ;;  %v6532_v25 = vld [vmem:[%s6806_s11 + $0xa8] sm:$0xff] }
 0x12b   : > { %1155 = vmatmul.bf16.gmra.mxu1 %v1019_v12  ;;  %1680 = vmatmul.bf16.gmra.mxu2 %v1544_v37  ;;  %v7509_v20 = vadd.f32 %v2763_v35, %v2119_v56  ;;  %v1216_v35 = vadd.f32 %v1116_v22, %v7118_v9  ;;  %v924_v37 = vshrl.u32 %v566_v6, 16  ;;  %v1468_v22 = vsel %vm6957_vm5, %v1466_v59, %v1467_v50  ;;  %v567_v6 = vld [vmem:[%s6806_s11 + $0xb0] sm:$0x1] }
 0x12c   : > { %2059 = vmatmul.bf16.gmra.mxu3 %v6531_v26  ;;  %v909_v26 = vsel %vm6950_vm4, %v904_v32, %v908_v54  ;;  %v2574_v56 = vshrl.u32 %v5960_v11, 16  ;;  %v2559_v32 = vsel %vm6950_vm4, %v2554_v27, %v2558_v58  ;;  %v6551_v54 = vld [vmem:[%s8490_s1 + $0x140] sm:$0xff]  ;;  %v916_v59 = vrot.slane %v914_v48, 5  ;;  %v5961_v48 = vld [vmem:[%s6806_s11 + $0xbc] sm:$0x1] }
 0x12d   : > { %8510 = vst [vmem:[#allocation9_spill] sm:$0xff] %v7509_v20  ;;  %2805 = vmatmul.bf16.gmra.mxu0 %v2669_v63  ;;  %v2561_v63 = vshrl.u32 %v5959_v62, 16  ;;  %v7544_v4 = vrot.slane %v920_v47, 5  ;;  %v926_v50 = vrot.slane %v924_v37, 4  ;;  %v1002_v24 = vunpack.c.l.b16 %v909_v26  ;;  %v1315_v62 = vld [vmem:[%s6806_s11 + $0xac] sm:$0xf]  ;;  %3266 = vmatpush.bf16.msra.mxu1 %v6551_v54 }
 0x12e   : > { %v1641_v12 = vpop.f32.mrf.mxu2  ;;  %v1527_v44 = vunpack.c.l.b16 %v1468_v22  ;;  %v2652_v27 = vunpack.c.l.b16 %v2559_v32  ;;  %v7547_v58 = vrot.slane %v2570_v52, 5  ;;  %v2576_v11 = vrot.slane %v2574_v56, 4  ;;  %v1316_v54 = vld [vmem:[%s6806_s11 + $0xb0] sm:$0x1] }
 0x12f   : > { %v1741_v31 = vadd.f32 %v1641_v12, %v1216_v35  ;;  %v2020_v8 = vpop.f32.mrf.mxu3  ;;  %v2563_v34 = vrot.slane %v2561_v63, 4  ;;  %v2566_v35 = vrot.slane %v2564_v13, 5  ;;  %v930_v17 = vshll.u32 %v567_v6, 16 }
 0x130   : > { %v1118_v9 = vpop.f32.mrf.mxu1  ;;  %v917_v37 = vor.u32 %v916_v59, %v913_v5  ;;  %v1471_v26 = vrot.slane %v1315_v62, 5  ;;  %v1020_v22 = vpack.c.b16 %v1002_v24, %v1001_v40  ;;  %v1545_v29 = vpack.c.b16 %v1527_v44, %v1526_v46 }
 0x131   : > { %v2120_v55 = vadd.f32 %v2020_v8, %v1741_v31  ;;  %v1217_v12 = vadd.f32 %v1118_v9, %v7154_v43  ;;  %v927_v31 = vor.u32 %v926_v50, %v7544_v4  ;;  %v1314_v8 = vld [vmem:[%s6806_s11 + $0xa8] sm:$0xe]  ;;  %v2567_v32 = vor.u32 %v2566_v35, %v2563_v34 }
 0x132   : > { %v2768_v61 = vpop.f32.mrf.mxu0  ;;  %v2670_v56 = vpack.c.b16 %v2652_v27, %v2651_v0  ;;  %v2577_v20 = vor.u32 %v2576_v11, %v7547_v58  ;;  %v2580_v43 = vshll.u32 %v5961_v48, 16  ;;  %v932_v5 = vrot.slane %v930_v17, 5  ;;  %v568_v0 = vld [vmem:[%s6806_s11 + $0xb4] sm:$0xf]  ;;  %v569_v11 = vld [vmem:[%s6806_s11 + $0xb8] sm:$0xf] }
 0x133   : > { %v5723_v59 = vrot.slane %v1314_v8, 9  ;;  %v918_v50 = vrot.slane %v917_v37, 4  ;;  %v928_v62 = vrot.slane %v927_v31, 4  ;;  %v1474_v40 = vrot.slane %v1316_v54, 5  ;;  %v5962_v17 = vld [vmem:[%s6806_s11 + $0xc0] sm:$0xf] }
 0x134   : > { %v2568_v46 = vrot.slane %v2567_v32, 4  ;;  %v7557_v24 = vadd.f32 %v7500_v18, %v2120_v55  ;;  %v2578_v34 = vrot.slane %v2577_v20, 4  ;;  %v2582_v35 = vrot.slane %v2580_v43, 5 }
 0x135   : > { %v933_v18 = vsel %vm6950_vm4, %v928_v62, %v932_v5  ;;  %v1472_v55 = vsel %vm6957_vm5, %v5723_v59, %v1471_v26  ;;  %v935_v8 = vshrl.u32 %v568_v0, 16  ;;  %v570_v62 = vld [vmem:[%s6806_s11 + $0xbc] sm:$0x1] }
 0x136   : > { %v1643_v47 = vpop.f32.mrf.mxu2 }
 0x137   : > { %v1742_v63 = vadd.f32 %v1643_v47, %v1217_v12  ;;  %v2022_v13 = vpop.f32.mrf.mxu3  ;;  %v1473_v12 = vrot.slane %v1471_v26, 4  ;;  %v923_v47 = vsel %vm6950_vm4, %v918_v50, %v7544_v4  ;;  %v2583_v4 = vsel %vm6950_vm4, %v2578_v34, %v2582_v35  ;;  %v1318_v35 = vld [vmem:[%s6806_s11 + $0xb8] sm:$0xf] }
 0x138   : > { %v1121_v52 = vpop.f32.mrf.mxu1  ;;  %v2585_v26 = vshrl.u32 %v5962_v17, 16  ;;  %v1003_v43 = vunpack.c.l.b16 %v923_v47  ;;  %v2654_v50 = vunpack.c.l.b16 %v2583_v4 }
 0x139   : > { %v2121_v9 = vadd.f32 %v2022_v13, %v1742_v63  ;;  %v1218_v27 = vadd.f32 %v1121_v52, %v7174_v15  ;;  %v1475_v20 = vsel %vm6957_vm5, %v1473_v12, %v1474_v40  ;;  %v2573_v15 = vsel %vm6950_vm4, %v2568_v46, %v7547_v58 }
 0x13a   : > { %v2771_v6 = vpop.f32.mrf.mxu0  ;;  %v938_v63 = vshll.u32 %v568_v0, 16  ;;  %v2588_v52 = vshll.u32 %v5962_v17, 16  ;;  %v1528_v58 = vunpack.c.l.b16 %v1472_v55  ;;  %v1529_v5 = vunpack.c.l.b16 %v1475_v20  ;;  %v1317_v17 = vld [vmem:[%s6806_s11 + $0xb4] sm:$0xe] }
 0x13b   : > { %1160 = vmatmul.bf16.gmra.mxu1 %v1020_v22  ;;  %1685 = vmatmul.bf16.gmra.mxu2 %v1545_v29  ;;  %v7559_v44 = vadd.f32 %v2768_v61, %v2121_v9  ;;  %v5963_v61 = vld [vmem:[%s6806_s11 + $0xc4] sm:$0xf]  ;;  %v944_v22 = vshll.u32 %v569_v11, 16  ;;  %v948_v29 = vshrl.u32 %v569_v11, 16  ;;  %v1004_v9 = vunpack.c.l.b16 %v933_v18 }
 0x13c   : > { %2064 = vmatmul.bf16.gmra.mxu3 %v6532_v25  ;;  %v2594_v25 = vshll.u32 %v5963_v61, 16  ;;  %v2653_v59 = vunpack.c.l.b16 %v2573_v15  ;;  %v937_v12 = vrot.slane %v935_v8, 4  ;;  %v940_v40 = vrot.slane %v938_v63, 5 }
 0x13d   : > { %2810 = vmatmul.bf16.gmra.mxu0 %v2670_v56  ;;  %v2598_v56 = vshrl.u32 %v5963_v61, 16  ;;  %v7581_v46 = vrot.slane %v944_v22, 5  ;;  %v950_v34 = vrot.slane %v948_v29, 4  ;;  %v2587_v0 = vrot.slane %v2585_v26, 4  ;;  %v5964_v61 = vld [vmem:[%s6806_s11 + $0xc8] sm:$0x1] }
 0x13e   : > { %v1646_v48 = vpop.f32.mrf.mxu2  ;;  %v7588_v47 = vrot.slane %v2594_v25, 5  ;;  %v1021_v20 = vpack.c.b16 %v1004_v9, %v1003_v43  ;;  %v1546_v15 = vpack.c.b16 %v1529_v5, %v1528_v58  ;;  %v2671_v8 = vpack.c.b16 %v2654_v50, %v2653_v59  ;;  %v6269_v5 = vld [vmem:[%s6806_s11 + $0x18] sm:$0xf]  ;;  %v6270_v59 = vld [vmem:[%s6806_s11 + $0x1c] sm:$0xf] }
 0x13f   : > { %v1743_v37 = vadd.f32 %v1646_v48, %v1218_v27  ;;  %v2025_v31 = vpop.f32.mrf.mxu3  ;;  %v2590_v48 = vrot.slane %v2588_v52, 5  ;;  %v2600_v18 = vrot.slane %v2598_v56, 4  ;;  %v954_v63 = vshll.u32 %v570_v62, 16 }
 0x140   : > { %v1123_v13 = vpop.f32.mrf.mxu1  ;;  %v941_v22 = vor.u32 %v940_v40, %v937_v12  ;;  %v5724_v29 = vrot.slane %v1317_v17, 9  ;;  %v1478_v26 = vrot.slane %v1318_v35, 5  ;;  %v2604_v43 = vshll.u32 %v5964_v61, 16 }
 0x141   : > { %v2122_v54 = vadd.f32 %v2025_v31, %v1743_v37  ;;  %v1219_v11 = vadd.f32 %v1123_v13, %v7198_v51  ;;  %v951_v51 = vor.u32 %v950_v34, %v7581_v46  ;;  %v1319_v13 = vld [vmem:[%s6806_s11 + $0xbc] sm:$0x1]  ;;  %v2591_v25 = vor.u32 %v2590_v48, %v2587_v0 }
 0x142   : > { %v2773_v32 = vpop.f32.mrf.mxu0  ;;  %v2601_v56 = vor.u32 %v2600_v18, %v7588_v47  ;;  %v956_v9 = vrot.slane %v954_v63, 5  ;;  %v1481_v58 = vrot.slane %v1319_v13, 5  ;;  %v942_v62 = vrot.slane %v941_v22, 4  ;;  %v6014_v13 = vld [vmem:[%s6806_s11 + $0x10] sm:$0xf] }
 0x143   : > { %v7584_v27 = vadd.f32 %v2771_v6, %v2122_v54  ;;  %v6533_v6 = vld [vmem:[%s6806_s11 + $0xb4] sm:$0xff]  ;;  %v952_v12 = vrot.slane %v951_v51, 4  ;;  %v1479_v40 = vsel %vm6957_vm5, %v5724_v29, %v1478_v26  ;;  %v1480_v34 = vrot.slane %v1478_v26, 4 }
 0x144   : > { %v2592_v0 = vrot.slane %v2591_v25, 4  ;;  %v2606_v17 = vrot.slane %v2604_v43, 5  ;;  %v3872_v18 = vshrl.u32 %v6269_v5, 16 }
 0x146   : > { %v1648_v55 = vpop.f32.mrf.mxu2  ;;  %v2597_v22 = vsel %vm6950_vm4, %v2592_v0, %v7588_v47  ;;  %v6366_v47 = vld [vmem:[%s6806_s11 + $0x1c] sm:$0xf] }
 0x147   : > { %v1744_v37 = vadd.f32 %v1648_v55, %v1219_v11  ;;  %v2027_v31 = vpop.f32.mrf.mxu3  ;;  %v2602_v11 = vrot.slane %v2601_v56, 4  ;;  %v3875_v55 = vshll.u32 %v6269_v5, 16  ;;  %v2655_v5 = vunpack.c.l.b16 %v2597_v22 }
 0x148   : > { %v1126_v4 = vpop.f32.mrf.mxu1 }
 0x149   : > { %v2123_v54 = vadd.f32 %v2027_v31, %v1744_v37  ;;  %v1220_v35 = vadd.f32 %v1126_v4, %v7221_v28  ;;  %v957_v28 = vsel %vm6950_vm4, %v952_v12, %v956_v9  ;;  %v2607_v51 = vsel %vm6950_vm4, %v2602_v11, %v2606_v17  ;;  %v6271_v9 = vld [vmem:[%s6806_s11 + $0x20] sm:$0x1] }
 0x14a   : > { %v2776_v52 = vpop.f32.mrf.mxu0  ;;  %v3877_v29 = vrot.slane %v3875_v55, 5  ;;  %v1006_v56 = vunpack.c.l.b16 %v957_v28  ;;  %v3020_v12 = vrot.slane %v6014_v13, 5  ;;  %v3891_v11 = vshll.u32 %v6271_v9, 16  ;;  %v6015_v55 = vld [vmem:[%s6806_s11 + $0x14] sm:$0x1] }
 0x14b   : > { %1165 = vmatmul.bf16.gmra.mxu1 %v1021_v20  ;;  %1690 = vmatmul.bf16.gmra.mxu2 %v1546_v15  ;;  %v7597_v50 = vadd.f32 %v2773_v32, %v2123_v54  ;;  %v3881_v20 = vshll.u32 %v6270_v59, 16  ;;  %v3885_v32 = vshrl.u32 %v6270_v59, 16  ;;  %v947_v15 = vsel %vm6950_vm4, %v942_v62, %v7581_v46  ;;  %v6273_v9 = vld [vmem:[%s6806_s11 + $0x28] sm:$0xf] }
 0x14c   : > { %2069 = vmatmul.bf16.gmra.mxu3 %v6533_v6  ;;  %v1530_v6 = vunpack.c.l.b16 %v1479_v40  ;;  %v3874_v46 = vrot.slane %v3872_v18, 4  ;;  %v1005_v25 = vunpack.c.l.b16 %v947_v15  ;;  %v2656_v59 = vunpack.c.l.b16 %v2607_v51  ;;  %v6365_v15 = vld [vmem:[%s6806_s11 + $0x18] sm:$0xe] }
 0x14d   : > { %2815 = vmatmul.bf16.gmra.mxu0 %v2671_v8  ;;  %v1482_v8 = vsel %vm6957_vm5, %v1480_v34, %v1481_v58  ;;  %v7615_v26 = vrot.slane %v3881_v20, 5  ;;  %v3887_v54 = vrot.slane %v3885_v32, 4  ;;  %v6013_v34 = vld [vmem:[%s6806_s11 + $0xc] sm:$0xe]  ;;  %v4667_v20 = vrot.slane %v6366_v47, 5 }
 0x14e   : > { %v1651_v48 = vpop.f32.mrf.mxu2  ;;  %v1531_v43 = vunpack.c.l.b16 %v1482_v8  ;;  %v1022_v18 = vpack.c.b16 %v1006_v56, %v1005_v25  ;;  %v6061_v8 = vrot.slane %v6013_v34, 9  ;;  %v3023_v22 = vrot.slane %v6015_v55, 5 }
 0x14f   : > { %v1745_v61 = vadd.f32 %v1651_v48, %v1220_v35  ;;  %v2030_v37 = vpop.f32.mrf.mxu3  ;;  %v3878_v35 = vor.u32 %v3877_v29, %v3874_v46  ;;  %v3888_v0 = vor.u32 %v3887_v54, %v7615_v26  ;;  %v3893_v46 = vrot.slane %v3891_v11, 5 }
 0x150   : > { %v1128_v31 = vpop.f32.mrf.mxu1  ;;  %v4669_v29 = vrot.slane %v4667_v20, 4 }
 0x151   : > { %v2124_v63 = vadd.f32 %v2030_v37, %v1745_v61  ;;  %v1221_v62 = vadd.f32 %v1128_v31, %v7250_v14  ;;  %v6534_v61 = vld [vmem:[%s6806_s11 + $0xc0] sm:$0xff]  ;;  %v2672_v37 = vpack.c.b16 %v2656_v59, %v2655_v5  ;;  %v3879_v51 = vrot.slane %v3878_v35, 4 }
 0x152   : > { %v2778_v4 = vpop.f32.mrf.mxu0  ;;  %v6367_v14 = vld [vmem:[%s6806_s11 + $0x20] sm:$0x1]  ;;  %v3889_v13 = vrot.slane %v3888_v0, 4  ;;  %v3021_v59 = vsel %vm6957_vm5, %v6061_v8, %v3020_v12 }
 0x153   : > { %v7618_v58 = vadd.f32 %v2776_v52, %v2124_v63  ;;  %v1547_v52 = vpack.c.b16 %v1531_v43, %v1530_v6  ;;  %v3022_v63 = vrot.slane %v3020_v12, 4  ;;  %v6413_v6 = vrot.slane %v6365_v15, 9  ;;  %v6272_v43 = vld [vmem:[%s6806_s11 + $0x24] sm:$0xf] }
 0x154   : > { %v4670_v54 = vrot.slane %v6367_v14, 5  ;;  %v3894_v34 = vsel %vm6950_vm4, %v3889_v13, %v3893_v46  ;;  %v3896_v0 = vshrl.u32 %v6272_v43, 16  ;;  %v3899_v11 = vshll.u32 %v6272_v43, 16  ;;  %v6017_v14 = vld [vmem:[%s6806_s11 + $0x1c] sm:$0xf] }
 0x155   : > { %v3024_v47 = vsel %vm6957_vm5, %v3022_v63, %v3023_v22  ;;  %v6274_v13 = vld [vmem:[%s6806_s11 + $0x2c] sm:$0x1] }
 0x156   : > { %v1653_v40 = vpop.f32.mrf.mxu2  ;;  %v4671_v35 = vsel %vm6957_vm5, %v4669_v29, %v4670_v54  ;;  %v3148_v55 = vunpack.c.l.b16 %v3024_v47  ;;  %v3901_v8 = vrot.slane %v3899_v11, 5  ;;  %v6016_v47 = vld [vmem:[%s6806_s11 + $0x18] sm:$0xe] }
 0x157   : > { %v1746_v17 = vadd.f32 %v1653_v40, %v1221_v62  ;;  %v2032_v48 = vpop.f32.mrf.mxu3  ;;  %v3884_v62 = vsel %vm6950_vm4, %v3879_v51, %v7615_v26  ;;  %v6062_v11 = vrot.slane %v6016_v47, 9 }
 0x158   : > { %v1131_v32 = vpop.f32.mrf.mxu1 }
 0x159   : > { %v2125_v31 = vadd.f32 %v2032_v48, %v1746_v17  ;;  %v1222_v56 = vadd.f32 %v1131_v32, %v7279_v2  ;;  %v4668_v2 = vsel %vm6957_vm5, %v6413_v6, %v4667_v20  ;;  %v3905_v17 = vshll.u32 %v6273_v9, 16  ;;  %v6369_v6 = vld [vmem:[%s6806_s11 + $0x28] sm:$0xf] }
 0x15a   : > { %v2781_v28 = vpop.f32.mrf.mxu0  ;;  %v3909_v48 = vshrl.u32 %v6273_v9, 16  ;;  %v4272_v32 = vunpack.c.l.b16 %v3884_v62  ;;  %v4795_v20 = vunpack.c.l.b16 %v4671_v35  ;;  %v3027_v9 = vrot.slane %v6017_v14, 5 }
 0x15b   : > { %1170 = vmatmul.bf16.gmra.mxu1 %v1022_v18  ;;  %1695 = vmatmul.bf16.gmra.mxu2 %v1547_v52  ;;  %v7628_v25 = vadd.f32 %v2778_v4, %v2125_v31  ;;  %v3147_v52 = vunpack.c.l.b16 %v3021_v59  ;;  %v3898_v31 = vrot.slane %v3896_v0, 4  ;;  %v7649_v63 = vrot.slane %v3905_v17, 5  ;;  %v6370_v0 = vld [vmem:[%s6806_s11 + $0x2c] sm:$0x1] }
 0x15c   : > { %2074 = vmatmul.bf16.gmra.mxu3 %v6534_v61  ;;  %v4273_v61 = vunpack.c.l.b16 %v3894_v34  ;;  %v3911_v22 = vrot.slane %v3909_v48, 4  ;;  %v4674_v35 = vrot.slane %v6369_v6, 5  ;;  %v3029_v17 = vrot.slane %v3027_v9, 4  ;;  %v6275_v48 = vld [vmem:[%s6806_s11 + $0x30] sm:$0xf] }
 0x15d   : > { %2820 = vmatmul.bf16.gmra.mxu0 %v2672_v37  ;;  %v4794_v37 = vunpack.c.l.b16 %v4668_v2  ;;  %v3902_v62 = vor.u32 %v3901_v8, %v3898_v31  ;;  %v6018_v2 = vld [vmem:[%s6806_s11 + $0x20] sm:$0x1]  ;;  %v4677_v8 = vrot.slane %v6370_v0, 5  ;;  %v6277_v0 = vld [vmem:[%s6806_s11 + $0x38] sm:$0x1] }
 0x15e   : > { %v1656_v5 = vpop.f32.mrf.mxu2  ;;  %v4304_v43 = vpack.c.b16 %v4273_v61, %v4272_v32  ;;  %v4676_v31 = vrot.slane %v4674_v35, 4 }
 0x15f   : > { %v1747_v40 = vadd.f32 %v1656_v5, %v1222_v56  ;;  %v2035_v4 = vpop.f32.mrf.mxu3  ;;  %v3179_v56 = vpack.c.b16 %v3148_v55, %v3147_v52  ;;  %v4826_v59 = vpack.c.b16 %v4795_v20, %v4794_v37  ;;  %v3030_v55 = vrot.slane %v6018_v2, 5 }
 0x160   : > { %v1133_v12 = vpop.f32.mrf.mxu1  ;;  %v3903_v32 = vrot.slane %v3902_v62, 4  ;;  %v4678_v62 = vsel %vm6957_vm5, %v4676_v31, %v4677_v8  ;;  %v3939_v8 = vshll.u32 %v6277_v0, 16 }
 0x161   : > { %v2126_v18 = vadd.f32 %v2035_v4, %v1747_v40  ;;  %v1223_v51 = vadd.f32 %v1133_v12, %v7307_v57  ;;  %v3912_v57 = vor.u32 %v3911_v22, %v7649_v63  ;;  %v3915_v40 = vshll.u32 %v6274_v13, 16  ;;  %v6368_v12 = vld [vmem:[%s6806_s11 + $0x24] sm:$0xe] }
 0x162   : > { %v2783_v26 = vpop.f32.mrf.mxu0  ;;  %v6414_v14 = vrot.slane %v6368_v12, 9  ;;  %v3923_v13 = vshll.u32 %v6275_v48, 16 }
 0x163   : > { %v7646_v15 = vadd.f32 %v2781_v28, %v2126_v18  ;;  %v6559_v28 = vld [vmem:[%s6806_s11 + $0x18] sm:$0xff]  ;;  %v6276_v18 = vld [vmem:[%s6806_s11 + $0x34] sm:$0xf]  ;;  %v3913_v61 = vrot.slane %v3912_v57, 4  ;;  %v3917_v37 = vrot.slane %v3915_v40, 5 }
 0x164   : > { %v3933_v6 = vshrl.u32 %v6276_v18, 16  ;;  %v4675_v47 = vsel %vm6957_vm5, %v6414_v14, %v4674_v35  ;;  %v3925_v40 = vrot.slane %v3923_v13, 5  ;;  %v6560_v13 = vld [vmem:[%s6806_s11 + $0x24] sm:$0xff] }
 0x165   : > { %v4796_v35 = vunpack.c.l.b16 %v4675_v47 }
 0x166   : > { %v1658_v46 = vpop.f32.mrf.mxu2  ;;  %v3935_v2 = vrot.slane %v3933_v6, 4 }
 0x167   : > { %v1748_v29 = vadd.f32 %v1658_v46, %v1223_v51  ;;  %v2037_v54 = vpop.f32.mrf.mxu3  ;;  %v3920_v51 = vshrl.u32 %v6275_v48, 16  ;;  %v3929_v46 = vshll.u32 %v6276_v18, 16  ;;  %v4797_v18 = vunpack.c.l.b16 %v4678_v62 }
 0x168   : > { %v1136_v5 = vpop.f32.mrf.mxu1 }
 0x169   : > { %v2127_v4 = vadd.f32 %v2037_v54, %v1748_v29  ;;  %v1224_v20 = vadd.f32 %v1136_v5, %v7138_v30  ;;  %v3908_v30 = vsel %vm6950_vm4, %v3903_v32, %v7649_v63  ;;  %v3922_v57 = vrot.slane %v3920_v51, 4 }
 0x16a   : > { %v2786_v34 = vpop.f32.mrf.mxu0 }
 0x16b   : > { %3267 = vmatmul.bf16.vlgmr.msra.gmra.mxu1 %v3179_v56  ;;  %3646 = vmatmul.bf16.vlgmr.msra.gmra.mxu2 %v6559_v28  ;;  %v7662_v52 = vadd.f32 %v2783_v26, %v2127_v4  ;;  %v3028_v56 = vsel %vm6957_vm5, %v6062_v11, %v3027_v9  ;;  %v3031_v28 = vsel %vm6957_vm5, %v3029_v17, %v3030_v55  ;;  %v6020_v9 = vld [vmem:[%s6806_s11 + $0x28] sm:$0xf]  ;;  %v7679_v4 = vrot.slane %v3929_v46, 5  ;;  %v6372_v55 = vld [vmem:[%s6806_s11 + $0x34] sm:$0xf] }
 0x16c   : > { %4392 = vmatmul.bf16.vlgmr.msra.gmra.mxu3 %v4304_v43  ;;  %v3149_v63 = vunpack.c.l.b16 %v3028_v56  ;;  %v3150_v12 = vunpack.c.l.b16 %v3031_v28  ;;  %v4274_v17 = vunpack.c.l.b16 %v3908_v30  ;;  %v3926_v14 = vor.u32 %v3925_v40, %v3922_v57  ;;  %v6021_v46 = vld [vmem:[%s6806_s11 + $0x2c] sm:$0x1]  ;;  %v6371_v28 = vld [vmem:[%s6806_s11 + $0x30] sm:$0xe] }
 0x16d   : > { %4914 = vmatmul.bf16.vlgmr.msra.gmra.mxu0 %v4826_v59  ;;  %v3918_v59 = vsel %vm6950_vm4, %v3913_v61, %v3917_v37  ;;  %v3034_v61 = vrot.slane %v6020_v9, 5  ;;  %v3936_v31 = vor.u32 %v3935_v2, %v7679_v4  ;;  %v4681_v6 = vrot.slane %v6372_v55, 5 }
 0x16e   : > { %v1661_v22 = vpop.f32.mrf.mxu2  ;;  %v4275_v48 = vunpack.c.l.b16 %v3918_v59  ;;  %v3180_v51 = vpack.c.b16 %v3150_v12, %v3149_v63  ;;  %v4827_v56 = vpack.c.b16 %v4797_v18, %v4796_v35  ;;  %v3037_v47 = vrot.slane %v6021_v46, 5 }
 0x16f   : > { %v1749_v29 = vadd.f32 %v1661_v22, %v1224_v20  ;;  %v2040_v26 = vpop.f32.mrf.mxu3  ;;  %v6019_v20 = vld [vmem:[%s6806_s11 + $0x24] sm:$0xe]  ;;  %v3036_v59 = vrot.slane %v3034_v61, 4  ;;  %v3927_v62 = vrot.slane %v3926_v14, 4  ;;  %v3937_v9 = vrot.slane %v3936_v31, 4 }
 0x170   : > { %v1138_v54 = vpop.f32.mrf.mxu1  ;;  %v3941_v57 = vrot.slane %v3939_v8, 5  ;;  %v6415_v40 = vrot.slane %v6371_v28, 9  ;;  %v4683_v2 = vrot.slane %v4681_v6, 4 }
 0x171   : > { %v2128_v43 = vadd.f32 %v2040_v26, %v1749_v29  ;;  %v1225_v32 = vadd.f32 %v1138_v54, %v7168_v3  ;;  %v4305_v26 = vpack.c.b16 %v4275_v48, %v4274_v17  ;;  %v6373_v3 = vld [vmem:[%s6806_s11 + $0x38] sm:$0x1]  ;;  %v6278_v17 = vld [vmem:[%s6806_s11 + $0x3c] sm:$0xf]  ;;  %v6279_v48 = vld [vmem:[%s6806_s11 + $0x40] sm:$0xf]  ;;  %v3038_v55 = vsel %vm6957_vm5, %v3036_v59, %v3037_v47 }
 0x172   : > { %v2788_v5 = vpop.f32.mrf.mxu0  ;;  %v4684_v63 = vrot.slane %v6373_v3, 5  ;;  %v3944_v31 = vshrl.u32 %v6278_v17, 16  ;;  %v3947_v8 = vshll.u32 %v6278_v17, 16  ;;  %v3152_v46 = vunpack.c.l.b16 %v3038_v55  ;;  %v6023_v3 = vld [vmem:[%s6806_s11 + $0x34] sm:$0xf] }
 0x173   : > { %v7682_v11 = vadd.f32 %v2786_v34, %v2128_v43  ;;  %v6063_v43 = vrot.slane %v6019_v20, 9  ;;  %v3942_v20 = vsel %vm6950_vm4, %v3937_v9, %v3941_v57  ;;  %v6280_v9 = vld [vmem:[%s6806_s11 + $0x44] sm:$0x1]  ;;  %v6022_v55 = vld [vmem:[%s6806_s11 + $0x30] sm:$0xe] }
 0x174   : > { %v4685_v14 = vsel %vm6957_vm5, %v4683_v2, %v4684_v63 }
 0x175   : > { %v3035_v18 = vsel %vm6957_vm5, %v6063_v43, %v3034_v61  ;;  %v3949_v43 = vrot.slane %v3947_v8, 5  ;;  %v6064_v8 = vrot.slane %v6022_v55, 9 }
 0x176   : > { %v1663_v37 = vpop.f32.mrf.mxu2 }
 0x177   : > { %v1750_v34 = vadd.f32 %v1663_v37, %v1225_v32  ;;  %v2042_v22 = vpop.f32.mrf.mxu3  ;;  %v3932_v32 = vsel %vm6950_vm4, %v3927_v62, %v7679_v4 }
 0x178   : > { %v1141_v29 = vpop.f32.mrf.mxu1 }
 0x179   : > { %v2129_v54 = vadd.f32 %v2042_v22, %v1750_v34  ;;  %v1226_v0 = vadd.f32 %v1141_v29, %v7183_v39  ;;  %v4682_v39 = vsel %vm6957_vm5, %v6415_v40, %v4681_v6  ;;  %v3953_v34 = vshll.u32 %v6279_v48, 16  ;;  %v6375_v40 = vld [vmem:[%s6806_s11 + $0x40] sm:$0xf] }
 0x17a   : > { %v2791_v30 = vpop.f32.mrf.mxu0  ;;  %v3957_v22 = vshrl.u32 %v6279_v48, 16  ;;  %v4276_v29 = vunpack.c.l.b16 %v3932_v32  ;;  %v4799_v6 = vunpack.c.l.b16 %v4685_v14  ;;  %v3041_v48 = vrot.slane %v6023_v3, 5 }
 0x17b   : > { %3272 = vmatmul.bf16.gmra.mxu1 %v3180_v51  ;;  %3651 = vmatmul.bf16.gmra.mxu2 %v6560_v13  ;;  %v7692_v12 = vadd.f32 %v2788_v5, %v2129_v54  ;;  %v3151_v13 = vunpack.c.l.b16 %v3035_v18  ;;  %v3946_v54 = vrot.slane %v3944_v31, 4  ;;  %v7713_v59 = vrot.slane %v3953_v34, 5  ;;  %v6376_v31 = vld [vmem:[%s6806_s11 + $0x44] sm:$0x1] }
 0x17c   : > { %4397 = vmatmul.bf16.gmra.mxu3 %v4305_v26  ;;  %v4277_v26 = vunpack.c.l.b16 %v3942_v20  ;;  %v3959_v47 = vrot.slane %v3957_v22, 4  ;;  %v4688_v14 = vrot.slane %v6375_v40, 5  ;;  %v3043_v34 = vrot.slane %v3041_v48, 4  ;;  %v6281_v22 = vld [vmem:[%s6806_s11 + $0x48] sm:$0xf] }
 0x17d   : > { %4919 = vmatmul.bf16.gmra.mxu0 %v4827_v56  ;;  %v4798_v56 = vunpack.c.l.b16 %v4682_v39  ;;  %v3950_v32 = vor.u32 %v3949_v43, %v3946_v54  ;;  %v6024_v39 = vld [vmem:[%s6806_s11 + $0x38] sm:$0x1]  ;;  %v4691_v43 = vrot.slane %v6376_v31, 5  ;;  %v6283_v31 = vld [vmem:[%s6806_s11 + $0x50] sm:$0x1] }
 0x17e   : > { %v1666_v35 = vpop.f32.mrf.mxu2  ;;  %v4306_v17 = vpack.c.b16 %v4277_v26, %v4276_v29  ;;  %v4690_v54 = vrot.slane %v4688_v14, 4 }
 0x17f   : > { %v1751_v37 = vadd.f32 %v1666_v35, %v1226_v0  ;;  %v2045_v5 = vpop.f32.mrf.mxu3  ;;  %v3181_v0 = vpack.c.b16 %v3152_v46, %v3151_v13  ;;  %v4828_v18 = vpack.c.b16 %v4799_v6, %v4798_v56  ;;  %v3044_v46 = vrot.slane %v6024_v39, 5 }
 0x180   : > { %v1143_v61 = vpop.f32.mrf.mxu1  ;;  %v3951_v29 = vrot.slane %v3950_v32, 4  ;;  %v4692_v32 = vsel %vm6957_vm5, %v4690_v54, %v4691_v43  ;;  %v3987_v43 = vshll.u32 %v6283_v31, 16 }
 0x181   : > { %v2130_v51 = vadd.f32 %v2045_v5, %v1751_v37  ;;  %v1227_v62 = vadd.f32 %v1143_v61, %v7215_v19  ;;  %v3960_v19 = vor.u32 %v3959_v47, %v7713_v59  ;;  %v3963_v37 = vshll.u32 %v6280_v9, 16  ;;  %v6374_v61 = vld [vmem:[%s6806_s11 + $0x3c] sm:$0xe] }
 0x182   : > { %v2793_v4 = vpop.f32.mrf.mxu0  ;;  %v6416_v3 = vrot.slane %v6374_v61, 9  ;;  %v3971_v9 = vshll.u32 %v6281_v22, 16 }
 0x183   : > { %v7710_v28 = vadd.f32 %v2791_v30, %v2130_v51  ;;  %v6561_v30 = vld [vmem:[%s6806_s11 + $0x30] sm:$0xff]  ;;  %v6282_v51 = vld [vmem:[%s6806_s11 + $0x4c] sm:$0xf]  ;;  %v3961_v26 = vrot.slane %v3960_v19, 4  ;;  %v3965_v56 = vrot.slane %v3963_v37, 5 }
 0x184   : > { %v3981_v40 = vshrl.u32 %v6282_v51, 16  ;;  %v4689_v55 = vsel %vm6957_vm5, %v6416_v3, %v4688_v14  ;;  %v3973_v37 = vrot.slane %v3971_v9, 5  ;;  %v6562_v9 = vld [vmem:[%s6806_s11 + $0x3c] sm:$0xff] }
 0x185   : > { %v4800_v14 = vunpack.c.l.b16 %v4689_v55 }
 0x186   : > { %v1668_v57 = vpop.f32.mrf.mxu2  ;;  %v3983_v39 = vrot.slane %v3981_v40, 4 }
 0x187   : > { %v1752_v2 = vadd.f32 %v1668_v57, %v1227_v62  ;;  %v2047_v63 = vpop.f32.mrf.mxu3  ;;  %v3968_v62 = vshrl.u32 %v6281_v22, 16  ;;  %v3977_v57 = vshll.u32 %v6282_v51, 16  ;;  %v4801_v51 = vunpack.c.l.b16 %v4692_v32 }
 0x188   : > { %v1146_v35 = vpop.f32.mrf.mxu1 }
 0x189   : > { %v2131_v5 = vadd.f32 %v2047_v63, %v1752_v2  ;;  %v1228_v6 = vadd.f32 %v1146_v35, %v7242_v1  ;;  %v3956_v1 = vsel %vm6950_vm4, %v3951_v29, %v7713_v59  ;;  %v3970_v19 = vrot.slane %v3968_v62, 4 }
 0x18a   : > { %v2796_v20 = vpop.f32.mrf.mxu0 }
 0x18b   : > { %3277 = vmatmul.bf16.gmra.mxu1 %v3181_v0  ;;  %3656 = vmatmul.bf16.gmra.mxu2 %v6561_v30  ;;  %v7726_v13 = vadd.f32 %v2793_v4, %v2131_v5  ;;  %v3042_v0 = vsel %vm6957_vm5, %v6064_v8, %v3041_v48  ;;  %v3045_v30 = vsel %vm6957_vm5, %v3043_v34, %v3044_v46  ;;  %v6026_v48 = vld [vmem:[%s6806_s11 + $0x40] sm:$0xf]  ;;  %v7743_v5 = vrot.slane %v3977_v57, 5  ;;  %v6378_v46 = vld [vmem:[%s6806_s11 + $0x4c] sm:$0xf] }
 0x18c   : > { %4402 = vmatmul.bf16.gmra.mxu3 %v4306_v17  ;;  %v3153_v59 = vunpack.c.l.b16 %v3042_v0  ;;  %v3154_v61 = vunpack.c.l.b16 %v3045_v30  ;;  %v4278_v34 = vunpack.c.l.b16 %v3956_v1  ;;  %v3974_v3 = vor.u32 %v3973_v37, %v3970_v19  ;;  %v6027_v57 = vld [vmem:[%s6806_s11 + $0x44] sm:$0x1]  ;;  %v6377_v30 = vld [vmem:[%s6806_s11 + $0x48] sm:$0xe] }
 0x18d   : > { %4924 = vmatmul.bf16.gmra.mxu0 %v4828_v18  ;;  %v3966_v18 = vsel %vm6950_vm4, %v3961_v26, %v3965_v56  ;;  %v3048_v26 = vrot.slane %v6026_v48, 5  ;;  %v3984_v54 = vor.u32 %v3983_v39, %v7743_v5  ;;  %v4695_v40 = vrot.slane %v6378_v46, 5 }
 0x18e   : > { %v1671_v47 = vpop.f32.mrf.mxu2  ;;  %v4279_v22 = vunpack.c.l.b16 %v3966_v18  ;;  %v3182_v62 = vpack.c.b16 %v3154_v61, %v3153_v59  ;;  %v4829_v0 = vpack.c.b16 %v4801_v51, %v4800_v14  ;;  %v3051_v55 = vrot.slane %v6027_v57, 5 }
 0x18f   : > { %v1753_v2 = vadd.f32 %v1671_v47, %v1228_v6  ;;  %v2050_v4 = vpop.f32.mrf.mxu3  ;;  %v6025_v6 = vld [vmem:[%s6806_s11 + $0x3c] sm:$0xe]  ;;  %v3050_v18 = vrot.slane %v3048_v26, 4  ;;  %v3975_v32 = vrot.slane %v3974_v3, 4  ;;  %v3985_v48 = vrot.slane %v3984_v54, 4 }
 0x190   : > { %v1148_v63 = vpop.f32.mrf.mxu1  ;;  %v3989_v19 = vrot.slane %v3987_v43, 5  ;;  %v6417_v37 = vrot.slane %v6377_v30, 9  ;;  %v4697_v39 = vrot.slane %v4695_v40, 4 }
 0x191   : > { %v2132_v17 = vadd.f32 %v2050_v4, %v1753_v2  ;;  %v1229_v29 = vadd.f32 %v1148_v63, %v7272_v53  ;;  %v4307_v4 = vpack.c.b16 %v4279_v22, %v4278_v34  ;;  %v6379_v53 = vld [vmem:[%s6806_s11 + $0x50] sm:$0x1]  ;;  %v6284_v34 = vld [vmem:[%s6806_s11 + $0x54] sm:$0xf]  ;;  %v6285_v22 = vld [vmem:[%s6806_s11 + $0x58] sm:$0xf]  ;;  %v3052_v46 = vsel %vm6957_vm5, %v3050_v18, %v3051_v55 }
 0x192   : > { %v2798_v35 = vpop.f32.mrf.mxu0  ;;  %v4698_v59 = vrot.slane %v6379_v53, 5  ;;  %v3992_v54 = vshrl.u32 %v6284_v34, 16  ;;  %v3995_v43 = vshll.u32 %v6284_v34, 16  ;;  %v3156_v57 = vunpack.c.l.b16 %v3052_v46  ;;  %v6029_v53 = vld [vmem:[%s6806_s11 + $0x4c] sm:$0xf] }
 0x193   : > { %v7746_v8 = vadd.f32 %v2796_v20, %v2132_v17  ;;  %v6065_v17 = vrot.slane %v6025_v6, 9  ;;  %v3990_v6 = vsel %vm6950_vm4, %v3985_v48, %v3989_v19  ;;  %v6286_v48 = vld [vmem:[%s6806_s11 + $0x5c] sm:$0x1]  ;;  %v6028_v46 = vld [vmem:[%s6806_s11 + $0x48] sm:$0xe] }
 0x194   : > { %v4699_v3 = vsel %vm6957_vm5, %v4697_v39, %v4698_v59 }
 0x195   : > { %v3049_v51 = vsel %vm6957_vm5, %v6065_v17, %v3048_v26  ;;  %v3997_v17 = vrot.slane %v3995_v43, 5  ;;  %v6066_v43 = vrot.slane %v6028_v46, 9 }
 0x196   : > { %v1673_v56 = vpop.f32.mrf.mxu2 }
 0x197   : > { %v1754_v20 = vadd.f32 %v1673_v56, %v1229_v29  ;;  %v2052_v47 = vpop.f32.mrf.mxu3  ;;  %v3980_v29 = vsel %vm6950_vm4, %v3975_v32, %v7743_v5 }
 0x198   : > { %v1151_v2 = vpop.f32.mrf.mxu1 }
 0x199   : > { %v2133_v63 = vadd.f32 %v2052_v47, %v1754_v20  ;;  %v1230_v31 = vadd.f32 %v1151_v2, %v7287_v41  ;;  %v4696_v41 = vsel %vm6957_vm5, %v6417_v37, %v4695_v40  ;;  %v4001_v20 = vshll.u32 %v6285_v22, 16  ;;  %v6381_v37 = vld [vmem:[%s6806_s11 + $0x58] sm:$0xf] }
 0x19a   : > { %v2801_v1 = vpop.f32.mrf.mxu0  ;;  %v4005_v47 = vshrl.u32 %v6285_v22, 16  ;;  %v4280_v2 = vunpack.c.l.b16 %v3980_v29  ;;  %v4803_v40 = vunpack.c.l.b16 %v4699_v3  ;;  %v3055_v22 = vrot.slane %v6029_v53, 5 }
 0x19b   : > { %3282 = vmatmul.bf16.gmra.mxu1 %v3182_v62  ;;  %3661 = vmatmul.bf16.gmra.mxu2 %v6562_v9  ;;  %v7756_v61 = vadd.f32 %v2798_v35, %v2133_v63  ;;  %v3155_v9 = vunpack.c.l.b16 %v3049_v51  ;;  %v3994_v63 = vrot.slane %v3992_v54, 4  ;;  %v7777_v18 = vrot.slane %v4001_v20, 5  ;;  %v6382_v54 = vld [vmem:[%s6806_s11 + $0x5c] sm:$0x1] }
 0x19c   : > { %4407 = vmatmul.bf16.gmra.mxu3 %v4307_v4  ;;  %v4281_v4 = vunpack.c.l.b16 %v3990_v6  ;;  %v4007_v55 = vrot.slane %v4005_v47, 4  ;;  %v4702_v3 = vrot.slane %v6381_v37, 5  ;;  %v3057_v20 = vrot.slane %v3055_v22, 4  ;;  %v6287_v47 = vld [vmem:[%s6806_s11 + $0x60] sm:$0xf] }
 0x19d   : > { %4929 = vmatmul.bf16.gmra.mxu0 %v4829_v0  ;;  %v4802_v0 = vunpack.c.l.b16 %v4696_v41  ;;  %v3998_v29 = vor.u32 %v3997_v17, %v3994_v63  ;;  %v6030_v41 = vld [vmem:[%s6806_s11 + $0x50] sm:$0x1]  ;;  %v4705_v17 = vrot.slane %v6382_v54, 5  ;;  %v6289_v54 = vld [vmem:[%s6806_s11 + $0x68] sm:$0x1] }
 0x19e   : > { %v1676_v14 = vpop.f32.mrf.mxu2  ;;  %v4308_v34 = vpack.c.b16 %v4281_v4, %v4280_v2  ;;  %v4704_v63 = vrot.slane %v4702_v3, 4 }
 0x19f   : > { %v1755_v56 = vadd.f32 %v1676_v14, %v1230_v31  ;;  %v2055_v35 = vpop.f32.mrf.mxu3  ;;  %v3183_v31 = vpack.c.b16 %v3156_v57, %v3155_v9  ;;  %v4830_v51 = vpack.c.b16 %v4803_v40, %v4802_v0  ;;  %v3058_v57 = vrot.slane %v6030_v41, 5 }
 0x1a0   : > { %v1153_v26 = vpop.f32.mrf.mxu1  ;;  %v3999_v2 = vrot.slane %v3998_v29, 4  ;;  %v4706_v29 = vsel %vm6957_vm5, %v4704_v63, %v4705_v17  ;;  %v4035_v17 = vshll.u32 %v6289_v54, 16 }
 0x1a1   : > { %v2134_v62 = vadd.f32 %v2055_v35, %v1755_v56  ;;  %v1231_v32 = vadd.f32 %v1153_v26, %v7319_v42  ;;  %v4008_v42 = vor.u32 %v4007_v55, %v7777_v18  ;;  %v4011_v56 = vshll.u32 %v6286_v48, 16  ;;  %v6380_v26 = vld [vmem:[%s6806_s11 + $0x54] sm:$0xe] }
 0x1a2   : > { %v2803_v5 = vpop.f32.mrf.mxu0  ;;  %v6418_v53 = vrot.slane %v6380_v26, 9  ;;  %v4019_v48 = vshll.u32 %v6287_v47, 16 }
 0x1a3   : > { %v7774_v30 = vadd.f32 %v2801_v1, %v2134_v62  ;;  %v6563_v1 = vld [vmem:[%s6806_s11 + $0x48] sm:$0xff]  ;;  %v6288_v62 = vld [vmem:[%s6806_s11 + $0x64] sm:$0xf]  ;;  %v4009_v4 = vrot.slane %v4008_v42, 4  ;;  %v4013_v0 = vrot.slane %v4011_v56, 5 }
 0x1a4   : > { %v4029_v37 = vshrl.u32 %v6288_v62, 16  ;;  %v4703_v46 = vsel %vm6957_vm5, %v6418_v53, %v4702_v3  ;;  %v4021_v56 = vrot.slane %v4019_v48, 5  ;;  %v6564_v48 = vld [vmem:[%s6806_s11 + $0x54] sm:$0xff] }
 0x1a5   : > { %v4804_v3 = vunpack.c.l.b16 %v4703_v46 }
 0x1a6   : > { %v1678_v19 = vpop.f32.mrf.mxu2  ;;  %v4031_v41 = vrot.slane %v4029_v37, 4 }
 0x1a7   : > { %v1756_v39 = vadd.f32 %v1678_v19, %v1231_v32  ;;  %v2057_v59 = vpop.f32.mrf.mxu3  ;;  %v4016_v32 = vshrl.u32 %v6287_v47, 16  ;;  %v4025_v19 = vshll.u32 %v6288_v62, 16  ;;  %v4805_v62 = vunpack.c.l.b16 %v4706_v29 }
 0x1a8   : > { %v1156_v14 = vpop.f32.mrf.mxu1 }
 0x1a9   : > { %v2135_v35 = vadd.f32 %v2057_v59, %v1756_v39  ;;  %v1232_v40 = vadd.f32 %v1156_v14, %v7144_v36  ;;  %v4004_v36 = vsel %vm6950_vm4, %v3999_v2, %v7777_v18  ;;  %v4018_v42 = vrot.slane %v4016_v32, 4 }
 0x1aa   : > { %v2806_v6 = vpop.f32.mrf.mxu0 }
 0x1ab   : > { %3287 = vmatmul.bf16.gmra.mxu1 %v3183_v31  ;;  %3666 = vmatmul.bf16.gmra.mxu2 %v6563_v1  ;;  %v7790_v9 = vadd.f32 %v2803_v5, %v2135_v35  ;;  %v3056_v31 = vsel %vm6957_vm5, %v6066_v43, %v3055_v22  ;;  %v3059_v1 = vsel %vm6957_vm5, %v3057_v20, %v3058_v57  ;;  %v6032_v22 = vld [vmem:[%s6806_s11 + $0x58] sm:$0xf]  ;;  %v7807_v35 = vrot.slane %v4025_v19, 5  ;;  %v6384_v57 = vld [vmem:[%s6806_s11 + $0x64] sm:$0xf] }
 0x1ac   : > { %4412 = vmatmul.bf16.gmra.mxu3 %v4308_v34  ;;  %v3157_v18 = vunpack.c.l.b16 %v3056_v31  ;;  %v3158_v26 = vunpack.c.l.b16 %v3059_v1  ;;  %v4282_v20 = vunpack.c.l.b16 %v4004_v36  ;;  %v4022_v53 = vor.u32 %v4021_v56, %v4018_v42  ;;  %v6033_v19 = vld [vmem:[%s6806_s11 + $0x5c] sm:$0x1]  ;;  %v6383_v1 = vld [vmem:[%s6806_s11 + $0x60] sm:$0xe] }
 0x1ad   : > { %4934 = vmatmul.bf16.gmra.mxu0 %v4830_v51  ;;  %v4014_v51 = vsel %vm6950_vm4, %v4009_v4, %v4013_v0  ;;  %v3062_v4 = vrot.slane %v6032_v22, 5  ;;  %v4032_v63 = vor.u32 %v4031_v41, %v7807_v35  ;;  %v4709_v37 = vrot.slane %v6384_v57, 5 }
 0x1ae   : > { %v1681_v55 = vpop.f32.mrf.mxu2  ;;  %v4283_v47 = vunpack.c.l.b16 %v4014_v51  ;;  %v3184_v32 = vpack.c.b16 %v3158_v26, %v3157_v18  ;;  %v4831_v31 = vpack.c.b16 %v4805_v62, %v4804_v3  ;;  %v3065_v46 = vrot.slane %v6033_v19, 5 }
 0x1af   : > { %v1757_v39 = vadd.f32 %v1681_v55, %v1232_v40  ;;  %v2060_v5 = vpop.f32.mrf.mxu3  ;;  %v6031_v40 = vld [vmem:[%s6806_s11 + $0x54] sm:$0xe]  ;;  %v3064_v51 = vrot.slane %v3062_v4, 4  ;;  %v4023_v29 = vrot.slane %v4022_v53, 4  ;;  %v4033_v22 = vrot.slane %v4032_v63, 4 }
 0x1b0   : > { %v1158_v59 = vpop.f32.mrf.mxu1  ;;  %v4037_v42 = vrot.slane %v4035_v17, 5  ;;  %v6419_v56 = vrot.slane %v6383_v1, 9  ;;  %v4711_v41 = vrot.slane %v4709_v37, 4 }
 0x1b1   : > { %v2136_v34 = vadd.f32 %v2060_v5, %v1757_v39  ;;  %v1233_v2 = vadd.f32 %v1158_v59, %v7170_v7  ;;  %v4309_v5 = vpack.c.b16 %v4283_v47, %v4282_v20  ;;  %v6385_v7 = vld [vmem:[%s6806_s11 + $0x68] sm:$0x1]  ;;  %v6290_v20 = vld [vmem:[%s6806_s11 + $0x6c] sm:$0xf]  ;;  %v6291_v47 = vld [vmem:[%s6806_s11 + $0x70] sm:$0xf]  ;;  %v3066_v57 = vsel %vm6957_vm5, %v3064_v51, %v3065_v46 }
 0x1b2   : > { %v2808_v14 = vpop.f32.mrf.mxu0  ;;  %v4712_v18 = vrot.slane %v6385_v7, 5  ;;  %v4040_v63 = vshrl.u32 %v6290_v20, 16  ;;  %v4043_v17 = vshll.u32 %v6290_v20, 16  ;;  %v3160_v19 = vunpack.c.l.b16 %v3066_v57  ;;  %v6035_v7 = vld [vmem:[%s6806_s11 + $0x64] sm:$0xf] }
 0x1b3   : > { %v7810_v43 = vadd.f32 %v2806_v6, %v2136_v34  ;;  %v6067_v34 = vrot.slane %v6031_v40, 9  ;;  %v4038_v40 = vsel %vm6950_vm4, %v4033_v22, %v4037_v42  ;;  %v6292_v42 = vld [vmem:[%s6806_s11 + $0x74] sm:$0x1] }
 0x1b4   : > { %v4713_v53 = vsel %vm6957_vm5, %v4711_v41, %v4712_v18  ;;  %v6387_v41 = vld [vmem:[%s6806_s11 + $0x70] sm:$0xf] }
 0x1b5   : > { %v3063_v62 = vsel %vm6957_vm5, %v6067_v34, %v3062_v4  ;;  %v4045_v34 = vrot.slane %v4043_v17, 5  ;;  %v6386_v17 = vld [vmem:[%s6806_s11 + $0x6c] sm:$0xe] }
 0x1b6   : > { %v1683_v0 = vpop.f32.mrf.mxu2 }
 0x1b7   : > { %v1758_v6 = vadd.f32 %v1683_v0, %v1233_v2  ;;  %v2062_v55 = vpop.f32.mrf.mxu3  ;;  %v4028_v2 = vsel %vm6950_vm4, %v4023_v29, %v7807_v35  ;;  %v8511_v29 = vld [vmem:[#allocation3_spill] sm:$0xff] }
 0x1b8   : > { %v1161_v39 = vpop.f32.mrf.mxu1 }
 0x1b9   : > { %v2137_v59 = vadd.f32 %v2062_v55, %v1758_v6  ;;  %v1234_v54 = vadd.f32 %v1161_v39, %v7187_v45  ;;  %v4710_v45 = vsel %vm6957_vm5, %v6419_v56, %v4709_v37  ;;  %v4049_v6 = vshll.u32 %v6291_v47, 16 }
 0x1ba   : > { %v2811_v36 = vpop.f32.mrf.mxu0  ;;  %v4053_v55 = vshrl.u32 %v6291_v47, 16  ;;  %v4284_v39 = vunpack.c.l.b16 %v4028_v2  ;;  %v4807_v37 = vunpack.c.l.b16 %v4713_v53  ;;  %v6034_v2 = vld [vmem:[%s6806_s11 + $0x60] sm:$0xe] }
 0x1bb   : > { %3292 = vmatmul.bf16.gmra.mxu1 %v3184_v32  ;;  %3671 = vmatmul.bf16.gmra.mxu2 %v6564_v48  ;;  %v7820_v26 = vadd.f32 %v2808_v14, %v2137_v59  ;;  %v3159_v48 = vunpack.c.l.b16 %v3063_v62  ;;  %v4042_v59 = vrot.slane %v4040_v63, 4  ;;  %v7841_v51 = vrot.slane %v4049_v6, 5  ;;  %v6388_v6 = vld [vmem:[%s6806_s11 + $0x74] sm:$0x1] }
 0x1bc   : > { %4417 = vmatmul.bf16.gmra.mxu3 %v4309_v5  ;;  %v4285_v5 = vunpack.c.l.b16 %v4038_v40  ;;  %v4055_v46 = vrot.slane %v4053_v55, 4  ;;  %v4059_v40 = vshll.u32 %v6292_v42, 16  ;;  %v4716_v63 = vrot.slane %v6387_v41, 5 }
 0x1bd   : > { %4939 = vmatmul.bf16.gmra.mxu0 %v4831_v31  ;;  %v4806_v31 = vunpack.c.l.b16 %v4710_v45  ;;  %v3185_v20 = vpack.c.b16 %v3160_v19, %v3159_v48  ;;  %v6068_v55 = vrot.slane %v6034_v2, 9  ;;  %v6293_v48 = vld [vmem:[%s6806_s11 + $0x78] sm:$0xf]  ;;  %v6294_v19 = vld [vmem:[%s6806_s11 + $0x7c] sm:$0xf] }
 0x1be   : > { %v1686_v3 = vpop.f32.mrf.mxu2  ;;  %v4310_v47 = vpack.c.b16 %v4285_v5, %v4284_v39  ;;  %v4067_v41 = vshll.u32 %v6293_v48, 16 }
 0x1bf   : > { %v1759_v0 = vadd.f32 %v1686_v3, %v1234_v54  ;;  %v2065_v14 = vpop.f32.mrf.mxu3  ;;  %v3069_v3 = vrot.slane %v6035_v7, 5  ;;  %v4832_v57 = vpack.c.b16 %v4807_v37, %v4806_v31  ;;  %v4061_v7 = vrot.slane %v4059_v40, 5 }
 0x1c0   : > { %v1163_v4 = vpop.f32.mrf.mxu1 }
 0x1c1   : > { %v2138_v32 = vadd.f32 %v2065_v14, %v1759_v0  ;;  %v1235_v22 = vadd.f32 %v1163_v4, %v8511_v29  ;;  %v4046_v0 = vor.u32 %v4045_v34, %v4042_v59  ;;  %v4056_v14 = vor.u32 %v4055_v46, %v7841_v51  ;;  %v6036_v4 = vld [vmem:[%s6806_s11 + $0x68] sm:$0x1] }
 0x1c2   : > { %v2813_v35 = vpop.f32.mrf.mxu0  ;;  %v3072_v5 = vrot.slane %v6036_v4, 5  ;;  %v8512_v59 = vld [vmem:[#allocation4_spill] sm:$0xff]  ;;  %v6420_v46 = vrot.slane %v6386_v17, 9  ;;  %v4718_v29 = vrot.slane %v4716_v63, 4  ;;  %v4069_v4 = vrot.slane %v4067_v41, 5 }
 0x1c3   : > { %v7838_v1 = vadd.f32 %v2811_v36, %v2138_v32  ;;  %v6565_v36 = vld [vmem:[%s6806_s11 + $0x60] sm:$0xff]  ;;  %v3071_v32 = vrot.slane %v3069_v3, 4  ;;  %v4047_v31 = vrot.slane %v4046_v0, 4  ;;  %v4057_v37 = vrot.slane %v4056_v14, 4 }
 0x1c4   : > { %v4717_v40 = vsel %vm6957_vm5, %v6420_v46, %v4716_v63 }
 0x1c5   : > { %v4062_v14 = vsel %vm6950_vm4, %v4057_v37, %v4061_v7  ;;  %v4808_v63 = vunpack.c.l.b16 %v4717_v40  ;;  %v6390_v7 = vld [vmem:[%s6806_s11 + $0x7c] sm:$0xf] }
 0x1c6   : > { %v1688_v56 = vpop.f32.mrf.mxu2 }
 0x1c7   : > { %v1760_v18 = vadd.f32 %v1688_v56, %v1235_v22  ;;  %v2067_v54 = vpop.f32.mrf.mxu3  ;;  %v4719_v22 = vrot.slane %v6388_v6, 5  ;;  %v4064_v56 = vshrl.u32 %v6293_v48, 16  ;;  %v6295_v48 = vld [vmem:[%s6806_s11 + $0x80] sm:$0x1] }
 0x1c8   : > { %v1166_v62 = vpop.f32.mrf.mxu1 }
 0x1c9   : > { %v2139_v45 = vadd.f32 %v2067_v54, %v1760_v18  ;;  %v1236_v34 = vadd.f32 %v1166_v62, %v8512_v59  ;;  %v4073_v18 = vshll.u32 %v6294_v19, 16  ;;  %v4077_v54 = vshrl.u32 %v6294_v19, 16  ;;  %v8513_v59 = vld [vmem:[#allocation5_spill] sm:$0xff] }
 0x1ca   : > { %v2816_v53 = vpop.f32.mrf.mxu0  ;;  %v4052_v62 = vsel %vm6950_vm4, %v4047_v31, %v7841_v51  ;;  %v4287_v31 = vunpack.c.l.b16 %v4062_v14  ;;  %v6389_v14 = vld [vmem:[%s6806_s11 + $0x78] sm:$0xe] }
 0x1cb   : > { %3297 = vmatmul.bf16.gmra.mxu1 %v3185_v20  ;;  %3676 = vmatmul.bf16.gmra.mxu2 %v6565_v36  ;;  %v7854_v39 = vadd.f32 %v2813_v35, %v2139_v45  ;;  %v4720_v45 = vsel %vm6957_vm5, %v4718_v29, %v4719_v22  ;;  %v7870_v17 = vrot.slane %v4073_v18, 5  ;;  %v4079_v6 = vrot.slane %v4077_v54, 4  ;;  %v6037_v29 = vld [vmem:[%s6806_s11 + $0x6c] sm:$0xe]  ;;  %v6039_v22 = vld [vmem:[%s6806_s11 + $0x74] sm:$0x1] }
 0x1cc   : > { %4422 = vmatmul.bf16.gmra.mxu3 %v4310_v47  ;;  %v3070_v47 = vsel %vm6957_vm5, %v6068_v55, %v3069_v3  ;;  %v4066_v3 = vrot.slane %v4064_v56, 4  ;;  %v4809_v37 = vunpack.c.l.b16 %v4720_v45  ;;  %v4083_v18 = vshll.u32 %v6295_v48, 16 }
 0x1cd   : > { %4944 = vmatmul.bf16.gmra.mxu0 %v4832_v57  ;;  %v3073_v57 = vsel %vm6957_vm5, %v3071_v32, %v3072_v5  ;;  %v3161_v51 = vunpack.c.l.b16 %v3070_v47  ;;  %v6038_v32 = vld [vmem:[%s6806_s11 + $0x70] sm:$0xf]  ;;  %v4286_v5 = vunpack.c.l.b16 %v4052_v62  ;;  %v4080_v41 = vor.u32 %v4079_v6, %v7870_v17 }
 0x1ce   : > { %v1691_v42 = vpop.f32.mrf.mxu2  ;;  %v3162_v55 = vunpack.c.l.b16 %v3073_v57  ;;  %v4070_v56 = vor.u32 %v4069_v4, %v4066_v3  ;;  %v4723_v47 = vrot.slane %v6390_v7, 5  ;;  %v4085_v48 = vrot.slane %v4083_v18, 5 }
 0x1cf   : > { %v1761_v20 = vadd.f32 %v1691_v42, %v1236_v34  ;;  %v2070_v36 = vpop.f32.mrf.mxu3  ;;  %v3076_v42 = vrot.slane %v6038_v32, 5  ;;  %v4311_v62 = vpack.c.b16 %v4287_v31, %v4286_v5  ;;  %v3079_v32 = vrot.slane %v6039_v22, 5  ;;  %v8514_v5 = vld [vmem:[#allocation6_spill] sm:$0xff] }
 0x1d0   : > { %v1168_v35 = vpop.f32.mrf.mxu1  ;;  %v4071_v4 = vrot.slane %v4070_v56, 4  ;;  %v4081_v6 = vrot.slane %v4080_v41, 4 }
 0x1d1   : > { %v2140_v2 = vadd.f32 %v2070_v36, %v1761_v20  ;;  %v1237_v34 = vadd.f32 %v1168_v35, %v8513_v59  ;;  %v3186_v20 = vpack.c.b16 %v3162_v55, %v3161_v51  ;;  %v6566_v36 = vld [vmem:[%s6806_s11 + $0x6c] sm:$0xff]  ;;  %v6391_v35 = vld [vmem:[%s6806_s11 + $0x80] sm:$0x1]  ;;  %v6069_v59 = vrot.slane %v6037_v29, 9 }
 0x1d2   : > { %v2818_v0 = vpop.f32.mrf.mxu0  ;;  %v3078_v3 = vrot.slane %v3076_v42, 4  ;;  %v6421_v51 = vrot.slane %v6389_v14, 9  ;;  %v4725_v55 = vrot.slane %v4723_v47, 4  ;;  %v4726_v7 = vrot.slane %v6391_v35, 5 }
 0x1d3   : > { %v7874_v19 = vadd.f32 %v2816_v53, %v2140_v2  ;;  %v4833_v2 = vpack.c.b16 %v4809_v37, %v4808_v63  ;;  %v6296_v63 = vld [vmem:[%s6806_s11 + $0x84] sm:$0xf]  ;;  %v6297_v37 = vld [vmem:[%s6806_s11 + $0x88] sm:$0xf]  ;;  %v3077_v29 = vsel %vm6957_vm5, %v6069_v59, %v3076_v42  ;;  %v4076_v56 = vsel %vm6950_vm4, %v4071_v4, %v7870_v17  ;;  %v6041_v4 = vld [vmem:[%s6806_s11 + $0x7c] sm:$0xf] }
 0x1d4   : > { %v3080_v22 = vsel %vm6957_vm5, %v3078_v3, %v3079_v32  ;;  %v4086_v18 = vsel %vm6950_vm4, %v4081_v6, %v4085_v48  ;;  %v3163_v14 = vunpack.c.l.b16 %v3077_v29 }
 0x1d5   : > { %v3164_v35 = vunpack.c.l.b16 %v3080_v22  ;;  %v4289_v59 = vunpack.c.l.b16 %v4086_v18 }
 0x1d6   : > { %v1693_v46 = vpop.f32.mrf.mxu2 }
 0x1d7   : > { %v1762_v53 = vadd.f32 %v1693_v46, %v1237_v34  ;;  %v2072_v54 = vpop.f32.mrf.mxu3  ;;  %v3187_v22 = vpack.c.b16 %v3164_v35, %v3163_v14 }
 0x1d8   : > { %v1171_v57 = vpop.f32.mrf.mxu1 }
 0x1d9   : > { %v2141_v40 = vadd.f32 %v2072_v54, %v1762_v53  ;;  %v1238_v31 = vadd.f32 %v1171_v57, %v8514_v5  ;;  %v4724_v53 = vsel %vm6957_vm5, %v6421_v51, %v4723_v47  ;;  %v4727_v54 = vsel %vm6957_vm5, %v4725_v55, %v4726_v7  ;;  %v8515_v7 = vld [vmem:[#allocation7_spill] sm:$0xff] }
 0x1da   : > { %v2821_v45 = vpop.f32.mrf.mxu0  ;;  %v4097_v57 = vshll.u32 %v6297_v37, 16  ;;  %v4810_v32 = vunpack.c.l.b16 %v4724_v53  ;;  %v4811_v47 = vunpack.c.l.b16 %v4727_v54  ;;  %v6040_v53 = vld [vmem:[%s6806_s11 + $0x78] sm:$0xe] }
 0x1db   : > { %3302 = vmatmul.bf16.gmra.mxu1 %v3186_v20  ;;  %3681 = vmatmul.bf16.gmra.mxu2 %v6566_v36  ;;  %v7884_v34 = vadd.f32 %v2818_v0, %v2141_v40  ;;  %v4088_v20 = vshrl.u32 %v6296_v63, 16  ;;  %v4091_v36 = vshll.u32 %v6296_v63, 16  ;;  %v4288_v40 = vunpack.c.l.b16 %v4076_v56 }
 0x1dc   : > { %4427 = vmatmul.bf16.gmra.mxu3 %v4311_v62  ;;  %v4101_v62 = vshrl.u32 %v6297_v37, 16  ;;  %v7905_v51 = vrot.slane %v4097_v57, 5  ;;  %v6393_v37 = vld [vmem:[%s6806_s11 + $0x88] sm:$0xf]  ;;  %v4834_v18 = vpack.c.b16 %v4811_v47, %v4810_v32  ;;  %v6070_v14 = vrot.slane %v6040_v53, 9 }
 0x1dd   : > { %4949 = vmatmul.bf16.gmra.mxu0 %v4833_v2  ;;  %v4090_v6 = vrot.slane %v4088_v20, 4  ;;  %v4093_v48 = vrot.slane %v4091_v36, 5  ;;  %v4312_v56 = vpack.c.b16 %v4289_v59, %v4288_v40  ;;  %v6299_v40 = vld [vmem:[%s6806_s11 + $0x90] sm:$0xf]  ;;  %v6300_v59 = vld [vmem:[%s6806_s11 + $0x94] sm:$0xf] }
 0x1de   : > { %v1696_v46 = vpop.f32.mrf.mxu2  ;;  %v4103_v55 = vrot.slane %v4101_v62, 4  ;;  %v6042_v62 = vld [vmem:[%s6806_s11 + $0x80] sm:$0x1]  ;;  %v4125_v53 = vshrl.u32 %v6300_v59, 16 }
 0x1df   : > { %v1763_v41 = vadd.f32 %v1696_v46, %v1238_v31  ;;  %v2075_v0 = vpop.f32.mrf.mxu3  ;;  %v6298_v31 = vld [vmem:[%s6806_s11 + $0x8c] sm:$0x1]  ;;  %v4094_v54 = vor.u32 %v4093_v48, %v4090_v6  ;;  %v3086_v32 = vrot.slane %v6042_v62, 5 }
 0x1e0   : > { %v1173_v42 = vpop.f32.mrf.mxu1  ;;  %v4107_v20 = vshll.u32 %v6298_v31, 16 }
 0x1e1   : > { %v2142_v2 = vadd.f32 %v2075_v0, %v1763_v41  ;;  %v1239_v5 = vadd.f32 %v1173_v42, %v8515_v7  ;;  %v3083_v41 = vrot.slane %v6041_v4, 5  ;;  %v4104_v42 = vor.u32 %v4103_v55, %v7905_v51  ;;  %v6392_v7 = vld [vmem:[%s6806_s11 + $0x84] sm:$0xe] }
 0x1e2   : > { %v2823_v17 = vpop.f32.mrf.mxu0  ;;  %v4095_v47 = vrot.slane %v4094_v54, 4  ;;  %v4109_v48 = vrot.slane %v4107_v20, 5  ;;  %v6422_v31 = vrot.slane %v6392_v7, 9 }
 0x1e3   : > { %v7902_v3 = vadd.f32 %v2821_v45, %v2142_v2  ;;  %v6567_v45 = vld [vmem:[%s6806_s11 + $0x78] sm:$0xff]  ;;  %v4730_v2 = vrot.slane %v6393_v37, 5  ;;  %v3085_v35 = vrot.slane %v3083_v41, 4  ;;  %v4105_v6 = vrot.slane %v4104_v42, 4  ;;  %v7932_v42 = vld [vmem:[%s8491_s2] ss:$0 sm:$0xff] }
 0x1e5   : > { %v4110_v62 = vsel %vm6950_vm4, %v4105_v6, %v4109_v48 }
 0x1e6   : > { %v1698_v63 = vpop.f32.mrf.mxu2  ;;  %v4291_v48 = vunpack.c.l.b16 %v4110_v62 }
 0x1e7   : > { %v1764_v46 = vadd.f32 %v1698_v63, %v1239_v5  ;;  %v2077_v29 = vpop.f32.mrf.mxu3  ;;  %v6394_v5 = vld [vmem:[%s6806_s11 + $0x8c] sm:$0x1]  ;;  %v4732_v63 = vrot.slane %v4730_v2, 4 }
 0x1e8   : > { %v3268_v0 = vpop.f32.mrf.mxu1  ;;  %v4733_v37 = vrot.slane %v6394_v5, 5  ;;  %v6044_v5 = vld [vmem:[%s6806_s11 + $0x88] sm:$0xf] }
 0x1e9   : > { %v2143_v36 = vadd.f32 %v2077_v29, %v1764_v46  ;;  %v3380_v55 = vadd.f32 %v3268_v0, %v7379_v49  ;;  %v4112_v29 = vshrl.u32 %v6299_v40, 16  ;;  %v3087_v49 = vsel %vm6957_vm5, %v3085_v35, %v3086_v32 }
 0x1ea   : > { %v4915_v57 = vpop.f32.mrf.mxu0  ;;  %v4100_v0 = vsel %vm6950_vm4, %v4095_v47, %v7905_v51  ;;  %v4734_v7 = vsel %vm6957_vm5, %v4732_v63, %v4733_v37  ;;  %v3166_v47 = vunpack.c.l.b16 %v3087_v49  ;;  %v6396_v63 = vld [vmem:[%s6806_s11 + $0x94] sm:$0xf]  ;;  %v6045_v49 = vld [vmem:[%s6806_s11 + $0x8c] sm:$0x1] }
 0x1eb   : > { %3307 = vmatmul.bf16.gmra.mxu1 %v3187_v22  ;;  %3686 = vmatmul.bf16.gmra.mxu2 %v6567_v45  ;;  %v7918_v4 = vadd.f32 %v2823_v17, %v2143_v36  ;;  %v4115_v22 = vshll.u32 %v6299_v40, 16  ;;  %v4121_v45 = vshll.u32 %v6300_v59, 16  ;;  %v4114_v51 = vrot.slane %v4112_v29, 4 }
 0x1ec   : > { %4432 = vmatmul.bf16.gmra.mxu3 %v4312_v56  ;;  %v4127_v40 = vrot.slane %v4125_v53, 4  ;;  %v4290_v6 = vunpack.c.l.b16 %v4100_v0  ;;  %v4737_v0 = vrot.slane %v6396_v63, 5 }
 0x1ed   : > { %8516 = vst [vmem:[#allocation3_spill] sm:$0xff] %v7918_v4  ;;  %4954 = vmatmul.bf16.gmra.mxu0 %v4834_v18  ;;  %v3084_v18 = vsel %vm6957_vm5, %v6070_v14, %v3083_v41  ;;  %v4731_v41 = vsel %vm6957_vm5, %v6422_v31, %v4730_v2  ;;  %v4117_v14 = vrot.slane %v4115_v22, 5  ;;  %v7941_v35 = vrot.slane %v4121_v45, 5  ;;  %v6301_v2 = vld [vmem:[%s6806_s11 + $0x98] sm:$0x1] }
 0x1ee   : > { %v3647_v46 = vpop.f32.mrf.mxu2  ;;  %v3165_v32 = vunpack.c.l.b16 %v3084_v18  ;;  %v4813_v31 = vunpack.c.l.b16 %v4734_v7  ;;  %v6043_v22 = vld [vmem:[%s6806_s11 + $0x84] sm:$0xe]  ;;  %v4313_v62 = vpack.c.b16 %v4291_v48, %v4290_v6  ;;  %v6395_v7 = vld [vmem:[%s6806_s11 + $0x90] sm:$0xe]  ;;  %v4739_v63 = vrot.slane %v4737_v0, 4 }
 0x1ef   : > { %v3759_v17 = vadd.f32 %v3647_v46, %v3380_v55  ;;  %v4393_v36 = vpop.f32.mrf.mxu3  ;;  %v4812_v55 = vunpack.c.l.b16 %v4731_v41  ;;  %v3090_v46 = vrot.slane %v6044_v5, 5  ;;  %v4118_v45 = vor.u32 %v4117_v14, %v4114_v51  ;;  %v6397_v5 = vld [vmem:[%s6806_s11 + $0x98] sm:$0x1] }
 0x1f0   : > { %v3270_v56 = vpop.f32.mrf.mxu1  ;;  %v4128_v53 = vor.u32 %v4127_v40, %v7941_v35  ;;  %v6071_v40 = vrot.slane %v6043_v22, 9  ;;  %v4740_v6 = vrot.slane %v6397_v5, 5  ;;  %v6303_v22 = vld [vmem:[%s6806_s11 + $0xa0] sm:$0xf] }
 0x1f1   : > { %v4505_v54 = vadd.f32 %v4393_v36, %v3759_v17  ;;  %v4131_v17 = vshll.u32 %v6301_v2, 16  ;;  %v4835_v41 = vpack.c.b16 %v4813_v31, %v4812_v55  ;;  %v3093_v2 = vrot.slane %v6045_v49, 5  ;;  %v6302_v31 = vld [vmem:[%s6806_s11 + $0x9c] sm:$0xf] }
 0x1f2   : > { %v4917_v20 = vpop.f32.mrf.mxu0 }
 0x1f3   : > { %v5027_v59 = vadd.f32 %v4915_v57, %v4505_v54  ;;  %v3381_v57 = vadd.f32 %v3270_v56, %v7381_v21  ;;  %v3188_v21 = vpack.c.b16 %v3166_v47, %v3165_v32  ;;  %v6568_v56 = vld [vmem:[%s6806_s11 + $0x84] sm:$0xff]  ;;  %v4133_v4 = vrot.slane %v4131_v17, 5 }
 0x1f4   : > { %v6423_v47 = vrot.slane %v6395_v7, 9 }
 0x1f5   : > { %v7952_v37 = vadd.f32 %v7932_v42, %v5027_v59  ;;  %v3092_v59 = vrot.slane %v3090_v46, 4 }
 0x1f6   : > { %v3649_v29 = vpop.f32.mrf.mxu2 }
 0x1f7   : > { %v3760_v36 = vadd.f32 %v3649_v29, %v3381_v57  ;;  %v4395_v18 = vpop.f32.mrf.mxu3  ;;  %5223 = vrot.lane.b32.xlu0 %v7952_v37, %s6738_s12  ;;  %v4119_v57 = vrot.slane %v4118_v45, 4  ;;  %v4129_v29 = vrot.slane %v4128_v53, 4  ;;  %v3091_v45 = vsel %vm6957_vm5, %v6071_v40, %v3090_v46 }
 0x1f8   : > { %v3273_v54 = vpop.f32.mrf.mxu1  ;;  %v3094_v53 = vsel %vm6957_vm5, %v3092_v59, %v3093_v2  ;;  %v4738_v46 = vsel %vm6957_vm5, %v6423_v47, %v4737_v0  ;;  %v3167_v5 = vunpack.c.l.b16 %v3091_v45 }
 0x1f9   : > { %v4506_v51 = vadd.f32 %v4395_v18, %v3760_v36  ;;  %v3382_v55 = vadd.f32 %v3273_v54, %v7419_v60  ;;  %v4124_v17 = vsel %vm6950_vm4, %v4119_v57, %v7941_v35  ;;  %v4134_v60 = vsel %vm6950_vm4, %v4129_v29, %v4133_v4  ;;  %v6047_v29 = vld [vmem:[%s6806_s11 + $0x94] sm:$0xf] }
 0x1fa   : > { %v4920_v14 = vpop.f32.mrf.mxu0  ;;  %v4136_v35 = vshrl.u32 %v6302_v31, 16  ;;  %v4139_v54 = vshll.u32 %v6302_v31, 16  ;;  %v4149_v4 = vshrl.u32 %v6303_v22, 16  ;;  %v4292_v40 = vunpack.c.l.b16 %v4124_v17  ;;  %v8519_v31 = vld [vmem:[#allocation8_spill] sm:$0xff] }
 0x1fb   : > { %v5028_v32 = vadd.f32 %v4917_v20, %v4506_v51  ;;  %3312 = vmatmul.bf16.gmra.mxu1 %v3188_v21  ;;  %3691 = vmatmul.bf16.gmra.mxu2 %v6568_v56  ;;  %v4741_v56 = vsel %vm6957_vm5, %v4739_v63, %v4740_v6  ;;  %v3168_v51 = vunpack.c.l.b16 %v3094_v53  ;;  %v4293_v2 = vunpack.c.l.b16 %v4134_v60 }
 0x1fc   : > { %4437 = vmatmul.bf16.gmra.mxu3 %v4313_v62  ;;  %v4145_v62 = vshll.u32 %v6303_v22, 16  ;;  %v4814_v0 = vunpack.c.l.b16 %v4738_v46  ;;  %v4815_v57 = vunpack.c.l.b16 %v4741_v56  ;;  %v4141_v47 = vrot.slane %v4139_v54, 5  ;;  %v6048_v54 = vld [vmem:[%s6806_s11 + $0x98] sm:$0x1] }
 0x1fd   : > { %4959 = vmatmul.bf16.gmra.mxu0 %v4835_v41  ;;  %v7971_v48 = vadd.f32 %v7932_v42, %v5028_v32  ;;  %v4138_v32 = vrot.slane %v4136_v35, 4  ;;  %v4151_v6 = vrot.slane %v4149_v4, 4  ;;  %v3189_v60 = vpack.c.b16 %v3168_v51, %v3167_v5  ;;  %v6400_v5 = vld [vmem:[%s6806_s11 + $0xa4] sm:$0x1] }
 0x1fe   : > { %v3652_v20 = vpop.f32.mrf.mxu2  ;;  %v8000_v63 = vrot.slane %v4145_v62, 5  ;;  %v3097_v46 = vrot.slane %v6047_v29, 5  ;;  %v4836_v35 = vpack.c.b16 %v4815_v57, %v4814_v0  ;;  %v6305_v29 = vld [vmem:[%s6806_s11 + $0xa8] sm:$0xf] }
 0x1ff   : > { %v6602_v36 = vpack.c.bf16 %v7971_v48, %v7952_v37  ;;  %v3761_v18 = vadd.f32 %v3652_v20, %v3382_v55  ;;  %v4398_v21 = vpop.f32.mrf.mxu3  ;;  %5225 = vrot.lane.b32.xlu0 %v7971_v48, %s6738_s12  ;;  %v6304_v20 = vld [vmem:[%s6806_s11 + $0xa4] sm:$0x1] }
 0x200   : > { %v3275_v49 = vpop.f32.mrf.mxu1  ;;  %v4152_v62 = vor.u32 %v4151_v6, %v8000_v63  ;;  %v4155_v4 = vshll.u32 %v6304_v20, 16  ;;  %v6306_v6 = vld [vmem:[%s6806_s11 + $0xac] sm:$0xf] }
 0x201   : > { %6603 = vst [vmem:[%s7979_s17] sm:$0xff] %v6602_v36   ;;  %v4507_v41 = vadd.f32 %v4398_v21, %v3761_v18  ;;  %v3383_v22 = vadd.f32 %v3275_v49, %v8519_v31  ;;  %v6569_v36 = vld [vmem:[%s6806_s11 + $0x90] sm:$0xff]  ;;  %v4314_v18 = vpack.c.b16 %v4293_v2, %v4292_v40  ;;  %v4142_v49 = vor.u32 %v4141_v47, %v4138_v32  ;;  %v6398_v31 = vld [vmem:[%s6806_s11 + $0x9c] sm:$0xe] }
 0x202   : > { %v4922_v7 = vpop.f32.mrf.mxu0  ;;  %v6046_v21 = vld [vmem:[%s6806_s11 + $0x90] sm:$0xe]  ;;  %v3099_v40 = vrot.slane %v3097_v46, 4  ;;  %v3100_v2 = vrot.slane %v6048_v54, 5  ;;  %v4153_v57 = vrot.slane %v4152_v62, 4  ;;  %v4157_v32 = vrot.slane %v4155_v4, 5 }
 0x203   : > { %v5029_v59 = vadd.f32 %v4920_v14, %v4507_v41  ;;  %v6399_v14 = vld [vmem:[%s6806_s11 + $0xa0] sm:$0xf]  ;;  %v4143_v0 = vrot.slane %v4142_v49, 4  ;;  %v6424_v47 = vrot.slane %v6398_v31, 9  ;;  %v4169_v49 = vshll.u32 %v6306_v6, 16 }
 0x204   : > { %v3101_v62 = vsel %vm6957_vm5, %v3099_v40, %v3100_v2  ;;  %v4158_v31 = vsel %vm6950_vm4, %v4153_v57, %v4157_v32 }
 0x205   : > { %v8003_v55 = vadd.f32 %v7932_v42, %v5029_v59  ;;  %v4295_v57 = vunpack.c.l.b16 %v4158_v31  ;;  %v6401_v31 = vld [vmem:[%s6806_s11 + $0xa8] sm:$0xe] }
 0x206   : > { %v3654_v45 = vpop.f32.mrf.mxu2 }
 0x207   : > { %8518 = vst [vmem:[#allocation4_spill] sm:$0xff] %v8003_v55  ;;  %v3762_v53 = vadd.f32 %v3654_v45, %v3383_v22  ;;  %v4400_v17 = vpop.f32.mrf.mxu3  ;;  %5227 = vrot.lane.b32.xlu1 %v8003_v55, %s6738_s12  ;;  %v4744_v22 = vrot.slane %v6399_v14, 5  ;;  %v6072_v45 = vrot.slane %v6046_v21, 9 }
 0x208   : > { %v3278_v56 = vpop.f32.mrf.mxu1 }
 0x209   : > { %v4508_v41 = vadd.f32 %v4400_v17, %v3762_v53  ;;  %v3384_v14 = vadd.f32 %v3278_v56, %v7468_v23  ;;  %v4746_v53 = vrot.slane %v4744_v22, 4  ;;  %v4173_v23 = vshrl.u32 %v6306_v6, 16 }
 0x20a   : > { %v4925_v59 = vpop.f32.mrf.mxu0 }
 0x20b   : > { %v5030_v51 = vadd.f32 %v4922_v7, %v4508_v41  ;;  %3317 = vmatmul.bf16.gmra.mxu1 %v3189_v60  ;;  %3696 = vmatmul.bf16.gmra.mxu2 %v6569_v36  ;;  %v4747_v7 = vrot.slane %v6400_v5, 5  ;;  %v3098_v60 = vsel %vm6957_vm5, %v6072_v45, %v3097_v46  ;;  %v4160_v36 = vshrl.u32 %v6305_v29, 16 }
 0x20c   : > { %4442 = vmatmul.bf16.gmra.mxu3 %v4314_v18  ;;  %v4163_v18 = vshll.u32 %v6305_v29, 16  ;;  %v4148_v46 = vsel %vm6950_vm4, %v4143_v0, %v8000_v63  ;;  %v4745_v45 = vsel %vm6957_vm5, %v6424_v47, %v4744_v22  ;;  %v6050_v29 = vld [vmem:[%s6806_s11 + $0xa0] sm:$0xf]  ;;  %v3170_v63 = vunpack.c.l.b16 %v3101_v62  ;;  %v6307_v0 = vld [vmem:[%s6806_s11 + $0xb0] sm:$0x1] }
 0x20d   : > { %4964 = vmatmul.bf16.gmra.mxu0 %v4836_v35  ;;  %v8019_v20 = vadd.f32 %v7932_v42, %v5030_v51  ;;  %v4748_v5 = vsel %vm6957_vm5, %v4746_v53, %v4747_v7  ;;  %v3169_v51 = vunpack.c.l.b16 %v3098_v60  ;;  %v4162_v40 = vrot.slane %v4160_v36, 4  ;;  %v6402_v47 = vld [vmem:[%s6806_s11 + $0xac] sm:$0xf]  ;;  %v6049_v36 = vld [vmem:[%s6806_s11 + $0x9c] sm:$0xe] }
 0x20e   : > { %v3657_v17 = vpop.f32.mrf.mxu2  ;;  %v4165_v2 = vrot.slane %v4163_v18, 5  ;;  %v4816_v32 = vunpack.c.l.b16 %v4745_v45  ;;  %v4817_v22 = vunpack.c.l.b16 %v4748_v5  ;;  %v3104_v60 = vrot.slane %v6050_v29, 5  ;;  %v6570_v62 = vld [vmem:[%s6806_s11 + $0x9c] sm:$0xff]  ;;  %v6403_v29 = vld [vmem:[%s6806_s11 + $0xb0] sm:$0x1] }
 0x20f   : > { %8520 = vst [vmem:[#allocation5_spill] sm:$0xff] %v8019_v20  ;;  %v6607_v21 = vpack.c.bf16 %v8019_v20, %v8003_v55  ;;  %v3763_v35 = vadd.f32 %v3657_v17, %v3384_v14  ;;  %v4403_v54 = vpop.f32.mrf.mxu3  ;;  %5229 = vrot.lane.b32.xlu1 %v8019_v20, %s6738_s12  ;;  %v8042_v14 = vrot.slane %v4169_v49, 5  ;;  %v4175_v17 = vrot.slane %v4173_v23, 4 }
 0x210   : > { %v3280_v56 = vpop.f32.mrf.mxu1  ;;  %v4166_v18 = vor.u32 %v4165_v2, %v4162_v40  ;;  %v3190_v23 = vpack.c.b16 %v3170_v63, %v3169_v51  ;;  %v4751_v45 = vrot.slane %v6402_v47, 5  ;;  %v6073_v40 = vrot.slane %v6049_v36, 9 }
 0x211   : > { %6679 = vst [vmem:[%s7979_s17 + $0x8] sm:$0xff] %v6607_v21   ;;  %v4509_v4 = vadd.f32 %v4403_v54, %v3763_v35  ;;  %v4294_v21 = vunpack.c.l.b16 %v4148_v46  ;;  %v3385_v7 = vadd.f32 %v3280_v56, %v7470_v10  ;;  %v4179_v35 = vshll.u32 %v6307_v0, 16  ;;  %v6051_v46 = vld [vmem:[%s6806_s11 + $0xa4] sm:$0x1] }
 0x212   : > { %v4927_v41 = vpop.f32.mrf.mxu0  ;;  %v4837_v56 = vpack.c.b16 %v4817_v22, %v4816_v32  ;;  %v3106_v2 = vrot.slane %v3104_v60, 4  ;;  %v3107_v0 = vrot.slane %v6051_v46, 5  ;;  %v6425_v51 = vrot.slane %v6401_v31, 9  ;;  %v6308_v32 = vld [vmem:[%s6806_s11 + $0xb4] sm:$0xf] }
 0x213   : > { %v5031_v6 = vadd.f32 %v4925_v59, %v4509_v4  ;;  %v4176_v4 = vor.u32 %v4175_v17, %v8042_v14  ;;  %v4315_v10 = vpack.c.b16 %v4295_v57, %v4294_v21  ;;  %v4753_v55 = vrot.slane %v4751_v45, 4  ;;  %v6309_v22 = vld [vmem:[%s6806_s11 + $0xb8] sm:$0xf] }
 0x214   : > { %v4754_v47 = vrot.slane %v6403_v29, 5  ;;  %v4193_v31 = vshll.u32 %v6309_v22, 16 }
 0x215   : > { %v8046_v53 = vadd.f32 %v7932_v42, %v5031_v6  ;;  %v4177_v17 = vrot.slane %v4176_v4, 4  ;;  %v4187_v4 = vshll.u32 %v6308_v32, 16 }
 0x216   : > { %v3659_v59 = vpop.f32.mrf.mxu2 }
 0x217   : > { %v3764_v54 = vadd.f32 %v3659_v59, %v3385_v7  ;;  %v4405_v49 = vpop.f32.mrf.mxu3  ;;  %5231 = vrot.lane.b32.xlu2 %v8046_v53, %s6738_s12  ;;  %v4167_v7 = vrot.slane %v4166_v18, 4  ;;  %v4181_v59 = vrot.slane %v4179_v35, 5  ;;  %v3105_v18 = vsel %vm6957_vm5, %v6073_v40, %v3104_v60 }
 0x218   : > { %v3283_v5 = vpop.f32.mrf.mxu1 }
 0x219   : > { %v4510_v6 = vadd.f32 %v4405_v49, %v3764_v54  ;;  %v3386_v57 = vadd.f32 %v3283_v5, %v7507_v16  ;;  %v4172_v35 = vsel %vm6950_vm4, %v4167_v7, %v8042_v14  ;;  %v4752_v54 = vsel %vm6957_vm5, %v6425_v51, %v4751_v45 }
 0x21a   : > { %v4930_v20 = vpop.f32.mrf.mxu0  ;;  %v4182_v60 = vsel %vm6950_vm4, %v4177_v17, %v4181_v59  ;;  %v4184_v14 = vshrl.u32 %v6308_v32, 16  ;;  %v4197_v45 = vshrl.u32 %v6309_v22, 16  ;;  %v4189_v51 = vrot.slane %v4187_v4, 5  ;;  %v6310_v22 = vld [vmem:[%s6806_s11 + $0xbc] sm:$0x1] }
 0x21b   : > { %v5032_v63 = vadd.f32 %v4927_v41, %v4510_v6  ;;  %3322 = vmatmul.bf16.gmra.mxu1 %v3190_v23  ;;  %3701 = vmatmul.bf16.gmra.mxu2 %v6570_v62  ;;  %v3108_v41 = vsel %vm6957_vm5, %v3106_v2, %v3107_v0  ;;  %v4755_v62 = vsel %vm6957_vm5, %v4753_v55, %v4754_v47  ;;  %v4296_v6 = vunpack.c.l.b16 %v4172_v35  ;;  %v6053_v55 = vld [vmem:[%s6806_s11 + $0xac] sm:$0xf] }
 0x21c   : > { %4447 = vmatmul.bf16.gmra.mxu3 %v4315_v10  ;;  %v3172_v29 = vunpack.c.l.b16 %v3108_v41  ;;  %v4297_v2 = vunpack.c.l.b16 %v4182_v60  ;;  %v4818_v0 = vunpack.c.l.b16 %v4752_v54  ;;  %v4819_v7 = vunpack.c.l.b16 %v4755_v62  ;;  %v6571_v54 = vld [vmem:[%s6806_s11 + $0xa8] sm:$0xff] }
 0x21d   : > { %4969 = vmatmul.bf16.gmra.mxu0 %v4837_v56  ;;  %v8058_v21 = vadd.f32 %v7932_v42, %v5032_v63  ;;  %v3171_v56 = vunpack.c.l.b16 %v3105_v18  ;;  %v4186_v59 = vrot.slane %v4184_v14, 4  ;;  %v8082_v63 = vrot.slane %v4193_v31, 5  ;;  %v6054_v14 = vld [vmem:[%s6806_s11 + $0xb0] sm:$0x1] }
 0x21e   : > { %v3662_v36 = vpop.f32.mrf.mxu2  ;;  %v4199_v17 = vrot.slane %v4197_v45, 4  ;;  %v4838_v62 = vpack.c.b16 %v4819_v7, %v4818_v0  ;;  %v4203_v31 = vshll.u32 %v6310_v22, 16 }
 0x21f   : > { %v6612_v16 = vpack.c.bf16 %v8058_v21, %v8046_v53  ;;  %v3765_v49 = vadd.f32 %v3662_v36, %v3386_v57  ;;  %v4408_v23 = vpop.f32.mrf.mxu3  ;;  %5233 = vrot.lane.b32.xlu2 %v8058_v21, %s6738_s12  ;;  %v8521_v57 = vld [vmem:[#allocation9_spill] sm:$0xff]  ;;  %v3191_v35 = vpack.c.b16 %v3172_v29, %v3171_v56  ;;  %v6406_v56 = vld [vmem:[%s6806_s11 + $0xbc] sm:$0x1] }
 0x220   : > { %v3285_v46 = vpop.f32.mrf.mxu1  ;;  %v4200_v4 = vor.u32 %v4199_v17, %v8082_v63  ;;  %v6312_v17 = vld [vmem:[%s6806_s11 + $0xc4] sm:$0xf] }
 0x221   : > { %6680 = vst [vmem:[%s7979_s17 + $0x10] sm:$0xff] %v6612_v16   ;;  %v4511_v5 = vadd.f32 %v4408_v23, %v3765_v49  ;;  %v3387_v32 = vadd.f32 %v3285_v46, %v8521_v57  ;;  %v4316_v16 = vpack.c.b16 %v4297_v2, %v4296_v6  ;;  %v6052_v49 = vld [vmem:[%s6806_s11 + $0xa8] sm:$0xe]  ;;  %v3111_v23 = vrot.slane %v6053_v55, 5  ;;  %v6311_v55 = vld [vmem:[%s6806_s11 + $0xc0] sm:$0xf] }
 0x222   : > { %v4932_v10 = vpop.f32.mrf.mxu0  ;;  %v4190_v46 = vor.u32 %v4189_v51, %v4186_v59  ;;  %v3114_v2 = vrot.slane %v6054_v14, 5  ;;  %v4201_v7 = vrot.slane %v4200_v4, 4  ;;  %v4205_v59 = vrot.slane %v4203_v31, 5 }
 0x223   : > { %v5033_v40 = vadd.f32 %v4930_v20, %v4511_v5  ;;  %v6405_v20 = vld [vmem:[%s6806_s11 + $0xb8] sm:$0xf]  ;;  %v3113_v6 = vrot.slane %v3111_v23, 4  ;;  %v4217_v14 = vshll.u32 %v6312_v17, 16 }
 0x224   : > { %v4758_v57 = vrot.slane %v6405_v20, 5  ;;  %v4191_v0 = vrot.slane %v4190_v46, 4 }
 0x225   : > { %v8085_v47 = vadd.f32 %v7932_v42, %v5033_v40  ;;  %v6404_v40 = vld [vmem:[%s6806_s11 + $0xb4] sm:$0xe]  ;;  %v3115_v46 = vsel %vm6957_vm5, %v3113_v6, %v3114_v2 }
 0x226   : > { %v3664_v36 = vpop.f32.mrf.mxu2  ;;  %v6426_v51 = vrot.slane %v6404_v40, 9  ;;  %v4760_v20 = vrot.slane %v4758_v57, 4 }
 0x227   : > { %v3766_v18 = vadd.f32 %v3664_v36, %v3387_v32  ;;  %v4410_v41 = vpop.f32.mrf.mxu3  ;;  %5235 = vrot.lane.b32.xlu0 %v8085_v47, %s6738_s12  ;;  %v6074_v32 = vrot.slane %v6052_v49, 9 }
 0x228   : > { %v3288_v60 = vpop.f32.mrf.mxu1  ;;  %v4759_v40 = vsel %vm6957_vm5, %v6426_v51, %v4758_v57  ;;  %v6408_v51 = vld [vmem:[%s6806_s11 + $0xc4] sm:$0xf] }
 0x229   : > { %v4512_v45 = vadd.f32 %v4410_v41, %v3766_v18  ;;  %v3388_v36 = vadd.f32 %v3288_v60, %v7557_v24  ;;  %v3112_v41 = vsel %vm6957_vm5, %v6074_v32, %v3111_v23  ;;  %v4221_v24 = vshrl.u32 %v6312_v17, 16 }
 0x22a   : > { %v4935_v5 = vpop.f32.mrf.mxu0  ;;  %v4196_v23 = vsel %vm6950_vm4, %v4191_v0, %v8082_v63  ;;  %v3174_v63 = vunpack.c.l.b16 %v3115_v46  ;;  %v6313_v0 = vld [vmem:[%s6806_s11 + $0xc8] sm:$0x1]  ;;  %v8124_v17 = vrot.slane %v4217_v14, 5  ;;  %v6057_v46 = vld [vmem:[%s6806_s11 + $0xbc] sm:$0x1] }
 0x22b   : > { %v5034_v29 = vadd.f32 %v4932_v10, %v4512_v45  ;;  %3327 = vmatmul.bf16.gmra.mxu1 %v3191_v35  ;;  %3706 = vmatmul.bf16.gmra.mxu2 %v6571_v54  ;;  %v4761_v10 = vrot.slane %v6406_v56, 5  ;;  %v4208_v35 = vshrl.u32 %v6311_v55, 16  ;;  %v4211_v54 = vshll.u32 %v6311_v55, 16 }
 0x22c   : > { %4452 = vmatmul.bf16.gmra.mxu3 %v4316_v16  ;;  %v4206_v45 = vsel %vm6950_vm4, %v4201_v7, %v4205_v59  ;;  %v3173_v56 = vunpack.c.l.b16 %v3112_v41  ;;  %v4820_v59 = vunpack.c.l.b16 %v4759_v40 }
 0x22d   : > { %4974 = vmatmul.bf16.gmra.mxu0 %v4838_v62  ;;  %v8101_v22 = vadd.f32 %v7932_v42, %v5034_v29  ;;  %v4762_v32 = vsel %vm6957_vm5, %v4760_v20, %v4761_v10  ;;  %v6056_v29 = vld [vmem:[%s6806_s11 + $0xb8] sm:$0xf]  ;;  %v4210_v6 = vrot.slane %v4208_v35, 4  ;;  %v4213_v2 = vrot.slane %v4211_v54, 5  ;;  %v6055_v35 = vld [vmem:[%s6806_s11 + $0xb4] sm:$0xe] }
 0x22e   : > { %v3667_v18 = vpop.f32.mrf.mxu2  ;;  %v4299_v7 = vunpack.c.l.b16 %v4206_v45  ;;  %v4821_v57 = vunpack.c.l.b16 %v4762_v32  ;;  %v3118_v41 = vrot.slane %v6056_v29, 5  ;;  %v3192_v14 = vpack.c.b16 %v3174_v63, %v3173_v56  ;;  %v6409_v32 = vld [vmem:[%s6806_s11 + $0xc8] sm:$0x1] }
 0x22f   : > { %8522 = vst [vmem:[#allocation6_spill] sm:$0xff] %v8101_v22  ;;  %v6617_v16 = vpack.c.bf16 %v8101_v22, %v8085_v47  ;;  %v3767_v49 = vadd.f32 %v3667_v18, %v3388_v36  ;;  %v4413_v62 = vpop.f32.mrf.mxu3  ;;  %5237 = vrot.lane.b32.xlu1 %v8101_v22, %s6738_s12  ;;  %v4223_v36 = vrot.slane %v4221_v24, 4  ;;  %v4298_v18 = vunpack.c.l.b16 %v4196_v23  ;;  %v6572_v24 = vld [vmem:[%s6806_s11 + $0xb4] sm:$0xff] }
 0x230   : > { %v3290_v60 = vpop.f32.mrf.mxu1  ;;  %v4214_v54 = vor.u32 %v4213_v2, %v4210_v6  ;;  %v4765_v45 = vrot.slane %v6408_v51, 5  ;;  %v6075_v6 = vrot.slane %v6055_v35, 9  ;;  %v3120_v2 = vrot.slane %v3118_v41, 4 }
 0x231   : > { %6681 = vst [vmem:[%s7979_s17 + $0x18] sm:$0xff] %v6617_v16   ;;  %v4513_v4 = vadd.f32 %v4413_v62, %v3767_v49  ;;  %v3389_v10 = vadd.f32 %v3290_v60, %v7559_v44  ;;  %v4227_v16 = vshll.u32 %v6313_v0, 16  ;;  %v4224_v23 = vor.u32 %v4223_v36, %v8124_v17 }
 0x232   : > { %v4937_v31 = vpop.f32.mrf.mxu0  ;;  %v4317_v44 = vpack.c.b16 %v4299_v7, %v4298_v18  ;;  %v4839_v60 = vpack.c.b16 %v4821_v57, %v4820_v59  ;;  %v3121_v0 = vrot.slane %v6057_v46, 5  ;;  %v4767_v22 = vrot.slane %v4765_v45, 4  ;;  %v6314_v59 = vld [vmem:[%s6806_s11 + $0xcc] sm:$0xf]  ;;  %v6315_v57 = vld [vmem:[%s6806_s11 + $0xd0] sm:$0xf] }
 0x233   : > { %v5035_v55 = vadd.f32 %v4935_v5, %v4513_v4  ;;  %v6407_v4 = vld [vmem:[%s6806_s11 + $0xc0] sm:$0xe]  ;;  %v4225_v36 = vrot.slane %v4224_v23, 4  ;;  %v4768_v51 = vrot.slane %v6409_v32, 5  ;;  %v4235_v23 = vshll.u32 %v6314_v59, 16 }
 0x234   : > { %v6427_v56 = vrot.slane %v6407_v4, 9  ;;  %v4241_v4 = vshll.u32 %v6315_v57, 16 }
 0x235   : > { %v8128_v20 = vadd.f32 %v7932_v42, %v5035_v55 }
 0x236   : > { %v3669_v5 = vpop.f32.mrf.mxu2 }
 0x237   : > { %v3768_v49 = vadd.f32 %v3669_v5, %v3389_v10  ;;  %v4415_v62 = vpop.f32.mrf.mxu3  ;;  %5239 = vrot.lane.b32.xlu2 %v8128_v20, %s6738_s12  ;;  %v4215_v10 = vrot.slane %v4214_v54, 4  ;;  %v4229_v5 = vrot.slane %v4227_v16, 5  ;;  %v3119_v54 = vsel %vm6957_vm5, %v6075_v6, %v3118_v41 }
 0x238   : > { %v3293_v40 = vpop.f32.mrf.mxu1 }
 0x239   : > { %v4514_v29 = vadd.f32 %v4415_v62, %v3768_v49  ;;  %v3390_v7 = vadd.f32 %v3293_v40, %v7584_v27  ;;  %v4220_v16 = vsel %vm6950_vm4, %v4215_v10, %v8124_v17  ;;  %v4766_v49 = vsel %vm6957_vm5, %v6427_v56, %v4765_v45 }
 0x23a   : > { %v4940_v55 = vpop.f32.mrf.mxu0  ;;  %v4230_v41 = vsel %vm6950_vm4, %v4225_v36, %v4229_v5  ;;  %v4232_v17 = vshrl.u32 %v6314_v59, 16  ;;  %v4245_v45 = vshrl.u32 %v6315_v57, 16  ;;  %v4237_v56 = vrot.slane %v4235_v23, 5  ;;  %v6316_v59 = vld [vmem:[%s6806_s11 + $0xd4] sm:$0x1] }
 0x23b   : > { %v5036_v63 = vadd.f32 %v4937_v31, %v4514_v29  ;;  %3332 = vmatmul.bf16.gmra.mxu1 %v3192_v14  ;;  %3711 = vmatmul.bf16.gmra.mxu2 %v6572_v24  ;;  %v3122_v31 = vsel %vm6957_vm5, %v3120_v2, %v3121_v0  ;;  %v4769_v24 = vsel %vm6957_vm5, %v4767_v22, %v4768_v51  ;;  %v4300_v29 = vunpack.c.l.b16 %v4220_v16  ;;  %v6059_v22 = vld [vmem:[%s6806_s11 + $0xc4] sm:$0xf] }
 0x23c   : > { %4457 = vmatmul.bf16.gmra.mxu3 %v4317_v44  ;;  %v3176_v32 = vunpack.c.l.b16 %v3122_v31  ;;  %v4301_v2 = vunpack.c.l.b16 %v4230_v41  ;;  %v4822_v0 = vunpack.c.l.b16 %v4766_v49  ;;  %v4823_v10 = vunpack.c.l.b16 %v4769_v24  ;;  %v6573_v16 = vld [vmem:[%s6806_s11 + $0xc0] sm:$0xff]  ;;  %v6060_v24 = vld [vmem:[%s6806_s11 + $0xc8] sm:$0x1] }
 0x23d   : > { %4979 = vmatmul.bf16.gmra.mxu0 %v4839_v60  ;;  %v8140_v18 = vadd.f32 %v7932_v42, %v5036_v63  ;;  %v3175_v60 = vunpack.c.l.b16 %v3119_v54  ;;  %v4234_v5 = vrot.slane %v4232_v17, 4  ;;  %v4243_v63 = vrot.slane %v4241_v4, 5  ;;  %v6058_v41 = vld [vmem:[%s6806_s11 + $0xc0] sm:$0xe] }
 0x23e   : > { %v3672_v35 = vpop.f32.mrf.mxu2  ;;  %v4247_v36 = vrot.slane %v4245_v45, 4  ;;  %v4318_v49 = vpack.c.b16 %v4301_v2, %v4300_v29  ;;  %v6410_v45 = vld [vmem:[%s6806_s11 + $0xcc] sm:$0xe] }
 0x23f   : > { %v6622_v27 = vpack.c.bf16 %v8140_v18, %v8128_v20  ;;  %v3769_v62 = vadd.f32 %v3672_v35, %v3390_v7  ;;  %v4418_v14 = vpop.f32.mrf.mxu3  ;;  %5241 = vrot.lane.b32.xlu0 %v8140_v18, %s6738_s12  ;;  %v6411_v35 = vld [vmem:[%s6806_s11 + $0xd0] sm:$0xf]  ;;  %v3193_v31 = vpack.c.b16 %v3176_v32, %v3175_v60  ;;  %v4238_v17 = vor.u32 %v4237_v56, %v4234_v5 }
 0x240   : > { %v3295_v46 = vpop.f32.mrf.mxu1  ;;  %v3128_v32 = vrot.slane %v6060_v24, 5 }
 0x241   : > { %6682 = vst [vmem:[%s7979_s17 + $0x20] sm:$0xff] %v6622_v27   ;;  %v4515_v40 = vadd.f32 %v4418_v14, %v3769_v62  ;;  %v3391_v7 = vadd.f32 %v3295_v46, %v7597_v50  ;;  %v3125_v27 = vrot.slane %v6059_v22, 5  ;;  %v4840_v14 = vpack.c.b16 %v4823_v10, %v4822_v0 }
 0x242   : > { %v4942_v44 = vpop.f32.mrf.mxu0  ;;  %v4248_v50 = vor.u32 %v4247_v36, %v4243_v63  ;;  %v4251_v46 = vshll.u32 %v6316_v59, 16  ;;  %v4239_v29 = vrot.slane %v4238_v17, 4  ;;  %v6428_v10 = vrot.slane %v6410_v45, 9 }
 0x243   : > { %v5037_v6 = vadd.f32 %v4940_v55, %v4515_v40  ;;  %v4772_v40 = vrot.slane %v6411_v35, 5  ;;  %v3127_v60 = vrot.slane %v3125_v27, 4 }
 0x244   : > { %v4249_v2 = vrot.slane %v4248_v50, 4  ;;  %v4253_v0 = vrot.slane %v4251_v46, 5 }
 0x245   : > { %v8165_v51 = vadd.f32 %v7932_v42, %v5037_v6  ;;  %v6412_v6 = vld [vmem:[%s6806_s11 + $0xd4] sm:$0x1]  ;;  %v4774_v56 = vrot.slane %v4772_v40, 4 }
 0x246   : > { %v3674_v57 = vpop.f32.mrf.mxu2  ;;  %v4775_v36 = vrot.slane %v6412_v6, 5 }
 0x247   : > { %v3770_v55 = vadd.f32 %v3674_v57, %v3391_v7  ;;  %v4420_v54 = vpop.f32.mrf.mxu3  ;;  %5243 = vrot.lane.b32.xlu1 %v8165_v51, %s6738_s12  ;;  %v6076_v57 = vrot.slane %v6058_v41, 9  ;;  %v4773_v41 = vsel %vm6957_vm5, %v6428_v10, %v4772_v40  ;;  %v6574_v40 = vld [vmem:[%s6806_s11 + $0xcc] sm:$0xff] }
 0x248   : > { %v3298_v62 = vpop.f32.mrf.mxu1  ;;  %v4776_v24 = vsel %vm6957_vm5, %v4774_v56, %v4775_v36  ;;  %v4824_v45 = vunpack.c.l.b16 %v4773_v41 }
 0x249   : > { %v4516_v23 = vadd.f32 %v4420_v54, %v3770_v55  ;;  %v3392_v5 = vadd.f32 %v3298_v62, %v7618_v58  ;;  %v4244_v58 = vsel %vm6950_vm4, %v4239_v29, %v4243_v63  ;;  %v4825_v63 = vunpack.c.l.b16 %v4776_v24 }
 0x24a   : > { %v4945_v4 = vpop.f32.mrf.mxu0  ;;  %v4302_v46 = vunpack.c.l.b16 %v4244_v58 }
 0x24b   : > { %v5038_v7 = vadd.f32 %v4942_v44, %v4516_v23  ;;  %3337 = vmatmul.bf16.gmra.mxu1 %v3193_v31  ;;  %3716 = vmatmul.bf16.gmra.mxu2 %v6573_v16  ;;  %v3126_v31 = vsel %vm6957_vm5, %v6076_v57, %v3125_v27  ;;  %v3129_v16 = vsel %vm6957_vm5, %v3127_v60, %v3128_v32 }
 0x24c   : > { %4462 = vmatmul.bf16.gmra.mxu3 %v4318_v49  ;;  %v3177_v17 = vunpack.c.l.b16 %v3126_v31  ;;  %v3178_v50 = vunpack.c.l.b16 %v3129_v16  ;;  %v4841_v29 = vpack.c.b16 %v4825_v63, %v4824_v45 }
 0x24d   : > { %4984 = vmatmul.bf16.gmra.mxu0 %v4840_v14  ;;  %v8178_v22 = vadd.f32 %v7932_v42, %v5038_v7  ;;  %v4254_v14 = vsel %vm6950_vm4, %v4249_v2, %v4253_v0 }
 0x24e   : > { %v3677_v44 = vpop.f32.mrf.mxu2  ;;  %v4303_v23 = vunpack.c.l.b16 %v4254_v14  ;;  %v3194_v38 = vpack.c.b16 %v3178_v50, %v3177_v17 }
 0x24f   : > { %v6627_v59 = vpack.c.bf16 %v8178_v22, %v8165_v51  ;;  %v3771_v35 = vadd.f32 %v3677_v44, %v3392_v5  ;;  %v4423_v55 = vpop.f32.mrf.mxu3  ;;  %5245 = vrot.lane.b32.xlu2 %v8178_v22, %s6738_s12 }
 0x250   : > { %v3300_v54 = vpop.f32.mrf.mxu1  ;;  %v4319_v32 = vpack.c.b16 %v4303_v23, %v4302_v46 }
 0x251   : > { %6683 = vst [vmem:[%s7979_s17 + $0x28] sm:$0xff] %v6627_v59   ;;  %v4517_v49 = vadd.f32 %v4423_v55, %v3771_v35  ;;  %v3393_v33 = vadd.f32 %v3300_v54, %v7628_v25 }
 0x252   : > { %v4947_v62 = vpop.f32.mrf.mxu0 }
 0x253   : > { %v5039_v27 = vadd.f32 %v4945_v4, %v4517_v49 }
 0x255   : > { %v8199_v6 = vadd.f32 %v7932_v42, %v5039_v27 }
 0x256   : > { %v3679_v7 = vpop.f32.mrf.mxu2 }
 0x257   : > { %v3772_v57 = vadd.f32 %v3679_v7, %v3393_v33  ;;  %v4425_v60 = vpop.f32.mrf.mxu3  ;;  %5247 = vrot.lane.b32.xlu0 %v8199_v6, %s6738_s12 }
 0x258   : > { %v3303_v4 = vpop.f32.mrf.mxu1 }
 0x259   : > { %v4518_v2 = vadd.f32 %v4425_v60, %v3772_v57  ;;  %v3394_v5 = vadd.f32 %v3303_v4, %v7646_v15 }
 0x25a   : > { %v4950_v0 = vpop.f32.mrf.mxu0 }
 0x25b   : > { %v5040_v10 = vadd.f32 %v4947_v62, %v4518_v2  ;;  %3342 = vmatmul.bf16.gmra.mxu1 %v3194_v38  ;;  %3721 = vmatmul.bf16.gmra.mxu2 %v6574_v40 }
 0x25c   : > { %4467 = vmatmul.bf16.gmra.mxu3 %v4319_v32 }
 0x25d   : > { %4989 = vmatmul.bf16.gmra.mxu0 %v4841_v29  ;;  %v8206_v25 = vadd.f32 %v7932_v42, %v5040_v10 }
 0x25e   : > { %v3682_v56 = vpop.f32.mrf.mxu2 }
 0x25f   : > { %v6632_v36 = vpack.c.bf16 %v8206_v25, %v8199_v6  ;;  %v3773_v44 = vadd.f32 %v3682_v56, %v3394_v5  ;;  %v4428_v59 = vpop.f32.mrf.mxu3  ;;  %5249 = vrot.lane.b32.xlu1 %v8206_v25, %s6738_s12 }
 0x260   : > { %v3305_v35 = vpop.f32.mrf.mxu1 }
 0x261   : > { %6684 = vst [vmem:[%s7979_s17 + $0x30] sm:$0xff] %v6632_v36   ;;  %v4519_v55 = vadd.f32 %v4428_v59, %v3773_v44  ;;  %v3395_v58 = vadd.f32 %v3305_v35, %v7662_v52 }
 0x262   : > { %v4952_v54 = vpop.f32.mrf.mxu0 }
 0x263   : > { %v5041_v31 = vadd.f32 %v4950_v0, %v4519_v55 }
 0x265   : > { %v8215_v16 = vadd.f32 %v7932_v42, %v5041_v31 }
 0x266   : > { %v3684_v15 = vpop.f32.mrf.mxu2 }
 0x267   : > { %v3774_v49 = vadd.f32 %v3684_v15, %v3395_v58  ;;  %v4430_v62 = vpop.f32.mrf.mxu3  ;;  %5251 = vrot.lane.b32.xlu2 %v8215_v16, %s6738_s12 }
 0x268   : > { %v3308_v14 = vpop.f32.mrf.mxu1 }
 0x269   : > { %v4520_v41 = vadd.f32 %v4430_v62, %v3774_v49  ;;  %v3396_v50 = vadd.f32 %v3308_v14, %v7682_v11 }
 0x26a   : > { %v4955_v24 = vpop.f32.mrf.mxu0 }
 0x26b   : > { %v5042_v27 = vadd.f32 %v4952_v54, %v4520_v41 }
 0x26d   : > { %v8221_v17 = vadd.f32 %v7932_v42, %v5042_v27 }
 0x26e   : > { %v3687_v46 = vpop.f32.mrf.mxu2 }
 0x26f   : > { %v6637_v52 = vpack.c.bf16 %v8221_v17, %v8215_v16  ;;  %v3775_v23 = vadd.f32 %v3687_v46, %v3396_v50  ;;  %v4433_v45 = vpop.f32.mrf.mxu3  ;;  %5253 = vrot.lane.b32.xlu0 %v8221_v17, %s6738_s12 }
 0x270   : > { %v3310_v63 = vpop.f32.mrf.mxu1 }
 0x271   : > { %6685 = vst [vmem:[%s7979_s17 + $0x38] sm:$0xff] %v6637_v52   ;;  %v4521_v33 = vadd.f32 %v4433_v45, %v3775_v23  ;;  %v3397_v38 = vadd.f32 %v3310_v63, %v7692_v12 }
 0x272   : > { %v4957_v7 = vpop.f32.mrf.mxu0 }
 0x273   : > { %v5043_v57 = vadd.f32 %v4955_v24, %v4521_v33 }
 0x275   : > { %v8230_v60 = vadd.f32 %v7932_v42, %v5043_v57 }
 0x276   : > { %v3689_v11 = vpop.f32.mrf.mxu2 }
 0x277   : > { %v3776_v40 = vadd.f32 %v3689_v11, %v3397_v38  ;;  %v4435_v4 = vpop.f32.mrf.mxu3  ;;  %5255 = vrot.lane.b32.xlu1 %v8230_v60, %s6738_s12 }
 0x278   : > { %v3313_v32 = vpop.f32.mrf.mxu1 }
 0x279   : > { %v4522_v29 = vadd.f32 %v4435_v4, %v3776_v40  ;;  %v3398_v5 = vadd.f32 %v3313_v32, %v7710_v28 }
 0x27a   : > { %v4960_v2 = vpop.f32.mrf.mxu0 }
 0x27b   : > { %v5044_v0 = vadd.f32 %v4957_v7, %v4522_v29 }
 0x27d   : > { %v8236_v10 = vadd.f32 %v7932_v42, %v5044_v0  ;;  %v8247_v42 = vld [vmem:[%s8491_s2] ss:$0 sm:$0xff] }
 0x27e   : > { %v3692_v56 = vpop.f32.mrf.mxu2 }
 0x27f   : > { %v6642_v12 = vpack.c.bf16 %v8236_v10, %v8230_v60  ;;  %v3777_v36 = vadd.f32 %v3692_v56, %v3398_v5  ;;  %v4438_v44 = vpop.f32.mrf.mxu3  ;;  %5257 = vrot.lane.b32.xlu2 %v8236_v10, %s6738_s12 }
 0x280   : > { %v3315_v59 = vpop.f32.mrf.mxu1 }
 0x281   : > { %6686 = vst [vmem:[%s7979_s17 + $0x40] sm:$0xff] %v6642_v12   ;;  %v4523_v35 = vadd.f32 %v4438_v44, %v3777_v36  ;;  %v3399_v31 = vadd.f32 %v3315_v59, %v7726_v13 }
 0x282   : > { %v4962_v55 = vpop.f32.mrf.mxu0 }
 0x283   : > { %v5045_v54 = vadd.f32 %v4960_v2, %v4523_v35 }
 0x285   : > { %v8250_v28 = vadd.f32 %v8247_v42, %v5045_v54 }
 0x286   : > { %v3694_v58 = vpop.f32.mrf.mxu2 }
 0x287   : > { %v3778_v15 = vadd.f32 %v3694_v58, %v3399_v31  ;;  %v4440_v49 = vpop.f32.mrf.mxu3  ;;  %5259 = vrot.lane.b32.xlu0 %v8250_v28, %s6738_s12 }
 0x288   : > { %v3318_v62 = vpop.f32.mrf.mxu1 }
 0x289   : > { %v4524_v14 = vadd.f32 %v4440_v49, %v3778_v15  ;;  %v3400_v50 = vadd.f32 %v3318_v62, %v7746_v8 }
 0x28a   : > { %v4965_v41 = vpop.f32.mrf.mxu0 }
 0x28b   : > { %v5046_v24 = vadd.f32 %v4962_v55, %v4524_v14 }
 0x28d   : > { %v8256_v27 = vadd.f32 %v8247_v42, %v5046_v24 }
 0x28e   : > { %v3697_v46 = vpop.f32.mrf.mxu2 }
 0x28f   : > { %v6647_v13 = vpack.c.bf16 %v8256_v27, %v8250_v28  ;;  %v3779_v52 = vadd.f32 %v3697_v46, %v3400_v50  ;;  %v4443_v23 = vpop.f32.mrf.mxu3  ;;  %5261 = vrot.lane.b32.xlu1 %v8256_v27, %s6738_s12 }
 0x290   : > { %v3320_v45 = vpop.f32.mrf.mxu1 }
 0x291   : > { %6687 = vst [vmem:[%s7979_s17 + $0x48] sm:$0xff] %v6647_v13   ;;  %v4525_v63 = vadd.f32 %v4443_v23, %v3779_v52  ;;  %v3401_v38 = vadd.f32 %v3320_v45, %v7756_v61 }
 0x292   : > { %v4967_v33 = vpop.f32.mrf.mxu0 }
 0x293   : > { %v5047_v7 = vadd.f32 %v4965_v41, %v4525_v63 }
 0x295   : > { %v8265_v57 = vadd.f32 %v8247_v42, %v5047_v7 }
 0x296   : > { %v3699_v8 = vpop.f32.mrf.mxu2 }
 0x297   : > { %v3780_v11 = vadd.f32 %v3699_v8, %v3401_v38  ;;  %v4445_v40 = vpop.f32.mrf.mxu3  ;;  %5263 = vrot.lane.b32.xlu2 %v8265_v57, %s6738_s12 }
 0x298   : > { %v3323_v4 = vpop.f32.mrf.mxu1 }
 0x299   : > { %v4526_v32 = vadd.f32 %v4445_v40, %v3780_v11  ;;  %v3402_v5 = vadd.f32 %v3323_v4, %v7774_v30 }
 0x29a   : > { %v4970_v29 = vpop.f32.mrf.mxu0 }
 0x29b   : > { %v5048_v2 = vadd.f32 %v4967_v33, %v4526_v32 }
 0x29d   : > { %v8271_v0 = vadd.f32 %v8247_v42, %v5048_v2 }
 0x29e   : > { %v3702_v56 = vpop.f32.mrf.mxu2 }
 0x29f   : > { %v6652_v61 = vpack.c.bf16 %v8271_v0, %v8265_v57  ;;  %v3781_v12 = vadd.f32 %v3702_v56, %v3402_v5  ;;  %v4448_v36 = vpop.f32.mrf.mxu3  ;;  %5265 = vrot.lane.b32.xlu0 %v8271_v0, %s6738_s12 }
 0x2a0   : > { %v3325_v44 = vpop.f32.mrf.mxu1 }
 0x2a1   : > { %6688 = vst [vmem:[%s7979_s17 + $0x50] sm:$0xff] %v6652_v61   ;;  %v4527_v59 = vadd.f32 %v4448_v36, %v3781_v12  ;;  %v3403_v31 = vadd.f32 %v3325_v44, %v7790_v9 }
 0x2a2   : > { %v4972_v35 = vpop.f32.mrf.mxu0 }
 0x2a3   : > { %v5049_v55 = vadd.f32 %v4970_v29, %v4527_v59 }
 0x2a5   : > { %v8280_v54 = vadd.f32 %v8247_v42, %v5049_v55 }
 0x2a6   : > { %v3704_v30 = vpop.f32.mrf.mxu2 }
 0x2a7   : > { %v3782_v58 = vadd.f32 %v3704_v30, %v3403_v31  ;;  %v4450_v15 = vpop.f32.mrf.mxu3  ;;  %5267 = vrot.lane.b32.xlu1 %v8280_v54, %s6738_s12 }
 0x2a8   : > { %v3328_v49 = vpop.f32.mrf.mxu1 }
 0x2a9   : > { %v4528_v62 = vadd.f32 %v4450_v15, %v3782_v58  ;;  %v3404_v50 = vadd.f32 %v3328_v49, %v7810_v43 }
 0x2aa   : > { %v4975_v14 = vpop.f32.mrf.mxu0 }
 0x2ab   : > { %v5050_v41 = vadd.f32 %v4972_v35, %v4528_v62 }
 0x2ad   : > { %v8286_v24 = vadd.f32 %v8247_v42, %v5050_v41 }
 0x2ae   : > { %v3707_v46 = vpop.f32.mrf.mxu2 }
 0x2af   : > { %v6657_v9 = vpack.c.bf16 %v8286_v24, %v8280_v54  ;;  %v3783_v13 = vadd.f32 %v3707_v46, %v3404_v50  ;;  %v4453_v52 = vpop.f32.mrf.mxu3  ;;  %5269 = vrot.lane.b32.xlu2 %v8286_v24, %s6738_s12 }
 0x2b0   : > { %v3330_v23 = vpop.f32.mrf.mxu1 }
 0x2b1   : > { %6689 = vst [vmem:[%s7979_s17 + $0x58] sm:$0xff] %v6657_v9   ;;  %v4529_v45 = vadd.f32 %v4453_v52, %v3783_v13  ;;  %v3405_v38 = vadd.f32 %v3330_v23, %v7820_v26 }
 0x2b2   : > { %v4977_v63 = vpop.f32.mrf.mxu0 }
 0x2b3   : > { %v5051_v33 = vadd.f32 %v4975_v14, %v4529_v45 }
 0x2b5   : > { %v8295_v7 = vadd.f32 %v8247_v42, %v5051_v33 }
 0x2b6   : > { %v3709_v43 = vpop.f32.mrf.mxu2 }
 0x2b7   : > { %v3784_v8 = vadd.f32 %v3709_v43, %v3405_v38  ;;  %v4455_v11 = vpop.f32.mrf.mxu3  ;;  %5271 = vrot.lane.b32.xlu0 %v8295_v7, %s6738_s12 }
 0x2b8   : > { %v3333_v40 = vpop.f32.mrf.mxu1 }
 0x2b9   : > { %v4530_v4 = vadd.f32 %v4455_v11, %v3784_v8  ;;  %v3406_v5 = vadd.f32 %v3333_v40, %v7838_v1 }
 0x2ba   : > { %v4980_v32 = vpop.f32.mrf.mxu0 }
 0x2bb   : > { %v5052_v29 = vadd.f32 %v4977_v63, %v4530_v4 }
 0x2bd   : > { %v8301_v2 = vadd.f32 %v8247_v42, %v5052_v29 }
 0x2be   : > { %v3712_v56 = vpop.f32.mrf.mxu2 }
 0x2bf   : > { %v6662_v26 = vpack.c.bf16 %v8301_v2, %v8295_v7  ;;  %v3785_v61 = vadd.f32 %v3712_v56, %v3406_v5  ;;  %v4458_v12 = vpop.f32.mrf.mxu3  ;;  %5273 = vrot.lane.b32.xlu1 %v8301_v2, %s6738_s12 }
 0x2c0   : > { %v3335_v36 = vpop.f32.mrf.mxu1 }
 0x2c1   : > { %6690 = vst [vmem:[%s7979_s17 + $0x60] sm:$0xff] %v6662_v26   ;;  %v4531_v44 = vadd.f32 %v4458_v12, %v3785_v61  ;;  %v3407_v31 = vadd.f32 %v3335_v36, %v7854_v39 }
 0x2c2   : > { %v4982_v59 = vpop.f32.mrf.mxu0 }
 0x2c3   : > { %v5053_v35 = vadd.f32 %v4980_v32, %v4531_v44 }
 0x2c5   : > { %v8310_v55 = vadd.f32 %v8247_v42, %v5053_v35  ;;  %v8523_v35 = vld [vmem:[#allocation3_spill] sm:$0xff] }
 0x2c6   : > { %v3714_v1 = vpop.f32.mrf.mxu2 }
 0x2c7   : > { %v3786_v30 = vadd.f32 %v3714_v1, %v3407_v31  ;;  %v4460_v58 = vpop.f32.mrf.mxu3  ;;  %5275 = vrot.lane.b32.xlu2 %v8310_v55, %s6738_s12 }
 0x2c8   : > { %v3338_v15 = vpop.f32.mrf.mxu1 }
 0x2c9   : > { %v4532_v49 = vadd.f32 %v4460_v58, %v3786_v30  ;;  %v3408_v50 = vadd.f32 %v3338_v15, %v7874_v19 }
 0x2ca   : > { %v4985_v14 = vpop.f32.mrf.mxu0 }
 0x2cb   : > { %v5054_v62 = vadd.f32 %v4982_v59, %v4532_v49 }
 0x2cd   : > { %v8316_v41 = vadd.f32 %v8247_v42, %v5054_v62 }
 0x2ce   : > { %v3717_v46 = vpop.f32.mrf.mxu2 }
 0x2cf   : > { %v6667_v39 = vpack.c.bf16 %v8316_v41, %v8310_v55  ;;  %v3787_v9 = vadd.f32 %v3717_v46, %v3408_v50  ;;  %v4463_v13 = vpop.f32.mrf.mxu3  ;;  %5277 = vrot.lane.b32.xlu0 %v8316_v41, %s6738_s12  ;;  %v5224_v50 = vpop.permute.xlu0 %5223 }
 0x2d0   : > { %v3340_v52 = vpop.f32.mrf.mxu1  ;;  %v5228_v46 = vpop.permute.xlu1 %5227 }
 0x2d1   : > { %6691 = vst [vmem:[%s7979_s17 + $0x68] sm:$0xff] %v6667_v39   ;;  %v4533_v23 = vadd.f32 %v4463_v13, %v3787_v9  ;;  %v3409_v33 = vadd.f32 %v3340_v52, %v7884_v34  ;;  %v5232_v13 = vpop.permute.xlu2 %5231 }
 0x2d2   : > { %v4987_v38 = vpop.f32.mrf.mxu0 }
 0x2d3   : > { %v5055_v45 = vadd.f32 %v4985_v14, %v4533_v23  ;;  %v5393_v23 = vmul.f32 %v5224_v50, %v7952_v37 }
 0x2d5   : > { %v8325_v63 = vadd.f32 %v8247_v42, %v5055_v45  ;;  %v8524_v45 = vld [vmem:[#allocation4_spill] sm:$0xff] }
 0x2d6   : > { %v3719_v19 = vpop.f32.mrf.mxu2 }
 0x2d7   : > { %v3788_v43 = vadd.f32 %v3719_v19, %v3409_v33  ;;  %v4465_v8 = vpop.f32.mrf.mxu3  ;;  %5279 = vrot.lane.b32.xlu1 %v8325_v63, %s6738_s12  ;;  %v5226_v39 = vpop.permute.xlu0 %5225  ;;  %v5395_v33 = vmul.f32 %v5228_v46, %v8524_v45 }
 0x2d8   : > { %v3343_v11 = vpop.f32.mrf.mxu1  ;;  %v5394_v9 = vmul.f32 %v5226_v39, %v7971_v48  ;;  %v5230_v52 = vpop.permute.xlu1 %5229 }
 0x2d9   : > { %v4534_v40 = vadd.f32 %v4465_v8, %v3788_v43  ;;  %v3410_v29 = vadd.f32 %v3343_v11, %v7902_v3  ;;  %v5325_v43 = vmul.f32 %v7971_v48, %v7971_v48  ;;  %v5324_v11 = vmul.f32 %v7952_v37, %v7952_v37 }
 0x2da   : > { %v4990_v61 = vpop.f32.mrf.mxu0 }
 0x2db   : > { %v5056_v4 = vadd.f32 %v4987_v38, %v4534_v40  ;;  %v8525_v38 = vld [vmem:[#allocation5_spill] sm:$0xff]  ;;  %v5326_v40 = vmul.f32 %v8524_v45, %v8524_v45 }
 0x2dc   : > { %v5396_v19 = vmul.f32 %v5230_v52, %v8525_v38 }
 0x2dd   : > { %v8331_v32 = vadd.f32 %v8247_v42, %v5056_v4 }
 0x2de   : > { %v3722_v5 = vpop.f32.mrf.mxu2 }
 0x2df   : > { %v6672_v34 = vpack.c.bf16 %v8331_v32, %v8325_v63  ;;  %v3789_v56 = vadd.f32 %v3722_v5, %v3410_v29  ;;  %v4468_v26 = vpop.f32.mrf.mxu3  ;;  %5281 = vrot.lane.b32.xlu2 %v8331_v32, %s6738_s12  ;;  %v5356_v29 = vadd.f32 %v5325_v43, %v5324_v11  ;;  %v5327_v5 = vmul.f32 %v8525_v38, %v8525_v38 }
 0x2e0   : > { %v3345_v36 = vpop.f32.mrf.mxu1 }
 0x2e1   : > { %6692 = vst [vmem:[%s7979_s17 + $0x70] sm:$0xff] %v6672_v34   ;;  %v4535_v12 = vadd.f32 %v4468_v26, %v3789_v56  ;;  %v3411_v3 = vadd.f32 %v3345_v36, %v8523_v35  ;;  %v5397_v34 = vmul.f32 %v5232_v13, %v8046_v53  ;;  %v5287_v56 = vadd.f32 %v7971_v48, %v7952_v37  ;;  %v5236_v36 = vpop.permute.xlu0 %5235 }
 0x2e2   : > { %v4992_v15 = vpop.f32.mrf.mxu0  ;;  %v5357_v26 = vadd.f32 %v5356_v29, %v5326_v40  ;;  %v5334_v29 = vmul.f32 %v8165_v51, %v8165_v51 }
 0x2e3   : > { %v5057_v44 = vadd.f32 %v4990_v61, %v4535_v12  ;;  %v5328_v61 = vmul.f32 %v8046_v53, %v8046_v53  ;;  %v5234_v12 = vpop.permute.xlu2 %5233  ;;  %v5288_v35 = vadd.f32 %v5287_v56, %v8524_v45  ;;  %v5332_v45 = vmul.f32 %v8128_v20, %v8128_v20 }
 0x2e5   : > { %v8340_v59 = vadd.f32 %v8247_v42, %v5057_v44  ;;  %v5289_v37 = vadd.f32 %v5288_v35, %v8525_v38 }
 0x2e6   : > { %v3724_v31 = vpop.f32.mrf.mxu2 }
 0x2e7   : > { %v3790_v1 = vadd.f32 %v3724_v31, %v3411_v3  ;;  %5283 = vrot.lane.b32.xlu0 %v8340_v59, %s6738_s12  ;;  %v4470_v30 = vpop.f32.mrf.mxu3  ;;  %v5358_v3 = vadd.f32 %v5357_v26, %v5327_v5  ;;  %v5329_v31 = vmul.f32 %v8058_v21, %v8058_v21  ;;  %v5290_v46 = vadd.f32 %v5289_v37, %v8046_v53 }
 0x2e8   : > { %v5333_v53 = vmul.f32 %v8140_v18, %v8140_v18  ;;  %v5335_v26 = vmul.f32 %v8178_v22, %v8178_v22 }
 0x2e9   : > { %v4536_v58 = vadd.f32 %v4470_v30, %v3790_v1  ;;  %v5238_v1 = vpop.permute.xlu1 %5237  ;;  %v5398_v30 = vmul.f32 %v5234_v12, %v8058_v21  ;;  %v5359_v48 = vadd.f32 %v5358_v3, %v5328_v61  ;;  %v5291_v52 = vadd.f32 %v5290_v46, %v8058_v21 }
 0x2eb   : > { %v5058_v49 = vadd.f32 %v4992_v15, %v4536_v58  ;;  %v5399_v58 = vmul.f32 %v5236_v36, %v8085_v47  ;;  %v5330_v15 = vmul.f32 %v8085_v47, %v8085_v47  ;;  %v5360_v39 = vadd.f32 %v5359_v48, %v5329_v31 }
 0x2ed   : > { %v8346_v62 = vadd.f32 %v8247_v42, %v5058_v49  ;;  %v5425_v42 = vadd.f32 %v5394_v9, %v5393_v23  ;;  %v5361_v23 = vadd.f32 %v5360_v39, %v5330_v15  ;;  %v5339_v39 = vmul.f32 %v8221_v17, %v8221_v17 }
 0x2ef   : > { %v6677_v14 = vpack.c.bf16 %v8346_v62, %v8340_v59  ;;  %5285 = vrot.lane.b32.xlu1 %v8346_v62, %s6738_s12  ;;  %v5426_v8 = vadd.f32 %v5425_v42, %v5395_v33  ;;  %v5240_v33 = vpop.permute.xlu2 %5239  ;;  %v5242_v42 = vpop.permute.xlu0 %5241 }
 0x2f0   : > { %v5401_v11 = vmul.f32 %v5240_v33, %v8128_v20  ;;  %v5402_v40 = vmul.f32 %v5242_v42, %v8140_v18 }
 0x2f1   : > { %6693 = vst [vmem:[%s7979_s17 + $0x78] sm:$0xff] %v6677_v14   ;;  %v5427_v4 = vadd.f32 %v5426_v8, %v5396_v19  ;;  %v8526_v14 = vld [vmem:[#allocation6_spill] sm:$0xff]  ;;  %v5292_v19 = vadd.f32 %v5291_v52, %v8085_v47  ;;  %v5244_v8 = vpop.permute.xlu1 %5243 }
 0x2f2   : > { %v5400_v50 = vmul.f32 %v5238_v1, %v8526_v14  ;;  %v5331_v9 = vmul.f32 %v8526_v14, %v8526_v14 }
 0x2f3   : > { %v5428_v44 = vadd.f32 %v5427_v4, %v5397_v34  ;;  %v5293_v21 = vadd.f32 %v5292_v19, %v8526_v14  ;;  %v5403_v34 = vmul.f32 %v5244_v8, %v8165_v51 }
 0x2f4   : > { %v5362_v43 = vadd.f32 %v5361_v23, %v5331_v9 }
 0x2f5   : > { %v5429_v49 = vadd.f32 %v5428_v44, %v5398_v30  ;;  %v5294_v47 = vadd.f32 %v5293_v21, %v8128_v20  ;;  %v5336_v44 = vmul.f32 %v8199_v6, %v8199_v6  ;;  %v5337_v20 = vmul.f32 %v8206_v25, %v8206_v25 }
 0x2f6   : > { %v5363_v4 = vadd.f32 %v5362_v43, %v5332_v45 }
 0x2f7   : > { %v5430_v13 = vadd.f32 %v5429_v49, %v5399_v58  ;;  %v5295_v12 = vadd.f32 %v5294_v47, %v8140_v18  ;;  %v5246_v35 = vpop.permute.xlu2 %5245  ;;  %v5248_v3 = vpop.permute.xlu0 %5247  ;;  %v5338_v49 = vmul.f32 %v8215_v16, %v8215_v16 }
 0x2f8   : > { %v5364_v56 = vadd.f32 %v5363_v4, %v5333_v53  ;;  %v5404_v37 = vmul.f32 %v5246_v35, %v8178_v22  ;;  %v5405_v48 = vmul.f32 %v5248_v3, %v8199_v6 }
 0x2f9   : > { %v5431_v38 = vadd.f32 %v5430_v13, %v5400_v50  ;;  %v5296_v1 = vadd.f32 %v5295_v12, %v8165_v51  ;;  %v5250_v58 = vpop.permute.xlu1 %5249 }
 0x2fa   : > { %v5365_v36 = vadd.f32 %v5364_v56, %v5334_v29  ;;  %v5406_v50 = vmul.f32 %v5250_v58, %v8206_v25 }
 0x2fb   : > { %v5432_v5 = vadd.f32 %v5431_v38, %v5401_v11  ;;  %v5297_v18 = vadd.f32 %v5296_v1, %v8178_v22  ;;  %v5340_v22 = vmul.f32 %v8230_v60, %v8230_v60  ;;  %v5342_v11 = vmul.f32 %v8250_v28, %v8250_v28 }
 0x2fc   : > { %v5366_v30 = vadd.f32 %v5365_v36, %v5335_v26 }
 0x2fd   : > { %v5433_v61 = vadd.f32 %v5432_v5, %v5402_v40  ;;  %v5298_v51 = vadd.f32 %v5297_v18, %v8199_v6  ;;  %v5341_v6 = vmul.f32 %v8236_v10, %v8236_v10  ;;  %v5343_v5 = vmul.f32 %v8256_v27, %v8256_v27 }
 0x2fe   : > { %v5367_v15 = vadd.f32 %v5366_v30, %v5336_v44  ;;  %v5346_v30 = vmul.f32 %v8280_v54, %v8280_v54  ;;  %v5347_v18 = vmul.f32 %v8286_v24, %v8286_v24 }
 0x2ff   : > { %v5434_v31 = vadd.f32 %v5433_v61, %v5403_v34  ;;  %v5299_v13 = vadd.f32 %v5298_v51, %v8206_v25  ;;  %v5252_v23 = vpop.permute.xlu2 %5251  ;;  %v5254_v45 = vpop.permute.xlu0 %5253 }
 0x300   : > { %v5368_v46 = vadd.f32 %v5367_v15, %v5337_v20  ;;  %v5407_v43 = vmul.f32 %v5252_v23, %v8215_v16  ;;  %v5408_v53 = vmul.f32 %v5254_v45, %v8221_v17  ;;  %v5350_v45 = vmul.f32 %v8310_v55, %v8310_v55 }
 0x301   : > { %v5435_v14 = vadd.f32 %v5434_v31, %v5404_v37  ;;  %v5300_v42 = vadd.f32 %v5299_v13, %v8215_v16  ;;  %v5256_v19 = vpop.permute.xlu1 %5255 }
 0x302   : > { %v5369_v52 = vadd.f32 %v5368_v46, %v5338_v49  ;;  %v5409_v21 = vmul.f32 %v5256_v19, %v8230_v60  ;;  %v5351_v19 = vmul.f32 %v8316_v41, %v8316_v41 }
 0x303   : > { %v5436_v9 = vadd.f32 %v5435_v14, %v5405_v48  ;;  %v5301_v25 = vadd.f32 %v5300_v42, %v8221_v17  ;;  %v5344_v17 = vmul.f32 %v8265_v57, %v8265_v57 }
 0x304   : > { %v5370_v38 = vadd.f32 %v5369_v52, %v5339_v39 }
 0x305   : > { %v5437_v33 = vadd.f32 %v5436_v9, %v5406_v50  ;;  %v5302_v4 = vadd.f32 %v5301_v25, %v8230_v60  ;;  %v5345_v60 = vmul.f32 %v8271_v0, %v8271_v0 }
 0x306   : > { %v5371_v8 = vadd.f32 %v5370_v38, %v5340_v22 }
 0x307   : > { %v5438_v40 = vadd.f32 %v5437_v33, %v5407_v43  ;;  %v5303_v16 = vadd.f32 %v5302_v4, %v8236_v10  ;;  %v5258_v56 = vpop.permute.xlu2 %5257  ;;  %v5260_v26 = vpop.permute.xlu0 %5259 }
 0x308   : > { %v5372_v29 = vadd.f32 %v5371_v8, %v5341_v6  ;;  %v5410_v35 = vmul.f32 %v5258_v56, %v8236_v10  ;;  %v5411_v3 = vmul.f32 %v5260_v26, %v8250_v28 }
 0x309   : > { %v5439_v34 = vadd.f32 %v5438_v40, %v5408_v53  ;;  %v5304_v12 = vadd.f32 %v5303_v16, %v8250_v28  ;;  %v5262_v44 = vpop.permute.xlu1 %5261  ;;  %v5348_v28 = vmul.f32 %v8295_v7, %v8295_v7 }
 0x30a   : > { %v5373_v47 = vadd.f32 %v5372_v29, %v5342_v11  ;;  %v5412_v58 = vmul.f32 %v5262_v44, %v8256_v27 }
 0x30b   : > { %v5440_v61 = vadd.f32 %v5439_v34, %v5409_v21  ;;  %v5305_v31 = vadd.f32 %v5304_v12, %v8256_v27  ;;  %v5349_v27 = vmul.f32 %v8301_v2, %v8301_v2  ;;  %v5355_v12 = vmul.f32 %v8346_v62, %v8346_v62 }
 0x30c   : > { %v5374_v36 = vadd.f32 %v5373_v47, %v5343_v5  ;;  %v5354_v47 = vmul.f32 %v8340_v59, %v8340_v59 }
 0x30d   : > { %v5441_v20 = vadd.f32 %v5440_v61, %v5410_v35  ;;  %v5306_v37 = vadd.f32 %v5305_v31, %v8265_v57 }
 0x30e   : > { %v5375_v1 = vadd.f32 %v5374_v36, %v5344_v17 }
 0x30f   : > { %v5442_v15 = vadd.f32 %v5441_v20, %v5411_v3  ;;  %v5307_v10 = vadd.f32 %v5306_v37, %v8271_v0  ;;  %v5264_v14 = vpop.permute.xlu2 %5263 }
 0x310   : > { %v5376_v48 = vadd.f32 %v5375_v1, %v5345_v60  ;;  %v5413_v13 = vmul.f32 %v5264_v14, %v8265_v57 }
 0x311   : > { %v5266_v50 = vpop.permute.xlu0 %5265  ;;  %v5443_v51 = vadd.f32 %v5442_v15, %v5412_v58  ;;  %v5308_v46 = vadd.f32 %v5307_v10, %v8280_v54 }
 0x312   : > { %v5377_v49 = vadd.f32 %v5376_v48, %v5346_v30  ;;  %v5414_v52 = vmul.f32 %v5266_v50, %v8271_v0  ;;  %v5352_v0 = vmul.f32 %v8325_v63, %v8325_v63 }
 0x313   : > { %v5309_v22 = vadd.f32 %v5308_v46, %v8286_v24  ;;  %v5444_v33 = vadd.f32 %v5443_v51, %v5413_v13 }
 0x314   : > { %v5378_v39 = vadd.f32 %v5377_v49, %v5347_v18 }
 0x315   : > { %v5310_v38 = vadd.f32 %v5309_v22, %v8295_v7  ;;  %v5445_v43 = vadd.f32 %v5444_v33, %v5414_v52 }
 0x316   : > { %v5379_v23 = vadd.f32 %v5378_v39, %v5348_v28 }
 0x317   : > { %v5311_v57 = vadd.f32 %v5310_v38, %v8301_v2  ;;  %v5270_v25 = vpop.permute.xlu2 %5269 }
 0x318   : > { %v5380_v6 = vadd.f32 %v5379_v23, %v5349_v27  ;;  %v5416_v29 = vmul.f32 %v5270_v25, %v8286_v24 }
 0x319   : > { %v5268_v9 = vpop.permute.xlu1 %5267  ;;  %v5312_v40 = vadd.f32 %v5311_v57, %v8310_v55 }
 0x31a   : > { %v5415_v42 = vmul.f32 %v5268_v9, %v8280_v54  ;;  %v5381_v53 = vadd.f32 %v5380_v6, %v5350_v45  ;;  %v5353_v54 = vmul.f32 %v8331_v32, %v8331_v32 }
 0x31b   : > { %v5313_v34 = vadd.f32 %v5312_v40, %v8316_v41 }
 0x31c   : > { %v5446_v11 = vadd.f32 %v5445_v43, %v5415_v42  ;;  %v5382_v21 = vadd.f32 %v5381_v53, %v5351_v19 }
 0x31d   : > { %v5314_v26 = vadd.f32 %v5313_v34, %v8325_v63 }
 0x31e   : > { %v5383_v16 = vadd.f32 %v5382_v21, %v5352_v0  ;;  %v5447_v17 = vadd.f32 %v5446_v11, %v5416_v29 }
 0x31f   : > { %v5315_v24 = vadd.f32 %v5314_v26, %v8331_v32 }
 0x320   : > { %v5384_v61 = vadd.f32 %v5383_v16, %v5353_v54 }
 0x321   : > { %v5316_v3 = vadd.f32 %v5315_v24, %v8340_v59 }
 0x322   : > { %v5385_v60 = vadd.f32 %v5384_v61, %v5354_v47 }
 0x323   : > { %v5317_v20 = vadd.f32 %v5316_v3, %v8346_v62 }
 0x324   : > { %v5386_v31 = vadd.f32 %v5385_v60, %v5355_v12 }
 0x325   : > { %v5318_v15 = vrot.slane %v5317_v20, 4 }
 0x326   : > { %v5387_v48 = vrot.slane %v5386_v31, 4 }
 0x327   : > { %v5319_v46 = vadd.f32 %v5318_v15, %v5317_v20 }
 0x328   : > { %v5388_v14 = vadd.f32 %v5387_v48, %v5386_v31 }
 0x329   : > { %v5272_v8 = vpop.permute.xlu0 %5271 }
 0x32a   : > { %v5417_v5 = vmul.f32 %v5272_v8, %v8295_v7  ;;  %v5276_v7 = vpop.permute.xlu2 %5275 }
 0x32b   : > { %v5419_v30 = vmul.f32 %v5276_v7, %v8310_v55 }
 0x32c   : > { %v5448_v36 = vadd.f32 %v5447_v17, %v5417_v5 }
 0x331   : > { %v5274_v4 = vpop.permute.xlu1 %5273 }
 0x332   : > { %v5418_v56 = vmul.f32 %v5274_v4, %v8301_v2 }
 0x334   : > { %v5449_v35 = vadd.f32 %v5448_v36, %v5418_v56 }
 0x336   : > { %v5450_v58 = vadd.f32 %v5449_v35, %v5419_v30 }
 0x339   : > { %v5282_v10 = vpop.permute.xlu2 %5281 }
 0x33a   : > { %v5422_v50 = vmul.f32 %v5282_v10, %v8331_v32 }
 0x341   : > { %v5278_v44 = vpop.permute.xlu0 %5277 }
 0x342   : > { %v5420_v2 = vmul.f32 %v5278_v44, %v8316_v41  ;;  %v5389_v41 = vrot.slane %v5388_v14, 2 }
 0x344   : > { %v5451_v18 = vadd.f32 %v5450_v58, %v5420_v2  ;;  %v5390_v52 = vadd.f32 %v5389_v41, %v5388_v14 }
 0x346   : > { %v5391_v33 = vrot.slane %v5390_v52, 1 }
 0x348   : > { %v5392_v6 = vadd.f32 %v5391_v33, %v5390_v52 }
 0x349   : > { %v5280_v1 = vpop.permute.xlu1 %5279 }
 0x34a   : > { %v5421_v37 = vmul.f32 %v5280_v1, %v8325_v63  ;;  %v5320_v63 = vrot.slane %v5319_v46, 2 }
 0x34c   : > { %v5452_v28 = vadd.f32 %v5451_v18, %v5421_v37  ;;  %v5321_v23 = vadd.f32 %v5320_v63, %v5319_v46 }
 0x34e   : > { %v5453_v55 = vadd.f32 %v5452_v28, %v5422_v50  ;;  %v5322_v38 = vrot.slane %v5321_v23, 1 }
 0x350   : > { %v5323_v19 = vadd.f32 %v5322_v38, %v5321_v23 }
 0x359   : > { %v5284_v49 = vpop.permute.xlu0 %5283 }
 0x35a   : > { %v5423_v51 = vmul.f32 %v5284_v49, %v8340_v59 }
 0x35c   : > { %v5454_v27 = vadd.f32 %v5453_v55, %v5423_v51 }
 0x361   : > { %v5286_v39 = vpop.permute.xlu1 %5285 }
 0x362   : > { %v5424_v9 = vmul.f32 %v5286_v39, %v8346_v62  ;;  %v5463_v62 = vsel %vm5462_vm6, %v5323_v19, %v5392_v6 }
 0x364   : > { %v5455_v13 = vadd.f32 %v5454_v27, %v5424_v9 }
 0x366   : > { %v5456_v22 = vrot.slane %v5455_v13, 4 }
 0x368   : > { %v5457_v45 = vadd.f32 %v5456_v22, %v5455_v13 }
 0x36a   : > { %v5458_v42 = vrot.slane %v5457_v45, 2 }
 0x36c   : > { %v5459_v32 = vadd.f32 %v5458_v42, %v5457_v45 }
 0x36e   : > { %v5460_v59 = vrot.slane %v5459_v32, 1 }
 0x370   : > { %v5461_v43 = vadd.f32 %v5460_v59, %v5459_v32 }
 0x372   : > { %v5465_v57 = vsel %vm5464_vm7, %v5463_v62, %v5461_v43 }
 0x373   : > { %v5467_v53 = vsel %vm1368_vm2, %v5465_v57, 0.0 }
 0x374   : > { %5468 = vst [vmem:[%s209_s22] sm:$0xff] %v5467_v53 }
 0x375 PF: > { %s15_s15 = sadd.s32 1, %s6736_s15  }
 0x376   : > { %p12_p5 = scmp.ge.s32.totalorder %s15_s15, 4  }
 0x378   :  { %14 = sbr.rel (!%p12_p5) target bundleno = 1 (0x1), region = 84 }

</bundles_post_ra>
